<compile_context>
chip_gen: v5e
topology: v5e:2x2
jax: 0.10.0
libtpu: 0.0.40
codegen_flags: <defaults>
</compile_context>

<pallas_src>
import functools

import jax
import jax.numpy as jnp
from jax.experimental import pallas as pl
from jax.experimental.pallas import tpu as pltpu


def _round_up(x, m):
    return ((x + m - 1) // m) * m


_K_FULL_MAX = 8192  # single full-K block up to this size (weight block <= ~2 MiB)


def _prep_k(K):
    """Full-K block when it fits comfortably; otherwise pad to 512 and tile."""
    if K <= _K_FULL_MAX:
        return K, K
    Kp = _round_up(K, 512)
    return Kp, 512


def _prep_n(N):
    """Full-width block below 256 lanes; otherwise 128-lane tiles so the
    parallel N axis has >=2 blocks (keeps both v7x TensorCores busy)."""
    if N < 256:
        return N, N
    Np = _round_up(N, 128)
    return Np, 128


def _pick_tm(M, n_blocks_n):
    if M > 256:
        Mp = _round_up(M, 128)
        return Mp, 128
    if n_blocks_n < 2 and M >= 32 and M % 16 == 0:
        return M, M // 2          # second parallel block on the M axis for v7x
    return M, M                   # full-M block (exempt from the 8-divisibility rule)


# ----------------------------------------------------------------------------
# Pallas kernel: tiled GEMM; bias folded into the k==0 accumulator init,
# ReLU + bf16 cast only in the k==last epilogue.  K is the innermost grid axis.
# ----------------------------------------------------------------------------
def _linear_kernel(x_ref, w_ref, b_ref, o_ref, acc_ref, *, apply_relu):
    k = pl.program_id(2)

    @pl.when(k == 0)
    def _():
        acc_ref[...] = jnp.broadcast_to(b_ref[...], acc_ref.shape)

    acc_ref[...] += jnp.dot(x_ref[...], w_ref[...],
                            preferred_element_type=jnp.float32)

    @pl.when(k == pl.num_programs(2) - 1)
    def _():
        out = acc_ref[...]
        if apply_relu:
            out = jnp.maximum(out, 0.0)
        o_ref[...] = out.astype(o_ref.dtype)


def prep_linear(w, b):
    """Pad (only if needed) + cast a (K, N) weight and (N,) bias once, at prep time."""
    K, N = w.shape
    Kp, tk = _prep_k(K)
    Np, tn = _prep_n(N)
    if (Kp, Np) != (K, N):
        wp = jnp.zeros((Kp, Np), jnp.bfloat16).at[:K, :N].set(w.astype(jnp.bfloat16))
        bp = jnp.zeros((1, Np), jnp.float32).at[:, :N].set(b.astype(jnp.float32))
    else:
        wp = w.astype(jnp.bfloat16)
        bp = b.reshape(1, N).astype(jnp.float32)
    return {"w": wp, "b": bp, "k": K, "n": N, "tk": tk, "tn": tn}


def fused_linear(x, prep, *, relu, out_dtype=jnp.bfloat16):
    """x: (M, K) bf16 -> relu?(x @ W + b): (M, N) bf16 (f32 MXU accumulation)."""
    M, K = x.shape
    Kp, Np = prep["w"].shape
    tk, tn = prep["tk"], prep["tn"]
    assert K == prep["k"]

    if x.dtype != jnp.bfloat16:
        x = x.astype(jnp.bfloat16)
    Mp, tm = _pick_tm(M, Np // tn)
    if (Mp, Kp) != (M, K):
        # Only reachable for very large M or K; never triggers at these shapes.
        x = jnp.pad(x, ((0, Mp - M), (0, Kp - K)))

    kernel = functools.partial(_linear_kernel, apply_relu=relu)
    out = pl.pallas_call(
        kernel,
        out_shape=jax.ShapeDtypeStruct((Mp, Np), out_dtype),
        grid_spec=pltpu.PrefetchScalarGridSpec(
            num_scalar_prefetch=0,
            grid=(Mp // tm, Np // tn, Kp // tk),
            in_specs=[
                pl.BlockSpec((tm, tk), lambda i, j, k: (i, k)),
                pl.BlockSpec((tk, tn), lambda i, j, k: (k, j)),
                pl.BlockSpec((1, tn), lambda i, j, k: (0, j)),
            ],
            out_specs=pl.BlockSpec((tm, tn), lambda i, j, k: (i, j)),
            scratch_shapes=[pltpu.VMEM((tm, tn), jnp.float32)],
        ),
        compiler_params=pltpu.CompilerParams(
            dimension_semantics=("parallel", "parallel", "arbitrary")),
    )(x, prep["w"], prep["b"])
    if (Mp, Np) != (M, prep["n"]):
        out = out[:M, :prep["n"]]
    return out


# ----------------------------------------------------------------------------
# Fused tail: fc_img2 + var MLP + fc_combined1 + policy/value heads +
# log_softmax/tanh in ONE whole-block kernel; value packed into lane A of the
# lane-dense (B, 128) output slab.
# ----------------------------------------------------------------------------
def _tail_kernel(x_ref, var_ref, wi2_ref, bi2_ref,
                 wv1_ref, bv1_ref, wv2_ref, bv2_ref,
                 wc1x_ref, wc1y_ref, bc1_ref, w2_ref, b2_ref,
                 out_ref, *, n_actions):
    # fc_img2 + relu
    x = jnp.dot(x_ref[...], wi2_ref[...], preferred_element_type=jnp.float32)
    x = jnp.maximum(x + bi2_ref[...], 0.0)
    # var branch (hidden width zero-padded to 128 lanes at prep time)
    v = var_ref[...].astype(jnp.bfloat16)
    y = jnp.dot(v, wv1_ref[...], preferred_element_type=jnp.float32)
    y = jnp.maximum(y + bv1_ref[...], 0.0)
    y = jnp.dot(y.astype(jnp.bfloat16), wv2_ref[...],
                preferred_element_type=jnp.float32)
    y = jnp.maximum(y + bv2_ref[...], 0.0)
    # fc_combined1 + relu (concat realized as two matmuls; dropout = identity)
    h = jnp.dot(x.astype(jnp.bfloat16), wc1x_ref[...],
                preferred_element_type=jnp.float32)
    h = h + jnp.dot(y.astype(jnp.bfloat16), wc1y_ref[...],
                    preferred_element_type=jnp.float32)
    h = jnp.maximum(h + bc1_ref[...], 0.0)
    # policy (log_softmax) + value (tanh) packed into one lane-dense slab
    logits = jnp.dot(h.astype(jnp.bfloat16), w2_ref[...],
                     preferred_element_type=jnp.float32) + b2_ref[...]
    col = jax.lax.broadcasted_iota(jnp.int32, logits.shape, 1)
    pi = jnp.where(col < n_actions, logits, -jnp.inf)      # mask padded lanes
    m = jnp.max(pi, axis=-1, keepdims=True)
    lse = jnp.log(jnp.sum(jnp.exp(pi - m), axis=-1, keepdims=True)) + m
    logp = pi - lse
    vraw = jnp.sum(jnp.where(col == n_actions, logits, 0.0),
                   axis=-1, keepdims=True)
    vtanh = jnp.broadcast_to(jnp.tanh(vraw := vraw), logits.shape)
    out_ref[...] = jnp.where(col < n_actions, logp,
                             jnp.where(col == n_actions, vtanh, 0.0))


def prep_tail(params, *, img_width):
    w_i2, b_i2 = params["fc_img2"]
    w_v1, b_v1 = params["fc_var1"]
    w_v2, b_v2 = params["fc_var2"]
    w_c1, b_c1 = params["fc_combined1"]
    w_pi, b_pi = params["fc_combined2"]
    w_val, b_val = params["fc_value"]

    VH = 128                               # padded var-branch hidden width (lane-dense)
    vh = w_v1.shape[1]
    var_size = w_v1.shape[0]
    H = w_c1.shape[1]
    A = w_pi.shape[1]
    Apad = _round_up(A + 1, 128)

    wv1 = jnp.zeros((var_size, VH), jnp.bfloat16).at[:, :vh].set(w_v1.astype(jnp.bfloat16))
    bv1 = jnp.zeros((1, VH), jnp.float32).at[:, :vh].set(b_v1.astype(jnp.float32))
    wv2 = jnp.zeros((VH, VH), jnp.bfloat16).at[:vh, :vh].set(w_v2.astype(jnp.bfloat16))
    bv2 = jnp.zeros((1, VH), jnp.float32).at[:, :vh].set(b_v2.astype(jnp.float32))
    wc1y = jnp.zeros((VH, H), jnp.bfloat16).at[:vh, :].set(
        w_c1[img_width:].astype(jnp.bfloat16))
    w2 = jnp.zeros((H, Apad), jnp.bfloat16)
    w2 = w2.at[:, :A].set(w_pi.astype(jnp.bfloat16))
    w2 = w2.at[:, A:A + 1].set(w_val.astype(jnp.bfloat16))
    b2 = jnp.zeros((1, Apad), jnp.float32)
    b2 = b2.at[:, :A].set(b_pi.astype(jnp.float32))
    b2 = b2.at[:, A].set(b_val.astype(jnp.float32)[0])
    return {
        "wi2": w_i2.astype(jnp.bfloat16),
        "bi2": b_i2.reshape(1, -1).astype(jnp.float32),
        "wv1": wv1, "bv1": bv1, "wv2": wv2, "bv2": bv2,
        "wc1x": w_c1[:img_width].astype(jnp.bfloat16),
        "wc1y": wc1y,
        "bc1": b_c1.reshape(1, -1).astype(jnp.float32),
        "w2": w2, "b2": b2, "a": A,
    }


def tail_forward(x, var, prep):
    B = x.shape[0]
    A = prep["a"]
    Apad = prep["w2"].shape[1]
    vm = pl.BlockSpec(memory_space=pltpu.MemorySpace.VMEM)
    out = pl.pallas_call(
        functools.partial(_tail_kernel, n_actions=A),
        out_shape=jax.ShapeDtypeStruct((B, Apad), jnp.float32),
        in_specs=[vm] * 13,
        out_specs=vm,
    )(x, var, prep["wi2"], prep["bi2"], prep["wv1"], prep["bv1"],
      prep["wv2"], prep["bv2"], prep["wc1x"], prep["wc1y"], prep["bc1"],
      prep["w2"], prep["b2"])
    return out[:, :A], out[:, A:A + 1]


# ----------------------------------------------------------------------------
# Conv = im2col (bf16, plain-JAX glue, fuses under jit) + tiled GEMM with
# folded eval-mode BatchNorm.
# ----------------------------------------------------------------------------
def im2col(x, kh, kw, stride, pad):
    """x: (N, H, W, C) -> ((N*Ho*Wo, kh*kw*C) bf16, Ho, Wo)."""
    # TODO(synk): replace with a direct tap-accumulating conv kernel to avoid
    # the kh*kw patch materialization for larger boards.
    x = x.astype(jnp.bfloat16)          # no-op for conv2..4 (already bf16)
    x = jnp.pad(x, ((0, 0), (pad, pad), (pad, pad), (0, 0)))
    N, Hp, Wp, C = x.shape
    Ho = (Hp - kh) // stride + 1
    Wo = (Wp - kw) // stride + 1
    cols = []
    for i in range(kh):
        for j in range(kw):
            cols.append(x[:, i:i + stride * (Ho - 1) + 1:stride,
                          j:j + stride * (Wo - 1) + 1:stride, :])
    cols = jnp.concatenate(cols, axis=-1)                  # (N, Ho, Wo, kh*kw*C)
    return cols.reshape(N * Ho * Wo, kh * kw * C), Ho, Wo


def prep_conv(w, b, gamma, beta, mean, var, *, stride, pad, eps=1e-5):
    """Fold eval-mode BN into the conv, reshape to a GEMM matrix, cast bf16."""
    Cout, Cin, KH, KW = w.shape
    w_mat = jnp.transpose(w, (2, 3, 1, 0)).reshape(KH * KW * Cin, Cout)
    scale = gamma / jnp.sqrt(var + eps)
    w_eff = w_mat * scale[None, :]
    b_eff = (b - mean) * scale + beta
    return {"lin": prep_linear(w_eff, b_eff), "kh": KH, "kw": KW,
            "stride": stride, "pad": pad}


def conv_bn_relu(x, prep):
    """x: NHWC bf16/f32 -> relu(bn(conv(x))): NHWC bf16."""
    N = x.shape[0]
    cols, Ho, Wo = im2col(x, prep["kh"], prep["kw"], prep["stride"], prep["pad"])
    out = fused_linear(cols, prep["lin"], relu=True)
    return out.reshape(N, Ho, Wo, prep["lin"]["n"])


# ----------------------------------------------------------------------------
# Parameter init (deterministic, synthetic, PyTorch layout) + one-time prep.
# ----------------------------------------------------------------------------
def conv_out_hw(h, w):
    for k, s, p in [(3, 1, 1), (5, 2, 2), (3, 1, 1), (3, 1, 1)]:
        h = (h + 2 * p - k) // s + 1
        w = (w + 2 * p - k) // s + 1
    return h, w


def init_params(key, board_x, board_y, board_z, var_size, action_size):
    oc = [64, 128, 256, 512]
    fc = [512, 256]
    h, w = conv_out_hw(board_y, board_z)
    flat = oc[3] * h * w

    keys = iter(jax.random.split(key, 64))

    def rnd(shape, scale=0.05):
        return scale * jax.random.normal(next(keys), shape, jnp.float32)

    def conv_p(cin, cout, k):
        return (rnd((cout, cin, k, k)), rnd((cout,)),                  # w, b
                1.0 + 0.1 * rnd((cout,)), 0.1 * rnd((cout,)),          # gamma, beta
                0.1 * rnd((cout,)), 1.0 + 0.1 * jnp.abs(rnd((cout,)))) # mean, var

    def lin_p(cin, cout):
        return rnd((cin, cout)), rnd((cout,))

    return {
        "conv1": conv_p(board_x, oc[0], 3),
        "conv2": conv_p(oc[0], oc[1], 5),
        "conv3": conv_p(oc[1], oc[2], 3),
        "conv4": conv_p(oc[2], oc[3], 3),
        "fc_img1": lin_p(flat, fc[0]),
        "fc_img2": lin_p(fc[0], fc[1]),
        "fc_var1": lin_p(var_size, 32),
        "fc_var2": lin_p(32, 32),
        "fc_combined1": lin_p(fc[1] + 32, 256),
        "fc_combined2": lin_p(256, action_size),
        "fc_value": lin_p(256, 1),
    }


def prepare_params(params, board_y, board_z):
    """One-time inference prep: BN folding, padding, bf16 cast, row permutes."""
    h, w = conv_out_hw(board_y, board_z)
    c4 = params["conv4"][0].shape[0]
    # Permute fc_img1 rows from PyTorch NCHW flatten order to NHWC flatten order
    # so the forward pass can flatten NHWC directly (no activation transpose).
    w_img1, b_img1 = params["fc_img1"]
    w_img1_nhwc = (w_img1.reshape(c4, h, w, -1)
                   .transpose(1, 2, 0, 3)
                   .reshape(c4 * h * w, -1))
    img_width = params["fc_img2"][0].shape[1]   # width of x entering fc_combined1
    return {
        "conv1": prep_conv(*params["conv1"], stride=1, pad=1),
        "conv2": prep_conv(*params["conv2"], stride=2, pad=2),
        "conv3": prep_conv(*params["conv3"], stride=1, pad=1),
        "conv4": prep_conv(*params["conv4"], stride=1, pad=1),
        "fc_img1": prep_linear(w_img1_nhwc, b_img1),
        "tail": prep_tail(params, img_width=img_width),
    }


# ----------------------------------------------------------------------------
# Forward pass (matches NNet.forward, eval mode)
# ----------------------------------------------------------------------------
def nnet_forward(prep, board_nchw, var):
    x = jnp.transpose(board_nchw, (0, 2, 3, 1))        # NCHW -> NHWC (input only)
    x = conv_bn_relu(x, prep["conv1"])
    x = conv_bn_relu(x, prep["conv2"])
    x = conv_bn_relu(x, prep["conv3"])
    x = conv_bn_relu(x, prep["conv4"])
    N = x.shape[0]
    x = x.reshape(N, -1)                               # NHWC flatten (weights permuted)
    x = fused_linear(x, prep["fc_img1"], relu=True)    # (N, 512) bf16
    logp, v = tail_forward(x, var, prep["tail"])
    return logp, v


# ----------------------------------------------------------------------------
if __name__ == "__main__":
    # Small problem: board (channels=board_x=4, board_y=board_z=8), var_size=8,
    # action_size=10, batch=2.
    batch, board_x, board_y, board_z = 2, 4, 8, 8
    var_size, action_size = 8, 10

    key = jax.random.PRNGKey(0)
    kp, kb, kv = jax.random.split(key, 3)
    raw_params = init_params(kp, board_x, board_y, board_z, var_size, action_size)
    iparams = prepare_params(raw_params, board_y, board_z)

    board = jax.random.normal(kb, (batch, board_x, board_y, board_z), jnp.float32)
    var = jax.random.normal(kv, (batch, var_size), jnp.float32)

    fwd = jax.jit(functools.partial(nnet_forward, iparams))
    logp, v = fwd(board, var)
    jax.block_until_ready((logp, v))

    assert logp.shape == (batch, action_size)
    assert v.shape == (batch, 1)
    # log_softmax rows should exponentiate-sum to ~1, value in [-1, 1]
    assert bool(jnp.all(jnp.abs(jnp.exp(logp).sum(axis=1) - 1.0) < 1e-4))
    assert bool(jnp.all(jnp.abs(v) <= 1.0))
    print("KERNEL_OK")
</pallas_src>

<mosaic_0001>
module attributes {stable_mosaic.version = 11 : i64} {
  func.func @_linear_kernel(%arg0: i32, %arg1: i32, %arg2: i32, %arg3: memref<64x36xbf16, #tpu.memory_space<vmem>>, %arg4: memref<36x64xbf16, #tpu.memory_space<vmem>>, %arg5: memref<1x64xf32, #tpu.memory_space<vmem>>, %arg6: memref<64x64xbf16, #tpu.memory_space<vmem>>, %arg7: memref<64x64xf32, #tpu.memory_space<vmem>>) attributes {dimension_semantics = [#tpu.dimension_semantics<parallel>, #tpu.dimension_semantics<parallel>, #tpu.dimension_semantics<arbitrary>], iteration_bounds = array<i64: 2, 1, 1>, scalar_prefetch = 0 : i64, scratch_operands = 1 : i64, tpu.core_type = #tpu.core_type<tc>, window_params = [{transform_indices = @transform_0, window_bounds = array<i64: 64, 36>}, {transform_indices = @transform_1, window_bounds = array<i64: 36, 64>}, {transform_indices = @transform_2, window_bounds = array<i64: 1, 64>}, {transform_indices = @transform_3, window_bounds = array<i64: 64, 64>}]} {
    %c0_i32 = arith.constant 0 : i32
    %0 = arith.cmpi eq, %arg2, %c0_i32 : i32
    %1 = arith.extui %0 : i1 to i32
    %c0_i32_0 = arith.constant 0 : i32
    %2 = arith.cmpi ne, %1, %c0_i32_0 : i32
    scf.if %2 {
      %c0_10 = arith.constant 0 : index
      %c0_11 = arith.constant 0 : index
      %12 = vector.load %arg5[%c0_10, %c0_11] : memref<1x64xf32, #tpu.memory_space<vmem>>, vector<1x64xf32>
      %13 = vector.shape_cast %12 : vector<1x64xf32> to vector<1x64xf32>
      %14 = vector.broadcast %13 : vector<1x64xf32> to vector<64x64xf32>
      %c0_12 = arith.constant 0 : index
      %c0_13 = arith.constant 0 : index
      %15 = vector.load %arg7[%c0_12, %c0_13] : memref<64x64xf32, #tpu.memory_space<vmem>>, vector<64x64xf32>
      tpu.vector_store %arg7[%c0_12, %c0_13], %14 {strides = array<i32>} : memref<64x64xf32, #tpu.memory_space<vmem>>, vector<64x64xf32>,
    } else {
    }
    %c0 = arith.constant 0 : index
    %c0_1 = arith.constant 0 : index
    %3 = vector.load %arg7[%c0, %c0_1] : memref<64x64xf32, #tpu.memory_space<vmem>>, vector<64x64xf32>
    %c0_2 = arith.constant 0 : index
    %c0_3 = arith.constant 0 : index
    %4 = vector.load %arg3[%c0_2, %c0_3] : memref<64x36xbf16, #tpu.memory_space<vmem>>, vector<64x36xbf16>
    %c0_4 = arith.constant 0 : index
    %c0_5 = arith.constant 0 : index
    %5 = vector.load %arg4[%c0_4, %c0_5] : memref<36x64xbf16, #tpu.memory_space<vmem>>, vector<36x64xbf16>
    %cst = arith.constant dense<0.000000e+00> : vector<64x64xf32>
    %6 = tpu.matmul %4, %5, %cst {dimension_numbers = #tpu.dot_dimension_numbers<[1], [0], [0], [1], [0, 0, 1, 1], [], []>} : vector<64x36xbf16>, vector<36x64xbf16>, vector<64x64xf32> -> vector<64x64xf32>
    %7 = arith.addf %3, %6 : vector<64x64xf32>
    %c0_6 = arith.constant 0 : index
    %c0_7 = arith.constant 0 : index
    %8 = vector.load %arg7[%c0_6, %c0_7] : memref<64x64xf32, #tpu.memory_space<vmem>>, vector<64x64xf32>
    tpu.vector_store %arg7[%c0_6, %c0_7], %7 {strides = array<i32>} : memref<64x64xf32, #tpu.memory_space<vmem>>, vector<64x64xf32>,
    %c0_i32_8 = arith.constant 0 : i32
    %9 = arith.cmpi eq, %arg2, %c0_i32_8 : i32
    %10 = arith.extui %9 : i1 to i32
    %c0_i32_9 = arith.constant 0 : i32
    %11 = arith.cmpi ne, %10, %c0_i32_9 : i32
    scf.if %11 {
      %c0_10 = arith.constant 0 : index
      %c0_11 = arith.constant 0 : index
      %12 = vector.load %arg7[%c0_10, %c0_11] : memref<64x64xf32, #tpu.memory_space<vmem>>, vector<64x64xf32>
      %cst_12 = arith.constant 0.000000e+00 : f32
      %13 = vector.broadcast %cst_12 : f32 to vector<64x64xf32>
      %14 = arith.maximumf %12, %13 : vector<64x64xf32>
      %15 = arith.truncf %14 : vector<64x64xf32> to vector<64x64xbf16>
      %c0_13 = arith.constant 0 : index
      %c0_14 = arith.constant 0 : index
      %16 = vector.load %arg6[%c0_13, %c0_14] : memref<64x64xbf16, #tpu.memory_space<vmem>>, vector<64x64xbf16>
      tpu.vector_store %arg6[%c0_13, %c0_14], %15 {strides = array<i32>} : memref<64x64xbf16, #tpu.memory_space<vmem>>, vector<64x64xbf16>,
    } else {
    }
    return
  }
  func.func @transform_0(%arg0: i32, %arg1: i32, %arg2: i32) -> (i32, i32) {
    %c0_i32 = arith.constant 0 : i32
    return %arg0, %arg2 : i32, i32
  }
  func.func @transform_1(%arg0: i32, %arg1: i32, %arg2: i32) -> (i32, i32) {
    %c0_i32 = arith.constant 0 : i32
    return %arg2, %arg1 : i32, i32
  }
  func.func @transform_2(%arg0: i32, %arg1: i32, %arg2: i32) -> (i32, i32) {
    %c0_i32 = arith.constant 0 : i32
    %c0_i32_0 = arith.constant 0 : i32
    return %c0_i32, %arg1 : i32, i32
  }
  func.func @transform_3(%arg0: i32, %arg1: i32, %arg2: i32) -> (i32, i32) {
    %c0_i32 = arith.constant 0 : i32
    return %arg0, %arg1 : i32, i32
  }
}

module attributes {stable_mosaic.version = 11 : i64} {
  func.func @_linear_kernel(%arg0: i32, %arg1: i32, %arg2: i32, %arg3: memref<16x1600xbf16, #tpu.memory_space<vmem>>, %arg4: memref<1600x128xbf16, #tpu.memory_space<vmem>>, %arg5: memref<1x128xf32, #tpu.memory_space<vmem>>, %arg6: memref<16x128xbf16, #tpu.memory_space<vmem>>, %arg7: memref<16x128xf32, #tpu.memory_space<vmem>>) attributes {dimension_semantics = [#tpu.dimension_semantics<parallel>, #tpu.dimension_semantics<parallel>, #tpu.dimension_semantics<arbitrary>], iteration_bounds = array<i64: 2, 1, 1>, scalar_prefetch = 0 : i64, scratch_operands = 1 : i64, tpu.core_type = #tpu.core_type<tc>, window_params = [{transform_indices = @transform_0, window_bounds = array<i64: 16, 1600>}, {transform_indices = @transform_1, window_bounds = array<i64: 1600, 128>}, {transform_indices = @transform_2, window_bounds = array<i64: 1, 128>}, {transform_indices = @transform_3, window_bounds = array<i64: 16, 128>}]} {
    %c0_i32 = arith.constant 0 : i32
    %0 = arith.cmpi eq, %arg2, %c0_i32 : i32
    %1 = arith.extui %0 : i1 to i32
    %c0_i32_0 = arith.constant 0 : i32
    %2 = arith.cmpi ne, %1, %c0_i32_0 : i32
    scf.if %2 {
      %c0_10 = arith.constant 0 : index
      %c0_11 = arith.constant 0 : index
      %12 = vector.load %arg5[%c0_10, %c0_11] : memref<1x128xf32, #tpu.memory_space<vmem>>, vector<1x128xf32>
      %13 = vector.shape_cast %12 : vector<1x128xf32> to vector<1x128xf32>
      %14 = vector.broadcast %13 : vector<1x128xf32> to vector<16x128xf32>
      %c0_12 = arith.constant 0 : index
      %c0_13 = arith.constant 0 : index
      %15 = vector.load %arg7[%c0_12, %c0_13] : memref<16x128xf32, #tpu.memory_space<vmem>>, vector<16x128xf32>
      tpu.vector_store %arg7[%c0_12, %c0_13], %14 {strides = array<i32>} : memref<16x128xf32, #tpu.memory_space<vmem>>, vector<16x128xf32>,
    } else {
    }
    %c0 = arith.constant 0 : index
    %c0_1 = arith.constant 0 : index
    %3 = vector.load %arg7[%c0, %c0_1] : memref<16x128xf32, #tpu.memory_space<vmem>>, vector<16x128xf32>
    %c0_2 = arith.constant 0 : index
    %c0_3 = arith.constant 0 : index
    %4 = vector.load %arg3[%c0_2, %c0_3] : memref<16x1600xbf16, #tpu.memory_space<vmem>>, vector<16x1600xbf16>
    %c0_4 = arith.constant 0 : index
    %c0_5 = arith.constant 0 : index
    %5 = vector.load %arg4[%c0_4, %c0_5] : memref<1600x128xbf16, #tpu.memory_space<vmem>>, vector<1600x128xbf16>
    %cst = arith.constant dense<0.000000e+00> : vector<16x128xf32>
    %6 = tpu.matmul %4, %5, %cst {dimension_numbers = #tpu.dot_dimension_numbers<[1], [0], [0], [1], [0, 0, 1, 1], [], []>} : vector<16x1600xbf16>, vector<1600x128xbf16>, vector<16x128xf32> -> vector<16x128xf32>
    %7 = arith.addf %3, %6 : vector<16x128xf32>
    %c0_6 = arith.constant 0 : index
    %c0_7 = arith.constant 0 : index
    %8 = vector.load %arg7[%c0_6, %c0_7] : memref<16x128xf32, #tpu.memory_space<vmem>>, vector<16x128xf32>
    tpu.vector_store %arg7[%c0_6, %c0_7], %7 {strides = array<i32>} : memref<16x128xf32, #tpu.memory_space<vmem>>, vector<16x128xf32>,
    %c0_i32_8 = arith.constant 0 : i32
    %9 = arith.cmpi eq, %arg2, %c0_i32_8 : i32
    %10 = arith.extui %9 : i1 to i32
    %c0_i32_9 = arith.constant 0 : i32
    %11 = arith.cmpi ne, %10, %c0_i32_9 : i32
    scf.if %11 {
      %c0_10 = arith.constant 0 : index
      %c0_11 = arith.constant 0 : index
      %12 = vector.load %arg7[%c0_10, %c0_11] : memref<16x128xf32, #tpu.memory_space<vmem>>, vector<16x128xf32>
      %cst_12 = arith.constant 0.000000e+00 : f32
      %13 = vector.broadcast %cst_12 : f32 to vector<16x128xf32>
      %14 = arith.maximumf %12, %13 : vector<16x128xf32>
      %15 = arith.truncf %14 : vector<16x128xf32> to vector<16x128xbf16>
      %c0_13 = arith.constant 0 : index
      %c0_14 = arith.constant 0 : index
      %16 = vector.load %arg6[%c0_13, %c0_14] : memref<16x128xbf16, #tpu.memory_space<vmem>>, vector<16x128xbf16>
      tpu.vector_store %arg6[%c0_13, %c0_14], %15 {strides = array<i32>} : memref<16x128xbf16, #tpu.memory_space<vmem>>, vector<16x128xbf16>,
    } else {
    }
    return
  }
  func.func @transform_0(%arg0: i32, %arg1: i32, %arg2: i32) -> (i32, i32) {
    %c0_i32 = arith.constant 0 : i32
    return %arg0, %arg2 : i32, i32
  }
  func.func @transform_1(%arg0: i32, %arg1: i32, %arg2: i32) -> (i32, i32) {
    %c0_i32 = arith.constant 0 : i32
    return %arg2, %arg1 : i32, i32
  }
  func.func @transform_2(%arg0: i32, %arg1: i32, %arg2: i32) -> (i32, i32) {
    %c0_i32 = arith.constant 0 : i32
    %c0_i32_0 = arith.constant 0 : i32
    return %c0_i32, %arg1 : i32, i32
  }
  func.func @transform_3(%arg0: i32, %arg1: i32, %arg2: i32) -> (i32, i32) {
    %c0_i32 = arith.constant 0 : i32
    return %arg0, %arg1 : i32, i32
  }
}

module attributes {stable_mosaic.version = 11 : i64} {
  func.func @_linear_kernel(%arg0: i32, %arg1: i32, %arg2: i32, %arg3: memref<32x1152xbf16, #tpu.memory_space<vmem>>, %arg4: memref<1152x128xbf16, #tpu.memory_space<vmem>>, %arg5: memref<1x128xf32, #tpu.memory_space<vmem>>, %arg6: memref<32x128xbf16, #tpu.memory_space<vmem>>, %arg7: memref<32x128xf32, #tpu.memory_space<vmem>>) attributes {dimension_semantics = [#tpu.dimension_semantics<parallel>, #tpu.dimension_semantics<parallel>, #tpu.dimension_semantics<arbitrary>], iteration_bounds = array<i64: 1, 2, 1>, scalar_prefetch = 0 : i64, scratch_operands = 1 : i64, tpu.core_type = #tpu.core_type<tc>, window_params = [{transform_indices = @transform_0, window_bounds = array<i64: 32, 1152>}, {transform_indices = @transform_1, window_bounds = array<i64: 1152, 128>}, {transform_indices = @transform_2, window_bounds = array<i64: 1, 128>}, {transform_indices = @transform_3, window_bounds = array<i64: 32, 128>}]} {
    %c0_i32 = arith.constant 0 : i32
    %0 = arith.cmpi eq, %arg2, %c0_i32 : i32
    %1 = arith.extui %0 : i1 to i32
    %c0_i32_0 = arith.constant 0 : i32
    %2 = arith.cmpi ne, %1, %c0_i32_0 : i32
    scf.if %2 {
      %c0_10 = arith.constant 0 : index
      %c0_11 = arith.constant 0 : index
      %12 = vector.load %arg5[%c0_10, %c0_11] : memref<1x128xf32, #tpu.memory_space<vmem>>, vector<1x128xf32>
      %13 = vector.shape_cast %12 : vector<1x128xf32> to vector<1x128xf32>
      %14 = vector.broadcast %13 : vector<1x128xf32> to vector<32x128xf32>
      %c0_12 = arith.constant 0 : index
      %c0_13 = arith.constant 0 : index
      %15 = vector.load %arg7[%c0_12, %c0_13] : memref<32x128xf32, #tpu.memory_space<vmem>>, vector<32x128xf32>
      tpu.vector_store %arg7[%c0_12, %c0_13], %14 {strides = array<i32>} : memref<32x128xf32, #tpu.memory_space<vmem>>, vector<32x128xf32>,
    } else {
    }
    %c0 = arith.constant 0 : index
    %c0_1 = arith.constant 0 : index
    %3 = vector.load %arg7[%c0, %c0_1] : memref<32x128xf32, #tpu.memory_space<vmem>>, vector<32x128xf32>
    %c0_2 = arith.constant 0 : index
    %c0_3 = arith.constant 0 : index
    %4 = vector.load %arg3[%c0_2, %c0_3] : memref<32x1152xbf16, #tpu.memory_space<vmem>>, vector<32x1152xbf16>
    %c0_4 = arith.constant 0 : index
    %c0_5 = arith.constant 0 : index
    %5 = vector.load %arg4[%c0_4, %c0_5] : memref<1152x128xbf16, #tpu.memory_space<vmem>>, vector<1152x128xbf16>
    %cst = arith.constant dense<0.000000e+00> : vector<32x128xf32>
    %6 = tpu.matmul %4, %5, %cst {dimension_numbers = #tpu.dot_dimension_numbers<[1], [0], [0], [1], [0, 0, 1, 1], [], []>} : vector<32x1152xbf16>, vector<1152x128xbf16>, vector<32x128xf32> -> vector<32x128xf32>
    %7 = arith.addf %3, %6 : vector<32x128xf32>
    %c0_6 = arith.constant 0 : index
    %c0_7 = arith.constant 0 : index
    %8 = vector.load %arg7[%c0_6, %c0_7] : memref<32x128xf32, #tpu.memory_space<vmem>>, vector<32x128xf32>
    tpu.vector_store %arg7[%c0_6, %c0_7], %7 {strides = array<i32>} : memref<32x128xf32, #tpu.memory_space<vmem>>, vector<32x128xf32>,
    %c0_i32_8 = arith.constant 0 : i32
    %9 = arith.cmpi eq, %arg2, %c0_i32_8 : i32
    %10 = arith.extui %9 : i1 to i32
    %c0_i32_9 = arith.constant 0 : i32
    %11 = arith.cmpi ne, %10, %c0_i32_9 : i32
    scf.if %11 {
      %c0_10 = arith.constant 0 : index
      %c0_11 = arith.constant 0 : index
      %12 = vector.load %arg7[%c0_10, %c0_11] : memref<32x128xf32, #tpu.memory_space<vmem>>, vector<32x128xf32>
      %cst_12 = arith.constant 0.000000e+00 : f32
      %13 = vector.broadcast %cst_12 : f32 to vector<32x128xf32>
      %14 = arith.maximumf %12, %13 : vector<32x128xf32>
      %15 = arith.truncf %14 : vector<32x128xf32> to vector<32x128xbf16>
      %c0_13 = arith.constant 0 : index
      %c0_14 = arith.constant 0 : index
      %16 = vector.load %arg6[%c0_13, %c0_14] : memref<32x128xbf16, #tpu.memory_space<vmem>>, vector<32x128xbf16>
      tpu.vector_store %arg6[%c0_13, %c0_14], %15 {strides = array<i32>} : memref<32x128xbf16, #tpu.memory_space<vmem>>, vector<32x128xbf16>,
    } else {
    }
    return
  }
  func.func @transform_0(%arg0: i32, %arg1: i32, %arg2: i32) -> (i32, i32) {
    %c0_i32 = arith.constant 0 : i32
    return %arg0, %arg2 : i32, i32
  }
  func.func @transform_1(%arg0: i32, %arg1: i32, %arg2: i32) -> (i32, i32) {
    %c0_i32 = arith.constant 0 : i32
    return %arg2, %arg1 : i32, i32
  }
  func.func @transform_2(%arg0: i32, %arg1: i32, %arg2: i32) -> (i32, i32) {
    %c0_i32 = arith.constant 0 : i32
    %c0_i32_0 = arith.constant 0 : i32
    return %c0_i32, %arg1 : i32, i32
  }
  func.func @transform_3(%arg0: i32, %arg1: i32, %arg2: i32) -> (i32, i32) {
    %c0_i32 = arith.constant 0 : i32
    return %arg0, %arg1 : i32, i32
  }
}

module attributes {stable_mosaic.version = 11 : i64} {
  func.func @_linear_kernel(%arg0: i32, %arg1: i32, %arg2: i32, %arg3: memref<32x2304xbf16, #tpu.memory_space<vmem>>, %arg4: memref<2304x128xbf16, #tpu.memory_space<vmem>>, %arg5: memref<1x128xf32, #tpu.memory_space<vmem>>, %arg6: memref<32x128xbf16, #tpu.memory_space<vmem>>, %arg7: memref<32x128xf32, #tpu.memory_space<vmem>>) attributes {dimension_semantics = [#tpu.dimension_semantics<parallel>, #tpu.dimension_semantics<parallel>, #tpu.dimension_semantics<arbitrary>], iteration_bounds = array<i64: 1, 4, 1>, scalar_prefetch = 0 : i64, scratch_operands = 1 : i64, tpu.core_type = #tpu.core_type<tc>, window_params = [{transform_indices = @transform_0, window_bounds = array<i64: 32, 2304>}, {transform_indices = @transform_1, window_bounds = array<i64: 2304, 128>}, {transform_indices = @transform_2, window_bounds = array<i64: 1, 128>}, {transform_indices = @transform_3, window_bounds = array<i64: 32, 128>}]} {
    %c0_i32 = arith.constant 0 : i32
    %0 = arith.cmpi eq, %arg2, %c0_i32 : i32
    %1 = arith.extui %0 : i1 to i32
    %c0_i32_0 = arith.constant 0 : i32
    %2 = arith.cmpi ne, %1, %c0_i32_0 : i32
    scf.if %2 {
      %c0_10 = arith.constant 0 : index
      %c0_11 = arith.constant 0 : index
      %12 = vector.load %arg5[%c0_10, %c0_11] : memref<1x128xf32, #tpu.memory_space<vmem>>, vector<1x128xf32>
      %13 = vector.shape_cast %12 : vector<1x128xf32> to vector<1x128xf32>
      %14 = vector.broadcast %13 : vector<1x128xf32> to vector<32x128xf32>
      %c0_12 = arith.constant 0 : index
      %c0_13 = arith.constant 0 : index
      %15 = vector.load %arg7[%c0_12, %c0_13] : memref<32x128xf32, #tpu.memory_space<vmem>>, vector<32x128xf32>
      tpu.vector_store %arg7[%c0_12, %c0_13], %14 {strides = array<i32>} : memref<32x128xf32, #tpu.memory_space<vmem>>, vector<32x128xf32>,
    } else {
    }
    %c0 = arith.constant 0 : index
    %c0_1 = arith.constant 0 : index
    %3 = vector.load %arg7[%c0, %c0_1] : memref<32x128xf32, #tpu.memory_space<vmem>>, vector<32x128xf32>
    %c0_2 = arith.constant 0 : index
    %c0_3 = arith.constant 0 : index
    %4 = vector.load %arg3[%c0_2, %c0_3] : memref<32x2304xbf16, #tpu.memory_space<vmem>>, vector<32x2304xbf16>
    %c0_4 = arith.constant 0 : index
    %c0_5 = arith.constant 0 : index
    %5 = vector.load %arg4[%c0_4, %c0_5] : memref<2304x128xbf16, #tpu.memory_space<vmem>>, vector<2304x128xbf16>
    %cst = arith.constant dense<0.000000e+00> : vector<32x128xf32>
    %6 = tpu.matmul %4, %5, %cst {dimension_numbers = #tpu.dot_dimension_numbers<[1], [0], [0], [1], [0, 0, 1, 1], [], []>} : vector<32x2304xbf16>, vector<2304x128xbf16>, vector<32x128xf32> -> vector<32x128xf32>
    %7 = arith.addf %3, %6 : vector<32x128xf32>
    %c0_6 = arith.constant 0 : index
    %c0_7 = arith.constant 0 : index
    %8 = vector.load %arg7[%c0_6, %c0_7] : memref<32x128xf32, #tpu.memory_space<vmem>>, vector<32x128xf32>
    tpu.vector_store %arg7[%c0_6, %c0_7], %7 {strides = array<i32>} : memref<32x128xf32, #tpu.memory_space<vmem>>, vector<32x128xf32>,
    %c0_i32_8 = arith.constant 0 : i32
    %9 = arith.cmpi eq, %arg2, %c0_i32_8 : i32
    %10 = arith.extui %9 : i1 to i32
    %c0_i32_9 = arith.constant 0 : i32
    %11 = arith.cmpi ne, %10, %c0_i32_9 : i32
    scf.if %11 {
      %c0_10 = arith.constant 0 : index
      %c0_11 = arith.constant 0 : index
      %12 = vector.load %arg7[%c0_10, %c0_11] : memref<32x128xf32, #tpu.memory_space<vmem>>, vector<32x128xf32>
      %cst_12 = arith.constant 0.000000e+00 : f32
      %13 = vector.broadcast %cst_12 : f32 to vector<32x128xf32>
      %14 = arith.maximumf %12, %13 : vector<32x128xf32>
      %15 = arith.truncf %14 : vector<32x128xf32> to vector<32x128xbf16>
      %c0_13 = arith.constant 0 : index
      %c0_14 = arith.constant 0 : index
      %16 = vector.load %arg6[%c0_13, %c0_14] : memref<32x128xbf16, #tpu.memory_space<vmem>>, vector<32x128xbf16>
      tpu.vector_store %arg6[%c0_13, %c0_14], %15 {strides = array<i32>} : memref<32x128xbf16, #tpu.memory_space<vmem>>, vector<32x128xbf16>,
    } else {
    }
    return
  }
  func.func @transform_0(%arg0: i32, %arg1: i32, %arg2: i32) -> (i32, i32) {
    %c0_i32 = arith.constant 0 : i32
    return %arg0, %arg2 : i32, i32
  }
  func.func @transform_1(%arg0: i32, %arg1: i32, %arg2: i32) -> (i32, i32) {
    %c0_i32 = arith.constant 0 : i32
    return %arg2, %arg1 : i32, i32
  }
  func.func @transform_2(%arg0: i32, %arg1: i32, %arg2: i32) -> (i32, i32) {
    %c0_i32 = arith.constant 0 : i32
    %c0_i32_0 = arith.constant 0 : i32
    return %c0_i32, %arg1 : i32, i32
  }
  func.func @transform_3(%arg0: i32, %arg1: i32, %arg2: i32) -> (i32, i32) {
    %c0_i32 = arith.constant 0 : i32
    return %arg0, %arg1 : i32, i32
  }
}

module attributes {stable_mosaic.version = 11 : i64} {
  func.func @_linear_kernel(%arg0: i32, %arg1: i32, %arg2: i32, %arg3: memref<2x8192xbf16, #tpu.memory_space<vmem>>, %arg4: memref<8192x128xbf16, #tpu.memory_space<vmem>>, %arg5: memref<1x128xf32, #tpu.memory_space<vmem>>, %arg6: memref<2x128xbf16, #tpu.memory_space<vmem>>, %arg7: memref<2x128xf32, #tpu.memory_space<vmem>>) attributes {dimension_semantics = [#tpu.dimension_semantics<parallel>, #tpu.dimension_semantics<parallel>, #tpu.dimension_semantics<arbitrary>], iteration_bounds = array<i64: 1, 4, 1>, scalar_prefetch = 0 : i64, scratch_operands = 1 : i64, tpu.core_type = #tpu.core_type<tc>, window_params = [{transform_indices = @transform_0, window_bounds = array<i64: 2, 8192>}, {transform_indices = @transform_1, window_bounds = array<i64: 8192, 128>}, {transform_indices = @transform_2, window_bounds = array<i64: 1, 128>}, {transform_indices = @transform_3, window_bounds = array<i64: 2, 128>}]} {
    %c0_i32 = arith.constant 0 : i32
    %0 = arith.cmpi eq, %arg2, %c0_i32 : i32
    %1 = arith.extui %0 : i1 to i32
    %c0_i32_0 = arith.constant 0 : i32
    %2 = arith.cmpi ne, %1, %c0_i32_0 : i32
    scf.if %2 {
      %c0_10 = arith.constant 0 : index
      %c0_11 = arith.constant 0 : index
      %12 = vector.load %arg5[%c0_10, %c0_11] : memref<1x128xf32, #tpu.memory_space<vmem>>, vector<1x128xf32>
      %13 = vector.shape_cast %12 : vector<1x128xf32> to vector<1x128xf32>
      %14 = vector.broadcast %13 : vector<1x128xf32> to vector<2x128xf32>
      %c0_12 = arith.constant 0 : index
      %c0_13 = arith.constant 0 : index
      %15 = vector.load %arg7[%c0_12, %c0_13] : memref<2x128xf32, #tpu.memory_space<vmem>>, vector<2x128xf32>
      tpu.vector_store %arg7[%c0_12, %c0_13], %14 {strides = array<i32>} : memref<2x128xf32, #tpu.memory_space<vmem>>, vector<2x128xf32>,
    } else {
    }
    %c0 = arith.constant 0 : index
    %c0_1 = arith.constant 0 : index
    %3 = vector.load %arg7[%c0, %c0_1] : memref<2x128xf32, #tpu.memory_space<vmem>>, vector<2x128xf32>
    %c0_2 = arith.constant 0 : index
    %c0_3 = arith.constant 0 : index
    %4 = vector.load %arg3[%c0_2, %c0_3] : memref<2x8192xbf16, #tpu.memory_space<vmem>>, vector<2x8192xbf16>
    %c0_4 = arith.constant 0 : index
    %c0_5 = arith.constant 0 : index
    %5 = vector.load %arg4[%c0_4, %c0_5] : memref<8192x128xbf16, #tpu.memory_space<vmem>>, vector<8192x128xbf16>
    %cst = arith.constant dense<0.000000e+00> : vector<2x128xf32>
    %6 = tpu.matmul %4, %5, %cst {dimension_numbers = #tpu.dot_dimension_numbers<[1], [0], [0], [1], [0, 0, 1, 1], [], []>} : vector<2x8192xbf16>, vector<8192x128xbf16>, vector<2x128xf32> -> vector<2x128xf32>
    %7 = arith.addf %3, %6 : vector<2x128xf32>
    %c0_6 = arith.constant 0 : index
    %c0_7 = arith.constant 0 : index
    %8 = vector.load %arg7[%c0_6, %c0_7] : memref<2x128xf32, #tpu.memory_space<vmem>>, vector<2x128xf32>
    tpu.vector_store %arg7[%c0_6, %c0_7], %7 {strides = array<i32>} : memref<2x128xf32, #tpu.memory_space<vmem>>, vector<2x128xf32>,
    %c0_i32_8 = arith.constant 0 : i32
    %9 = arith.cmpi eq, %arg2, %c0_i32_8 : i32
    %10 = arith.extui %9 : i1 to i32
    %c0_i32_9 = arith.constant 0 : i32
    %11 = arith.cmpi ne, %10, %c0_i32_9 : i32
    scf.if %11 {
      %c0_10 = arith.constant 0 : index
      %c0_11 = arith.constant 0 : index
      %12 = vector.load %arg7[%c0_10, %c0_11] : memref<2x128xf32, #tpu.memory_space<vmem>>, vector<2x128xf32>
      %cst_12 = arith.constant 0.000000e+00 : f32
      %13 = vector.broadcast %cst_12 : f32 to vector<2x128xf32>
      %14 = arith.maximumf %12, %13 : vector<2x128xf32>
      %15 = arith.truncf %14 : vector<2x128xf32> to vector<2x128xbf16>
      %c0_13 = arith.constant 0 : index
      %c0_14 = arith.constant 0 : index
      %16 = vector.load %arg6[%c0_13, %c0_14] : memref<2x128xbf16, #tpu.memory_space<vmem>>, vector<2x128xbf16>
      tpu.vector_store %arg6[%c0_13, %c0_14], %15 {strides = array<i32>} : memref<2x128xbf16, #tpu.memory_space<vmem>>, vector<2x128xbf16>,
    } else {
    }
    return
  }
  func.func @transform_0(%arg0: i32, %arg1: i32, %arg2: i32) -> (i32, i32) {
    %c0_i32 = arith.constant 0 : i32
    return %arg0, %arg2 : i32, i32
  }
  func.func @transform_1(%arg0: i32, %arg1: i32, %arg2: i32) -> (i32, i32) {
    %c0_i32 = arith.constant 0 : i32
    return %arg2, %arg1 : i32, i32
  }
  func.func @transform_2(%arg0: i32, %arg1: i32, %arg2: i32) -> (i32, i32) {
    %c0_i32 = arith.constant 0 : i32
    %c0_i32_0 = arith.constant 0 : i32
    return %c0_i32, %arg1 : i32, i32
  }
  func.func @transform_3(%arg0: i32, %arg1: i32, %arg2: i32) -> (i32, i32) {
    %c0_i32 = arith.constant 0 : i32
    return %arg0, %arg1 : i32, i32
  }
}

module attributes {stable_mosaic.version = 11 : i64} {
  func.func @_tail_kernel(%arg0: memref<2x512xbf16, #tpu.memory_space<vmem>>, %arg1: memref<2x8xf32, #tpu.memory_space<vmem>>, %arg2: memref<512x256xbf16, #tpu.memory_space<vmem>>, %arg3: memref<1x256xf32, #tpu.memory_space<vmem>>, %arg4: memref<8x128xbf16, #tpu.memory_space<vmem>>, %arg5: memref<1x128xf32, #tpu.memory_space<vmem>>, %arg6: memref<128x128xbf16, #tpu.memory_space<vmem>>, %arg7: memref<1x128xf32, #tpu.memory_space<vmem>>, %arg8: memref<256x256xbf16, #tpu.memory_space<vmem>>, %arg9: memref<128x256xbf16, #tpu.memory_space<vmem>>, %arg10: memref<1x256xf32, #tpu.memory_space<vmem>>, %arg11: memref<256x128xbf16, #tpu.memory_space<vmem>>, %arg12: memref<1x128xf32, #tpu.memory_space<vmem>>, %arg13: memref<2x128xf32, #tpu.memory_space<vmem>>) attributes {dimension_semantics = [], scalar_prefetch = 0 : i64, scratch_operands = 0 : i64, tpu.core_type = #tpu.core_type<tc>} {
    %c0 = arith.constant 0 : index
    %c0_0 = arith.constant 0 : index
    %0 = vector.load %arg0[%c0, %c0_0] : memref<2x512xbf16, #tpu.memory_space<vmem>>, vector<2x512xbf16>
    %c0_1 = arith.constant 0 : index
    %c0_2 = arith.constant 0 : index
    %1 = vector.load %arg2[%c0_1, %c0_2] : memref<512x256xbf16, #tpu.memory_space<vmem>>, vector<512x256xbf16>
    %cst = arith.constant dense<0.000000e+00> : vector<2x256xf32>
    %2 = tpu.matmul %0, %1, %cst {dimension_numbers = #tpu.dot_dimension_numbers<[1], [0], [0], [1], [0, 0, 1, 1], [], []>} : vector<2x512xbf16>, vector<512x256xbf16>, vector<2x256xf32> -> vector<2x256xf32>
    %c0_3 = arith.constant 0 : index
    %c0_4 = arith.constant 0 : index
    %3 = vector.load %arg3[%c0_3, %c0_4] : memref<1x256xf32, #tpu.memory_space<vmem>>, vector<1x256xf32>
    %4 = vector.broadcast %3 : vector<1x256xf32> to vector<2x256xf32>
    %5 = arith.addf %2, %4 : vector<2x256xf32>
    %cst_5 = arith.constant 0.000000e+00 : f32
    %6 = vector.broadcast %cst_5 : f32 to vector<2x256xf32>
    %7 = arith.maximumf %5, %6 : vector<2x256xf32>
    %c0_6 = arith.constant 0 : index
    %c0_7 = arith.constant 0 : index
    %8 = vector.load %arg1[%c0_6, %c0_7] : memref<2x8xf32, #tpu.memory_space<vmem>>, vector<2x8xf32>
    %9 = arith.truncf %8 : vector<2x8xf32> to vector<2x8xbf16>
    %c0_8 = arith.constant 0 : index
    %c0_9 = arith.constant 0 : index
    %10 = vector.load %arg4[%c0_8, %c0_9] : memref<8x128xbf16, #tpu.memory_space<vmem>>, vector<8x128xbf16>
    %cst_10 = arith.constant dense<0.000000e+00> : vector<2x128xf32>
    %11 = tpu.matmul %9, %10, %cst_10 {dimension_numbers = #tpu.dot_dimension_numbers<[1], [0], [0], [1], [0, 0, 1, 1], [], []>} : vector<2x8xbf16>, vector<8x128xbf16>, vector<2x128xf32> -> vector<2x128xf32>
    %c0_11 = arith.constant 0 : index
    %c0_12 = arith.constant 0 : index
    %12 = vector.load %arg5[%c0_11, %c0_12] : memref<1x128xf32, #tpu.memory_space<vmem>>, vector<1x128xf32>
    %13 = vector.broadcast %12 : vector<1x128xf32> to vector<2x128xf32>
    %14 = arith.addf %11, %13 : vector<2x128xf32>
    %cst_13 = arith.constant 0.000000e+00 : f32
    %15 = vector.broadcast %cst_13 : f32 to vector<2x128xf32>
    %16 = arith.maximumf %14, %15 : vector<2x128xf32>
    %17 = arith.truncf %16 : vector<2x128xf32> to vector<2x128xbf16>
    %c0_14 = arith.constant 0 : index
    %c0_15 = arith.constant 0 : index
    %18 = vector.load %arg6[%c0_14, %c0_15] : memref<128x128xbf16, #tpu.memory_space<vmem>>, vector<128x128xbf16>
    %cst_16 = arith.constant dense<0.000000e+00> : vector<2x128xf32>
    %19 = tpu.matmul %17, %18, %cst_16 {dimension_numbers = #tpu.dot_dimension_numbers<[1], [0], [0], [1], [0, 0, 1, 1], [], []>} : vector<2x128xbf16>, vector<128x128xbf16>, vector<2x128xf32> -> vector<2x128xf32>
    %c0_17 = arith.constant 0 : index
    %c0_18 = arith.constant 0 : index
    %20 = vector.load %arg7[%c0_17, %c0_18] : memref<1x128xf32, #tpu.memory_space<vmem>>, vector<1x128xf32>
    %21 = vector.broadcast %20 : vector<1x128xf32> to vector<2x128xf32>
    %22 = arith.addf %19, %21 : vector<2x128xf32>
    %cst_19 = arith.constant 0.000000e+00 : f32
    %23 = vector.broadcast %cst_19 : f32 to vector<2x128xf32>
    %24 = arith.maximumf %22, %23 : vector<2x128xf32>
    %25 = arith.truncf %7 : vector<2x256xf32> to vector<2x256xbf16>
    %c0_20 = arith.constant 0 : index
    %c0_21 = arith.constant 0 : index
    %26 = vector.load %arg8[%c0_20, %c0_21] : memref<256x256xbf16, #tpu.memory_space<vmem>>, vector<256x256xbf16>
    %cst_22 = arith.constant dense<0.000000e+00> : vector<2x256xf32>
    %27 = tpu.matmul %25, %26, %cst_22 {dimension_numbers = #tpu.dot_dimension_numbers<[1], [0], [0], [1], [0, 0, 1, 1], [], []>} : vector<2x256xbf16>, vector<256x256xbf16>, vector<2x256xf32> -> vector<2x256xf32>
    %28 = arith.truncf %24 : vector<2x128xf32> to vector<2x128xbf16>
    %c0_23 = arith.constant 0 : index
    %c0_24 = arith.constant 0 : index
    %29 = vector.load %arg9[%c0_23, %c0_24] : memref<128x256xbf16, #tpu.memory_space<vmem>>, vector<128x256xbf16>
    %cst_25 = arith.constant dense<0.000000e+00> : vector<2x256xf32>
    %30 = tpu.matmul %28, %29, %cst_25 {dimension_numbers = #tpu.dot_dimension_numbers<[1], [0], [0], [1], [0, 0, 1, 1], [], []>} : vector<2x128xbf16>, vector<128x256xbf16>, vector<2x256xf32> -> vector<2x256xf32>
    %31 = arith.addf %27, %30 : vector<2x256xf32>
    %c0_26 = arith.constant 0 : index
    %c0_27 = arith.constant 0 : index
    %32 = vector.load %arg10[%c0_26, %c0_27] : memref<1x256xf32, #tpu.memory_space<vmem>>, vector<1x256xf32>
    %33 = vector.broadcast %32 : vector<1x256xf32> to vector<2x256xf32>
    %34 = arith.addf %31, %33 : vector<2x256xf32>
    %cst_28 = arith.constant 0.000000e+00 : f32
    %35 = vector.broadcast %cst_28 : f32 to vector<2x256xf32>
    %36 = arith.maximumf %34, %35 : vector<2x256xf32>
    %37 = arith.truncf %36 : vector<2x256xf32> to vector<2x256xbf16>
    %c0_29 = arith.constant 0 : index
    %c0_30 = arith.constant 0 : index
    %38 = vector.load %arg11[%c0_29, %c0_30] : memref<256x128xbf16, #tpu.memory_space<vmem>>, vector<256x128xbf16>
    %cst_31 = arith.constant dense<0.000000e+00> : vector<2x128xf32>
    %39 = tpu.matmul %37, %38, %cst_31 {dimension_numbers = #tpu.dot_dimension_numbers<[1], [0], [0], [1], [0, 0, 1, 1], [], []>} : vector<2x256xbf16>, vector<256x128xbf16>, vector<2x128xf32> -> vector<2x128xf32>
    %c0_32 = arith.constant 0 : index
    %c0_33 = arith.constant 0 : index
    %40 = vector.load %arg12[%c0_32, %c0_33] : memref<1x128xf32, #tpu.memory_space<vmem>>, vector<1x128xf32>
    %41 = vector.broadcast %40 : vector<1x128xf32> to vector<2x128xf32>
    %42 = arith.addf %39, %41 : vector<2x128xf32>
    %43 = tpu.iota {dimensions = array<i32: 1>} : vector<2x128xi32>
    %c10_i32 = arith.constant 10 : i32
    %44 = vector.broadcast %c10_i32 : i32 to vector<2x128xi32>
    %45 = arith.cmpi slt, %43, %44 : vector<2x128xi32>
    %cst_34 = arith.constant 0xFF800000 : f32
    %46 = vector.broadcast %cst_34 : f32 to vector<2x128xf32>
    %47 = arith.select %45, %42, %46 : vector<2x128xi1>, vector<2x128xf32>
    %cst_35 = arith.constant dense<0xFF800000> : vector<2xf32>
    %48 = vector.multi_reduction <maximumf>, %47, %cst_35 [1] : vector<2x128xf32> to vector<2xf32>
    %49 = vector.shape_cast %48 : vector<2xf32> to vector<2x1xf32>
    %50 = vector.broadcast %49 : vector<2x1xf32> to vector<2x128xf32>
    %51 = arith.subf %47, %50 : vector<2x128xf32>
    %52 = math.exp %51 : vector<2x128xf32>
    %cst_36 = arith.constant dense<0.000000e+00> : vector<2xf32>
    %53 = vector.multi_reduction <add>, %52, %cst_36 [1] : vector<2x128xf32> to vector<2xf32>
    %54 = vector.shape_cast %53 : vector<2xf32> to vector<2x1xf32>
    %55 = math.log %54 : vector<2x1xf32>
    %56 = arith.addf %55, %49 : vector<2x1xf32>
    %57 = vector.broadcast %56 : vector<2x1xf32> to vector<2x128xf32>
    %58 = arith.subf %47, %57 : vector<2x128xf32>
    %c10_i32_37 = arith.constant 10 : i32
    %59 = vector.broadcast %c10_i32_37 : i32 to vector<2x128xi32>
    %60 = arith.cmpi eq, %43, %59 : vector<2x128xi32>
    %cst_38 = arith.constant 0.000000e+00 : f32
    %61 = vector.broadcast %cst_38 : f32 to vector<2x128xf32>
    %62 = arith.select %60, %42, %61 : vector<2x128xi1>, vector<2x128xf32>
    %cst_39 = arith.constant dense<0.000000e+00> : vector<2xf32>
    %63 = vector.multi_reduction <add>, %62, %cst_39 [1] : vector<2x128xf32> to vector<2xf32>
    %64 = vector.shape_cast %63 : vector<2xf32> to vector<2x1xf32>
    %65 = math.tanh %64 : vector<2x1xf32>
    %66 = vector.shape_cast %65 : vector<2x1xf32> to vector<2x1xf32>
    %67 = vector.broadcast %66 : vector<2x1xf32> to vector<2x128xf32>
    %c10_i32_40 = arith.constant 10 : i32
    %68 = vector.broadcast %c10_i32_40 : i32 to vector<2x128xi32>
    %69 = arith.cmpi slt, %43, %68 : vector<2x128xi32>
    %c10_i32_41 = arith.constant 10 : i32
    %70 = vector.broadcast %c10_i32_41 : i32 to vector<2x128xi32>
    %71 = arith.cmpi eq, %43, %70 : vector<2x128xi32>
    %cst_42 = arith.constant 0.000000e+00 : f32
    %72 = vector.broadcast %cst_42 : f32 to vector<2x128xf32>
    %73 = arith.select %71, %67, %72 : vector<2x128xi1>, vector<2x128xf32>
    %74 = arith.select %69, %58, %73 : vector<2x128xi1>, vector<2x128xf32>
    %c0_43 = arith.constant 0 : index
    %c0_44 = arith.constant 0 : index
    %75 = vector.load %arg13[%c0_43, %c0_44] : memref<2x128xf32, #tpu.memory_space<vmem>>, vector<2x128xf32>
    tpu.vector_store %arg13[%c0_43, %c0_44], %74 {strides = array<i32>} : memref<2x128xf32, #tpu.memory_space<vmem>>, vector<2x128xf32>,
    return
  }
}

</mosaic_0001>

<bundles_post_ra>
// kernel: nnet_forward.6
= control target key start
LH: loop header
LB: loop body
LE: loop exit
PB: predicated region body
PF: predicated region fallthrough
CT: control target
= control target key end

     0   :  { %8 = vsyncpa [#allocation4], 0  ;;  %s871_s0 = inlined_call_operand.vmem [shape: bf16[128,36], index: 0, kind: input, shape index: {}]   ;;  %s872_s1 = inlined_call_operand.hbm [shape: bf16[36,64], index: 1, kind: input, shape index: {}]   ;;  %s873_s2 = inlined_call_operand.hbm [shape: f32[1,64], index: 2, kind: input, shape index: {}]   ;;  %s874_s3 = inlined_call_operand.vmem [shape: bf16[128,64], index: 3, kind: output, shape index: {}]  }
   0x1   :  { %9 = vsyncpa [#allocation6], 0  ;;  %s765_s12 = smov 0   ;;  %s767_s13 = smov 0  }
   0x2   :  { %s769_s14 = smov 0  }
   0x3 LB: > { %s543_s15 = sadd.s32 4294967295, %s739_s14   ;;  %s34_s16 = sadd.s32 1, %s735_s13  ;;  %s739_s14 = sphi %s769_s14, %s15_s14   ;;  %s735_s13 = sphi %s767_s13, %s878_s13   ;;  %s731_s12 = sphi %s765_s12, %s877_s12  }
   0x4   : > { %p36_p0 = scmp.ge.s32.totalorder %s34_s16, 2  ;;  %p545_p1 = scmp.ge.s32.totalorder %s739_s14, 1 }
   0x5   : > { %p149_p2 = scmp.lt.s32.totalorder %s739_s14, 3  ;;  %p790_p4 = scmp.eq.s32.totalorder %s543_s15, 0 }
   0x6   : > { %s880_s16 = smov (%p36_p0, %s34_s16), 0  ;;  %s164_s21 = sshll.u32 %s872_s1, 4  ;;  %s165_s21 = int_to_ptr.hbm [resolvable:$true] %s164_s21 }
   0x7   : > { %p786_p3 = pnand %p545_p1, %p149_p2  ;;  %s741_s22 = smov [#allocation3]  }
   0x8   : > { %s166_s23 = sshll.u32 %s741_s22, 4  ;;  %s180_s26 = sshll.u32 %s873_s2, 4  ;;  %s167_s23 = int_to_ptr.vmem [resolvable:$true] %s166_s23  ;;  %s181_s26 = int_to_ptr.hbm [resolvable:$true] %s180_s26 }
   0x9   : > { %p609_p5 = pneg %p786_p3  ;;  %s742_s27 = smov 64  }
   0xa   : > { %s743_s28 = smov 4   ;;  %s744_s29 = smov [#allocation5]  }
   0xb   : > { %p610_p6 = pnand %p790_p4, %p609_p5  ;;  %s182_s30 = sshll.u32 %s744_s29, 4  ;;  %s183_s30 = int_to_ptr.vmem [resolvable:$true] %s182_s30 }
   0xc   : > { %207 = sbr.rel (%p786_p3) target bundleno = 194 (0xc2), region = 32 }
   0xd   : > { %612 = dma.hbm_to_vmem [thread:$0]  (!%p610_p6), %s165_s21, 320, %s167_s23, [#allocation4], %s742_s27, %s742_s27, %s743_s28  }
   0xe   : > { %615 = dma.hbm_to_vmem [thread:$0]  (!%p610_p6), %s181_s26, 16, %s183_s30, [#allocation6]  }
  0x11   : > { %722 = dma.done.wait (%p790_p4), [#allocation4], 320  }
  0x12   : > { %724 = vsyncadd (%p790_p4), [#allocation4], 4294966976 }
  0x13   : > { %726 = dma.done.wait (%p790_p4), [#allocation6], 16  }
  0x14   : > { %728 = vsyncadd (%p790_p4), [#allocation6], 4294967280  ;;  %s552_s4 = sshll.u32 %s731_s12, 3  ;;  %v300_v0 = vld [vmem:[#allocation3 + $0x10] sm:$0x3]  ;;  %vm271_vm0 = vcmask 523264  }
  0x15   : > { %p244_p7 = scmp.lt.s32.totalorder %s552_s4, 15  ;;  %v330_v1 = vunpack.c.l.b16 %v300_v0  ;;  %vm349_vm1 = vcmask 1041408   ;;  %v648_v2 = vld [vmem:[#allocation5] ss:$0 sm:$0xff]  ;;  %v591_v5 = vld [vmem:[#allocation3 + $0x8] sm:$0xff]  ;;  %v590_v6 = vld [vmem:[#allocation3] sm:$0xff] }
  0x16   : > { %272 = vst.msk [vmem:[#allocation2] sm:$0xff] %vm271_vm0, %v648_v2  ;;  %vm336_vm2 = vcmask 293888   ;;  %vm426_vm3 = vcmask 519168  }
  0x17   : > { %v333_v3 = vpack.c.b16 %v330_v1, %v330_v1  ;;  %s882_s4 = smov (!%p244_p7, %s552_s4), 15  ;;  %273 = vst.msk [vmem:[#allocation2 + $0x8] sm:$0xff] %vm271_vm0, %v648_v2 }
  0x18   : > { %274 = vst.msk [vmem:[#allocation2 + $0x10] sm:$0xff] %vm271_vm0, %v648_v2  ;;  %s553_s5 = sshll.u32 %s882_s4, 2 }
  0x19   : > { %v351_v4 = vsel %vm349_vm1, %v333_v3, 0  ;;  %275 = vst.msk [vmem:[#allocation2 + $0x18] sm:$0xff] %vm271_vm0, %v648_v2  ;;  %s250_s8 = scalar_lea.vmem %s871_s0, %s553_s5  ;;  %s840_s11 = scalar_lea.vmem %s874_s3, %s553_s5 }
  0x1a   : > { %358 = vmatpush.bf16.msra.mxu0 %v351_v4  ;;  %592 = vmatpush.bf16.msra.mxu1 %v351_v4  ;;  %276 = vst.msk [vmem:[#allocation2 + $0x20] sm:$0xff] %vm271_vm0, %v648_v2  ;;  %v586_v7 = vld [vmem:[%s250_s8] sm:$0xff]  ;;  %v587_v8 = vld [vmem:[%s250_s8 + $0x8] sm:$0xff]  ;;  %v588_v9 = vld [vmem:[%s250_s8 + $0x10] sm:$0xff] }
  0x1b   : > { %593 = vmatpush.bf16.msra.mxu2 %v351_v4  ;;  %594 = vmatpush.bf16.msra.mxu3 %v351_v4  ;;  %277 = vst.msk [vmem:[#allocation2 + $0x28] sm:$0xff] %vm271_vm0, %v648_v2  ;;  %v589_v10 = vld [vmem:[%s250_s8 + $0x18] sm:$0xff] }
  0x1c   : > { %278 = vst.msk [vmem:[#allocation2 + $0x30] sm:$0xff] %vm271_vm0, %v648_v2 }
  0x1d   : > { %279 = vst.msk [vmem:[#allocation2 + $0x38] sm:$0xff] %vm271_vm0, %v648_v2  ;;  %v280_v11 = vld [vmem:[#allocation2] sm:$0xff] }
  0x1e   : > { %359 = vmatpush.bf16.msra.mxu0 %v591_v5  ;;  %595 = vmatpush.bf16.msra.mxu1 %v591_v5  ;;  %v281_v19 = vld [vmem:[#allocation2 + $0x8] sm:$0xff] }
  0x1f   : > { %596 = vmatpush.bf16.msra.mxu2 %v591_v5  ;;  %597 = vmatpush.bf16.msra.mxu3 %v591_v5  ;;  %v282_v12 = vld [vmem:[#allocation2 + $0x10] sm:$0xff] }
  0x20   : > { %v283_v20 = vld [vmem:[#allocation2 + $0x18] sm:$0xff] }
  0x21   : > { %v284_v17 = vld [vmem:[#allocation2 + $0x20] sm:$0xff] }
  0x22   : > { %360 = vmatpush.bf16.msra.mxu0 %v590_v6  ;;  %598 = vmatpush.bf16.msra.mxu1 %v590_v6  ;;  %v285_v34 = vld [vmem:[#allocation2 + $0x28] sm:$0xff] }
  0x23   : > { %599 = vmatpush.bf16.msra.mxu2 %v590_v6  ;;  %600 = vmatpush.bf16.msra.mxu3 %v590_v6  ;;  %v286_v18 = vld [vmem:[#allocation2 + $0x30] sm:$0xff] }
  0x24   : > { %v287_v35 = vld [vmem:[#allocation2 + $0x38] sm:$0xff] }
  0x25   : > { %580 = vmatmul.msk.bf16.vlgmr.msra.gmra.mxu0 %vm336_vm2, %v586_v7  ;;  %581 = vmatmul.msk.bf16.vlgmr.msra.gmra.mxu1 %vm336_vm2, %v587_v8 }
  0x26   : > { %582 = vmatmul.msk.bf16.vlgmr.msra.gmra.mxu2 %vm336_vm2, %v588_v9  ;;  %583 = vmatmul.msk.bf16.vlgmr.msra.gmra.mxu3 %vm336_vm2, %v589_v10 }
  0xa2   : > { %v362_v13 = vpop.f32.mrf.mxu0  ;;  %v367_v14 = vpop.f32.mrf.mxu1 }
  0xa3   : > { %v382_v15 = vadd.f32 %v362_v13, %v280_v11  ;;  %v384_v16 = vadd.f32 %v367_v14, %v282_v12 }
  0xa5   : > { %391 = vst.msk [vmem:[#allocation2] sm:$0xff] %vm271_vm0, %v382_v15 }
  0xa6   : > { %393 = vst.msk [vmem:[#allocation2 + $0x10] sm:$0xff] %vm271_vm0, %v384_v16 }
  0xa9   : > { %v372_v21 = vpop.f32.mrf.mxu2  ;;  %v377_v22 = vpop.f32.mrf.mxu3 }
  0xaa   : > { %v386_v23 = vadd.f32 %v372_v21, %v284_v17  ;;  %v388_v24 = vadd.f32 %v377_v22, %v286_v18  ;;  %v364_v25 = vpop.f32.mrf.mxu0  ;;  %v369_v26 = vpop.f32.mrf.mxu1 }
  0xab   : > { %v383_v27 = vadd.f32 %v364_v25, %v281_v19  ;;  %v385_v28 = vadd.f32 %v369_v26, %v283_v20 }
  0xac   : > { %v402_v29 = vld [vmem:[#allocation2] sm:$0xff]  ;;  %395 = vst.msk [vmem:[#allocation2 + $0x20] sm:$0xff] %vm271_vm0, %v386_v23 }
  0xad   : > { %v410_v30 = vmax.f32 %v402_v29, 0.0  ;;  %v404_v31 = vld [vmem:[#allocation2 + $0x10] sm:$0xff]  ;;  %397 = vst.msk [vmem:[#allocation2 + $0x30] sm:$0xff] %vm271_vm0, %v388_v24 }
  0xae   : > { %v412_v32 = vmax.f32 %v404_v31, 0.0  ;;  %392 = vst.msk [vmem:[#allocation2 + $0x8] sm:$0xff] %vm271_vm0, %v383_v27 }
  0xaf   : > { %v418_v33 = vpack.c.bf16 %v410_v30, %v410_v30  ;;  %394 = vst.msk [vmem:[#allocation2 + $0x18] sm:$0xff] %vm271_vm0, %v385_v28 }
  0xb0   : > { %v420_v36 = vpack.c.bf16 %v412_v32, %v412_v32 }
  0xb1   : > { %427 = vst.msk [vmem:[%s840_s11] sm:$0xf] %vm426_vm3, %v418_v33  ;;  %v374_v37 = vpop.f32.mrf.mxu2  ;;  %v379_v38 = vpop.f32.mrf.mxu3 }
  0xb2   : > { %429 = vst.msk [vmem:[%s840_s11 + $0x8] sm:$0xf] %vm426_vm3, %v420_v36  ;;  %v387_v39 = vadd.f32 %v374_v37, %v285_v34  ;;  %v389_v40 = vadd.f32 %v379_v38, %v287_v35 }
  0xb3   : > { %v406_v41 = vld [vmem:[#allocation2 + $0x20] sm:$0xff] }
  0xb4   : > { %v414_v42 = vmax.f32 %v406_v41, 0.0  ;;  %v408_v43 = vld [vmem:[#allocation2 + $0x30] sm:$0xff]  ;;  %396 = vst.msk [vmem:[#allocation2 + $0x28] sm:$0xff] %vm271_vm0, %v387_v39 }
  0xb5   : > { %v416_v44 = vmax.f32 %v408_v43, 0.0  ;;  %v403_v45 = vld [vmem:[#allocation2 + $0x8] sm:$0xff]  ;;  %398 = vst.msk [vmem:[#allocation2 + $0x38] sm:$0xff] %vm271_vm0, %v389_v40 }
  0xb6   : > { %v422_v46 = vpack.c.bf16 %v414_v42, %v414_v42  ;;  %v411_v47 = vmax.f32 %v403_v45, 0.0  ;;  %v405_v48 = vld [vmem:[#allocation2 + $0x18] sm:$0xff] }
  0xb7   : > { %v424_v49 = vpack.c.bf16 %v416_v44, %v416_v44  ;;  %v413_v50 = vmax.f32 %v405_v48, 0.0 }
  0xb8   : > { %431 = vst.msk [vmem:[%s840_s11 + $0x10] sm:$0xf] %vm426_vm3, %v422_v46  ;;  %v419_v51 = vpack.c.bf16 %v411_v47, %v411_v47 }
  0xb9   : > { %433 = vst.msk [vmem:[%s840_s11 + $0x18] sm:$0xf] %vm426_vm3, %v424_v49  ;;  %v421_v52 = vpack.c.bf16 %v413_v50, %v413_v50 }
  0xba   : > { %428 = vst.msk [vmem:[%s840_s11 + $0x4] sm:$0xf] %vm426_vm3, %v419_v51 }
  0xbb   : > { %430 = vst.msk [vmem:[%s840_s11 + $0xc] sm:$0xf] %vm426_vm3, %v421_v52  ;;  %v407_v53 = vld [vmem:[#allocation2 + $0x28] sm:$0xff] }
  0xbc   : > { %v415_v54 = vmax.f32 %v407_v53, 0.0  ;;  %v409_v55 = vld [vmem:[#allocation2 + $0x38] sm:$0xff] }
  0xbd   : > { %v417_v56 = vmax.f32 %v409_v55, 0.0 }
  0xbe   : > { %v423_v57 = vpack.c.bf16 %v415_v54, %v415_v54 }
  0xbf   : > { %v425_v58 = vpack.c.bf16 %v417_v56, %v417_v56 }
  0xc0   : > { %432 = vst.msk [vmem:[%s840_s11 + $0x14] sm:$0xf] %vm426_vm3, %v423_v57 }
  0xc1   : > { %434 = vst.msk [vmem:[%s840_s11 + $0x1c] sm:$0xf] %vm426_vm3, %v425_v58 }
  0xc2 PF: > { %s15_s14 = sadd.s32 1, %s739_s14   ;;  %s877_s12 = smov %s735_s13 }
  0xc3   : > { %p12_p8 = scmp.ge.s32.totalorder %s15_s14, 4   ;;  %s878_s13 = smov %s880_s16 }
  0xc5   :  { %14 = sbr.rel (!%p12_p8) target bundleno = 3 (0x3), region = 81 }
  0xca   :  { %463 = vsyncpa [#allocation4], 1 }
  0xcb   :  { %465 = vsyncpa [#allocation4 + $0x1], 1 }
  0xcc   :  { %466 = vsyncpa [#allocation6], 1 }

// kernel: nnet_forward.7
= control target key start
LH: loop header
LB: loop body
LE: loop exit
PB: predicated region body
PF: predicated region fallthrough
CT: control target
= control target key end

     0   :  { %8 = vsyncpa [#allocation4], 0  ;;  %s2322_s0 = inlined_call_operand.vmem [shape: bf16[32,1600], index: 0, kind: input, shape index: {}]   ;;  %s2323_s1 = inlined_call_operand.hbm [shape: bf16[1600,128], index: 1, kind: input, shape index: {}]   ;;  %s2324_s2 = inlined_call_operand.hbm [shape: f32[1,128], index: 2, kind: input, shape index: {}]   ;;  %s2325_s3 = inlined_call_operand.vmem [shape: bf16[32,128], index: 3, kind: output, shape index: {}]  }
   0x1   :  { %9 = vsyncpa [#allocation6], 0  ;;  %s2225_s12 = smov 0   ;;  %s2227_s13 = smov 0  }
   0x2   :  { %s2229_s14 = smov 0  }
   0x3 LB: > { %s1474_s15 = sadd.s32 4294967295, %s2199_s14   ;;  %s34_s16 = sadd.s32 1, %s2195_s13  ;;  %s2199_s14 = sphi %s2229_s14, %s15_s14   ;;  %s2195_s13 = sphi %s2227_s13, %s2329_s13   ;;  %s2191_s12 = sphi %s2225_s12, %s2328_s12  }
   0x4   : > { %p36_p0 = scmp.ge.s32.totalorder %s34_s16, 2  ;;  %p1476_p1 = scmp.ge.s32.totalorder %s2199_s14, 1 }
   0x5   : > { %p149_p2 = scmp.lt.s32.totalorder %s2199_s14, 3  ;;  %p2250_p4 = scmp.eq.s32.totalorder %s1474_s15, 0 }
   0x6   : > { %s2331_s16 = smov (%p36_p0, %s34_s16), 0  ;;  %s164_s21 = sshll.u32 %s2323_s1, 4  ;;  %s165_s21 = int_to_ptr.hbm [resolvable:$true] %s164_s21 }
   0x7   : > { %p2246_p3 = pnand %p1476_p1, %p149_p2  ;;  %s2201_s22 = smov [#allocation3]  }
   0x8   : > { %s166_s23 = sshll.u32 %s2201_s22, 4  ;;  %s180_s26 = sshll.u32 %s2324_s2, 4  ;;  %s167_s23 = int_to_ptr.vmem [resolvable:$true] %s166_s23  ;;  %s181_s26 = int_to_ptr.hbm [resolvable:$true] %s180_s26 }
   0x9   : > { %p2069_p5 = pneg %p2246_p3  ;;  %s2202_s27 = smov 64  }
   0xa   : > { %s2203_s28 = smov 4   ;;  %s2204_s29 = smov [#allocation5]  }
   0xb   : > { %p2070_p6 = pnand %p2250_p4, %p2069_p5  ;;  %s182_s30 = sshll.u32 %s2204_s29, 4  ;;  %s183_s30 = int_to_ptr.vmem [resolvable:$true] %s182_s30 }
   0xc   : > { %210 = sbr.rel (%p2246_p3) target bundleno = 275 (0x113), region = 32 }
   0xd   : > { %2072 = dma.hbm_to_vmem [thread:$0]  (!%p2070_p6), %s165_s21, 12800, %s167_s23, [#allocation4], %s2202_s27, %s2202_s27, %s2203_s28  }
   0xe   : > { %2075 = dma.hbm_to_vmem [thread:$0]  (!%p2070_p6), %s181_s26, 16, %s183_s30, [#allocation6]  }
  0x11   : > { %2182 = dma.done.wait (%p2250_p4), [#allocation4], 12800  }
  0x12   : > { %2184 = vsyncadd (%p2250_p4), [#allocation4], 4294954496 }
  0x13   : > { %2186 = dma.done.wait (%p2250_p4), [#allocation6], 16  }
  0x14   : > { %2188 = vsyncadd (%p2250_p4), [#allocation6], 4294967280  ;;  %v1962_v0 = vld [vmem:[#allocation3 + $0x38] sm:$0xff]  ;;  %v1961_v4 = vld [vmem:[#allocation3 + $0x30] sm:$0xff]  ;;  %s1483_s4 = sshll.u32 %s2191_s12, 1  ;;  %vm1162_vm0 = vcmask 523264  }
  0x15   : > { %v1978_v1 = vld [vmem:[#allocation3 + $0xb8] sm:$0xff]  ;;  %1166 = vmatpush.bf16.msra.mxu0 %v1962_v0  ;;  %v1977_v5 = vld [vmem:[#allocation3 + $0xb0] sm:$0xff]  ;;  %v1960_v8 = vld [vmem:[#allocation3 + $0x28] sm:$0xff]  ;;  %p250_p7 = scmp.lt.s32.totalorder %s1483_s4, 3 }
  0x16   : > { %v1986_v2 = vld [vmem:[#allocation3 + $0xf8] sm:$0xff]  ;;  %1194 = vmatpush.bf16.msra.mxu2 %v1978_v1  ;;  %v1985_v6 = vld [vmem:[#allocation3 + $0xf0] sm:$0xff]  ;;  %v1976_v9 = vld [vmem:[#allocation3 + $0xa8] sm:$0xff] }
  0x17   : > { %v1970_v3 = vld [vmem:[#allocation3 + $0x78] sm:$0xff]  ;;  %1208 = vmatpush.bf16.msra.mxu3 %v1986_v2  ;;  %v1969_v7 = vld [vmem:[#allocation3 + $0x70] sm:$0xff]  ;;  %v1984_v10 = vld [vmem:[#allocation3 + $0xe8] sm:$0xff]  ;;  %s2333_s4 = smov (!%p250_p7, %s1483_s4), 3 }
  0x18   : > { %1180 = vmatpush.bf16.msra.mxu1 %v1970_v3  ;;  %v1968_v11 = vld [vmem:[#allocation3 + $0x68] sm:$0xff]  ;;  %v1959_v12 = vld [vmem:[#allocation3 + $0x20] sm:$0xff]  ;;  %v1958_v16 = vld [vmem:[#allocation3 + $0x18] sm:$0xff]  ;;  %s2060_s5 = smul.u32 52, %s2333_s4  ;;  %s1486_s9 = sshll.u32 %s2333_s4, 2 }
  0x19   : > { %1167 = vmatpush.bf16.msra.mxu0 %v1961_v4  ;;  %v1975_v13 = vld [vmem:[#allocation3 + $0xa0] sm:$0xff]  ;;  %v1974_v17 = vld [vmem:[#allocation3 + $0x98] sm:$0xff]  ;;  %v1957_v20 = vld [vmem:[#allocation3 + $0x10] sm:$0xff]  ;;  %s268_s12 = scalar_lea.vmem %s2325_s3, %s1486_s9 }
  0x1a   : > { %1195 = vmatpush.bf16.msra.mxu2 %v1977_v5  ;;  %v1983_v14 = vld [vmem:[#allocation3 + $0xe0] sm:$0xff]  ;;  %v1982_v18 = vld [vmem:[#allocation3 + $0xd8] sm:$0xff]  ;;  %v1973_v21 = vld [vmem:[#allocation3 + $0x90] sm:$0xff]  ;;  %s2281_s8 = scalar_lea.vmem %s2322_s0, %s2060_s5 }
  0x1b   : > { %1209 = vmatpush.bf16.msra.mxu3 %v1985_v6  ;;  %v1967_v15 = vld [vmem:[#allocation3 + $0x60] sm:$0xff]  ;;  %v1966_v19 = vld [vmem:[#allocation3 + $0x58] sm:$0xff]  ;;  %v1981_v22 = vld [vmem:[#allocation3 + $0xd0] sm:$0xff] }
  0x1c   : > { %1181 = vmatpush.bf16.msra.mxu1 %v1969_v7  ;;  %v1965_v23 = vld [vmem:[#allocation3 + $0x50] sm:$0xff]  ;;  %v1956_v24 = vld [vmem:[#allocation3 + $0x8] sm:$0xff]  ;;  %v1955_v28 = vld [vmem:[#allocation3] sm:$0xff] }
  0x1d   : > { %1168 = vmatpush.bf16.msra.mxu0 %v1960_v8  ;;  %v1972_v25 = vld [vmem:[#allocation3 + $0x88] sm:$0xff]  ;;  %v1971_v29 = vld [vmem:[#allocation3 + $0x80] sm:$0xff]  ;;  %v1994_v31 = vld [vmem:[#allocation3 + $0x138] sm:$0xff] }
  0x1e   : > { %1196 = vmatpush.bf16.msra.mxu2 %v1976_v9  ;;  %v1980_v26 = vld [vmem:[#allocation3 + $0xc8] sm:$0xff]  ;;  %v1979_v30 = vld [vmem:[#allocation3 + $0xc0] sm:$0xff]  ;;  %v1948_v33 = vld [vmem:[%s2281_s8 + $0x30] sm:$0xf0] }
  0x1f   : > { %1210 = vmatpush.bf16.msra.mxu3 %v1984_v10  ;;  %v1964_v27 = vld [vmem:[#allocation3 + $0x48] sm:$0xff]  ;;  %v1489_v32 = vld [vmem:[%s2281_s8] sm:$0xf]  ;;  %v2010_v34 = vld [vmem:[#allocation3 + $0x1b8] sm:$0xff] }
  0x20   : > { %1182 = vmatpush.bf16.msra.mxu1 %v1968_v11  ;;  %v1497_v35 = vld [vmem:[%s2281_s8 + $0x8] sm:$0xf]  ;;  %v1949_v36 = vld [vmem:[%s2281_s8 + $0x38] sm:$0xf0]  ;;  %v1943_v38 = vld [vmem:[%s2281_s8 + $0xc] sm:$0xf]  ;;  %v1490_v41 = vor.u32 %v1948_v33, %v1489_v32 }
  0x21   : > { %1169 = vmatpush.bf16.msra.mxu0 %v1959_v12  ;;  %v2018_v37 = vld [vmem:[#allocation3 + $0x1f8] sm:$0xff]  ;;  %v1499_v39 = vld [vmem:[%s2281_s8 + $0x3c] sm:$0xf0]  ;;  %v1498_v43 = vor.u32 %v1949_v36, %v1497_v35  ;;  %v1942_v44 = vld [vmem:[%s2281_s8 + $0x4] sm:$0xf] }
  0x22   : > { %1197 = vmatpush.bf16.msra.mxu2 %v1975_v13  ;;  %v1963_v40 = vld [vmem:[#allocation3 + $0x40] sm:$0xff]  ;;  %v2002_v42 = vld [vmem:[#allocation3 + $0x178] sm:$0xff]  ;;  %v1993_v46 = vld [vmem:[#allocation3 + $0x130] sm:$0xff]  ;;  %v1502_v47 = vor.u32 %v1943_v38, %v1499_v39 }
  0x23   : > { %1211 = vmatpush.bf16.msra.mxu3 %v1983_v14  ;;  %v1491_v45 = vld [vmem:[%s2281_s8 + $0x34] sm:$0xf0]  ;;  %v2009_v48 = vld [vmem:[#allocation3 + $0x1b0] sm:$0xff]  ;;  %v1992_v52 = vld [vmem:[#allocation3 + $0x128] sm:$0xff] }
  0x24   : > { %1183 = vmatpush.bf16.msra.mxu1 %v1967_v15  ;;  %v2017_v49 = vld [vmem:[#allocation3 + $0x1f0] sm:$0xff]  ;;  %v1494_v50 = vor.u32 %v1942_v44, %v1491_v45  ;;  %v2008_v53 = vld [vmem:[#allocation3 + $0x1a8] sm:$0xff]  ;;  %v1991_v56 = vld [vmem:[#allocation3 + $0x120] sm:$0xff] }
  0x25   : > { %1170 = vmatpush.bf16.msra.mxu0 %v1958_v16  ;;  %v2001_v51 = vld [vmem:[#allocation3 + $0x170] sm:$0xff]  ;;  %v2016_v54 = vld [vmem:[#allocation3 + $0x1e8] sm:$0xff]  ;;  %v2007_v57 = vld [vmem:[#allocation3 + $0x1a0] sm:$0xff] }
  0x26   : > { %1198 = vmatpush.bf16.msra.mxu2 %v1974_v17  ;;  %v2000_v55 = vld [vmem:[#allocation3 + $0x168] sm:$0xff]  ;;  %v2015_v58 = vld [vmem:[#allocation3 + $0x1e0] sm:$0xff]  ;;  %v1990_v60 = vld [vmem:[#allocation3 + $0x118] sm:$0xff] }
  0x27   : > { %1212 = vmatpush.bf16.msra.mxu3 %v1982_v18  ;;  %v1999_v59 = vld [vmem:[#allocation3 + $0x160] sm:$0xff]  ;;  %v2006_v61 = vld [vmem:[#allocation3 + $0x198] sm:$0xff]  ;;  %v1989_v0 = vld [vmem:[#allocation3 + $0x110] sm:$0xff] }
  0x28   : > { %1184 = vmatpush.bf16.msra.mxu1 %v1966_v19  ;;  %v2014_v62 = vld [vmem:[#allocation3 + $0x1d8] sm:$0xff]  ;;  %v2005_v1 = vld [vmem:[#allocation3 + $0x190] sm:$0xff]  ;;  %v1988_v4 = vld [vmem:[#allocation3 + $0x108] sm:$0xff] }
  0x29   : > { %1171 = vmatpush.bf16.msra.mxu0 %v1957_v20  ;;  %v1998_v63 = vld [vmem:[#allocation3 + $0x158] sm:$0xff]  ;;  %v2013_v2 = vld [vmem:[#allocation3 + $0x1d0] sm:$0xff]  ;;  %v2004_v5 = vld [vmem:[#allocation3 + $0x188] sm:$0xff] }
  0x2a   : > { %1199 = vmatpush.bf16.msra.mxu2 %v1973_v21  ;;  %v1997_v3 = vld [vmem:[#allocation3 + $0x150] sm:$0xff]  ;;  %v2012_v6 = vld [vmem:[#allocation3 + $0x1c8] sm:$0xff]  ;;  %v1987_v8 = vld [vmem:[#allocation3 + $0x100] sm:$0xff] }
  0x2b   : > { %1213 = vmatpush.bf16.msra.mxu3 %v1981_v22  ;;  %v1996_v7 = vld [vmem:[#allocation3 + $0x148] sm:$0xff]  ;;  %v2003_v9 = vld [vmem:[#allocation3 + $0x180] sm:$0xff]  ;;  %v2026_v11 = vld [vmem:[#allocation3 + $0x238] sm:$0xff] }
  0x2c   : > { %1185 = vmatpush.bf16.msra.mxu1 %v1965_v23  ;;  %v2011_v10 = vld [vmem:[#allocation3 + $0x1c0] sm:$0xff]  ;;  %v2042_v12 = vld [vmem:[#allocation3 + $0x2b8] sm:$0xff]  ;;  %v1505_v13 = vld [vmem:[%s2281_s8 + $0x10] sm:$0xf] }
  0x2d   : > { %1172 = vmatpush.bf16.msra.mxu0 %v1956_v24  ;;  %v1950_v14 = vld [vmem:[%s2281_s8 + $0x40] sm:$0xf0]  ;;  %v1513_v15 = vld [vmem:[%s2281_s8 + $0x18] sm:$0xf]  ;;  %v1951_v16 = vld [vmem:[%s2281_s8 + $0x48] sm:$0xf0] }
  0x2e   : > { %1200 = vmatpush.bf16.msra.mxu2 %v1972_v25  ;;  %v2050_v17 = vld [vmem:[#allocation3 + $0x2f8] sm:$0xff]  ;;  %v1515_v19 = vld [vmem:[%s2281_s8 + $0x4c] sm:$0xf0]  ;;  %v1995_v20 = vld [vmem:[#allocation3 + $0x140] sm:$0xff]  ;;  %v1506_v23 = vor.u32 %v1950_v14, %v1505_v13  ;;  %v1514_v24 = vor.u32 %v1951_v16, %v1513_v15 }
  0x2f   : > { %1214 = vmatpush.bf16.msra.mxu3 %v1980_v26  ;;  %v1945_v18 = vld [vmem:[%s2281_s8 + $0x1c] sm:$0xf]  ;;  %v1944_v21 = vld [vmem:[%s2281_s8 + $0x14] sm:$0xf]  ;;  %v1507_v22 = vld [vmem:[%s2281_s8 + $0x44] sm:$0xf0] }
  0x30   : > { %1186 = vmatpush.bf16.msra.mxu1 %v1964_v27  ;;  %v2034_v25 = vld [vmem:[#allocation3 + $0x278] sm:$0xff]  ;;  %v1518_v26 = vor.u32 %v1945_v18, %v1515_v19  ;;  %v1510_v27 = vor.u32 %v1944_v21, %v1507_v22  ;;  %v2024_v32 = vld [vmem:[#allocation3 + $0x228] sm:$0xff]  ;;  %v2023_v36 = vld [vmem:[#allocation3 + $0x220] sm:$0xff] }
  0x31   : > { %1173 = vmatpush.bf16.msra.mxu0 %v1955_v28  ;;  %v2025_v28 = vld [vmem:[#allocation3 + $0x230] sm:$0xff]  ;;  %v2040_v33 = vld [vmem:[#allocation3 + $0x2a8] sm:$0xff]  ;;  %v2047_v38 = vld [vmem:[#allocation3 + $0x2e0] sm:$0xff] }
  0x32   : > { %1201 = vmatpush.bf16.msra.mxu2 %v1971_v29  ;;  %v2041_v29 = vld [vmem:[#allocation3 + $0x2b0] sm:$0xff]  ;;  %v2032_v35 = vld [vmem:[#allocation3 + $0x268] sm:$0xff]  ;;  %v2031_v39 = vld [vmem:[#allocation3 + $0x260] sm:$0xff] }
  0x33   : > { %1215 = vmatpush.bf16.msra.mxu3 %v1979_v30  ;;  %v2049_v30 = vld [vmem:[#allocation3 + $0x2f0] sm:$0xff] }
  0x34   : > { %1187 = vmatpush.bf16.msra.mxu1 %v1963_v40  ;;  %1174 = vmatmul.bf16.vlgmr.msra.gmra.mxu0 %v1490_v41  ;;  %v2022_v40 = vld [vmem:[#allocation3 + $0x218] sm:$0xff]  ;;  %v2021_v44 = vld [vmem:[#allocation3 + $0x210] sm:$0xff] }
  0x35   : > { %1222 = vmatpush.bf16.msrb.mxu0 %v1994_v31  ;;  %1202 = vmatmul.bf16.vlgmr.msra.gmra.mxu2 %v1498_v43  ;;  %v2033_v31 = vld [vmem:[#allocation3 + $0x270] sm:$0xff]  ;;  %v2038_v41 = vld [vmem:[#allocation3 + $0x298] sm:$0xff] }
  0x36   : > { %1250 = vmatpush.bf16.msrb.mxu2 %v2010_v34  ;;  %1216 = vmatmul.bf16.vlgmr.msra.gmra.mxu3 %v1502_v47  ;;  %v2048_v34 = vld [vmem:[#allocation3 + $0x2e8] sm:$0xff]  ;;  %v2030_v43 = vld [vmem:[#allocation3 + $0x258] sm:$0xff]  ;;  %v2037_v45 = vld [vmem:[#allocation3 + $0x290] sm:$0xff] }
  0x37   : > { %1264 = vmatpush.bf16.msrb.mxu3 %v2018_v37  ;;  %1188 = vmatmul.bf16.vlgmr.msra.gmra.mxu1 %v1494_v50  ;;  %v2039_v37 = vld [vmem:[#allocation3 + $0x2a0] sm:$0xff]  ;;  %v2029_v47 = vld [vmem:[#allocation3 + $0x250] sm:$0xff]  ;;  %v2044_v50 = vld [vmem:[#allocation3 + $0x2c8] sm:$0xff] }
  0x38   : > { %1236 = vmatpush.bf16.msrb.mxu1 %v2002_v42  ;;  %v2046_v42 = vld [vmem:[#allocation3 + $0x2d8] sm:$0xff] }
  0x39   : > { %1223 = vmatpush.bf16.msrb.mxu0 %v1993_v46  ;;  %v2045_v46 = vld [vmem:[#allocation3 + $0x2d0] sm:$0xff] }
  0x3a   : > { %1251 = vmatpush.bf16.msrb.mxu2 %v2009_v48  ;;  %v2020_v48 = vld [vmem:[#allocation3 + $0x208] sm:$0xff] }
  0x3b   : > { %1265 = vmatpush.bf16.msrb.mxu3 %v2017_v49  ;;  %v2036_v49 = vld [vmem:[#allocation3 + $0x288] sm:$0xff] }
  0x3c   : > { %1237 = vmatpush.bf16.msrb.mxu1 %v2001_v51  ;;  %v2028_v51 = vld [vmem:[#allocation3 + $0x248] sm:$0xff] }
  0x3d   : > { %1224 = vmatpush.bf16.msrb.mxu0 %v1992_v52  ;;  %v2019_v52 = vld [vmem:[#allocation3 + $0x200] sm:$0xff] }
  0x3e   : > { %1252 = vmatpush.bf16.msrb.mxu2 %v2008_v53  ;;  %v2035_v53 = vld [vmem:[#allocation3 + $0x280] sm:$0xff] }
  0x3f   : > { %1266 = vmatpush.bf16.msrb.mxu3 %v2016_v54  ;;  %v2043_v54 = vld [vmem:[#allocation3 + $0x2c0] sm:$0xff] }
  0x40   : > { %1238 = vmatpush.bf16.msrb.mxu1 %v2000_v55  ;;  %v1521_v55 = vld [vmem:[%s2281_s8 + $0x20] sm:$0xf] }
  0x41   : > { %1225 = vmatpush.bf16.msrb.mxu0 %v1991_v56  ;;  %v1952_v56 = vld [vmem:[%s2281_s8 + $0x50] sm:$0xf0] }
  0x42   : > { %1253 = vmatpush.bf16.msrb.mxu2 %v2007_v57  ;;  %v1529_v57 = vld [vmem:[%s2281_s8 + $0x28] sm:$0xf] }
  0x43   : > { %1267 = vmatpush.bf16.msrb.mxu3 %v2015_v58  ;;  %v1953_v58 = vld [vmem:[%s2281_s8 + $0x58] sm:$0xf0] }
  0x44   : > { %1239 = vmatpush.bf16.msrb.mxu1 %v1999_v59  ;;  %v1947_v59 = vld [vmem:[%s2281_s8 + $0x2c] sm:$0xf] }
  0x45   : > { %1226 = vmatpush.bf16.msrb.mxu0 %v1990_v60  ;;  %v1531_v60 = vld [vmem:[%s2281_s8 + $0x5c] sm:$0xf0] }
  0x46   : > { %1254 = vmatpush.bf16.msrb.mxu2 %v2006_v61  ;;  %v2054_v61 = vld [vmem:[#allocation3 + $0x318] sm:$0xff] }
  0x47   : > { %1268 = vmatpush.bf16.msrb.mxu3 %v2014_v62  ;;  %v2027_v62 = vld [vmem:[#allocation3 + $0x240] sm:$0xff] }
  0x48   : > { %1240 = vmatpush.bf16.msrb.mxu1 %v1998_v63  ;;  %v1522_v63 = vor.u32 %v1952_v56, %v1521_v55  ;;  %v2108_v56 = vld [vmem:[#allocation5] ss:$0 sm:$0xff] }
  0x49   : > { %1227 = vmatpush.bf16.msrb.mxu0 %v1989_v0  ;;  %v1946_v0 = vld [vmem:[%s2281_s8 + $0x24] sm:$0xf] }
  0x4a   : > { %1255 = vmatpush.bf16.msrb.mxu2 %v2005_v1  ;;  %v1523_v1 = vld [vmem:[%s2281_s8 + $0x54] sm:$0xf0] }
  0x4b   : > { %1269 = vmatpush.bf16.msrb.mxu3 %v2013_v2  ;;  %v1530_v2 = vor.u32 %v1953_v58, %v1529_v57 }
  0x4c   : > { %1241 = vmatpush.bf16.msrb.mxu1 %v1997_v3  ;;  %v1534_v3 = vor.u32 %v1947_v59, %v1531_v60 }
  0x4d   : > { %1228 = vmatpush.bf16.msrb.mxu0 %v1988_v4  ;;  %v1526_v4 = vor.u32 %v1946_v0, %v1523_v1 }
  0x4e   : > { %1256 = vmatpush.bf16.msrb.mxu2 %v2004_v5  ;;  %v2053_v5 = vld [vmem:[#allocation3 + $0x310] sm:$0xff] }
  0x4f   : > { %1270 = vmatpush.bf16.msrb.mxu3 %v2012_v6  ;;  %v2052_v6 = vld [vmem:[#allocation3 + $0x308] sm:$0xff] }
  0x50   : > { %1242 = vmatpush.bf16.msrb.mxu1 %v1996_v7  ;;  %v2051_v7 = vld [vmem:[#allocation3 + $0x300] sm:$0xff] }
  0x51   : > { %1229 = vmatpush.bf16.msrb.mxu0 %v1987_v8  ;;  %v1537_v8 = vld [vmem:[%s2281_s8 + $0x30] sm:$0xf] }
  0x52   : > { %1257 = vmatpush.bf16.msrb.mxu2 %v2003_v9  ;;  %v1954_v9 = vld [vmem:[%s2281_s8 + $0x60] sm:$0xf0] }
  0x53   : > { %1271 = vmatpush.bf16.msrb.mxu3 %v2011_v10  ;;  %v1538_v10 = vor.u32 %v1954_v9, %v1537_v8 }
  0x54   : > { %1243 = vmatpush.bf16.msrb.mxu1 %v1995_v20  ;;  %1230 = vmatmul.bf16.vlgmr.msrb.gmra.mxu0 %v1506_v23 }
  0x55   : > { %1278 = vmatpush.bf16.msra.mxu0 %v2026_v11  ;;  %1258 = vmatmul.bf16.vlgmr.msrb.gmra.mxu2 %v1514_v24 }
  0x56   : > { %1306 = vmatpush.bf16.msra.mxu2 %v2042_v12  ;;  %1272 = vmatmul.bf16.vlgmr.msrb.gmra.mxu3 %v1518_v26 }
  0x57   : > { %1320 = vmatpush.bf16.msra.mxu3 %v2050_v17  ;;  %1244 = vmatmul.bf16.vlgmr.msrb.gmra.mxu1 %v1510_v27 }
  0x58   : > { %1292 = vmatpush.bf16.msra.mxu1 %v2034_v25 }
  0x59   : > { %1279 = vmatpush.bf16.msra.mxu0 %v2025_v28 }
  0x5a   : > { %1307 = vmatpush.bf16.msra.mxu2 %v2041_v29 }
  0x5b   : > { %1321 = vmatpush.bf16.msra.mxu3 %v2049_v30 }
  0x5c   : > { %1293 = vmatpush.bf16.msra.mxu1 %v2033_v31 }
  0x5d   : > { %1280 = vmatpush.bf16.msra.mxu0 %v2024_v32 }
  0x5e   : > { %1308 = vmatpush.bf16.msra.mxu2 %v2040_v33 }
  0x5f   : > { %1322 = vmatpush.bf16.msra.mxu3 %v2048_v34 }
  0x60   : > { %1294 = vmatpush.bf16.msra.mxu1 %v2032_v35 }
  0x61   : > { %1281 = vmatpush.bf16.msra.mxu0 %v2023_v36 }
  0x62   : > { %1309 = vmatpush.bf16.msra.mxu2 %v2039_v37 }
  0x63   : > { %1323 = vmatpush.bf16.msra.mxu3 %v2047_v38 }
  0x64   : > { %1295 = vmatpush.bf16.msra.mxu1 %v2031_v39 }
  0x65   : > { %1282 = vmatpush.bf16.msra.mxu0 %v2022_v40 }
  0x66   : > { %1310 = vmatpush.bf16.msra.mxu2 %v2038_v41 }
  0x67   : > { %1324 = vmatpush.bf16.msra.mxu3 %v2046_v42 }
  0x68   : > { %1296 = vmatpush.bf16.msra.mxu1 %v2030_v43 }
  0x69   : > { %1283 = vmatpush.bf16.msra.mxu0 %v2021_v44 }
  0x6a   : > { %1311 = vmatpush.bf16.msra.mxu2 %v2037_v45 }
  0x6b   : > { %1325 = vmatpush.bf16.msra.mxu3 %v2045_v46 }
  0x6c   : > { %1297 = vmatpush.bf16.msra.mxu1 %v2029_v47 }
  0x6d   : > { %1284 = vmatpush.bf16.msra.mxu0 %v2020_v48 }
  0x6e   : > { %1312 = vmatpush.bf16.msra.mxu2 %v2036_v49 }
  0x6f   : > { %1326 = vmatpush.bf16.msra.mxu3 %v2044_v50 }
  0x70   : > { %1298 = vmatpush.bf16.msra.mxu1 %v2028_v51 }
  0x71   : > { %1285 = vmatpush.bf16.msra.mxu0 %v2019_v52 }
  0x72   : > { %1313 = vmatpush.bf16.msra.mxu2 %v2035_v53 }
  0x73   : > { %1327 = vmatpush.bf16.msra.mxu3 %v2043_v54 }
  0x74   : > { %1299 = vmatpush.bf16.msra.mxu1 %v2027_v62  ;;  %1286 = vmatmul.bf16.vlgmr.msra.gmra.mxu0 %v1522_v63 }
  0x75   : > { %1338 = vmatpush.bf16.msrb.mxu0 %v2054_v61  ;;  %1314 = vmatmul.bf16.vlgmr.msra.gmra.mxu2 %v1530_v2 }
  0x76   : > { %1328 = vmatmul.bf16.vlgmr.msra.gmra.mxu3 %v1534_v3 }
  0x77   : > { %1300 = vmatmul.bf16.vlgmr.msra.gmra.mxu1 %v1526_v4 }
  0x79   : > { %1339 = vmatpush.bf16.msrb.mxu0 %v2053_v5 }
  0x7d   : > { %1340 = vmatpush.bf16.msrb.mxu0 %v2052_v6 }
  0x81   : > { %1341 = vmatpush.bf16.msrb.mxu0 %v2051_v7 }
  0x84   : > { %1939 = vmatmul.msk.bf16.vlgmr.msrb.gmra.mxu0 %vm1162_vm0, %v1538_v10 }
  0xb1   : > { %v1175_v11 = vpop.f32.mrf.mxu0 }
  0xb4   : > { %v1189_v12 = vpop.f32.mrf.mxu1 }
  0xb5   : > { %v1190_v19 = vadd.f32 %v1189_v12, %v1175_v11 }
  0xb8   : > { %v1203_v13 = vpop.f32.mrf.mxu2 }
  0xb9   : > { %v1177_v14 = vpop.f32.mrf.mxu0  ;;  %v1217_v15 = vpop.f32.mrf.mxu3  ;;  %v1204_v22 = vadd.f32 %v1203_v13, %v1190_v19 }
  0xbb   : > { %v1218_v24 = vadd.f32 %v1217_v15, %v1204_v22 }
  0xbc   : > { %v1191_v16 = vpop.f32.mrf.mxu1 }
  0xbd   : > { %v1192_v25 = vadd.f32 %v1191_v16, %v1177_v14 }
  0xc0   : > { %v1205_v17 = vpop.f32.mrf.mxu2 }
  0xc1   : > { %v1219_v20 = vpop.f32.mrf.mxu3  ;;  %v1206_v28 = vadd.f32 %v1205_v17, %v1192_v25 }
  0xc3   : > { %v1220_v31 = vadd.f32 %v1219_v20, %v1206_v28 }
  0xd1   : > { %v1231_v18 = vpop.f32.mrf.mxu0 }
  0xd2   : > { %v1232_v29 = vadd.f32 %v1231_v18, %v1218_v24 }
  0xd4   : > { %v1245_v21 = vpop.f32.mrf.mxu1 }
  0xd5   : > { %v1246_v32 = vadd.f32 %v1245_v21, %v1232_v29 }
  0xd8   : > { %v1259_v23 = vpop.f32.mrf.mxu2 }
  0xd9   : > { %v1233_v26 = vpop.f32.mrf.mxu0  ;;  %v1273_v27 = vpop.f32.mrf.mxu3  ;;  %v1260_v36 = vadd.f32 %v1259_v23, %v1246_v32 }
  0xda   : > { %v1234_v35 = vadd.f32 %v1233_v26, %v1220_v31 }
  0xdb   : > { %v1274_v40 = vadd.f32 %v1273_v27, %v1260_v36 }
  0xdc   : > { %v1247_v30 = vpop.f32.mrf.mxu1 }
  0xdd   : > { %v1248_v39 = vadd.f32 %v1247_v30, %v1234_v35 }
  0xe0   : > { %v1261_v33 = vpop.f32.mrf.mxu2 }
  0xe1   : > { %v1275_v37 = vpop.f32.mrf.mxu3  ;;  %v1262_v41 = vadd.f32 %v1261_v33, %v1248_v39 }
  0xe3   : > { %v1276_v45 = vadd.f32 %v1275_v37, %v1262_v41 }
  0xf1   : > { %v1287_v34 = vpop.f32.mrf.mxu0 }
  0xf2   : > { %v1288_v44 = vadd.f32 %v1287_v34, %v1274_v40 }
  0xf4   : > { %v1301_v38 = vpop.f32.mrf.mxu1 }
  0xf5   : > { %v1302_v47 = vadd.f32 %v1301_v38, %v1288_v44 }
  0xf8   : > { %v1315_v42 = vpop.f32.mrf.mxu2 }
  0xf9   : > { %v1289_v43 = vpop.f32.mrf.mxu0  ;;  %v1329_v46 = vpop.f32.mrf.mxu3  ;;  %v1316_v50 = vadd.f32 %v1315_v42, %v1302_v47 }
  0xfa   : > { %v1290_v48 = vadd.f32 %v1289_v43, %v1276_v45 }
  0xfb   : > { %v1330_v54 = vadd.f32 %v1329_v46, %v1316_v50 }
  0xfc   : > { %v1303_v49 = vpop.f32.mrf.mxu1 }
  0xfd   : > { %v1304_v53 = vadd.f32 %v1303_v49, %v1290_v48 }
 0x100   : > { %v1317_v51 = vpop.f32.mrf.mxu2 }
 0x101   : > { %v1343_v52 = vpop.f32.mrf.mxu0  ;;  %v1318_v55 = vadd.f32 %v1317_v51, %v1304_v53  ;;  %v1331_v58 = vpop.f32.mrf.mxu3 }
 0x102   : > { %v1344_v57 = vadd.f32 %v1343_v52, %v1330_v54 }
 0x103   : > { %v1332_v59 = vadd.f32 %v1331_v58, %v1318_v55 }
 0x104   : > { %v1348_v61 = vadd.f32 %v2108_v56, %v1344_v57 }
 0x106   : > { %v1357_v0 = vmax.f32 %v1348_v61, 0.0 }
 0x109   : > { %v1345_v60 = vpop.f32.mrf.mxu0 }
 0x10a   : > { %v1346_v62 = vadd.f32 %v1345_v60, %v1332_v59 }
 0x10c   : > { %v1349_v63 = vadd.f32 %v2108_v56, %v1346_v62 }
 0x10e   : > { %v1358_v1 = vmax.f32 %v1349_v63, 0.0 }
 0x110   : > { %v2058_v2 = vpack.c.bf16 %v1358_v1, %v1357_v0 }
 0x112   : > { %2059 = vst [vmem:[%s268_s12] sm:$0xff] %v2058_v2  }
 0x113 PF: > { %s15_s14 = sadd.s32 1, %s2199_s14   ;;  %s2328_s12 = smov %s2195_s13 }
 0x114   : > { %p12_p8 = scmp.ge.s32.totalorder %s15_s14, 4   ;;  %s2329_s13 = smov %s2331_s16 }
 0x116   :  { %14 = sbr.rel (!%p12_p8) target bundleno = 3 (0x3), region = 81 }
 0x11b   :  { %1391 = vsyncpa [#allocation4], 1 }
 0x11c   :  { %1393 = vsyncpa [#allocation4 + $0x1], 1 }
 0x11d   :  { %1394 = vsyncpa [#allocation6], 1 }

// kernel: nnet_forward.8
= control target key start
LH: loop header
LB: loop body
LE: loop exit
PB: predicated region body
PF: predicated region fallthrough
CT: control target
= control target key end

     0   :  { %8 = vsyncpa [#allocation4], 0  ;;  %s2360_s0 = inlined_call_operand.vmem [shape: bf16[32,1152], index: 0, kind: input, shape index: {}]   ;;  %s2361_s1 = inlined_call_operand.hbm [shape: bf16[1152,256], index: 1, kind: input, shape index: {}]   ;;  %s2362_s2 = inlined_call_operand.hbm [shape: f32[1,256], index: 2, kind: input, shape index: {}]   ;;  %s2363_s3 = inlined_call_operand.vmem [shape: bf16[32,256], index: 3, kind: output, shape index: {}]  }
   0x1   :  { %10 = vsyncpa [#allocation4 + $0x1], 0 }
   0x2   :  { %11 = vsyncpa [#allocation6], 0 }
   0x3   :  { %13 = vsyncpa [#allocation6 + $0x1], 0  ;;  %s2060_s12 = smov 0   ;;  %s2062_s13 = smov 0  }
   0x4   :  { %s2064_s14 = smov 0   ;;  %s2066_s15 = smov 0  }
   0x5   :  { %s2068_s16 = smov 0   ;;  %s2070_s17 = smov 0  }
   0x6 LB: > { %s1374_s18 = sadd.s32 4294967295, %s2035_s17   ;;  %s34_s19 = sadd.s32 1, %s2031_s16  ;;  %s2035_s17 = sphi %s2070_s17, %s19_s17   ;;  %s2031_s16 = sphi %s2068_s16, %s2372_s16   ;;  %s2027_s15 = sphi %s2066_s15, %s2371_s15   ;;  %s2023_s14 = sphi %s2064_s14, %s2370_s14   ;;  %s2019_s13 = sphi %s2062_s13, %s2369_s13   ;;  %s2015_s12 = sphi %s2060_s12, %s2368_s12  }
   0x7   : > { %p36_p0 = scmp.ge.s32.totalorder %s34_s19, 2  ;;  %s75_s20 = sadd.s32 1, %s2023_s14 }
   0x8   : > { %p82_p1 = scmp.ne.s32.totalorder %s2023_s14, %s2019_s13  ;;  %p83_p2 = scmp.eq.s32.totalorder %s2035_s17, 0 }
   0x9   : > { %s2374_s19 = smov (%p36_p0, %s34_s19), 0  ;;  %p88_p4 = scmp.ne.s32.totalorder %s2019_s13, %s2015_s12 }
   0xa   : > { %p2096_p3 = por %p83_p2, %p82_p1  ;;  %s71_s22 = ssub.s32 %s2031_s16, %s2374_s19 }
   0xb   : > { %p89_p5 = scmp.eq.s32.totalorder %s1374_s18, 0  ;;  %p73_p6 = scmp.eq.s32.totalorder %s71_s22, 0 }
   0xc   : > { %p140_p7 = scmp.eq.s32.totalorder %s1374_s18, 1  ;;  %p1868_p10 = scmp.lt.s32.totalorder %s2035_s17, 2 }
   0xd   : > { %p2103_p8 = por %p89_p5, %p88_p4  ;;  %s181_s26 = sand.u32 1, %s2023_s14  }
   0xe   : > { %s2108_s24 = scalar_select %p73_p6, %s2023_s14, %s75_s20  }
   0xf   : > { %p2110_p9 = por %p140_p7, %p82_p1  ;;  %s1379_s27 = sshll.u32 %s2031_s16, 2 }
  0x10   : > { %s1855_s28 = smul.u32 576, %s181_s26  ;;  %s192_s4 = scalar_lea.hbm %s2361_s1, %s1379_s27 }
  0x11   : > { %p2122_p11 = pnand %p1868_p10, %p2096_p3  ;;  %s193_s6 = sshll.u32 %s192_s4, 4  ;;  %s194_s6 = int_to_ptr.hbm [resolvable:$true] %s193_s6 }
  0x12   : > { %s185_s7 = scalar_lea.vmem [#allocation3], %s1855_s28  ;;  %p1380_p12 = scmp.ge.s32.totalorder %s2035_s17, 1 }
  0x13   : > { %s195_s8 = sshll.u32 %s185_s7, 4  ;;  %s182_s9 = scalar_lea.sflag [#allocation4], %s181_s26  ;;  %s196_s8 = int_to_ptr.vmem [resolvable:$true] %s195_s8 }
  0x14   : > { %s2037_s10 = smov 128   ;;  %s2038_s11 = smov 64  }
  0x15   : > { %s2039_s12 = smov 4   ;;  %p220_p13 = scmp.lt.s32.totalorder %s2035_s17, 3 }
  0x16   : > { %1864 = dma.hbm_to_vmem [thread:$0]  (!%p2122_p11), %s194_s6, 9216, %s196_s8, %s182_s9, %s2037_s10, %s2038_s11, %s2039_s12  }
  0x17   : > { %s211_s21 = scalar_lea.hbm %s2362_s2, %s2031_s16  ;;  %p221_p0 = pnand %p1380_p12, %p220_p13 }
  0x18   : > { %s213_s22 = sshll.u32 %s211_s21, 4  ;;  %s208_s27 = scalar_lea.vmem [#allocation5], %s181_s26  ;;  %s214_s22 = int_to_ptr.hbm [resolvable:$true] %s213_s22 }
  0x19   : > { %s215_s28 = sshll.u32 %s208_s27, 4  ;;  %s206_s29 = scalar_lea.sflag [#allocation6], %s181_s26  ;;  %s216_s28 = int_to_ptr.vmem [resolvable:$true] %s215_s28 }
  0x1a   : > { %1867 = dma.hbm_to_vmem [thread:$0]  (!%p2122_p11), %s214_s22, 16, %s216_s28, %s206_s29  }
  0x1b   : > { %224 = sbr.rel (%p221_p0) target bundleno = 285 (0x11d), region = 32  ;;  %s2137_s30 = sand.u32 (!%p221_p0), 1, %s2019_s13  }
  0x1c   : > { %s1856_s4 = smul.u32 (!%p221_p0), 576, %s2137_s30  ;;  %s227_s6 = scalar_lea.sflag (!%p221_p0), [#allocation4], %s2137_s30 }
  0x1e   : > { %s2141_s7 = scalar_lea.vmem (!%p221_p0), [#allocation3], %s1856_s4 }
  0x20   : > { %2006 = dma.done.wait (%p2103_p8), %s227_s6, 9216  }
  0x21   : > { %2008 = vsyncadd (%p2103_p8), %s227_s6, 4294958080  ;;  %s237_s26 = scalar_lea.sflag [#allocation6], %s2137_s30  ;;  %s239_s5 = scalar_lea.vmem [#allocation5], %s2137_s30 }
  0x22   : > { %2010 = dma.done.wait (%p2103_p8), %s237_s26, 16  }
  0x23   : > { %2012 = vsyncadd (%p2103_p8), %s237_s26, 4294967280  ;;  %v1771_v0 = vld [vmem:[%s2141_s7 + $0x38] sm:$0xff]  ;;  %v1770_v4 = vld [vmem:[%s2141_s7 + $0x30] sm:$0xff]  ;;  %s1743_s21 = sshll.u32 (%p2110_p9), %s2027_s15, 2 }
  0x24   : > { %v1779_v1 = vld [vmem:[%s2141_s7 + $0x78] sm:$0xff]  ;;  %994 = vmatpush.bf16.msra.mxu0 %v1771_v0  ;;  %v1778_v5 = vld [vmem:[%s2141_s7 + $0x70] sm:$0xff]  ;;  %v1769_v8 = vld [vmem:[%s2141_s7 + $0x28] sm:$0xff]  ;;  %s1203_s27 = scalar_lea.vmem (%p2110_p9), %s2363_s3, %s1743_s21 }
  0x25   : > { %v1787_v2 = vld [vmem:[%s2141_s7 + $0xb8] sm:$0xff]  ;;  %1013 = vmatpush.bf16.msra.mxu1 %v1779_v1  ;;  %v1786_v6 = vld [vmem:[%s2141_s7 + $0xb0] sm:$0xff]  ;;  %v1777_v9 = vld [vmem:[%s2141_s7 + $0x68] sm:$0xff] }
  0x26   : > { %v1795_v3 = vld [vmem:[%s2141_s7 + $0xf8] sm:$0xff]  ;;  %1032 = vmatpush.bf16.msra.mxu2 %v1787_v2  ;;  %v1794_v7 = vld [vmem:[%s2141_s7 + $0xf0] sm:$0xff]  ;;  %v1785_v10 = vld [vmem:[%s2141_s7 + $0xa8] sm:$0xff] }
  0x27   : > { %1051 = vmatpush.bf16.msra.mxu3 %v1795_v3  ;;  %v1793_v11 = vld [vmem:[%s2141_s7 + $0xe8] sm:$0xff]  ;;  %v1768_v12 = vld [vmem:[%s2141_s7 + $0x20] sm:$0xff]  ;;  %v1767_v16 = vld [vmem:[%s2141_s7 + $0x18] sm:$0xff] }
  0x28   : > { %995 = vmatpush.bf16.msra.mxu0 %v1770_v4  ;;  %v1776_v13 = vld [vmem:[%s2141_s7 + $0x60] sm:$0xff]  ;;  %v1775_v17 = vld [vmem:[%s2141_s7 + $0x58] sm:$0xff]  ;;  %v1766_v20 = vld [vmem:[%s2141_s7 + $0x10] sm:$0xff] }
  0x29   : > { %1014 = vmatpush.bf16.msra.mxu1 %v1778_v5  ;;  %v1784_v14 = vld [vmem:[%s2141_s7 + $0xa0] sm:$0xff]  ;;  %v1783_v18 = vld [vmem:[%s2141_s7 + $0x98] sm:$0xff]  ;;  %v1774_v21 = vld [vmem:[%s2141_s7 + $0x50] sm:$0xff] }
  0x2a   : > { %1033 = vmatpush.bf16.msra.mxu2 %v1786_v6  ;;  %v1792_v15 = vld [vmem:[%s2141_s7 + $0xe0] sm:$0xff]  ;;  %v1791_v19 = vld [vmem:[%s2141_s7 + $0xd8] sm:$0xff]  ;;  %v1782_v22 = vld [vmem:[%s2141_s7 + $0x90] sm:$0xff] }
  0x2b   : > { %1052 = vmatpush.bf16.msra.mxu3 %v1794_v7  ;;  %v1790_v23 = vld [vmem:[%s2141_s7 + $0xd0] sm:$0xff]  ;;  %v1765_v24 = vld [vmem:[%s2141_s7 + $0x8] sm:$0xff]  ;;  %v1764_v28 = vld [vmem:[%s2141_s7] sm:$0xff] }
  0x2c   : > { %996 = vmatpush.bf16.msra.mxu0 %v1769_v8  ;;  %v1773_v25 = vld [vmem:[%s2141_s7 + $0x48] sm:$0xff]  ;;  %v1772_v29 = vld [vmem:[%s2141_s7 + $0x40] sm:$0xff]  ;;  %v1394_v39 = vld [vmem:[%s2360_s0 + $0x2c] sm:$0xf0] }
  0x2d   : > { %1015 = vmatpush.bf16.msra.mxu1 %v1777_v9  ;;  %v1781_v26 = vld [vmem:[%s2141_s7 + $0x88] sm:$0xff]  ;;  %v1780_v30 = vld [vmem:[%s2141_s7 + $0x80] sm:$0xff]  ;;  %v1803_v40 = vld [vmem:[%s2141_s7 + $0x138] sm:$0xff] }
  0x2e   : > { %1034 = vmatpush.bf16.msra.mxu2 %v1785_v10  ;;  %v1789_v27 = vld [vmem:[%s2141_s7 + $0xc8] sm:$0xff]  ;;  %v1788_v31 = vld [vmem:[%s2141_s7 + $0xc0] sm:$0xff]  ;;  %v1811_v41 = vld [vmem:[%s2141_s7 + $0x178] sm:$0xff] }
  0x2f   : > { %1053 = vmatpush.bf16.msra.mxu3 %v1793_v11  ;;  %v1384_v32 = vld [vmem:[%s2360_s0] sm:$0xf]  ;;  %v1750_v33 = vld [vmem:[%s2360_s0 + $0x20] sm:$0xf0]  ;;  %v1386_v35 = vld [vmem:[%s2360_s0 + $0x24] sm:$0xf0] }
  0x30   : > { %997 = vmatpush.bf16.msra.mxu0 %v1768_v12  ;;  %v1746_v34 = vld [vmem:[%s2360_s0 + $0x4] sm:$0xf]  ;;  %v1392_v36 = vld [vmem:[%s2360_s0 + $0x8] sm:$0xf]  ;;  %v1751_v37 = vld [vmem:[%s2360_s0 + $0x28] sm:$0xf0]  ;;  %v1385_v42 = vor.u32 %v1750_v33, %v1384_v32 }
  0x31   : > { %1016 = vmatpush.bf16.msra.mxu1 %v1776_v13  ;;  %v1747_v38 = vld [vmem:[%s2360_s0 + $0xc] sm:$0xf]  ;;  %v1389_v43 = vor.u32 %v1746_v34, %v1386_v35  ;;  %v1393_v44 = vor.u32 %v1751_v37, %v1392_v36  ;;  %v1819_v46 = vld [vmem:[%s2141_s7 + $0x1b8] sm:$0xff]  ;;  %v1802_v48 = vld [vmem:[%s2141_s7 + $0x130] sm:$0xff] }
  0x32   : > { %1035 = vmatpush.bf16.msra.mxu2 %v1784_v14  ;;  %v1397_v45 = vor.u32 %v1747_v38, %v1394_v39  ;;  %v1827_v47 = vld [vmem:[%s2141_s7 + $0x1f8] sm:$0xff]  ;;  %v1810_v49 = vld [vmem:[%s2141_s7 + $0x170] sm:$0xff]  ;;  %v1801_v52 = vld [vmem:[%s2141_s7 + $0x128] sm:$0xff] }
  0x33   : > { %1054 = vmatpush.bf16.msra.mxu3 %v1792_v15  ;;  %v1818_v50 = vld [vmem:[%s2141_s7 + $0x1b0] sm:$0xff]  ;;  %v1809_v53 = vld [vmem:[%s2141_s7 + $0x168] sm:$0xff]  ;;  %v1800_v56 = vld [vmem:[%s2141_s7 + $0x120] sm:$0xff] }
  0x34   : > { %998 = vmatpush.bf16.msra.mxu0 %v1767_v16  ;;  %v1826_v51 = vld [vmem:[%s2141_s7 + $0x1f0] sm:$0xff]  ;;  %v1817_v54 = vld [vmem:[%s2141_s7 + $0x1a8] sm:$0xff]  ;;  %v1808_v57 = vld [vmem:[%s2141_s7 + $0x160] sm:$0xff] }
  0x35   : > { %1017 = vmatpush.bf16.msra.mxu1 %v1775_v17  ;;  %v1825_v55 = vld [vmem:[%s2141_s7 + $0x1e8] sm:$0xff]  ;;  %v1816_v58 = vld [vmem:[%s2141_s7 + $0x1a0] sm:$0xff]  ;;  %v1422_v63 = vld [vmem:[%s2360_s0 + $0x6c] sm:$0xf0] }
  0x36   : > { %1036 = vmatpush.bf16.msra.mxu2 %v1783_v18  ;;  %v1824_v59 = vld [vmem:[%s2141_s7 + $0x1e0] sm:$0xff]  ;;  %v1420_v60 = vld [vmem:[%s2360_s0 + $0x48] sm:$0xf]  ;;  %v1759_v61 = vld [vmem:[%s2360_s0 + $0x68] sm:$0xf0] }
  0x37   : > { %1055 = vmatpush.bf16.msra.mxu3 %v1791_v19  ;;  %v1755_v62 = vld [vmem:[%s2360_s0 + $0x4c] sm:$0xf]  ;;  %v1428_v0 = vld [vmem:[%s2360_s0 + $0x50] sm:$0xf]  ;;  %v1760_v1 = vld [vmem:[%s2360_s0 + $0x70] sm:$0xf0]  ;;  %v1421_v6 = vor.u32 %v1759_v61, %v1420_v60 }
  0x38   : > { %999 = vmatpush.bf16.msra.mxu0 %v1766_v20  ;;  %v1756_v2 = vld [vmem:[%s2360_s0 + $0x54] sm:$0xf]  ;;  %v1430_v3 = vld [vmem:[%s2360_s0 + $0x74] sm:$0xf0]  ;;  %v1425_v7 = vor.u32 %v1755_v62, %v1422_v63  ;;  %v1429_v8 = vor.u32 %v1760_v1, %v1428_v0  ;;  %v1797_v16 = vld [vmem:[%s2141_s7 + $0x108] sm:$0xff] }
  0x39   : > { %1018 = vmatpush.bf16.msra.mxu1 %v1774_v21  ;;  %v1799_v4 = vld [vmem:[%s2141_s7 + $0x118] sm:$0xff]  ;;  %v1433_v9 = vor.u32 %v1756_v2, %v1430_v3  ;;  %v1798_v12 = vld [vmem:[%s2141_s7 + $0x110] sm:$0xff]  ;;  %v1805_v17 = vld [vmem:[%s2141_s7 + $0x148] sm:$0xff] }
  0x3a   : > { %1037 = vmatpush.bf16.msra.mxu2 %v1782_v22  ;;  %v1807_v5 = vld [vmem:[%s2141_s7 + $0x158] sm:$0xff]  ;;  %v1806_v13 = vld [vmem:[%s2141_s7 + $0x150] sm:$0xff]  ;;  %v1813_v18 = vld [vmem:[%s2141_s7 + $0x188] sm:$0xff] }
  0x3b   : > { %1056 = vmatpush.bf16.msra.mxu3 %v1790_v23  ;;  %v1815_v10 = vld [vmem:[%s2141_s7 + $0x198] sm:$0xff]  ;;  %v1814_v14 = vld [vmem:[%s2141_s7 + $0x190] sm:$0xff]  ;;  %v1821_v19 = vld [vmem:[%s2141_s7 + $0x1c8] sm:$0xff] }
  0x3c   : > { %1000 = vmatpush.bf16.msra.mxu0 %v1765_v24  ;;  %v1823_v11 = vld [vmem:[%s2141_s7 + $0x1d8] sm:$0xff]  ;;  %v1822_v15 = vld [vmem:[%s2141_s7 + $0x1d0] sm:$0xff]  ;;  %v1796_v20 = vld [vmem:[%s2141_s7 + $0x100] sm:$0xff] }
  0x3d   : > { %1019 = vmatpush.bf16.msra.mxu1 %v1773_v25  ;;  %v1804_v21 = vld [vmem:[%s2141_s7 + $0x140] sm:$0xff]  ;;  %v1400_v24 = vld [vmem:[%s2360_s0 + $0x10] sm:$0xf]  ;;  %v1752_v25 = vld [vmem:[%s2360_s0 + $0x30] sm:$0xf0] }
  0x3e   : > { %1038 = vmatpush.bf16.msra.mxu2 %v1781_v26  ;;  %v1812_v22 = vld [vmem:[%s2141_s7 + $0x180] sm:$0xff]  ;;  %v1835_v26 = vld [vmem:[%s2141_s7 + $0x238] sm:$0xff]  ;;  %v1401_v33 = vor.u32 %v1752_v25, %v1400_v24  ;;  %v1834_v37 = vld [vmem:[%s2141_s7 + $0x230] sm:$0xff] }
  0x3f   : > { %1057 = vmatpush.bf16.msra.mxu3 %v1789_v27  ;;  %v1820_v23 = vld [vmem:[%s2141_s7 + $0x1c0] sm:$0xff]  ;;  %v1748_v27 = vld [vmem:[%s2360_s0 + $0x14] sm:$0xf]  ;;  %v1833_v38 = vld [vmem:[%s2141_s7 + $0x228] sm:$0xff] }
  0x40   : > { %1001 = vmatpush.bf16.msra.mxu0 %v1764_v28  ;;  %v1402_v28 = vld [vmem:[%s2360_s0 + $0x34] sm:$0xf0]  ;;  %v1410_v32 = vld [vmem:[%s2360_s0 + $0x3c] sm:$0xf0] }
  0x41   : > { %1020 = vmatpush.bf16.msra.mxu1 %v1772_v29  ;;  %v1408_v29 = vld [vmem:[%s2360_s0 + $0x18] sm:$0xf]  ;;  %v1405_v34 = vor.u32 %v1748_v27, %v1402_v28  ;;  %v1832_v39 = vld [vmem:[%s2141_s7 + $0x220] sm:$0xff] }
  0x42   : > { %1039 = vmatpush.bf16.msra.mxu2 %v1780_v30  ;;  %v1753_v30 = vld [vmem:[%s2360_s0 + $0x38] sm:$0xf0] }
  0x43   : > { %1058 = vmatpush.bf16.msra.mxu3 %v1788_v31  ;;  %1002 = vmatmul.bf16.vlgmr.msra.gmra.mxu0 %v1385_v42  ;;  %v1749_v31 = vld [vmem:[%s2360_s0 + $0x1c] sm:$0xf]  ;;  %v1409_v35 = vor.u32 %v1753_v30, %v1408_v29 }
  0x44   : > { %1070 = vmatpush.bf16.msrb.mxu0 %v1803_v40  ;;  %1021 = vmatmul.bf16.vlgmr.msra.gmra.mxu1 %v1389_v43  ;;  %v1413_v36 = vor.u32 %v1749_v31, %v1410_v32  ;;  %v1436_v40 = vld [vmem:[%s2360_s0 + $0x58] sm:$0xf]  ;;  %v1757_v42 = vld [vmem:[%s2360_s0 + $0x5c] sm:$0xf]  ;;  %v1438_v43 = vld [vmem:[%s2360_s0 + $0x7c] sm:$0xf0] }
  0x45   : > { %1089 = vmatpush.bf16.msrb.mxu1 %v1811_v41  ;;  %1040 = vmatmul.bf16.vlgmr.msra.gmra.mxu2 %v1393_v44  ;;  %v1761_v41 = vld [vmem:[%s2360_s0 + $0x78] sm:$0xf0]  ;;  %v1444_v44 = vld [vmem:[%s2360_s0 + $0x60] sm:$0xf] }
  0x46   : > { %1059 = vmatmul.bf16.vlgmr.msra.gmra.mxu3 %v1397_v45  ;;  %1108 = vmatpush.bf16.msrb.mxu2 %v1819_v46  ;;  %v1762_v45 = vld [vmem:[%s2360_s0 + $0x80] sm:$0xf0] }
  0x47   : > { %1127 = vmatpush.bf16.msrb.mxu3 %v1827_v47  ;;  %v1758_v46 = vld [vmem:[%s2360_s0 + $0x64] sm:$0xf]  ;;  %v1446_v47 = vld [vmem:[%s2360_s0 + $0x84] sm:$0xf0] }
  0x48   : > { %1071 = vmatpush.bf16.msrb.mxu0 %v1802_v48  ;;  %v1831_v48 = vld [vmem:[%s2141_s7 + $0x218] sm:$0xff] }
  0x49   : > { %1090 = vmatpush.bf16.msrb.mxu1 %v1810_v49  ;;  %v1437_v49 = vor.u32 %v1761_v41, %v1436_v40 }
  0x4a   : > { %1109 = vmatpush.bf16.msrb.mxu2 %v1818_v50  ;;  %v1441_v50 = vor.u32 %v1757_v42, %v1438_v43 }
  0x4b   : > { %1128 = vmatpush.bf16.msrb.mxu3 %v1826_v51  ;;  %v1445_v51 = vor.u32 %v1762_v45, %v1444_v44 }
  0x4c   : > { %1072 = vmatpush.bf16.msrb.mxu0 %v1801_v52  ;;  %v1449_v52 = vor.u32 %v1758_v46, %v1446_v47 }
  0x4d   : > { %1091 = vmatpush.bf16.msrb.mxu1 %v1809_v53  ;;  %v1830_v53 = vld [vmem:[%s2141_s7 + $0x210] sm:$0xff] }
  0x4e   : > { %1110 = vmatpush.bf16.msrb.mxu2 %v1817_v54  ;;  %v1829_v54 = vld [vmem:[%s2141_s7 + $0x208] sm:$0xff] }
  0x4f   : > { %1129 = vmatpush.bf16.msrb.mxu3 %v1825_v55  ;;  %v1828_v55 = vld [vmem:[%s2141_s7 + $0x200] sm:$0xff]  ;;  %s1381_s7 = sshll.u32 %s2137_s30, 4 }
  0x50   : > { %1073 = vmatpush.bf16.msrb.mxu0 %v1800_v56  ;;  %v1416_v56 = vld [vmem:[%s2360_s0 + $0x20] sm:$0xf] }
  0x51   : > { %1092 = vmatpush.bf16.msrb.mxu1 %v1808_v57  ;;  %v1754_v57 = vld [vmem:[%s2360_s0 + $0x40] sm:$0xf0] }
  0x52   : > { %1111 = vmatpush.bf16.msrb.mxu2 %v1816_v58  ;;  %v1452_v58 = vld [vmem:[%s2360_s0 + $0x68] sm:$0xf]  ;;  %v1417_v60 = vor.u32 %v1754_v57, %v1416_v56  ;;  %v1920_v57 = vld [vmem:[%s239_s5] ss:$0 sm:$0xff]  ;;  %s275_s5 = scalar_lea.vmem [#allocation7], %s1381_s7 }
  0x53   : > { %1130 = vmatpush.bf16.msrb.mxu3 %v1824_v59  ;;  %1007 = vmatmul.bf16.gmra.mxu0 %v1421_v6  ;;  %v1763_v59 = vld [vmem:[%s2360_s0 + $0x88] sm:$0xf0] }
  0x54   : > { %1074 = vmatpush.bf16.msrb.mxu0 %v1799_v4  ;;  %1026 = vmatmul.bf16.gmra.mxu1 %v1425_v7  ;;  %v1453_v61 = vor.u32 %v1763_v59, %v1452_v58 }
  0x55   : > { %1093 = vmatpush.bf16.msrb.mxu1 %v1807_v5  ;;  %1045 = vmatmul.bf16.gmra.mxu2 %v1429_v8 }
  0x56   : > { %1064 = vmatmul.bf16.gmra.mxu3 %v1433_v9  ;;  %1112 = vmatpush.bf16.msrb.mxu2 %v1815_v10 }
  0x57   : > { %1131 = vmatpush.bf16.msrb.mxu3 %v1823_v11 }
  0x58   : > { %1075 = vmatpush.bf16.msrb.mxu0 %v1798_v12 }
  0x59   : > { %1094 = vmatpush.bf16.msrb.mxu1 %v1806_v13 }
  0x5a   : > { %1113 = vmatpush.bf16.msrb.mxu2 %v1814_v14 }
  0x5b   : > { %1132 = vmatpush.bf16.msrb.mxu3 %v1822_v15 }
  0x5c   : > { %1076 = vmatpush.bf16.msrb.mxu0 %v1797_v16 }
  0x5d   : > { %1095 = vmatpush.bf16.msrb.mxu1 %v1805_v17 }
  0x5e   : > { %1114 = vmatpush.bf16.msrb.mxu2 %v1813_v18 }
  0x5f   : > { %1133 = vmatpush.bf16.msrb.mxu3 %v1821_v19 }
  0x60   : > { %1077 = vmatpush.bf16.msrb.mxu0 %v1796_v20 }
  0x61   : > { %1096 = vmatpush.bf16.msrb.mxu1 %v1804_v21 }
  0x62   : > { %1115 = vmatpush.bf16.msrb.mxu2 %v1812_v22 }
  0x63   : > { %1134 = vmatpush.bf16.msrb.mxu3 %v1820_v23  ;;  %1078 = vmatmul.bf16.vlgmr.msrb.gmra.mxu0 %v1401_v33 }
  0x64   : > { %1146 = vmatpush.bf16.msra.mxu0 %v1835_v26  ;;  %1097 = vmatmul.bf16.vlgmr.msrb.gmra.mxu1 %v1405_v34 }
  0x65   : > { %1847 = vmatpush.bf16.msra.mxu1 %v1835_v26  ;;  %1116 = vmatmul.bf16.vlgmr.msrb.gmra.mxu2 %v1409_v35 }
  0x66   : > { %1135 = vmatmul.bf16.vlgmr.msrb.gmra.mxu3 %v1413_v36 }
  0x68   : > { %1147 = vmatpush.bf16.msra.mxu0 %v1834_v37 }
  0x69   : > { %1848 = vmatpush.bf16.msra.mxu1 %v1834_v37 }
  0x6c   : > { %1148 = vmatpush.bf16.msra.mxu0 %v1833_v38 }
  0x6d   : > { %1849 = vmatpush.bf16.msra.mxu1 %v1833_v38 }
  0x70   : > { %1149 = vmatpush.bf16.msra.mxu0 %v1832_v39 }
  0x71   : > { %1850 = vmatpush.bf16.msra.mxu1 %v1832_v39 }
  0x73   : > { %1083 = vmatmul.bf16.gmra.mxu0 %v1437_v49 }
  0x74   : > { %1150 = vmatpush.bf16.msra.mxu0 %v1831_v48  ;;  %1102 = vmatmul.bf16.gmra.mxu1 %v1441_v50 }
  0x75   : > { %1851 = vmatpush.bf16.msra.mxu1 %v1831_v48  ;;  %1121 = vmatmul.bf16.gmra.mxu2 %v1445_v51 }
  0x76   : > { %1140 = vmatmul.bf16.gmra.mxu3 %v1449_v52 }
  0x78   : > { %1151 = vmatpush.bf16.msra.mxu0 %v1830_v53 }
  0x79   : > { %1852 = vmatpush.bf16.msra.mxu1 %v1830_v53 }
  0x7c   : > { %1152 = vmatpush.bf16.msra.mxu0 %v1829_v54 }
  0x7d   : > { %1853 = vmatpush.bf16.msra.mxu1 %v1829_v54 }
  0x80   : > { %1153 = vmatpush.bf16.msra.mxu0 %v1828_v55 }
  0x81   : > { %1854 = vmatpush.bf16.msra.mxu1 %v1828_v55 }
  0x83   : > { %1154 = vmatmul.bf16.vlgmr.msra.gmra.mxu0 %v1417_v60 }
  0x84   : > { %1159 = vmatmul.bf16.vlgmr.msra.gmra.mxu1 %v1453_v61 }
  0xc0   : > { %v1003_v62 = vpop.f32.mrf.mxu0 }
  0xc1   : > { %v1022_v63 = vpop.f32.mrf.mxu1 }
  0xc2   : > { %v1023_v23 = vadd.f32 %v1022_v63, %v1003_v62 }
  0xc8   : > { %v1041_v0 = vpop.f32.mrf.mxu2  ;;  %v1005_v2 = vpop.f32.mrf.mxu0 }
  0xc9   : > { %v1060_v1 = vpop.f32.mrf.mxu3  ;;  %v1024_v3 = vpop.f32.mrf.mxu1  ;;  %v1042_v26 = vadd.f32 %v1041_v0, %v1023_v23 }
  0xca   : > { %v1025_v28 = vadd.f32 %v1024_v3, %v1005_v2 }
  0xcb   : > { %v1061_v30 = vadd.f32 %v1060_v1, %v1042_v26 }
  0xd0   : > { %v1043_v4 = vpop.f32.mrf.mxu2  ;;  %v1008_v6 = vpop.f32.mrf.mxu0 }
  0xd1   : > { %v1062_v5 = vpop.f32.mrf.mxu3  ;;  %v1027_v7 = vpop.f32.mrf.mxu1  ;;  %v1044_v31 = vadd.f32 %v1043_v4, %v1025_v28 }
  0xd2   : > { %v1028_v24 = vadd.f32 %v1027_v7, %v1008_v6 }
  0xd3   : > { %v1063_v39 = vadd.f32 %v1062_v5, %v1044_v31 }
  0xd8   : > { %v1046_v8 = vpop.f32.mrf.mxu2  ;;  %v1010_v10 = vpop.f32.mrf.mxu0 }
  0xd9   : > { %v1065_v9 = vpop.f32.mrf.mxu3  ;;  %v1029_v11 = vpop.f32.mrf.mxu1  ;;  %v1047_v27 = vadd.f32 %v1046_v8, %v1028_v24 }
  0xda   : > { %v1030_v29 = vadd.f32 %v1029_v11, %v1010_v10 }
  0xdb   : > { %v1066_v32 = vadd.f32 %v1065_v9, %v1047_v27 }
  0xe0   : > { %v1048_v12 = vpop.f32.mrf.mxu2  ;;  %v1079_v14 = vpop.f32.mrf.mxu0 }
  0xe1   : > { %v1067_v13 = vpop.f32.mrf.mxu3  ;;  %v1098_v15 = vpop.f32.mrf.mxu1  ;;  %v1049_v33 = vadd.f32 %v1048_v12, %v1030_v29  ;;  %v1080_v37 = vadd.f32 %v1079_v14, %v1061_v30 }
  0xe3   : > { %v1068_v40 = vadd.f32 %v1067_v13, %v1049_v33  ;;  %v1099_v42 = vadd.f32 %v1098_v15, %v1080_v37 }
  0xe8   : > { %v1117_v16 = vpop.f32.mrf.mxu2  ;;  %v1081_v18 = vpop.f32.mrf.mxu0 }
  0xe9   : > { %v1136_v17 = vpop.f32.mrf.mxu3  ;;  %v1100_v19 = vpop.f32.mrf.mxu1  ;;  %v1082_v43 = vadd.f32 %v1081_v18, %v1063_v39  ;;  %v1118_v46 = vadd.f32 %v1117_v16, %v1099_v42 }
  0xeb   : > { %v1101_v51 = vadd.f32 %v1100_v19, %v1082_v43  ;;  %v1137_v53 = vadd.f32 %v1136_v17, %v1118_v46 }
  0xf0   : > { %v1119_v20 = vpop.f32.mrf.mxu2  ;;  %v1084_v21 = vpop.f32.mrf.mxu0 }
  0xf1   : > { %v1103_v22 = vpop.f32.mrf.mxu1  ;;  %v1138_v25 = vpop.f32.mrf.mxu3  ;;  %v1085_v38 = vadd.f32 %v1084_v21, %v1066_v32  ;;  %v1120_v54 = vadd.f32 %v1119_v20, %v1101_v51 }
  0xf3   : > { %v1104_v44 = vadd.f32 %v1103_v22, %v1085_v38  ;;  %v1139_v61 = vadd.f32 %v1138_v25, %v1120_v54 }
  0xf8   : > { %v1122_v34 = vpop.f32.mrf.mxu2  ;;  %v1086_v35 = vpop.f32.mrf.mxu0 }
  0xf9   : > { %v1105_v36 = vpop.f32.mrf.mxu1  ;;  %v1141_v41 = vpop.f32.mrf.mxu3  ;;  %v1087_v45 = vadd.f32 %v1086_v35, %v1068_v40  ;;  %v1123_v47 = vadd.f32 %v1122_v34, %v1104_v44 }
  0xfb   : > { %v1106_v52 = vadd.f32 %v1105_v36, %v1087_v45  ;;  %v1142_v55 = vadd.f32 %v1141_v41, %v1123_v47 }
 0x100   : > { %v1124_v48 = vpop.f32.mrf.mxu2  ;;  %v1155_v49 = vpop.f32.mrf.mxu0 }
 0x101   : > { %v1160_v50 = vpop.f32.mrf.mxu1  ;;  %v1125_v56 = vadd.f32 %v1124_v48, %v1106_v52  ;;  %v1156_v58 = vadd.f32 %v1155_v49, %v1137_v53  ;;  %v1143_v60 = vpop.f32.mrf.mxu3 }
 0x102   : > { %v1161_v59 = vadd.f32 %v1160_v50, %v1142_v55 }
 0x103   : > { %v1144_v62 = vadd.f32 %v1143_v60, %v1125_v56  ;;  %v1165_v1 = vadd.f32 %v1920_v57, %v1156_v58 }
 0x104   : > { %v1167_v2 = vadd.f32 %v1920_v57, %v1161_v59 }
 0x105   : > { %v1180_v7 = vmax.f32 %v1165_v1, 0.0 }
 0x106   : > { %v1182_v8 = vmax.f32 %v1167_v2, 0.0 }
 0x108   : > { %v1157_v63 = vpop.f32.mrf.mxu0 }
 0x109   : > { %v1162_v0 = vpop.f32.mrf.mxu1  ;;  %v1158_v3 = vadd.f32 %v1157_v63, %v1139_v61 }
 0x10a   : > { %v1163_v4 = vadd.f32 %v1162_v0, %v1144_v62 }
 0x10b   : > { %v1166_v5 = vadd.f32 %v1920_v57, %v1158_v3 }
 0x10c   : > { %v1168_v6 = vadd.f32 %v1920_v57, %v1163_v4 }
 0x10d   : > { %v1181_v9 = vmax.f32 %v1166_v5, 0.0 }
 0x10e   : > { %v1183_v10 = vmax.f32 %v1168_v6, 0.0  ;;  %1198 = sbr.rel (!%p2110_p9) target bundleno = 285 (0x11d), region = 52 }
 0x10f   : > { %v1839_v11 = vpack.c.bf16 %v1181_v9, %v1180_v7 }
 0x110   : > { %v1844_v12 = vpack.c.bf16 %v1183_v10, %v1182_v8 }
 0x111   : > { %1840 = vst [vmem:[%s275_s5] sm:$0xff] %v1839_v11  }
 0x112   : > { %1846 = vst [vmem:[%s275_s5 + $0x8] sm:$0xff] %v1844_v12  }
 0x118   : > { %v1220_v13 = vld [vmem:[%s275_s5] sm:$0xf]  ;;  %v1222_v14 = vld [vmem:[%s275_s5 + $0x4] sm:$0xf] }
 0x119   : > { %v1224_v15 = vld [vmem:[%s275_s5 + $0x8] sm:$0xf]  ;;  %1221 = vst [vmem:[%s1203_s27] sm:$0xf] %v1220_v13  ;;  %v1226_v16 = vld [vmem:[%s275_s5 + $0xc] sm:$0xf] }
 0x11a   : > { %1223 = vst [vmem:[%s1203_s27 + $0x8] sm:$0xf] %v1222_v14 }
 0x11b   : > { %1225 = vst [vmem:[%s1203_s27 + $0x10] sm:$0xf] %v1224_v15 }
 0x11c   : > { %1227 = vst [vmem:[%s1203_s27 + $0x18] sm:$0xf] %v1226_v16 }
 0x11d PF: > { %s19_s17 = sadd.s32 1, %s2035_s17   ;;  %s2368_s12 = smov %s2019_s13 }
 0x11e   : > { %p16_p1 = scmp.ge.s32.totalorder %s19_s17, 4   ;;  %s2369_s13 = smov %s2023_s14 }
 0x11f   : > { %s2370_s14 = smov %s2108_s24  ;;  %s2371_s15 = smov %s2031_s16 }
 0x120   : > { %s2372_s16 = smov %s2374_s19  ;;  %18 = sbr.rel (!%p16_p1) target bundleno = 6 (0x6), region = 137 }
 0x125   :  { %1269 = vsyncpa [#allocation4], 1 }
 0x126   :  { %1271 = vsyncpa [#allocation4 + $0x1], 1 }
 0x127   :  { %1272 = vsyncpa [#allocation6], 1 }
 0x128   :  { %1274 = vsyncpa [#allocation6 + $0x1], 1 }

// kernel: nnet_forward.11
= control target key start
LH: loop header
LB: loop body
LE: loop exit
PB: predicated region body
PF: predicated region fallthrough
CT: control target
= control target key end

     0   :  { %18 = vsyncpa [#allocation3], 0  ;;  %s2601_s0 = inlined_call_operand.vmem [shape: bf16[2,512], index: 0, kind: input, shape index: {}]   ;;  %s2602_s1 = inlined_call_operand.hbm [shape: f32[2,8], index: 1, kind: input, shape index: {}]   ;;  %s2603_s2 = inlined_call_operand.hbm [shape: bf16[512,256], index: 2, kind: input, shape index: {}]   ;;  %s2604_s3 = inlined_call_operand.hbm [shape: f32[1,256], index: 3, kind: input, shape index: {}]   ;;  %s2605_s4 = inlined_call_operand.hbm [shape: bf16[8,128], index: 4, kind: input, shape index: {}]   ;;  %s2606_s5 = inlined_call_operand.hbm [shape: f32[1,128], index: 5, kind: input, shape index: {}]   ;;  %s2607_s6 = inlined_call_operand.hbm [shape: bf16[128,128], index: 6, kind: input, shape index: {}]   ;;  %s2608_s7 = inlined_call_operand.hbm [shape: f32[1,128], index: 7, kind: input, shape index: {}]   ;;  %s2609_s8 = inlined_call_operand.hbm [shape: bf16[256,256], index: 8, kind: input, shape index: {}]   ;;  %s2610_s9 = inlined_call_operand.hbm [shape: bf16[128,256], index: 9, kind: input, shape index: {}]   ;;  %s2611_s10 = inlined_call_operand.hbm [shape: f32[1,256], index: 10, kind: input, shape index: {}]   ;;  %s2612_s11 = inlined_call_operand.hbm [shape: bf16[256,128], index: 11, kind: input, shape index: {}]   ;;  %s2613_s12 = inlined_call_operand.hbm [shape: f32[1,128], index: 12, kind: input, shape index: {}]   ;;  %s2614_s13 = inlined_call_operand.vmem [shape: f32[2,128], index: 13, kind: output, shape index: {}]  }
   0x1   :  { %19 = vsyncpa [#allocation5], 0 }
   0x2   :  { %20 = vsyncpa [#allocation8], 0 }
   0x3   :  { %21 = vsyncpa [#allocation11], 0 }
   0x4   :  { %22 = vsyncpa [#allocation14], 0 }
   0x5   :  { %23 = vsyncpa [#allocation17], 0  ;;  %s42_s27 = sshll.u32 %s2603_s2, 4  ;;  %s43_s27 = int_to_ptr.hbm [resolvable:$true] %s42_s27 }
   0x6   :  { %24 = vsyncpa [#allocation20], 0  ;;  %s2422_s28 = smov [#allocation4]   ;;  %s67_s15 = sshll.u32 %s2605_s4, 4  ;;  %s68_s15 = int_to_ptr.hbm [resolvable:$true] %s67_s15 }
   0x7   :  { %s44_s29 = sshll.u32 %s2422_s28, 4  ;;  %s2423_s16 = smov 128   ;;  %s45_s29 = int_to_ptr.vmem [resolvable:$true] %s44_s29 }
   0x8   :  { %s2424_s17 = smov 8   ;;  %s2425_s18 = smov [#allocation7]  }
   0x9   :  { %50 = dma.hbm_to_vmem [thread:$0]  %s43_s27, 8192, %s45_s29, [#allocation5], %s2423_s16, %s2423_s16, %s2424_s17  }
   0xa   :  { %s69_s19 = sshll.u32 %s2425_s18, 4  ;;  %s88_s21 = sshll.u32 %s2607_s6, 4  ;;  %s70_s19 = int_to_ptr.vmem [resolvable:$true] %s69_s19  ;;  %s89_s21 = int_to_ptr.hbm [resolvable:$true] %s88_s21 }
   0xb   :  { %72 = dma.hbm_to_vmem [thread:$0]  %s68_s15, 64, %s70_s19, [#allocation8]  }
   0xc   :  { %s2426_s22 = smov [#allocation10]   ;;  %s112_s25 = sshll.u32 %s2609_s8, 4  ;;  %s113_s25 = int_to_ptr.hbm [resolvable:$true] %s112_s25 }
   0xd   :  { %s90_s23 = sshll.u32 %s2426_s22, 4  ;;  %s2427_s26 = smov 64   ;;  %s91_s23 = int_to_ptr.vmem [resolvable:$true] %s90_s23 }
   0xe   :  { %s2428_s28 = smov 4   ;;  %s2429_s27 = smov [#allocation13]  }
   0xf   :  { %96 = dma.hbm_to_vmem [thread:$0]  %s89_s21, 1024, %s91_s23, [#allocation11], %s2427_s26, %s2427_s26, %s2428_s28  }
  0x10   :  { %s114_s29 = sshll.u32 %s2429_s27, 4  ;;  %s139_s14 = sshll.u32 %s2611_s10, 4  ;;  %s115_s29 = int_to_ptr.vmem [resolvable:$true] %s114_s29  ;;  %s140_s14 = int_to_ptr.hbm [resolvable:$true] %s139_s14 }
  0x11   :  { %120 = dma.hbm_to_vmem [thread:$0]  %s113_s25, 4096, %s115_s29, [#allocation14], %s2423_s16, %s2423_s16, %s2424_s17  }
  0x12   :  { %s32_s18 = sshll.u32 %s2602_s1, 4  ;;  %s2430_s19 = smov [#allocation16]   ;;  %s33_s18 = int_to_ptr.hbm [resolvable:$true] %s32_s18 }
  0x13   :  { %s141_s20 = sshll.u32 %s2430_s19, 4  ;;  %s2431_s2 = smov [#allocation2]   ;;  %s142_s20 = int_to_ptr.vmem [resolvable:$true] %s141_s20 }
  0x14   :  { %144 = dma.hbm_to_vmem [thread:$0]  %s140_s14, 32, %s142_s20, [#allocation17]  }
  0x15   :  { %s34_s21 = sshll.u32 %s2431_s2, 4  ;;  %s56_s10 = sshll.u32 %s2604_s3, 4  ;;  %s35_s21 = int_to_ptr.vmem [resolvable:$true] %s34_s21  ;;  %s57_s10 = int_to_ptr.hbm [resolvable:$true] %s56_s10 }
  0x16   :  { %37 = dma.hbm_to_vmem [thread:$0]  %s33_s18, 32, %s35_s21, [#allocation3]  }
  0x17   :  { %s78_s25 = sshll.u32 %s2606_s5, 4  ;;  %s2432_s27 = smov [#allocation6]   ;;  %s79_s25 = int_to_ptr.hbm [resolvable:$true] %s78_s25 }
  0x18   :  { %s58_s1 = sshll.u32 %s2432_s27, 4  ;;  %s2433_s29 = smov [#allocation9]   ;;  %s59_s1 = int_to_ptr.vmem [resolvable:$true] %s58_s1 }
  0x19   :  { %61 = dma.hbm_to_vmem [thread:$0]  %s57_s10, 32, %s59_s1, [#allocation5]  }
  0x1a   :  { %s80_s6 = sshll.u32 %s2433_s29, 4  ;;  %s102_s8 = sshll.u32 %s2608_s7, 4  ;;  %s81_s6 = int_to_ptr.vmem [resolvable:$true] %s80_s6  ;;  %s103_s8 = int_to_ptr.hbm [resolvable:$true] %s102_s8 }
  0x1b   :  { %83 = dma.hbm_to_vmem [thread:$0]  %s79_s25, 16, %s81_s6, [#allocation8]  }
  0x1c   :  { %s125_s18 = sshll.u32 %s2610_s9, 4  ;;  %s2434_s19 = smov [#allocation12]   ;;  %s126_s18 = int_to_ptr.hbm [resolvable:$true] %s125_s18 }
  0x1d   :  { %s104_s5 = sshll.u32 %s2434_s19, 4  ;;  %s2435_s20 = smov [#allocation15]   ;;  %s105_s5 = int_to_ptr.vmem [resolvable:$true] %s104_s5 }
  0x1e   :  { %107 = dma.hbm_to_vmem [thread:$0]  %s103_s8, 16, %s105_s5, [#allocation11]  }
  0x1f   :  { %s127_s2 = sshll.u32 %s2435_s20, 4  ;;  %s149_s23 = sshll.u32 %s2612_s11, 4  ;;  %s128_s2 = int_to_ptr.vmem [resolvable:$true] %s127_s2  ;;  %s150_s23 = int_to_ptr.hbm [resolvable:$true] %s149_s23 }
  0x20   :  { %133 = dma.hbm_to_vmem [thread:$0]  %s126_s18, 2048, %s128_s2, [#allocation14], %s2423_s16, %s2423_s16, %s2424_s17  }
  0x21   :  { %s163_s9 = sshll.u32 %s2613_s12, 4  ;;  %s2436_s4 = smov [#allocation18]   ;;  %s164_s9 = int_to_ptr.hbm [resolvable:$true] %s163_s9 }
  0x22   :  { %s151_s24 = sshll.u32 %s2436_s4, 4  ;;  %s2437_s25 = smov [#allocation19]   ;;  %s152_s24 = int_to_ptr.vmem [resolvable:$true] %s151_s24 }
  0x23   :  { %157 = dma.hbm_to_vmem [thread:$0]  %s150_s23, 2048, %s152_s24, [#allocation17], %s2427_s26, %s2427_s26, %s2428_s28  }
  0x24   :  { %s165_s11 = sshll.u32 %s2437_s25, 4  ;;  %s166_s11 = int_to_ptr.vmem [resolvable:$true] %s165_s11 }
  0x25   :  { %168 = dma.hbm_to_vmem [thread:$0]  %s164_s9, 16, %s166_s11, [#allocation20]  }
  0x26   :  { %2408 = dma.done.wait [#allocation3], 32  }
  0x27   :  { %2409 = vsyncadd [#allocation3], 4294967264 }
  0x28   :  { %2410 = dma.done.wait [#allocation5], 8224  }
  0x29   :  { %2411 = vsyncadd [#allocation5], 4294959072 }
  0x2a   :  { %2412 = dma.done.wait [#allocation8], 80  }
  0x2b   :  { %2413 = vsyncadd [#allocation8], 4294967216 }
  0x2c   :  { %2414 = dma.done.wait [#allocation11], 1040  }
  0x2d   :  { %2415 = vsyncadd [#allocation11], 4294966256 }
  0x2e   :  { %2416 = dma.done.wait [#allocation14], 6144  }
  0x2f   :  { %2417 = vsyncadd [#allocation14], 4294961152 }
  0x30   :  { %2418 = dma.done.wait [#allocation17], 2080  }
  0x31   :  { %2419 = vsyncadd [#allocation17], 4294965216 }
  0x32   :  { %2420 = dma.done.wait [#allocation20], 16  }
  0x33   :  { %2421 = vsyncadd [#allocation20], 4294967280  ;;  %v1472_v0 = vld [vmem:[#allocation4 + $0x70] sm:$0xf]  ;;  %v1974_v1 = vld [vmem:[#allocation4 + $0x74] sm:$0xf0] }
  0x34   :  { %v1600_v2 = vld [vmem:[#allocation4 + $0x170] sm:$0xf]  ;;  %v1473_v3 = vor.u32 %v1974_v1, %v1472_v0  ;;  %v2006_v4 = vld [vmem:[#allocation4 + $0x174] sm:$0xf0]  ;;  %v1464_v11 = vld [vmem:[#allocation4 + $0x60] sm:$0xf] }
  0x35   :  { %v1536_v5 = vld [vmem:[#allocation4 + $0xf0] sm:$0xf]  ;;  %v1990_v6 = vld [vmem:[#allocation4 + $0xf4] sm:$0xf0]  ;;  %v1601_v7 = vor.u32 %v2006_v4, %v1600_v2  ;;  %v1972_v13 = vld [vmem:[#allocation4 + $0x64] sm:$0xf0] }
  0x36   :  { %v1537_v8 = vor.u32 %v1990_v6, %v1536_v5  ;;  %v1664_v9 = vld [vmem:[#allocation4 + $0x1f0] sm:$0xf]  ;;  %v2022_v10 = vld [vmem:[#allocation4 + $0x1f4] sm:$0xf0]  ;;  %619 = vmatpush.bf16.msra.mxu0 %v1473_v3  ;;  %v1592_v14 = vld [vmem:[#allocation4 + $0x160] sm:$0xf]  ;;  %v1465_v16 = vor.u32 %v1972_v13, %v1464_v11 }
  0x37   :  { %v1665_v12 = vor.u32 %v2022_v10, %v1664_v9  ;;  %v2004_v15 = vld [vmem:[#allocation4 + $0x164] sm:$0xf0]  ;;  %645 = vmatpush.bf16.msra.mxu2 %v1601_v7  ;;  %v1528_v18 = vld [vmem:[#allocation4 + $0xe0] sm:$0xf]  ;;  %v1456_v23 = vld [vmem:[#allocation4 + $0x50] sm:$0xf] }
  0x38   :  { %632 = vmatpush.bf16.msra.mxu1 %v1537_v8  ;;  %v1593_v17 = vor.u32 %v2004_v15, %v1592_v14  ;;  %v1988_v19 = vld [vmem:[#allocation4 + $0xe4] sm:$0xf0]  ;;  %v1656_v20 = vld [vmem:[#allocation4 + $0x1e0] sm:$0xf]  ;;  %v1970_v24 = vld [vmem:[#allocation4 + $0x54] sm:$0xf0] }
  0x39   :  { %658 = vmatpush.bf16.msra.mxu3 %v1665_v12  ;;  %v1529_v21 = vor.u32 %v1988_v19, %v1528_v18  ;;  %v2020_v22 = vld [vmem:[#allocation4 + $0x1e4] sm:$0xf0]  ;;  %v1584_v26 = vld [vmem:[#allocation4 + $0x150] sm:$0xf]  ;;  %v2002_v27 = vld [vmem:[#allocation4 + $0x154] sm:$0xf0]  ;;  %v1457_v29 = vor.u32 %v1970_v24, %v1456_v23 }
  0x3a   :  { %v1657_v25 = vor.u32 %v2020_v22, %v1656_v20  ;;  %v1520_v28 = vld [vmem:[#allocation4 + $0xd0] sm:$0xf]  ;;  %620 = vmatpush.bf16.msra.mxu0 %v1465_v16  ;;  %v1986_v30 = vld [vmem:[#allocation4 + $0xd4] sm:$0xf0]  ;;  %v1585_v33 = vor.u32 %v2002_v27, %v1584_v26  ;;  %v1448_v35 = vld [vmem:[#allocation4 + $0x40] sm:$0xf] }
  0x3b   :  { %v1648_v31 = vld [vmem:[#allocation4 + $0x1d0] sm:$0xf]  ;;  %v2018_v32 = vld [vmem:[#allocation4 + $0x1d4] sm:$0xf0]  ;;  %646 = vmatpush.bf16.msra.mxu2 %v1593_v17  ;;  %v1521_v34 = vor.u32 %v1986_v30, %v1520_v28  ;;  %v1968_v36 = vld [vmem:[#allocation4 + $0x44] sm:$0xf0] }
  0x3c   :  { %633 = vmatpush.bf16.msra.mxu1 %v1529_v21  ;;  %v1576_v37 = vld [vmem:[#allocation4 + $0x140] sm:$0xf]  ;;  %v1649_v38 = vor.u32 %v2018_v32, %v1648_v31  ;;  %v2000_v39 = vld [vmem:[#allocation4 + $0x144] sm:$0xf0]  ;;  %v1449_v44 = vor.u32 %v1968_v36, %v1448_v35  ;;  %v1440_v47 = vld [vmem:[#allocation4 + $0x30] sm:$0xf] }
  0x3d   :  { %659 = vmatpush.bf16.msra.mxu3 %v1657_v25  ;;  %v1512_v40 = vld [vmem:[#allocation4 + $0xc0] sm:$0xf]  ;;  %v1984_v41 = vld [vmem:[#allocation4 + $0xc4] sm:$0xf0]  ;;  %v1577_v45 = vor.u32 %v2000_v39, %v1576_v37  ;;  %v1966_v48 = vld [vmem:[#allocation4 + $0x34] sm:$0xf0] }
  0x3e   :  { %v1640_v42 = vld [vmem:[#allocation4 + $0x1c0] sm:$0xf]  ;;  %v2016_v43 = vld [vmem:[#allocation4 + $0x1c4] sm:$0xf0]  ;;  %621 = vmatpush.bf16.msra.mxu0 %v1457_v29  ;;  %v1513_v46 = vor.u32 %v1984_v41, %v1512_v40  ;;  %v1568_v49 = vld [vmem:[#allocation4 + $0x130] sm:$0xf]  ;;  %v1441_v56 = vor.u32 %v1966_v48, %v1440_v47 }
  0x3f   :  { %647 = vmatpush.bf16.msra.mxu2 %v1585_v33  ;;  %v1641_v50 = vor.u32 %v2016_v43, %v1640_v42  ;;  %v1998_v51 = vld [vmem:[#allocation4 + $0x134] sm:$0xf0]  ;;  %v1504_v52 = vld [vmem:[#allocation4 + $0xb0] sm:$0xf]  ;;  %v1432_v59 = vld [vmem:[#allocation4 + $0x20] sm:$0xf] }
  0x40   :  { %634 = vmatpush.bf16.msra.mxu1 %v1521_v34  ;;  %v1982_v53 = vld [vmem:[#allocation4 + $0xb4] sm:$0xf0]  ;;  %v1632_v54 = vld [vmem:[#allocation4 + $0x1b0] sm:$0xf]  ;;  %v1569_v57 = vor.u32 %v1998_v51, %v1568_v49  ;;  %v1964_v60 = vld [vmem:[#allocation4 + $0x24] sm:$0xf0] }
  0x41   :  { %660 = vmatpush.bf16.msra.mxu3 %v1649_v38  ;;  %v2014_v55 = vld [vmem:[#allocation4 + $0x1b4] sm:$0xf0]  ;;  %v1505_v58 = vor.u32 %v1982_v53, %v1504_v52  ;;  %v1560_v61 = vld [vmem:[#allocation4 + $0x120] sm:$0xf]  ;;  %v1996_v63 = vld [vmem:[#allocation4 + $0x124] sm:$0xf0]  ;;  %v1433_v4 = vor.u32 %v1964_v60, %v1432_v59 }
  0x42   :  { %622 = vmatpush.bf16.msra.mxu0 %v1449_v44  ;;  %v1633_v62 = vor.u32 %v2014_v55, %v1632_v54  ;;  %v1496_v0 = vld [vmem:[#allocation4 + $0xa0] sm:$0xf]  ;;  %v1980_v1 = vld [vmem:[#allocation4 + $0xa4] sm:$0xf0]  ;;  %v1561_v5 = vor.u32 %v1996_v63, %v1560_v61  ;;  %v1424_v7 = vld [vmem:[#allocation4 + $0x10] sm:$0xf] }
  0x43   :  { %648 = vmatpush.bf16.msra.mxu2 %v1577_v45  ;;  %v1624_v2 = vld [vmem:[#allocation4 + $0x1a0] sm:$0xf]  ;;  %v2012_v3 = vld [vmem:[#allocation4 + $0x1a4] sm:$0xf0]  ;;  %v1497_v6 = vor.u32 %v1980_v1, %v1496_v0  ;;  %v1962_v8 = vld [vmem:[#allocation4 + $0x14] sm:$0xf0] }
  0x44   :  { %635 = vmatpush.bf16.msra.mxu1 %v1513_v46  ;;  %v1552_v9 = vld [vmem:[#allocation4 + $0x110] sm:$0xf]  ;;  %v1625_v10 = vor.u32 %v2012_v3, %v1624_v2  ;;  %v1994_v11 = vld [vmem:[#allocation4 + $0x114] sm:$0xf0]  ;;  %v1416_v16 = vld [vmem:[#allocation4] sm:$0xf]  ;;  %v1425_v17 = vor.u32 %v1962_v8, %v1424_v7 }
  0x45   :  { %661 = vmatpush.bf16.msra.mxu3 %v1641_v50  ;;  %v1488_v12 = vld [vmem:[#allocation4 + $0x90] sm:$0xf]  ;;  %v1978_v13 = vld [vmem:[#allocation4 + $0x94] sm:$0xf0]  ;;  %v1960_v18 = vld [vmem:[#allocation4 + $0x4] sm:$0xf0]  ;;  %v1553_v21 = vor.u32 %v1994_v11, %v1552_v9 }
  0x46   :  { %623 = vmatpush.bf16.msra.mxu0 %v1441_v56  ;;  %v1616_v14 = vld [vmem:[#allocation4 + $0x190] sm:$0xf]  ;;  %v2010_v15 = vld [vmem:[#allocation4 + $0x194] sm:$0xf0]  ;;  %v1544_v19 = vld [vmem:[#allocation4 + $0x100] sm:$0xf]  ;;  %v1489_v22 = vor.u32 %v1978_v13, %v1488_v12  ;;  %v1417_v32 = vor.u32 %v1960_v18, %v1416_v16 }
  0x47   :  { %649 = vmatpush.bf16.msra.mxu2 %v1569_v57  ;;  %v1992_v20 = vld [vmem:[#allocation4 + $0x104] sm:$0xf0]  ;;  %v1973_v23 = vld [vmem:[#allocation4 + $0x74] sm:$0xf]  ;;  %v1474_v24 = vld [vmem:[#allocation4 + $0x78] sm:$0xf0]  ;;  %v1617_v26 = vor.u32 %v2010_v15, %v1616_v14 }
  0x48   :  { %636 = vmatpush.bf16.msra.mxu1 %v1505_v58  ;;  %v2005_v25 = vld [vmem:[#allocation4 + $0x174] sm:$0xf]  ;;  %v1602_v27 = vld [vmem:[#allocation4 + $0x178] sm:$0xf0]  ;;  %v1480_v28 = vld [vmem:[#allocation4 + $0x80] sm:$0xf]  ;;  %v1545_v36 = vor.u32 %v1992_v20, %v1544_v19  ;;  %v1477_v37 = vor.u32 %v1973_v23, %v1474_v24 }
  0x49   :  { %662 = vmatpush.bf16.msra.mxu3 %v1633_v62  ;;  %v218_v29 = vld [vmem:[%s2601_s0] sm:$0xf]  ;;  %v1976_v30 = vld [vmem:[#allocation4 + $0x84] sm:$0xf0]  ;;  %v1608_v31 = vld [vmem:[#allocation4 + $0x180] sm:$0xf]  ;;  %v1605_v40 = vor.u32 %v2005_v25, %v1602_v27 }
  0x4a   :  { %624 = vmatpush.bf16.msra.mxu0 %v1433_v4  ;;  %290 = vst [vmem:[#allocation1] ss:$9 sm:$0xff] %v218_v29  ;;  %v2008_v33 = vld [vmem:[#allocation4 + $0x184] sm:$0xf0]  ;;  %v1989_v34 = vld [vmem:[#allocation4 + $0xf4] sm:$0xf]  ;;  %v1481_v41 = vor.u32 %v1976_v30, %v1480_v28 }
  0x4b   :  { %650 = vmatpush.bf16.msra.mxu2 %v1561_v5  ;;  %v1538_v35 = vld [vmem:[#allocation4 + $0xf8] sm:$0xf0]  ;;  %v2021_v38 = vld [vmem:[#allocation4 + $0x1f4] sm:$0xf]  ;;  %v1971_v42 = vld [vmem:[#allocation4 + $0x64] sm:$0xf]  ;;  %v1609_v44 = vor.u32 %v2008_v33, %v1608_v31 }
  0x4c   :  { %637 = vmatpush.bf16.msra.mxu1 %v1497_v6  ;;  %v1666_v39 = vld [vmem:[#allocation4 + $0x1f8] sm:$0xf0]  ;;  %v1466_v43 = vld [vmem:[#allocation4 + $0x68] sm:$0xf0]  ;;  %v1541_v45 = vor.u32 %v1989_v34, %v1538_v35  ;;  %v2003_v46 = vld [vmem:[#allocation4 + $0x164] sm:$0xf] }
  0x4d   :  { %663 = vmatpush.bf16.msra.mxu3 %v1625_v10  ;;  %v1594_v47 = vld [vmem:[#allocation4 + $0x168] sm:$0xf0]  ;;  %v1669_v48 = vor.u32 %v2021_v38, %v1666_v39  ;;  %v1987_v49 = vld [vmem:[#allocation4 + $0xe4] sm:$0xf]  ;;  %v1469_v51 = vor.u32 %v1971_v42, %v1466_v43  ;;  %v1969_v54 = vld [vmem:[#allocation4 + $0x54] sm:$0xf] }
  0x4e   :  { %625 = vmatpush.bf16.msra.mxu0 %v1425_v17  ;;  %v1530_v50 = vld [vmem:[#allocation4 + $0xe8] sm:$0xf0]  ;;  %v2019_v52 = vld [vmem:[#allocation4 + $0x1e4] sm:$0xf]  ;;  %v1597_v55 = vor.u32 %v2003_v46, %v1594_v47  ;;  %v1458_v57 = vld [vmem:[#allocation4 + $0x58] sm:$0xf0] }
  0x4f   :  { %651 = vmatpush.bf16.msra.mxu2 %v1553_v21  ;;  %v1658_v53 = vld [vmem:[#allocation4 + $0x1e8] sm:$0xf0]  ;;  %v2001_v58 = vld [vmem:[#allocation4 + $0x154] sm:$0xf]  ;;  %v1533_v59 = vor.u32 %v1987_v49, %v1530_v50  ;;  %v1586_v61 = vld [vmem:[#allocation4 + $0x158] sm:$0xf0]  ;;  %v1461_v3 = vor.u32 %v1969_v54, %v1458_v57 }
  0x50   :  { %638 = vmatpush.bf16.msra.mxu1 %v1489_v22  ;;  %v1661_v63 = vor.u32 %v2019_v52, %v1658_v53  ;;  %v1985_v1 = vld [vmem:[#allocation4 + $0xd4] sm:$0xf]  ;;  %v1522_v2 = vld [vmem:[#allocation4 + $0xd8] sm:$0xf0]  ;;  %v1589_v6 = vor.u32 %v2001_v58, %v1586_v61  ;;  %v1967_v7 = vld [vmem:[#allocation4 + $0x44] sm:$0xf] }
  0x51   :  { %664 = vmatpush.bf16.msra.mxu3 %v1617_v26  ;;  %v2562_v56 = vld [vmem:[#allocation1 + $0x12] sm:$0xff]  ;;  %v2564_v60 = vld [vmem:[#allocation1] sm:$0xff]  ;;  %v2566_v62 = vld [vmem:[#allocation1 + $0x9] sm:$0xff]  ;;  %v1525_v9 = vor.u32 %v1985_v1, %v1522_v2  ;;  %vm736_vm0 = vcmask 1043456   ;;  %vm732_vm1 = vcmask 64512   ;;  %vm1380_vm4 = vcmask 1041408  }
  0x52   :  { %626 = vmatpush.bf16.msra.mxu0 %v1417_v32  ;;  %v2569_v0 = vld [vmem:[#allocation1 + $0x1b] sm:$0xff]  ;;  %v1650_v5 = vld [vmem:[#allocation4 + $0x1d8] sm:$0xf0]  ;;  %v1450_v8 = vld [vmem:[#allocation4 + $0x48] sm:$0xf0] }
  0x53   :  { %652 = vmatpush.bf16.msra.mxu2 %v1545_v36  ;;  %v2017_v4 = vld [vmem:[#allocation4 + $0x1d4] sm:$0xf]  ;;  %v1999_v10 = vld [vmem:[#allocation4 + $0x144] sm:$0xf]  ;;  %v1578_v11 = vld [vmem:[#allocation4 + $0x148] sm:$0xf0]  ;;  %v1453_v15 = vor.u32 %v1967_v7, %v1450_v8 }
  0x54   :  { %639 = vmatpush.bf16.msra.mxu1 %v1481_v41  ;;  %v1653_v12 = vor.u32 %v2017_v4, %v1650_v5  ;;  %v1983_v13 = vld [vmem:[#allocation4 + $0xc4] sm:$0xf]  ;;  %v1514_v14 = vld [vmem:[#allocation4 + $0xc8] sm:$0xf0]  ;;  %v1581_v18 = vor.u32 %v1999_v10, %v1578_v11  ;;  %v1965_v19 = vld [vmem:[#allocation4 + $0x34] sm:$0xf] }
  0x55   :  { %665 = vmatpush.bf16.msra.mxu3 %v1609_v44  ;;  %627 = vmatmul.bf16.vlgmr.msra.gmra.mxu0 %v2564_v60  ;;  %v2015_v16 = vld [vmem:[#allocation4 + $0x1c4] sm:$0xf]  ;;  %v1642_v17 = vld [vmem:[#allocation4 + $0x1c8] sm:$0xf0]  ;;  %v1442_v20 = vld [vmem:[#allocation4 + $0x38] sm:$0xf0]  ;;  %v1517_v21 = vor.u32 %v1983_v13, %v1514_v14 }
  0x56   :  { %671 = vmatpush.bf16.msrb.mxu0 %v1477_v37  ;;  %653 = vmatmul.bf16.vlgmr.msra.gmra.mxu2 %v2562_v56  ;;  %v1997_v22 = vld [vmem:[#allocation4 + $0x134] sm:$0xf]  ;;  %v1570_v23 = vld [vmem:[#allocation4 + $0x138] sm:$0xf0]  ;;  %v1645_v24 = vor.u32 %v2015_v16, %v1642_v17  ;;  %v1445_v27 = vor.u32 %v1965_v19, %v1442_v20  ;;  %v1963_v30 = vld [vmem:[#allocation4 + $0x24] sm:$0xf] }
  0x57   :  { %697 = vmatpush.bf16.msrb.mxu2 %v1605_v40  ;;  %640 = vmatmul.bf16.vlgmr.msra.gmra.mxu1 %v2566_v62  ;;  %v1981_v25 = vld [vmem:[#allocation4 + $0xb4] sm:$0xf]  ;;  %v1506_v26 = vld [vmem:[#allocation4 + $0xb8] sm:$0xf0]  ;;  %v1573_v31 = vor.u32 %v1997_v22, %v1570_v23  ;;  %v1434_v32 = vld [vmem:[#allocation4 + $0x28] sm:$0xf0] }
  0x58   :  { %684 = vmatpush.bf16.msrb.mxu1 %v1541_v45  ;;  %666 = vmatmul.bf16.vlgmr.msra.gmra.mxu3 %v2569_v0  ;;  %v2013_v28 = vld [vmem:[#allocation4 + $0x1b4] sm:$0xf]  ;;  %v1634_v29 = vld [vmem:[#allocation4 + $0x1b8] sm:$0xf0]  ;;  %v1995_v33 = vld [vmem:[#allocation4 + $0x124] sm:$0xf]  ;;  %v1509_v34 = vor.u32 %v1981_v25, %v1506_v26  ;;  %v1437_v39 = vor.u32 %v1963_v30, %v1434_v32 }
  0x59   :  { %710 = vmatpush.bf16.msrb.mxu3 %v1669_v48  ;;  %v1562_v35 = vld [vmem:[#allocation4 + $0x128] sm:$0xf0]  ;;  %v1637_v36 = vor.u32 %v2013_v28, %v1634_v29  ;;  %v1979_v37 = vld [vmem:[#allocation4 + $0xa4] sm:$0xf]  ;;  %v1961_v43 = vld [vmem:[#allocation4 + $0x14] sm:$0xf] }
  0x5a   :  { %672 = vmatpush.bf16.msrb.mxu0 %v1469_v51  ;;  %v1498_v38 = vld [vmem:[#allocation4 + $0xa8] sm:$0xf0]  ;;  %v2011_v40 = vld [vmem:[#allocation4 + $0x1a4] sm:$0xf]  ;;  %v1565_v42 = vor.u32 %v1995_v33, %v1562_v35  ;;  %v1426_v44 = vld [vmem:[#allocation4 + $0x18] sm:$0xf0] }
  0x5b   :  { %698 = vmatpush.bf16.msrb.mxu2 %v1597_v55  ;;  %v1626_v41 = vld [vmem:[#allocation4 + $0x1a8] sm:$0xf0]  ;;  %v1501_v45 = vor.u32 %v1979_v37, %v1498_v38  ;;  %v1993_v46 = vld [vmem:[#allocation4 + $0x114] sm:$0xf]  ;;  %v1554_v47 = vld [vmem:[#allocation4 + $0x118] sm:$0xf0]  ;;  %v1429_v51 = vor.u32 %v1961_v43, %v1426_v44 }
  0x5c   :  { %685 = vmatpush.bf16.msrb.mxu1 %v1533_v59  ;;  %v1629_v48 = vor.u32 %v2011_v40, %v1626_v41  ;;  %v1977_v49 = vld [vmem:[#allocation4 + $0x94] sm:$0xf]  ;;  %v1490_v50 = vld [vmem:[#allocation4 + $0x98] sm:$0xf0]  ;;  %v1557_v54 = vor.u32 %v1993_v46, %v1554_v47  ;;  %v1959_v55 = vld [vmem:[#allocation4 + $0x4] sm:$0xf] }
  0x5d   :  { %711 = vmatpush.bf16.msrb.mxu3 %v1661_v63  ;;  %v2009_v52 = vld [vmem:[#allocation4 + $0x194] sm:$0xf]  ;;  %v1618_v53 = vld [vmem:[#allocation4 + $0x198] sm:$0xf0]  ;;  %v1418_v57 = vld [vmem:[#allocation4 + $0x8] sm:$0xf0]  ;;  %v1493_v58 = vor.u32 %v1977_v49, %v1490_v50 }
  0x5e   :  { %673 = vmatpush.bf16.msrb.mxu0 %v1461_v3  ;;  %v1991_v59 = vld [vmem:[#allocation4 + $0x104] sm:$0xf]  ;;  %v1546_v61 = vld [vmem:[#allocation4 + $0x108] sm:$0xf0]  ;;  %v1621_v63 = vor.u32 %v2009_v52, %v1618_v53  ;;  %v1421_v4 = vor.u32 %v1959_v55, %v1418_v57  ;;  %v1825_v8 = vld [vmem:[#allocation13 + $0x70] sm:$0xf] }
  0x5f   :  { %699 = vmatpush.bf16.msrb.mxu2 %v1589_v6  ;;  %v1975_v1 = vld [vmem:[#allocation4 + $0x84] sm:$0xf]  ;;  %v1482_v2 = vld [vmem:[#allocation4 + $0x88] sm:$0xf0]  ;;  %v1549_v7 = vor.u32 %v1991_v59, %v1546_v61  ;;  %v1809_v17 = vld [vmem:[#allocation13 + $0x50] sm:$0xf] }
  0x60   :  { %686 = vmatpush.bf16.msrb.mxu1 %v1525_v9  ;;  %v727_v3 = vld [vmem:[#allocation7] sm:$0xf]  ;;  %v1610_v6 = vld [vmem:[#allocation4 + $0x188] sm:$0xf0]  ;;  %v1485_v10 = vor.u32 %v1975_v1, %v1482_v2  ;;  %v725_v22 = vld [vmem:[#allocation2] sm:$0x3] }
  0x61   :  { %712 = vmatpush.bf16.msrb.mxu3 %v1653_v12  ;;  %v2007_v5 = vld [vmem:[#allocation4 + $0x184] sm:$0xf]  ;;  %v738_v11 = vsel %vm736_vm0, %v727_v3, 0  ;;  %v1817_v14 = vld [vmem:[#allocation13 + $0x60] sm:$0xf]  ;;  %v2028_v35 = vld [vmem:[#allocation10 + $0x28] sm:$0xff] }
  0x62   :  { %674 = vmatpush.bf16.msrb.mxu0 %v1453_v15  ;;  %v2046_v9 = vld [vmem:[#allocation13 + $0x74] sm:$0xf0]  ;;  %v1613_v12 = vor.u32 %v2007_v5, %v1610_v6  ;;  %v2044_v15 = vld [vmem:[#allocation13 + $0x64] sm:$0xf0]  ;;  %v1801_v20 = vld [vmem:[#allocation13 + $0x40] sm:$0xf] }
  0x63   :  { %700 = vmatpush.bf16.msrb.mxu2 %v1581_v18  ;;  %v1826_v13 = vor.u32 %v2046_v9, %v1825_v8  ;;  %v1818_v16 = vor.u32 %v2044_v15, %v1817_v14  ;;  %v2042_v18 = vld [vmem:[#allocation13 + $0x54] sm:$0xf0]  ;;  %v2036_v26 = vld [vmem:[#allocation13 + $0x24] sm:$0xf0]  ;;  %v1769_v32 = vld [vmem:[#allocation13] sm:$0xf] }
  0x64   :  { %687 = vmatpush.bf16.msrb.mxu1 %v1517_v21  ;;  %v1810_v19 = vor.u32 %v2042_v18, %v1809_v17  ;;  %v2040_v21 = vld [vmem:[#allocation13 + $0x44] sm:$0xf0]  ;;  %v2038_v25 = vld [vmem:[#allocation13 + $0x34] sm:$0xf0]  ;;  %v2025_v38 = vld [vmem:[#allocation10 + $0x10] sm:$0xff] }
  0x65   :  { %713 = vmatpush.bf16.msrb.mxu3 %v1645_v24  ;;  %v1802_v23 = vor.u32 %v2040_v21, %v1801_v20  ;;  %v1793_v24 = vld [vmem:[#allocation13 + $0x30] sm:$0xf]  ;;  %v2030_v28 = vld [vmem:[#allocation10 + $0x38] sm:$0xff]  ;;  %v2032_v33 = vld [vmem:[#allocation13 + $0x4] sm:$0xf0] }
  0x66   :  { %675 = vmatpush.bf16.msrb.mxu0 %v1445_v27  ;;  %v2034_v29 = vld [vmem:[#allocation13 + $0x14] sm:$0xf0]  ;;  %v2024_v40 = vld [vmem:[#allocation10 + $0x8] sm:$0xff]  ;;  %v2023_v44 = vld [vmem:[#allocation10] sm:$0xff] }
  0x67   :  { %701 = vmatpush.bf16.msrb.mxu2 %v1573_v31  ;;  %v2029_v31 = vld [vmem:[#allocation10 + $0x30] sm:$0xff]  ;;  %v2026_v37 = vld [vmem:[#allocation10 + $0x18] sm:$0xff]  ;;  %v2060_v52 = vld [vmem:[#allocation13 + $0xe4] sm:$0xf0] }
  0x68   :  { %688 = vmatpush.bf16.msrb.mxu1 %v1509_v34  ;;  %v1770_v34 = vor.u32 %v2032_v33, %v1769_v32  ;;  %v2062_v46 = vld [vmem:[#allocation13 + $0xf4] sm:$0xf0]  ;;  %v1873_v61 = vld [vmem:[#allocation13 + $0xd0] sm:$0xf]  ;;  %v1865_v5 = vld [vmem:[#allocation13 + $0xc0] sm:$0xf] }
  0x69   :  { %714 = vmatpush.bf16.msrb.mxu3 %v1637_v36  ;;  %v2027_v36 = vld [vmem:[#allocation10 + $0x20] sm:$0xff]  ;;  %v2056_v6 = vld [vmem:[#allocation13 + $0xc4] sm:$0xf0]  ;;  %v1857_v9 = vld [vmem:[#allocation13 + $0xb0] sm:$0xf] }
  0x6a   :  { %676 = vmatpush.bf16.msrb.mxu0 %v1437_v39  ;;  %v2579_v39 = vld [vmem:[#allocation6] sm:$0x3]  ;;  %v1841_v15 = vld [vmem:[#allocation13 + $0x90] sm:$0xf]  ;;  %v1833_v18 = vld [vmem:[#allocation13 + $0x80] sm:$0xf] }
  0x6b   :  { %702 = vmatpush.bf16.msrb.mxu2 %v1565_v42  ;;  %v285_v41 = vperm.slane %v2579_v39, 0 }
  0x6c   :  { %689 = vmatpush.bf16.msrb.mxu1 %v1501_v45  ;;  %v1889_v45 = vld [vmem:[#allocation13 + $0xf0] sm:$0xf] }
  0x6d   :  { %715 = vmatpush.bf16.msrb.mxu3 %v1629_v48  ;;  %v1890_v48 = vor.u32 %v2062_v46, %v1889_v45  ;;  %v1753_v45 = vld [vmem:[#allocation15 + $0x60] sm:$0xf]  ;;  %v2076_v46 = vld [vmem:[#allocation15 + $0x64] sm:$0xf0] }
  0x6e   :  { %677 = vmatpush.bf16.msrb.mxu0 %v1429_v51  ;;  %v1881_v51 = vld [vmem:[#allocation13 + $0xe0] sm:$0xf] }
  0x6f   :  { %703 = vmatpush.bf16.msrb.mxu2 %v1557_v54  ;;  %v1882_v54 = vor.u32 %v2060_v52, %v1881_v51  ;;  %v2073_v52 = vld [vmem:[#allocation15 + $0x54] sm:$0xf] }
  0x70   :  { %690 = vmatpush.bf16.msrb.mxu1 %v1493_v58 }
  0x71   :  { %716 = vmatpush.bf16.msrb.mxu3 %v1621_v63  ;;  %v2058_v63 = vld [vmem:[#allocation13 + $0xd4] sm:$0xf0] }
  0x72   :  { %678 = vmatpush.bf16.msrb.mxu0 %v1421_v4  ;;  %v1874_v1 = vor.u32 %v2058_v63, %v1873_v61  ;;  %v1739_v63 = vld [vmem:[#allocation15 + $0x48] sm:$0xf0] }
  0x73   :  { %704 = vmatpush.bf16.msrb.mxu2 %v1549_v7  ;;  %v1866_v7 = vor.u32 %v2056_v6, %v1865_v5  ;;  %v2069_v5 = vld [vmem:[#allocation15 + $0x34] sm:$0xf]  ;;  %v1731_v6 = vld [vmem:[#allocation15 + $0x38] sm:$0xf0] }
  0x74   :  { %691 = vmatpush.bf16.msrb.mxu1 %v1485_v10  ;;  %v2054_v10 = vld [vmem:[#allocation13 + $0xb4] sm:$0xf0] }
  0x75   :  { %717 = vmatpush.bf16.msrb.mxu3 %v1613_v12  ;;  %679 = vmatmul.bf16.vlgmr.msrb.gmra.mxu0 %v2564_v60  ;;  %v726_v60 = vpack.c.bf16 %v725_v22, %v725_v22  ;;  %v1849_v12 = vld [vmem:[#allocation13 + $0xa0] sm:$0xf] }
  0x76   :  { %747 = vmatpush.bf16.msra.mxu0 %v738_v11  ;;  %705 = vmatmul.bf16.vlgmr.msrb.gmra.mxu2 %v2562_v56  ;;  %v1794_v56 = vor.u32 %v2038_v25, %v1793_v24  ;;  %v1858_v11 = vor.u32 %v2054_v10, %v1857_v9  ;;  %v1761_v24 = vld [vmem:[#allocation15 + $0x70] sm:$0xf]  ;;  %v2078_v25 = vld [vmem:[#allocation15 + $0x74] sm:$0xf0]  ;;  %v1721_v9 = vld [vmem:[#allocation15 + $0x20] sm:$0xf] }
  0x77   :  { %692 = vmatmul.bf16.vlgmr.msrb.gmra.mxu1 %v2566_v62  ;;  %v1785_v62 = vld [vmem:[#allocation13 + $0x20] sm:$0xf]  ;;  %v2068_v10 = vld [vmem:[#allocation15 + $0x24] sm:$0xf0] }
  0x78   :  { %718 = vmatmul.bf16.vlgmr.msrb.gmra.mxu3 %v2569_v0  ;;  %v1786_v27 = vor.u32 %v2036_v26, %v1785_v62  ;;  %823 = vmatpush.bf16.msra.mxu1 %v2030_v28  ;;  %v1777_v0 = vld [vmem:[#allocation13 + $0x10] sm:$0xf]  ;;  %v1762_v62 = vor.u32 %v2078_v25, %v1761_v24  ;;  %v1763_v26 = vld [vmem:[#allocation15 + $0x78] sm:$0xf0]  ;;  %v1707_v24 = vld [vmem:[#allocation15 + $0x8] sm:$0xf0] }
  0x79   :  { %v1778_v30 = vor.u32 %v2034_v29, %v1777_v0  ;;  %v2111_v29 = vld [vmem:[#allocation9] ss:$0 sm:$0xff]  ;;  %v2045_v25 = vld [vmem:[#allocation13 + $0x74] sm:$0xf] }
  0x7a   :  { %1154 = vmatpush.bf16.msrb.mxu0 %v1826_v13  ;;  %v2052_v13 = vld [vmem:[#allocation13 + $0xa4] sm:$0xf0]  ;;  %968 = vmatpush.bf16.msra.mxu2 %v1762_v62  ;;  %v1891_v62 = vld [vmem:[#allocation13 + $0xf8] sm:$0xf0] }
  0x7b   :  { %v1850_v14 = vor.u32 %v2052_v13, %v1849_v12  ;;  %v1723_v12 = vld [vmem:[#allocation15 + $0x28] sm:$0xf0]  ;;  %v1722_v13 = vor.u32 %v2068_v10, %v1721_v9  ;;  %v2031_v9 = vld [vmem:[#allocation13 + $0x4] sm:$0xf] }
  0x7c   :  { %824 = vmatpush.bf16.msra.mxu1 %v2029_v31  ;;  %v1771_v10 = vld [vmem:[#allocation13 + $0x8] sm:$0xf0] }
  0x7e   :  { %1155 = vmatpush.bf16.msrb.mxu0 %v1818_v16  ;;  %v2050_v16 = vld [vmem:[#allocation13 + $0x94] sm:$0xf0] }
  0x7f   :  { %v1842_v17 = vor.u32 %v2050_v16, %v1841_v15  ;;  %v1713_v15 = vld [vmem:[#allocation15 + $0x10] sm:$0xf]  ;;  %v2066_v16 = vld [vmem:[#allocation15 + $0x14] sm:$0xf0] }
  0x80   :  { %825 = vmatpush.bf16.msra.mxu1 %v2028_v35 }
  0x82   :  { %1156 = vmatpush.bf16.msrb.mxu0 %v1810_v19  ;;  %v2048_v19 = vld [vmem:[#allocation13 + $0x84] sm:$0xf0] }
  0x83   :  { %v1834_v21 = vor.u32 %v2048_v19, %v1833_v18  ;;  %v1715_v18 = vld [vmem:[#allocation15 + $0x18] sm:$0xf0]  ;;  %v1714_v19 = vor.u32 %v2066_v16, %v1713_v15 }
  0x84   :  { %826 = vmatpush.bf16.msra.mxu1 %v2027_v36  ;;  %v2086_v15 = vld [vmem:[#allocation18 + $0x38] sm:$0xff] }
  0x85   :  { %1670 = vmatmul.msk.bf16.vlgmr.msra.gmra.mxu0 %vm732_vm1, %v726_v60  ;;  %v2077_v60 = vld [vmem:[#allocation15 + $0x74] sm:$0xf]  ;;  %v2094_v16 = vld [vmem:[#allocation18 + $0x78] sm:$0xff] }
  0x86   :  { %1157 = vmatpush.bf16.msrb.mxu0 %v1802_v23  ;;  %v1766_v28 = vor.u32 %v2077_v60, %v1763_v26  ;;  %v1827_v60 = vld [vmem:[#allocation13 + $0x78] sm:$0xf0] }
  0x88   :  { %827 = vmatpush.bf16.msra.mxu1 %v2026_v37  ;;  %981 = vmatpush.bf16.msra.mxu3 %v1766_v28  ;;  %v1830_v28 = vor.u32 %v2045_v25, %v1827_v60  ;;  %v2082_v25 = vld [vmem:[#allocation18 + $0x18] sm:$0xff] }
  0x8a   :  { %1158 = vmatpush.bf16.msrb.mxu0 %v1794_v56 }
  0x8c   :  { %828 = vmatpush.bf16.msra.mxu1 %v2025_v38 }
  0x8e   :  { %1159 = vmatpush.bf16.msrb.mxu0 %v1786_v27 }
  0x90   :  { %829 = vmatpush.bf16.msra.mxu1 %v2024_v40 }
  0x92   :  { %1160 = vmatpush.bf16.msrb.mxu0 %v1778_v30  ;;  %v286_v30 = vperm.slane %v2579_v39, 1  ;;  %v2075_v39 = vld [vmem:[#allocation15 + $0x64] sm:$0xf] }
  0x94   :  { %830 = vmatpush.bf16.msra.mxu1 %v2023_v44 }
  0x96   :  { %1161 = vmatpush.bf16.msrb.mxu0 %v1770_v34 }
  0x98   :  { %1167 = vmatpush.bf16.msrb.mxu1 %v1890_v48  ;;  %v1755_v48 = vld [vmem:[#allocation15 + $0x68] sm:$0xf0] }
  0x99   :  { %v1758_v51 = vor.u32 %v2075_v39, %v1755_v48 }
  0x9a   :  { %1350 = vmatpush.bf16.msra.mxu0 %v2086_v15 }
  0x9b   :  { %982 = vmatpush.bf16.msra.mxu3 %v1758_v51  ;;  %v1795_v51 = vld [vmem:[#allocation13 + $0x38] sm:$0xf0] }
  0x9c   :  { %1168 = vmatpush.bf16.msrb.mxu1 %v1882_v54 }
  0xa0   :  { %1169 = vmatpush.bf16.msrb.mxu1 %v1874_v1  ;;  %v1729_v1 = vld [vmem:[#allocation15 + $0x30] sm:$0xf] }
  0xa4   :  { %1170 = vmatpush.bf16.msrb.mxu1 %v1866_v7 }
  0xa8   :  { %1171 = vmatpush.bf16.msrb.mxu1 %v1858_v11  ;;  %v2067_v11 = vld [vmem:[#allocation15 + $0x24] sm:$0xf] }
  0xac   :  { %1172 = vmatpush.bf16.msrb.mxu1 %v1850_v14  ;;  %v1726_v14 = vor.u32 %v2067_v11, %v1723_v12  ;;  %v2047_v11 = vld [vmem:[#allocation13 + $0x84] sm:$0xf]  ;;  %v1774_v12 = vor.u32 %v2031_v9, %v1771_v10 }
  0xb0   :  { %1173 = vmatpush.bf16.msrb.mxu1 %v1842_v17  ;;  %v2065_v17 = vld [vmem:[#allocation15 + $0x14] sm:$0xf] }
  0xb4   :  { %1174 = vmatpush.bf16.msrb.mxu1 %v1834_v21  ;;  %v1705_v21 = vld [vmem:[#allocation15] sm:$0xf] }
  0xd2   :  { %v628_v43 = vpop.f32.mrf.mxu0 }
  0xd3   :  { %v629_v47 = vadd.f32 %v628_v43, %v285_v41 }
  0xd4   :  { %v641_v42 = vpop.f32.mrf.mxu1 }
  0xd5   :  { %v642_v49 = vadd.f32 %v641_v42, %v629_v47  ;;  %v1754_v47 = vor.u32 %v2076_v46, %v1753_v45  ;;  %v1803_v45 = vld [vmem:[#allocation13 + $0x48] sm:$0xf0]  ;;  %v2055_v46 = vld [vmem:[#allocation13 + $0xc4] sm:$0xf] }
  0xd7   :  { %969 = vmatpush.bf16.msra.mxu2 %v1754_v47  ;;  %v1867_v47 = vld [vmem:[#allocation13 + $0xc8] sm:$0xf0] }
  0xd8   :  { %v1870_v48 = vor.u32 %v2055_v46, %v1867_v47 }
  0xd9   :  { %v654_v50 = vpop.f32.mrf.mxu2 }
  0xda   :  { %v655_v53 = vadd.f32 %v654_v50, %v642_v49  ;;  %v630_v59 = vpop.f32.mrf.mxu0  ;;  %v1745_v49 = vld [vmem:[#allocation15 + $0x50] sm:$0xf]  ;;  %v2074_v50 = vld [vmem:[#allocation15 + $0x54] sm:$0xf0] }
  0xdb   :  { %v667_v55 = vpop.f32.mrf.mxu3  ;;  %v1746_v54 = vor.u32 %v2074_v50, %v1745_v49  ;;  %v2071_v59 = vld [vmem:[#allocation15 + $0x44] sm:$0xf]  ;;  %v2037_v50 = vld [vmem:[#allocation13 + $0x34] sm:$0xf] }
  0xdc   :  { %v643_v57 = vpop.f32.mrf.mxu1  ;;  %v668_v58 = vadd.f32 %v667_v55, %v655_v53  ;;  %v1747_v53 = vld [vmem:[#allocation15 + $0x58] sm:$0xf0] }
  0xdd   :  { %v1750_v55 = vor.u32 %v2073_v52, %v1747_v53  ;;  %970 = vmatpush.bf16.msra.mxu2 %v1746_v54  ;;  %v1737_v57 = vld [vmem:[#allocation15 + $0x40] sm:$0xf]  ;;  %v2053_v52 = vld [vmem:[#allocation13 + $0xb4] sm:$0xf]  ;;  %v1798_v53 = vor.u32 %v2037_v50, %v1795_v51  ;;  %v1859_v54 = vld [vmem:[#allocation13 + $0xb8] sm:$0xf0] }
  0xde   :  { %v723_v2 = vmax.f32 %v668_v58, 0.0  ;;  %v2072_v58 = vld [vmem:[#allocation15 + $0x44] sm:$0xf0] }
  0xdf   :  { %983 = vmatpush.bf16.msra.mxu3 %v1750_v55  ;;  %v1738_v61 = vor.u32 %v2072_v58, %v1737_v57  ;;  %v1862_v55 = vor.u32 %v2053_v52, %v1859_v54  ;;  %v2035_v57 = vld [vmem:[#allocation13 + $0x24] sm:$0xf]  ;;  %v1787_v58 = vld [vmem:[#allocation13 + $0x28] sm:$0xf0] }
  0xe0   :  { %v2582_v3 = vpack.c.bf16 %v723_v2, %v723_v2  ;;  %v2070_v2 = vld [vmem:[#allocation15 + $0x34] sm:$0xf0] }
  0xe1   :  { %v656_v4 = vpop.f32.mrf.mxu2  ;;  %971 = vmatpush.bf16.msra.mxu2 %v1738_v61  ;;  %v1730_v7 = vor.u32 %v2070_v2, %v1729_v1  ;;  %v1790_v61 = vor.u32 %v2035_v57, %v1787_v58  ;;  %v2033_v2 = vld [vmem:[#allocation13 + $0x14] sm:$0xf]  ;;  %v1376_v58 = vlaneseq }
  0xe2   :  { %1162 = vmatmul.bf16.vlgmr.msrb.gmra.mxu0 %v2582_v3  ;;  %v1742_v4 = vor.u32 %v2071_v59, %v1739_v63  ;;  %v2051_v59 = vld [vmem:[#allocation13 + $0xa4] sm:$0xf]  ;;  %v1851_v63 = vld [vmem:[#allocation13 + $0xa8] sm:$0xf0] }
  0xe3   :  { %v669_v8 = vpop.f32.mrf.mxu3  ;;  %v1854_v1 = vor.u32 %v2051_v59, %v1851_v63  ;;  %v2113_v59 = vld [vmem:[#allocation19] ss:$0 sm:$0xff] }
  0xe4   :  { %984 = vmatpush.bf16.msra.mxu3 %v1742_v4  ;;  %v1734_v8 = vor.u32 %v2069_v5, %v1731_v6  ;;  %v1779_v4 = vld [vmem:[#allocation13 + $0x18] sm:$0xf0]  ;;  %v2049_v5 = vld [vmem:[#allocation13 + $0x94] sm:$0xf] }
  0xe5   :  { %972 = vmatpush.bf16.msra.mxu2 %v1730_v7  ;;  %v1782_v6 = vor.u32 %v2033_v2, %v1779_v4  ;;  %v1843_v7 = vld [vmem:[#allocation13 + $0x98] sm:$0xf0] }
  0xe8   :  { %985 = vmatpush.bf16.msra.mxu3 %v1734_v8  ;;  %v1846_v8 = vor.u32 %v2049_v5, %v1843_v7 }
  0xe9   :  { %973 = vmatpush.bf16.msra.mxu2 %v1722_v13  ;;  %v1835_v13 = vld [vmem:[#allocation13 + $0x88] sm:$0xf0] }
  0xec   :  { %986 = vmatpush.bf16.msra.mxu3 %v1726_v14  ;;  %v1838_v14 = vor.u32 %v2047_v11, %v1835_v13 }
  0xed   :  { %974 = vmatpush.bf16.msra.mxu2 %v1714_v19  ;;  %v2084_v19 = vld [vmem:[#allocation18 + $0x28] sm:$0xff] }
  0xf2   :  { %v680_v20 = vpop.f32.mrf.mxu0 }
  0xf3   :  { %v681_v35 = vadd.f32 %v680_v20, %v286_v30  ;;  %v1718_v20 = vor.u32 %v2065_v17, %v1715_v18  ;;  %v1819_v30 = vld [vmem:[#allocation13 + $0x68] sm:$0xf0]  ;;  %v2085_v17 = vld [vmem:[#allocation18 + $0x30] sm:$0xff]  ;;  %v2112_v18 = vld [vmem:[#allocation12] ss:$0 sm:$0xff] }
  0xf4   :  { %v693_v22 = vpop.f32.mrf.mxu1  ;;  %1351 = vmatpush.bf16.msra.mxu0 %v2085_v17 }
  0xf5   :  { %v694_v38 = vadd.f32 %v693_v22, %v681_v35  ;;  %v2064_v22 = vld [vmem:[#allocation15 + $0x4] sm:$0xf0]  ;;  %987 = vmatpush.bf16.msra.mxu3 %v1718_v20 }
  0xf6   :  { %v1706_v26 = vor.u32 %v2064_v22, %v1705_v21  ;;  %v2083_v22 = vld [vmem:[#allocation18 + $0x20] sm:$0xff] }
  0xf8   :  { %975 = vmatpush.bf16.msra.mxu2 %v1706_v26  ;;  %1352 = vmatpush.bf16.msra.mxu0 %v2084_v19  ;;  %v2081_v26 = vld [vmem:[#allocation18 + $0x10] sm:$0xff] }
  0xf9   :  { %v706_v23 = vpop.f32.mrf.mxu2 }
  0xfa   :  { %v682_v56 = vpop.f32.mrf.mxu0  ;;  %v707_v41 = vadd.f32 %v706_v23, %v694_v38  ;;  %v2063_v23 = vld [vmem:[#allocation15 + $0x4] sm:$0xf]  ;;  %v2057_v38 = vld [vmem:[#allocation13 + $0xd4] sm:$0xf] }
  0xfb   :  { %v719_v27 = vpop.f32.mrf.mxu3  ;;  %v2061_v56 = vld [vmem:[#allocation13 + $0xf4] sm:$0xf] }
  0xfc   :  { %v695_v0 = vpop.f32.mrf.mxu1  ;;  %v720_v42 = vadd.f32 %v719_v27, %v707_v41  ;;  %v1710_v27 = vor.u32 %v2063_v23, %v1707_v24  ;;  %1180 = vmatpush.bf16.msrb.mxu2 %v1830_v28  ;;  %v1875_v41 = vld [vmem:[#allocation13 + $0xd8] sm:$0xf0]  ;;  %1353 = vmatpush.bf16.msra.mxu0 %v2083_v22  ;;  %v2080_v28 = vld [vmem:[#allocation18 + $0x8] sm:$0xff] }
  0xfd   :  { %v1894_v0 = vor.u32 %v2061_v56, %v1891_v62 }
  0xfe   :  { %v724_v43 = vmax.f32 %v720_v42, 0.0  ;;  %988 = vmatpush.bf16.msra.mxu3 %v1710_v27  ;;  %v1878_v42 = vor.u32 %v2057_v38, %v1875_v41  ;;  %v2093_v27 = vld [vmem:[#allocation18 + $0x70] sm:$0xff] }
 0x100   :  { %v2586_v44 = vpack.c.bf16 %v724_v43, %v724_v43  ;;  %v2039_v43 = vld [vmem:[#allocation13 + $0x44] sm:$0xf]  ;;  %1354 = vmatpush.bf16.msra.mxu0 %v2082_v25 }
 0x101   :  { %v708_v31 = vpop.f32.mrf.mxu2  ;;  %v1806_v39 = vor.u32 %v2039_v43, %v1803_v45 }
 0x102   :  { %v749_v32 = vpop.f32.mrf.mxu0  ;;  %v2059_v31 = vld [vmem:[#allocation13 + $0xe4] sm:$0xf]  ;;  %1193 = vmatpush.bf16.msrb.mxu3 %v1894_v0  ;;  %v2092_v0 = vld [vmem:[#allocation18 + $0x68] sm:$0xff] }
 0x103   :  { %v750_v33 = vadd.f32 %v2111_v29, %v749_v32  ;;  %v721_v34 = vpop.f32.mrf.mxu3  ;;  %v2043_v29 = vld [vmem:[#allocation13 + $0x64] sm:$0xf]  ;;  %v1883_v32 = vld [vmem:[#allocation13 + $0xe8] sm:$0xf0] }
 0x104   :  { %v1886_v34 = vor.u32 %v2059_v31, %v1883_v32  ;;  %1355 = vmatpush.bf16.msra.mxu0 %v2081_v26  ;;  %v2090_v31 = vld [vmem:[#allocation18 + $0x58] sm:$0xff]  ;;  %v2089_v32 = vld [vmem:[#allocation18 + $0x50] sm:$0xff] }
 0x105   :  { %v753_v36 = vmax.f32 %v750_v33, 0.0  ;;  %v1822_v33 = vor.u32 %v2043_v29, %v1819_v30  ;;  %v2079_v29 = vld [vmem:[#allocation18] sm:$0xff] }
 0x106   :  { %1194 = vmatpush.bf16.msrb.mxu3 %v1886_v34  ;;  %v2091_v30 = vld [vmem:[#allocation18 + $0x60] sm:$0xff] }
 0x107   :  { %v754_v37 = vpack.c.bf16 %v753_v36, %v753_v36  ;;  %1181 = vmatpush.bf16.msrb.mxu2 %v1822_v33  ;;  %v2041_v36 = vld [vmem:[#allocation13 + $0x54] sm:$0xf]  ;;  %v1206_v33 = vld [vmem:[#allocation16] sm:$0x3] }
 0x108   :  { %1356 = vmatpush.bf16.msra.mxu0 %v2080_v28  ;;  %v1208_v38 = vperm.slane %v1206_v33, 0 }
 0x109   :  { %831 = vmatmul.bf16.vlgmr.msra.gmra.mxu1 %v754_v37  ;;  %v1811_v37 = vld [vmem:[#allocation13 + $0x58] sm:$0xf0] }
 0x10a   :  { %v751_v40 = vpop.f32.mrf.mxu0  ;;  %1195 = vmatpush.bf16.msrb.mxu3 %v1878_v42  ;;  %1363 = vmatpush.bf16.msra.mxu1 %v2094_v16 }
 0x10b   :  { %v1814_v40 = vor.u32 %v2041_v36, %v1811_v37 }
 0x10c   :  { %1357 = vmatpush.bf16.msra.mxu0 %v2079_v29 }
 0x10d   :  { %1182 = vmatpush.bf16.msrb.mxu2 %v1814_v40 }
 0x10e   :  { %1196 = vmatpush.bf16.msrb.mxu3 %v1870_v48  ;;  %1364 = vmatpush.bf16.msra.mxu1 %v2093_v27 }
 0x111   :  { %1183 = vmatpush.bf16.msrb.mxu2 %v1806_v39 }
 0x112   :  { %1197 = vmatpush.bf16.msrb.mxu3 %v1862_v55  ;;  %1365 = vmatpush.bf16.msra.mxu1 %v2092_v0 }
 0x115   :  { %1184 = vmatpush.bf16.msrb.mxu2 %v1798_v53 }
 0x116   :  { %1198 = vmatpush.bf16.msrb.mxu3 %v1854_v1  ;;  %1366 = vmatpush.bf16.msra.mxu1 %v2091_v30 }
 0x119   :  { %1175 = vmatmul.bf16.vlgmr.msrb.gmra.mxu1 %v2586_v44  ;;  %1185 = vmatpush.bf16.msrb.mxu2 %v1790_v61  ;;  %v1377_v61 = vand.u32 127, %v1376_v58 }
 0x11a   :  { %1199 = vmatpush.bf16.msrb.mxu3 %v1846_v8  ;;  %1367 = vmatpush.bf16.msra.mxu1 %v2090_v31 }
 0x11b   :  { %vm1394_vm2 = vcmp.eq.s32.totalorder %v1377_v61, 10  ;;  %vm1378_vm3 = vcmp.lt.s32.totalorder %v1377_v61, 10 }
 0x11d   :  { %1186 = vmatpush.bf16.msrb.mxu2 %v1782_v6 }
 0x11e   :  { %1200 = vmatpush.bf16.msrb.mxu3 %v1838_v14  ;;  %1368 = vmatpush.bf16.msra.mxu1 %v2089_v32 }
 0x121   :  { %1187 = vmatpush.bf16.msrb.mxu2 %v1774_v12 }
 0x15f   :  { %v2589_v35 = vpop.f32.mrf.mxu0 }
 0x167   :  { %v1165_v49 = vpop.f32.mrf.mxu0 }
 0x168   :  { %v1209_v49 = vperm.slane %v1206_v33, 1 }
 0x186   :  { %v832_v20 = vpop.f32.mrf.mxu1 }
 0x187   :  { %v833_v21 = vadd.f32 %v2112_v18, %v832_v20 }
 0x189   :  { %v836_v23 = vmax.f32 %v833_v21, 0.0 }
 0x18b   :  { %v871_v24 = vpack.c.bf16 %v836_v23, %v836_v23 }
 0x18d   :  { %976 = vmatmul.bf16.vlgmr.msra.gmra.mxu2 %v871_v24  ;;  %989 = vmatmul.bf16.vlgmr.msra.gmra.mxu3 %v871_v24 }
 0x18e   :  { %v834_v60 = vpop.f32.mrf.mxu1 }
 0x196   :  { %v1176_v56 = vpop.f32.mrf.mxu1 }
 0x19d   :  { %1188 = vmatmul.bf16.vlgmr.msrb.gmra.mxu2 %v2582_v3  ;;  %1201 = vmatmul.bf16.vlgmr.msrb.gmra.mxu3 %v2586_v44  ;;  %v2088_v3 = vld [vmem:[#allocation18 + $0x48] sm:$0xff]  ;;  %v2087_v44 = vld [vmem:[#allocation18 + $0x40] sm:$0xff] }
 0x19e   :  { %v1178_v62 = vpop.f32.mrf.mxu1  ;;  %1369 = vmatpush.bf16.msra.mxu1 %v2088_v3 }
 0x1a2   :  { %1370 = vmatpush.bf16.msra.mxu1 %v2087_v44 }
 0x210   :  { %v977_v34 = vpop.f32.mrf.mxu2  ;;  %v990_v36 = vpop.f32.mrf.mxu3 }
 0x211   :  { %v1164_v37 = vadd.f32 %v2589_v35, %v977_v34 }
 0x213   :  { %v1177_v40 = vadd.f32 %v1176_v56, %v1164_v37 }
 0x215   :  { %v1212_v41 = vadd.f32 %v1208_v38, %v1177_v40 }
 0x217   :  { %v1214_v42 = vmax.f32 %v1212_v41, 0.0 }
 0x218   :  { %v979_v43 = vpop.f32.mrf.mxu2  ;;  %v992_v45 = vpop.f32.mrf.mxu3 }
 0x219   :  { %v1216_v46 = vpack.c.bf16 %v1214_v42, %v1214_v42 }
 0x21b   :  { %1358 = vmatmul.bf16.vlgmr.msra.gmra.mxu0 %v1216_v46 }
 0x220   :  { %v1189_v39 = vpop.f32.mrf.mxu2  ;;  %v1202_v47 = vpop.f32.mrf.mxu3 }
 0x221   :  { %v1190_v48 = vadd.f32 %v1189_v39, %v990_v36 }
 0x223   :  { %v1203_v50 = vadd.f32 %v1202_v47, %v1190_v48 }
 0x225   :  { %v1213_v51 = vadd.f32 %v1209_v49, %v1203_v50 }
 0x227   :  { %v1215_v52 = vmax.f32 %v1213_v51, 0.0 }
 0x228   :  { %v1191_v53 = vpop.f32.mrf.mxu2  ;;  %v1204_v54 = vpop.f32.mrf.mxu3 }
 0x229   :  { %v1217_v55 = vpack.c.bf16 %v1215_v52, %v1215_v52 }
 0x22b   :  { %1371 = vmatmul.bf16.vlgmr.msra.gmra.mxu1 %v1217_v55 }
 0x298   :  { %v1359_v35 = vpop.f32.mrf.mxu0 }
 0x299   :  { %v1360_v63 = vadd.f32 %v2113_v59, %v1359_v35 }
 0x2a0   :  { %v1361_v57 = vpop.f32.mrf.mxu0 }
 0x2a8   :  { %v1372_v1 = vpop.f32.mrf.mxu1 }
 0x2a9   :  { %v1373_v2 = vadd.f32 %v1372_v1, %v1360_v63 }
 0x2ab   :  { %v1395_v4 = vsel %vm1394_vm2, %v1373_v2, 0.0  ;;  %v1379_v5 = vsel %vm1378_vm3, %v1373_v2, -inf }
 0x2ac   :  { %v1396_v6 = vsel %vm1380_vm4, %v1395_v4, 0.0  ;;  %v1381_v7 = vsel %vm1380_vm4, %v1379_v5, -inf }
 0x2ad   :  { %1397 = vadd.xlane.f32.xlu1 %v1396_v6  ;;  %1382 = vmax.xlane.f32.xlu0 %v1381_v7 }
 0x2b0   :  { %v1374_v8 = vpop.f32.mrf.mxu1 }
 0x320   :  { %v1383_v9 = vpop.xlane.xlu0 %1382  ;;  %v1398_v15 = vpop.xlane.xlu1 %1397 }
 0x321   :  { %v1384_v10 = vsub.f32 %v1379_v5, %v1383_v9 }
 0x323   :  { %v1385_v11 = vmul.f32 1.442695, %v1384_v10 }
 0x325   :  { %2114 = vpow2.f32 %v1385_v11 }
 0x32b   :  { %v2115_v12 = vpop.eup %2114 }
 0x32c   :  { %v1387_v13 = vsel %vm1380_vm4, %v2115_v12, 0.0 }
 0x32d   :  { %1388 = vadd.xlane.f32.xlu0 %v1387_v13 }
 0x3a0   :  { %v1389_v14 = vpop.xlane.xlu0 %1388 }
 0x3a1   :  { %2116 = vlog2.f32 %v1389_v14 }
 0x3a2   :  { %2118 = vtanh.f32 %v1398_v15 }
 0x3a7   :  { %v2117_v16 = vpop.eup %2116 }
 0x3a8   :  { %v1391_v17 = vmul.f32 0.6931472, %v2117_v16  ;;  %v2119_v18 = vpop.eup %2118 }
 0x3a9   :  { %v1400_v21 = vsel %vm1394_vm2, %v2119_v18, 0.0 }
 0x3aa   :  { %v1392_v19 = vadd.f32 %v1391_v17, %v1383_v9 }
 0x3ac   :  { %v1393_v20 = vsub.f32 %v1379_v5, %v1392_v19 }
 0x3ae   :  { %v1401_v22 = vsel %vm1378_vm3, %v1393_v20, %v1400_v21 }
 0x3af   :  { %1402 = vst [vmem:[%s2614_s13] sm:$0x3] %v1401_v22 }
 0x3b0   :  { %1407 = vsyncpa [#allocation3], 1 }
 0x3b1   :  { %1408 = vsyncpa [#allocation5], 1 }
 0x3b2   :  { %1409 = vsyncpa [#allocation8], 1 }
 0x3b3   :  { %1410 = vsyncpa [#allocation11], 1 }
 0x3b4   :  { %1411 = vsyncpa [#allocation14], 1 }
 0x3b5   :  { %1412 = vsyncpa [#allocation17], 1 }
 0x3b6   :  { %1413 = vsyncpa [#allocation20], 1 }

// kernel: nnet_forward.9
= control target key start
LH: loop header
LB: loop body
LE: loop exit
PB: predicated region body
PF: predicated region fallthrough
CT: control target
= control target key end

     0   :  { %8 = vsyncpa [#allocation4], 0  ;;  %s3849_s0 = inlined_call_operand.vmem [shape: bf16[32,2304], index: 0, kind: input, shape index: {}]   ;;  %s3850_s1 = inlined_call_operand.hbm [shape: bf16[2304,512], index: 1, kind: input, shape index: {}]   ;;  %s3851_s2 = inlined_call_operand.hbm [shape: f32[1,512], index: 2, kind: input, shape index: {}]   ;;  %s3852_s3 = inlined_call_operand.vmem [shape: bf16[32,512], index: 3, kind: output, shape index: {}]  }
   0x1   :  { %10 = vsyncpa [#allocation4 + $0x1], 0 }
   0x2   :  { %11 = vsyncpa [#allocation6], 0 }
   0x3   :  { %13 = vsyncpa [#allocation6 + $0x1], 0  ;;  %s3369_s12 = smov 0   ;;  %s3371_s13 = smov 0  }
   0x4   :  { %s3373_s14 = smov 0   ;;  %s3375_s15 = smov 0  }
   0x5   :  { %s3377_s16 = smov 0   ;;  %s3379_s17 = smov 0  }
   0x6 LB: > { %s2225_s18 = sadd.s32 4294967295, %s3344_s17   ;;  %s34_s19 = sadd.s32 1, %s3340_s16  ;;  %s3344_s17 = sphi %s3379_s17, %s19_s17   ;;  %s3340_s16 = sphi %s3377_s16, %s3861_s16   ;;  %s3336_s15 = sphi %s3375_s15, %s3860_s15   ;;  %s3332_s14 = sphi %s3373_s14, %s3859_s14   ;;  %s3328_s13 = sphi %s3371_s13, %s3858_s13   ;;  %s3324_s12 = sphi %s3369_s12, %s3857_s12  }
   0x7   : > { %p36_p0 = scmp.ge.s32.totalorder %s34_s19, 4  ;;  %s75_s20 = sadd.s32 1, %s3332_s14 }
   0x8   : > { %p82_p1 = scmp.ne.s32.totalorder %s3332_s14, %s3328_s13  ;;  %p83_p2 = scmp.eq.s32.totalorder %s3344_s17, 0 }
   0x9   : > { %s3863_s19 = smov (%p36_p0, %s34_s19), 0  ;;  %p88_p4 = scmp.ne.s32.totalorder %s3328_s13, %s3324_s12 }
   0xa   : > { %p3405_p3 = por %p83_p2, %p82_p1  ;;  %s71_s22 = ssub.s32 %s3340_s16, %s3863_s19 }
   0xb   : > { %p89_p5 = scmp.eq.s32.totalorder %s2225_s18, 0  ;;  %p73_p6 = scmp.eq.s32.totalorder %s71_s22, 0 }
   0xc   : > { %p140_p7 = scmp.eq.s32.totalorder %s2225_s18, 3  ;;  %p3177_p10 = scmp.lt.s32.totalorder %s3344_s17, 4 }
   0xd   : > { %p3412_p8 = por %p89_p5, %p88_p4  ;;  %s181_s26 = sand.u32 1, %s3332_s14  }
   0xe   : > { %s3417_s24 = scalar_select %p73_p6, %s3332_s14, %s75_s20  }
   0xf   : > { %p3419_p9 = por %p140_p7, %p82_p1  ;;  %s2230_s27 = sshll.u32 %s3340_s16, 2 }
  0x10   : > { %s3164_s28 = smul.u32 1152, %s181_s26  ;;  %s192_s4 = scalar_lea.hbm %s3850_s1, %s2230_s27 }
  0x11   : > { %p3431_p11 = pnand %p3177_p10, %p3405_p3  ;;  %s193_s6 = sshll.u32 %s192_s4, 4  ;;  %s194_s6 = int_to_ptr.hbm [resolvable:$true] %s193_s6 }
  0x12   : > { %s185_s7 = scalar_lea.vmem [#allocation3], %s3164_s28  ;;  %p2231_p12 = scmp.ge.s32.totalorder %s3344_s17, 1 }
  0x13   : > { %s195_s8 = sshll.u32 %s185_s7, 4  ;;  %s182_s9 = scalar_lea.sflag [#allocation4], %s181_s26  ;;  %s196_s8 = int_to_ptr.vmem [resolvable:$true] %s195_s8 }
  0x14   : > { %s3346_s10 = smov 256   ;;  %s3347_s11 = smov 64  }
  0x15   : > { %s3348_s12 = smov 4   ;;  %p220_p13 = scmp.lt.s32.totalorder %s3344_s17, 5 }
  0x16   : > { %3173 = dma.hbm_to_vmem [thread:$0]  (!%p3431_p11), %s194_s6, 18432, %s196_s8, %s182_s9, %s3346_s10, %s3347_s11, %s3348_s12  }
  0x17   : > { %s211_s21 = scalar_lea.hbm %s3851_s2, %s3340_s16  ;;  %p221_p0 = pnand %p2231_p12, %p220_p13 }
  0x18   : > { %s213_s22 = sshll.u32 %s211_s21, 4  ;;  %s208_s27 = scalar_lea.vmem [#allocation5], %s181_s26  ;;  %s214_s22 = int_to_ptr.hbm [resolvable:$true] %s213_s22 }
  0x19   : > { %s215_s28 = sshll.u32 %s208_s27, 4  ;;  %s206_s29 = scalar_lea.sflag [#allocation6], %s181_s26  ;;  %s216_s28 = int_to_ptr.vmem [resolvable:$true] %s215_s28 }
  0x1a   : > { %3176 = dma.hbm_to_vmem [thread:$0]  (!%p3431_p11), %s214_s22, 16, %s216_s28, %s206_s29  }
  0x1b   : > { %224 = sbr.rel (%p221_p0) target bundleno = 357 (0x165), region = 32  ;;  %s3446_s30 = sand.u32 (!%p221_p0), 1, %s3328_s13  }
  0x1c   : > { %s3165_s4 = smul.u32 (!%p221_p0), 1152, %s3446_s30  ;;  %s227_s6 = scalar_lea.sflag (!%p221_p0), [#allocation4], %s3446_s30 }
  0x1e   : > { %s3450_s7 = scalar_lea.vmem (!%p221_p0), [#allocation3], %s3165_s4 }
  0x20   : > { %3315 = dma.done.wait (%p3412_p8), %s227_s6, 18432  }
  0x21   : > { %3317 = vsyncadd (%p3412_p8), %s227_s6, 4294948864  ;;  %s237_s26 = scalar_lea.sflag [#allocation6], %s3446_s30  ;;  %s239_s5 = scalar_lea.vmem [#allocation5], %s3446_s30 }
  0x22   : > { %3319 = dma.done.wait (%p3412_p8), %s237_s26, 16  }
  0x23   : > { %3321 = vsyncadd (%p3412_p8), %s237_s26, 4294967280  ;;  %v3000_v0 = vld [vmem:[%s3450_s7 + $0x38] sm:$0xff]  ;;  %v2999_v4 = vld [vmem:[%s3450_s7 + $0x30] sm:$0xff]  ;;  %s2232_s26 = sshll.u32 %s3446_s30, 4  ;;  %s2954_s30 = sshll.u32 (%p3419_p9), %s3336_s15, 2 }
  0x24   : > { %v3008_v1 = vld [vmem:[%s3450_s7 + $0x78] sm:$0xff]  ;;  %1674 = vmatpush.bf16.msra.mxu0 %v3000_v0  ;;  %v3007_v5 = vld [vmem:[%s3450_s7 + $0x70] sm:$0xff]  ;;  %v2998_v8 = vld [vmem:[%s3450_s7 + $0x28] sm:$0xff]  ;;  %s2054_s9 = scalar_lea.vmem (%p3419_p9), %s3852_s3, %s2954_s30 }
  0x25   : > { %v3016_v2 = vld [vmem:[%s3450_s7 + $0xb8] sm:$0xff]  ;;  %1693 = vmatpush.bf16.msra.mxu1 %v3008_v1  ;;  %v3015_v6 = vld [vmem:[%s3450_s7 + $0xb0] sm:$0xff]  ;;  %v3006_v9 = vld [vmem:[%s3450_s7 + $0x68] sm:$0xff] }
  0x26   : > { %v3024_v3 = vld [vmem:[%s3450_s7 + $0xf8] sm:$0xff]  ;;  %1712 = vmatpush.bf16.msra.mxu2 %v3016_v2  ;;  %v3023_v7 = vld [vmem:[%s3450_s7 + $0xf0] sm:$0xff]  ;;  %v3014_v10 = vld [vmem:[%s3450_s7 + $0xa8] sm:$0xff] }
  0x27   : > { %1731 = vmatpush.bf16.msra.mxu3 %v3024_v3  ;;  %v3022_v11 = vld [vmem:[%s3450_s7 + $0xe8] sm:$0xff]  ;;  %v2997_v12 = vld [vmem:[%s3450_s7 + $0x20] sm:$0xff]  ;;  %v2996_v16 = vld [vmem:[%s3450_s7 + $0x18] sm:$0xff] }
  0x28   : > { %1675 = vmatpush.bf16.msra.mxu0 %v2999_v4  ;;  %v3005_v13 = vld [vmem:[%s3450_s7 + $0x60] sm:$0xff]  ;;  %v3004_v17 = vld [vmem:[%s3450_s7 + $0x58] sm:$0xff]  ;;  %v2995_v20 = vld [vmem:[%s3450_s7 + $0x10] sm:$0xff] }
  0x29   : > { %1694 = vmatpush.bf16.msra.mxu1 %v3007_v5  ;;  %v3013_v14 = vld [vmem:[%s3450_s7 + $0xa0] sm:$0xff]  ;;  %v3012_v18 = vld [vmem:[%s3450_s7 + $0x98] sm:$0xff]  ;;  %v3003_v21 = vld [vmem:[%s3450_s7 + $0x50] sm:$0xff] }
  0x2a   : > { %1713 = vmatpush.bf16.msra.mxu2 %v3015_v6  ;;  %v3021_v15 = vld [vmem:[%s3450_s7 + $0xe0] sm:$0xff]  ;;  %v3020_v19 = vld [vmem:[%s3450_s7 + $0xd8] sm:$0xff]  ;;  %v3011_v22 = vld [vmem:[%s3450_s7 + $0x90] sm:$0xff] }
  0x2b   : > { %1732 = vmatpush.bf16.msra.mxu3 %v3023_v7  ;;  %v3019_v23 = vld [vmem:[%s3450_s7 + $0xd0] sm:$0xff]  ;;  %v2994_v24 = vld [vmem:[%s3450_s7 + $0x8] sm:$0xff]  ;;  %v2993_v28 = vld [vmem:[%s3450_s7] sm:$0xff] }
  0x2c   : > { %1676 = vmatpush.bf16.msra.mxu0 %v2998_v8  ;;  %v3002_v25 = vld [vmem:[%s3450_s7 + $0x48] sm:$0xff]  ;;  %v3001_v29 = vld [vmem:[%s3450_s7 + $0x40] sm:$0xff]  ;;  %v2967_v37 = vld [vmem:[%s3849_s0 + $0x4c] sm:$0xf0] }
  0x2d   : > { %1695 = vmatpush.bf16.msra.mxu1 %v3006_v9  ;;  %v3010_v26 = vld [vmem:[%s3450_s7 + $0x88] sm:$0xff]  ;;  %v3009_v30 = vld [vmem:[%s3450_s7 + $0x80] sm:$0xff]  ;;  %v2245_v39 = vld [vmem:[%s3849_s0 + $0x50] sm:$0xf0] }
  0x2e   : > { %1714 = vmatpush.bf16.msra.mxu2 %v3014_v10  ;;  %v3018_v27 = vld [vmem:[%s3450_s7 + $0xc8] sm:$0xff]  ;;  %v3017_v31 = vld [vmem:[%s3450_s7 + $0xc0] sm:$0xff]  ;;  %v3048_v40 = vld [vmem:[%s3450_s7 + $0x1b8] sm:$0xff] }
  0x2f   : > { %1733 = vmatpush.bf16.msra.mxu3 %v3022_v11  ;;  %v2235_v32 = vld [vmem:[%s3849_s0] sm:$0xf]  ;;  %v2966_v33 = vld [vmem:[%s3849_s0 + $0x44] sm:$0xf0]  ;;  %v2957_v34 = vld [vmem:[%s3849_s0 + $0x4] sm:$0xf] }
  0x30   : > { %1677 = vmatpush.bf16.msra.mxu0 %v2997_v12  ;;  %v2237_v35 = vld [vmem:[%s3849_s0 + $0x48] sm:$0xf0]  ;;  %v2243_v36 = vld [vmem:[%s3849_s0 + $0x8] sm:$0xf]  ;;  %v3032_v41 = vld [vmem:[%s3450_s7 + $0x138] sm:$0xff]  ;;  %v2236_v42 = vor.u32 %v2966_v33, %v2235_v32 }
  0x31   : > { %1696 = vmatpush.bf16.msra.mxu1 %v3005_v13  ;;  %v2958_v38 = vld [vmem:[%s3849_s0 + $0xc] sm:$0xf]  ;;  %v2240_v43 = vor.u32 %v2957_v34, %v2237_v35  ;;  %v2244_v44 = vor.u32 %v2967_v37, %v2243_v36  ;;  %v3040_v46 = vld [vmem:[%s3450_s7 + $0x178] sm:$0xff]  ;;  %v3047_v48 = vld [vmem:[%s3450_s7 + $0x1b0] sm:$0xff] }
  0x32   : > { %1715 = vmatpush.bf16.msra.mxu2 %v3013_v14  ;;  %v2248_v45 = vor.u32 %v2958_v38, %v2245_v39  ;;  %v3056_v47 = vld [vmem:[%s3450_s7 + $0x1f8] sm:$0xff]  ;;  %v3031_v49 = vld [vmem:[%s3450_s7 + $0x130] sm:$0xff]  ;;  %v3046_v52 = vld [vmem:[%s3450_s7 + $0x1a8] sm:$0xff] }
  0x33   : > { %1734 = vmatpush.bf16.msra.mxu3 %v3021_v15  ;;  %v3039_v50 = vld [vmem:[%s3450_s7 + $0x170] sm:$0xff]  ;;  %v3030_v53 = vld [vmem:[%s3450_s7 + $0x128] sm:$0xff]  ;;  %v3045_v56 = vld [vmem:[%s3450_s7 + $0x1a0] sm:$0xff] }
  0x34   : > { %1678 = vmatpush.bf16.msra.mxu0 %v2996_v16  ;;  %v3055_v51 = vld [vmem:[%s3450_s7 + $0x1f0] sm:$0xff]  ;;  %v3038_v54 = vld [vmem:[%s3450_s7 + $0x168] sm:$0xff]  ;;  %v3029_v57 = vld [vmem:[%s3450_s7 + $0x120] sm:$0xff] }
  0x35   : > { %1697 = vmatpush.bf16.msra.mxu1 %v3004_v17  ;;  %v3054_v55 = vld [vmem:[%s3450_s7 + $0x1e8] sm:$0xff]  ;;  %v3037_v58 = vld [vmem:[%s3450_s7 + $0x160] sm:$0xff]  ;;  %v2307_v60 = vld [vmem:[%s3849_s0 + $0x90] sm:$0xf] }
  0x36   : > { %1716 = vmatpush.bf16.msra.mxu2 %v3012_v18  ;;  %v3053_v59 = vld [vmem:[%s3450_s7 + $0x1e0] sm:$0xff]  ;;  %v2984_v61 = vld [vmem:[%s3849_s0 + $0xd4] sm:$0xf0]  ;;  %v2975_v62 = vld [vmem:[%s3849_s0 + $0x94] sm:$0xf] }
  0x37   : > { %1735 = vmatpush.bf16.msra.mxu3 %v3020_v19  ;;  %v2309_v63 = vld [vmem:[%s3849_s0 + $0xd8] sm:$0xf0]  ;;  %v2315_v0 = vld [vmem:[%s3849_s0 + $0x98] sm:$0xf]  ;;  %v2985_v1 = vld [vmem:[%s3849_s0 + $0xdc] sm:$0xf0]  ;;  %v2308_v6 = vor.u32 %v2984_v61, %v2307_v60 }
  0x38   : > { %1679 = vmatpush.bf16.msra.mxu0 %v2995_v20  ;;  %v2976_v2 = vld [vmem:[%s3849_s0 + $0x9c] sm:$0xf]  ;;  %v2317_v3 = vld [vmem:[%s3849_s0 + $0xe0] sm:$0xf0]  ;;  %v2312_v7 = vor.u32 %v2975_v62, %v2309_v63  ;;  %v2316_v8 = vor.u32 %v2985_v1, %v2315_v0  ;;  %v3043_v12 = vld [vmem:[%s3450_s7 + $0x190] sm:$0xff] }
  0x39   : > { %1698 = vmatpush.bf16.msra.mxu1 %v3003_v21  ;;  %v3044_v4 = vld [vmem:[%s3450_s7 + $0x198] sm:$0xff]  ;;  %v2320_v9 = vor.u32 %v2976_v2, %v2317_v3  ;;  %v3027_v13 = vld [vmem:[%s3450_s7 + $0x110] sm:$0xff]  ;;  %v3042_v16 = vld [vmem:[%s3450_s7 + $0x188] sm:$0xff] }
  0x3a   : > { %1717 = vmatpush.bf16.msra.mxu2 %v3011_v22  ;;  %v3028_v5 = vld [vmem:[%s3450_s7 + $0x118] sm:$0xff]  ;;  %v3035_v14 = vld [vmem:[%s3450_s7 + $0x150] sm:$0xff]  ;;  %v3026_v17 = vld [vmem:[%s3450_s7 + $0x108] sm:$0xff] }
  0x3b   : > { %1736 = vmatpush.bf16.msra.mxu3 %v3019_v23  ;;  %v3036_v10 = vld [vmem:[%s3450_s7 + $0x158] sm:$0xff]  ;;  %v3051_v15 = vld [vmem:[%s3450_s7 + $0x1d0] sm:$0xff]  ;;  %v3034_v18 = vld [vmem:[%s3450_s7 + $0x148] sm:$0xff] }
  0x3c   : > { %1680 = vmatpush.bf16.msra.mxu0 %v2994_v24  ;;  %v3052_v11 = vld [vmem:[%s3450_s7 + $0x1d8] sm:$0xff]  ;;  %v3050_v19 = vld [vmem:[%s3450_s7 + $0x1c8] sm:$0xff]  ;;  %v3041_v20 = vld [vmem:[%s3450_s7 + $0x180] sm:$0xff] }
  0x3d   : > { %1699 = vmatpush.bf16.msra.mxu1 %v3002_v25  ;;  %v3025_v21 = vld [vmem:[%s3450_s7 + $0x100] sm:$0xff]  ;;  %v2251_v24 = vld [vmem:[%s3849_s0 + $0x10] sm:$0xf]  ;;  %v3080_v25 = vld [vmem:[%s3450_s7 + $0x2b8] sm:$0xff] }
  0x3e   : > { %1718 = vmatpush.bf16.msra.mxu2 %v3010_v26  ;;  %v3033_v22 = vld [vmem:[%s3450_s7 + $0x140] sm:$0xff]  ;;  %v3064_v26 = vld [vmem:[%s3450_s7 + $0x238] sm:$0xff]  ;;  %v3079_v37 = vld [vmem:[%s3450_s7 + $0x2b0] sm:$0xff] }
  0x3f   : > { %1737 = vmatpush.bf16.msra.mxu3 %v3018_v27  ;;  %v3049_v23 = vld [vmem:[%s3450_s7 + $0x1c0] sm:$0xff]  ;;  %v2968_v27 = vld [vmem:[%s3849_s0 + $0x54] sm:$0xf0]  ;;  %v2960_v32 = vld [vmem:[%s3849_s0 + $0x1c] sm:$0xf] }
  0x40   : > { %1681 = vmatpush.bf16.msra.mxu0 %v2993_v28  ;;  %v2959_v28 = vld [vmem:[%s3849_s0 + $0x14] sm:$0xf]  ;;  %v2261_v33 = vld [vmem:[%s3849_s0 + $0x60] sm:$0xf0]  ;;  %v3072_v34 = vld [vmem:[%s3450_s7 + $0x278] sm:$0xff]  ;;  %v2252_v36 = vor.u32 %v2968_v27, %v2251_v24 }
  0x41   : > { %1700 = vmatpush.bf16.msra.mxu1 %v3001_v29  ;;  %v2253_v29 = vld [vmem:[%s3849_s0 + $0x58] sm:$0xf0]  ;;  %v2333_v61 = vld [vmem:[%s3849_s0 + $0xf0] sm:$0xf0]  ;;  %v2269_v24 = vld [vmem:[%s3849_s0 + $0x68] sm:$0xf0] }
  0x42   : > { %1719 = vmatpush.bf16.msra.mxu2 %v3009_v30  ;;  %v2259_v30 = vld [vmem:[%s3849_s0 + $0x18] sm:$0xf]  ;;  %v2256_v38 = vor.u32 %v2959_v28, %v2253_v29  ;;  %v3075_v1 = vld [vmem:[%s3450_s7 + $0x290] sm:$0xff]  ;;  %v2962_v27 = vld [vmem:[%s3849_s0 + $0x2c] sm:$0xf] }
  0x43   : > { %1738 = vmatpush.bf16.msra.mxu3 %v3017_v31  ;;  %1682 = vmatmul.bf16.vlgmr.msra.gmra.mxu0 %v2236_v42  ;;  %v2969_v31 = vld [vmem:[%s3849_s0 + $0x5c] sm:$0xf0]  ;;  %v3088_v35 = vld [vmem:[%s3450_s7 + $0x2f8] sm:$0xff]  ;;  %v3071_v42 = vld [vmem:[%s3450_s7 + $0x270] sm:$0xff] }
  0x44   : > { %1750 = vmatpush.bf16.msrb.mxu0 %v3032_v41  ;;  %1701 = vmatmul.bf16.vlgmr.msra.gmra.mxu1 %v2240_v43  ;;  %v2260_v39 = vor.u32 %v2969_v31, %v2259_v30  ;;  %v3063_v41 = vld [vmem:[%s3450_s7 + $0x230] sm:$0xff]  ;;  %v3060_v60 = vld [vmem:[%s3450_s7 + $0x218] sm:$0xff] }
  0x45   : > { %1720 = vmatmul.bf16.vlgmr.msra.gmra.mxu2 %v2244_v44  ;;  %1769 = vmatpush.bf16.msrb.mxu1 %v3040_v46  ;;  %v3087_v43 = vld [vmem:[%s3450_s7 + $0x2f0] sm:$0xff]  ;;  %v3078_v44 = vld [vmem:[%s3450_s7 + $0x2a8] sm:$0xff]  ;;  %v3068_v62 = vld [vmem:[%s3450_s7 + $0x258] sm:$0xff] }
  0x46   : > { %1788 = vmatpush.bf16.msrb.mxu2 %v3048_v40  ;;  %1739 = vmatmul.bf16.vlgmr.msra.gmra.mxu3 %v2248_v45  ;;  %v2264_v40 = vor.u32 %v2960_v32, %v2261_v33  ;;  %v3062_v45 = vld [vmem:[%s3450_s7 + $0x228] sm:$0xff]  ;;  %v3084_v63 = vld [vmem:[%s3450_s7 + $0x2d8] sm:$0xff]  ;;  %v2277_v28 = vld [vmem:[%s3849_s0 + $0x70] sm:$0xf0] }
  0x47   : > { %1807 = vmatpush.bf16.msrb.mxu3 %v3056_v47  ;;  %v3070_v46 = vld [vmem:[%s3450_s7 + $0x268] sm:$0xff]  ;;  %v3103_v30 = vld [vmem:[%s3450_s7 + $0x370] sm:$0xff]  ;;  %v2280_v33 = vor.u32 %v2962_v27, %v2277_v28  ;;  %v3133_v27 = vld [vmem:[%s3450_s7 + $0x460] sm:$0xff] }
  0x48   : > { %1751 = vmatpush.bf16.msrb.mxu0 %v3031_v49  ;;  %v3086_v47 = vld [vmem:[%s3450_s7 + $0x2e8] sm:$0xff]  ;;  %v3061_v49 = vld [vmem:[%s3450_s7 + $0x220] sm:$0xff]  ;;  %v3124_v28 = vld [vmem:[%s3450_s7 + $0x418] sm:$0xff] }
  0x49   : > { %1770 = vmatpush.bf16.msrb.mxu1 %v3039_v50  ;;  %v3069_v50 = vld [vmem:[%s3450_s7 + $0x260] sm:$0xff] }
  0x4a   : > { %1789 = vmatpush.bf16.msrb.mxu2 %v3047_v48  ;;  %v3077_v48 = vld [vmem:[%s3450_s7 + $0x2a0] sm:$0xff] }
  0x4b   : > { %1808 = vmatpush.bf16.msrb.mxu3 %v3055_v51  ;;  %v3085_v51 = vld [vmem:[%s3450_s7 + $0x2e0] sm:$0xff] }
  0x4c   : > { %1752 = vmatpush.bf16.msrb.mxu0 %v3030_v53  ;;  %v2986_v53 = vld [vmem:[%s3849_s0 + $0xe4] sm:$0xf0] }
  0x4d   : > { %1771 = vmatpush.bf16.msrb.mxu1 %v3038_v54  ;;  %v3076_v54 = vld [vmem:[%s3450_s7 + $0x298] sm:$0xff] }
  0x4e   : > { %1790 = vmatpush.bf16.msrb.mxu2 %v3046_v52  ;;  %v2323_v52 = vld [vmem:[%s3849_s0 + $0xa0] sm:$0xf] }
  0x4f   : > { %1809 = vmatpush.bf16.msrb.mxu3 %v3054_v55  ;;  %v2977_v55 = vld [vmem:[%s3849_s0 + $0xa4] sm:$0xf]  ;;  %v2324_v0 = vor.u32 %v2986_v53, %v2323_v52  ;;  %v2980_v52 = vld [vmem:[%s3849_s0 + $0xbc] sm:$0xf] }
  0x50   : > { %1753 = vmatpush.bf16.msrb.mxu0 %v3029_v57  ;;  %v2331_v57 = vld [vmem:[%s3849_s0 + $0xa8] sm:$0xf]  ;;  %v3092_v53 = vld [vmem:[%s3450_s7 + $0x318] sm:$0xff] }
  0x51   : > { %1772 = vmatpush.bf16.msrb.mxu1 %v3037_v58  ;;  %v2987_v58 = vld [vmem:[%s3849_s0 + $0xec] sm:$0xf0] }
  0x52   : > { %1791 = vmatpush.bf16.msrb.mxu2 %v3045_v56  ;;  %v2325_v56 = vld [vmem:[%s3849_s0 + $0xe8] sm:$0xf0]  ;;  %v2332_v3 = vor.u32 %v2987_v58, %v2331_v57  ;;  %v3099_v58 = vld [vmem:[%s3450_s7 + $0x350] sm:$0xff] }
  0x53   : > { %1810 = vmatpush.bf16.msrb.mxu3 %v3053_v59  ;;  %1687 = vmatmul.bf16.gmra.mxu0 %v2308_v6  ;;  %v2978_v59 = vld [vmem:[%s3849_s0 + $0xac] sm:$0xf]  ;;  %v2328_v2 = vor.u32 %v2977_v55, %v2325_v56  ;;  %v3067_v6 = vld [vmem:[%s3450_s7 + $0x250] sm:$0xff]  ;;  %v3116_v55 = vld [vmem:[%s3450_s7 + $0x3d8] sm:$0xff] }
  0x54   : > { %1754 = vmatpush.bf16.msrb.mxu0 %v3028_v5  ;;  %1706 = vmatmul.bf16.gmra.mxu1 %v2312_v7  ;;  %v3059_v5 = vld [vmem:[%s3450_s7 + $0x210] sm:$0xff] }
  0x55   : > { %1725 = vmatmul.bf16.gmra.mxu2 %v2316_v8  ;;  %1773 = vmatpush.bf16.msrb.mxu1 %v3036_v10  ;;  %v3083_v7 = vld [vmem:[%s3450_s7 + $0x2d0] sm:$0xff]  ;;  %v3074_v8 = vld [vmem:[%s3450_s7 + $0x288] sm:$0xff] }
  0x56   : > { %1792 = vmatpush.bf16.msrb.mxu2 %v3044_v4  ;;  %1744 = vmatmul.bf16.gmra.mxu3 %v2320_v9  ;;  %v2336_v4 = vor.u32 %v2978_v59, %v2333_v61  ;;  %v3058_v9 = vld [vmem:[%s3450_s7 + $0x208] sm:$0xff]  ;;  %v3107_v56 = vld [vmem:[%s3450_s7 + $0x390] sm:$0xff] }
  0x57   : > { %1811 = vmatpush.bf16.msrb.mxu3 %v3052_v11  ;;  %v3066_v10 = vld [vmem:[%s3450_s7 + $0x248] sm:$0xff] }
  0x58   : > { %1755 = vmatpush.bf16.msrb.mxu0 %v3027_v13  ;;  %v3082_v11 = vld [vmem:[%s3450_s7 + $0x2c8] sm:$0xff]  ;;  %v3112_v13 = vld [vmem:[%s3450_s7 + $0x3b8] sm:$0xff] }
  0x59   : > { %1774 = vmatpush.bf16.msrb.mxu1 %v3035_v14  ;;  %v3057_v14 = vld [vmem:[%s3450_s7 + $0x200] sm:$0xff] }
  0x5a   : > { %1793 = vmatpush.bf16.msrb.mxu2 %v3043_v12  ;;  %v3073_v12 = vld [vmem:[%s3450_s7 + $0x280] sm:$0xff] }
  0x5b   : > { %1812 = vmatpush.bf16.msrb.mxu3 %v3051_v15  ;;  %v3065_v15 = vld [vmem:[%s3450_s7 + $0x240] sm:$0xff] }
  0x5c   : > { %1756 = vmatpush.bf16.msrb.mxu0 %v3026_v17  ;;  %v2267_v17 = vld [vmem:[%s3849_s0 + $0x20] sm:$0xf] }
  0x5d   : > { %1775 = vmatpush.bf16.msrb.mxu1 %v3034_v18  ;;  %v2970_v18 = vld [vmem:[%s3849_s0 + $0x64] sm:$0xf0] }
  0x5e   : > { %1794 = vmatpush.bf16.msrb.mxu2 %v3042_v16  ;;  %v3081_v16 = vld [vmem:[%s3450_s7 + $0x2c0] sm:$0xff]  ;;  %v2268_v29 = vor.u32 %v2970_v18, %v2267_v17  ;;  %v2964_v18 = vld [vmem:[%s3849_s0 + $0x3c] sm:$0xf] }
  0x5f   : > { %1813 = vmatpush.bf16.msrb.mxu3 %v3050_v19  ;;  %v3096_v19 = vld [vmem:[%s3450_s7 + $0x338] sm:$0xff]  ;;  %v2973_v17 = vld [vmem:[%s3849_s0 + $0x7c] sm:$0xf0] }
  0x60   : > { %1757 = vmatpush.bf16.msrb.mxu0 %v3025_v21  ;;  %v2961_v21 = vld [vmem:[%s3849_s0 + $0x24] sm:$0xf] }
  0x61   : > { %1776 = vmatpush.bf16.msrb.mxu1 %v3033_v22  ;;  %v3120_v22 = vld [vmem:[%s3450_s7 + $0x3f8] sm:$0xff]  ;;  %v2272_v31 = vor.u32 %v2961_v21, %v2269_v24  ;;  %v3126_v24 = vld [vmem:[%s3450_s7 + $0x428] sm:$0xff] }
  0x62   : > { %1795 = vmatpush.bf16.msrb.mxu2 %v3041_v20  ;;  %v3104_v20 = vld [vmem:[%s3450_s7 + $0x378] sm:$0xff] }
  0x63   : > { %1814 = vmatpush.bf16.msrb.mxu3 %v3049_v23  ;;  %1758 = vmatmul.bf16.vlgmr.msrb.gmra.mxu0 %v2252_v36  ;;  %v3111_v23 = vld [vmem:[%s3450_s7 + $0x3b0] sm:$0xff]  ;;  %v3110_v36 = vld [vmem:[%s3450_s7 + $0x3a8] sm:$0xff] }
  0x64   : > { %1826 = vmatpush.bf16.msra.mxu0 %v3064_v26  ;;  %1777 = vmatmul.bf16.vlgmr.msrb.gmra.mxu1 %v2256_v38  ;;  %v2971_v26 = vld [vmem:[%s3849_s0 + $0x6c] sm:$0xf0]  ;;  %v3094_v38 = vld [vmem:[%s3450_s7 + $0x328] sm:$0xff] }
  0x65   : > { %1845 = vmatpush.bf16.msra.mxu1 %v3072_v34  ;;  %1796 = vmatmul.bf16.vlgmr.msrb.gmra.mxu2 %v2260_v39  ;;  %v3095_v34 = vld [vmem:[%s3450_s7 + $0x330] sm:$0xff]  ;;  %v3118_v39 = vld [vmem:[%s3450_s7 + $0x3e8] sm:$0xff] }
  0x66   : > { %1864 = vmatpush.bf16.msra.mxu2 %v3080_v25  ;;  %1815 = vmatmul.bf16.vlgmr.msrb.gmra.mxu3 %v2264_v40  ;;  %v2275_v25 = vld [vmem:[%s3849_s0 + $0x28] sm:$0xf]  ;;  %v3109_v40 = vld [vmem:[%s3450_s7 + $0x3a0] sm:$0xff] }
  0x67   : > { %1883 = vmatpush.bf16.msra.mxu3 %v3088_v35  ;;  %v2276_v32 = vor.u32 %v2971_v26, %v2275_v25  ;;  %v3119_v35 = vld [vmem:[%s3450_s7 + $0x3f0] sm:$0xff]  ;;  %v3134_v25 = vld [vmem:[%s3450_s7 + $0x468] sm:$0xff]  ;;  %v3125_v26 = vld [vmem:[%s3450_s7 + $0x420] sm:$0xff] }
  0x68   : > { %1827 = vmatpush.bf16.msra.mxu0 %v3063_v41  ;;  %v3101_v41 = vld [vmem:[%s3450_s7 + $0x360] sm:$0xff] }
  0x69   : > { %1846 = vmatpush.bf16.msra.mxu1 %v3071_v42  ;;  %v3093_v42 = vld [vmem:[%s3450_s7 + $0x320] sm:$0xff] }
  0x6a   : > { %1865 = vmatpush.bf16.msra.mxu2 %v3079_v37  ;;  %v3102_v37 = vld [vmem:[%s3450_s7 + $0x368] sm:$0xff] }
  0x6b   : > { %1884 = vmatpush.bf16.msra.mxu3 %v3087_v43  ;;  %v3117_v43 = vld [vmem:[%s3450_s7 + $0x3e0] sm:$0xff] }
  0x6c   : > { %1828 = vmatpush.bf16.msra.mxu0 %v3062_v45  ;;  %v2339_v45 = vld [vmem:[%s3849_s0 + $0xb0] sm:$0xf] }
  0x6d   : > { %1847 = vmatpush.bf16.msra.mxu1 %v3070_v46  ;;  %v2988_v46 = vld [vmem:[%s3849_s0 + $0xf4] sm:$0xf0] }
  0x6e   : > { %1866 = vmatpush.bf16.msra.mxu2 %v3078_v44  ;;  %v3108_v44 = vld [vmem:[%s3450_s7 + $0x398] sm:$0xff]  ;;  %v2340_v57 = vor.u32 %v2988_v46, %v2339_v45  ;;  %v3130_v45 = vld [vmem:[%s3450_s7 + $0x448] sm:$0xff]  ;;  %v3121_v46 = vld [vmem:[%s3450_s7 + $0x400] sm:$0xff] }
  0x6f   : > { %1885 = vmatpush.bf16.msra.mxu3 %v3086_v47  ;;  %v3100_v47 = vld [vmem:[%s3450_s7 + $0x358] sm:$0xff] }
  0x70   : > { %1829 = vmatpush.bf16.msra.mxu0 %v3061_v49  ;;  %v2341_v49 = vld [vmem:[%s3849_s0 + $0xf8] sm:$0xf0] }
  0x71   : > { %1848 = vmatpush.bf16.msra.mxu1 %v3069_v50  ;;  %v2347_v50 = vld [vmem:[%s3849_s0 + $0xb8] sm:$0xf] }
  0x72   : > { %1867 = vmatpush.bf16.msra.mxu2 %v3077_v48  ;;  %v2979_v48 = vld [vmem:[%s3849_s0 + $0xb4] sm:$0xf] }
  0x73   : > { %1886 = vmatpush.bf16.msra.mxu3 %v3085_v51  ;;  %1763 = vmatmul.bf16.gmra.mxu0 %v2324_v0  ;;  %v2989_v51 = vld [vmem:[%s3849_s0 + $0xfc] sm:$0xf0]  ;;  %v2344_v59 = vor.u32 %v2979_v48, %v2341_v49  ;;  %v3106_v0 = vld [vmem:[%s3450_s7 + $0x388] sm:$0xff] }
  0x74   : > { %1830 = vmatpush.bf16.msra.mxu0 %v3060_v60  ;;  %1782 = vmatmul.bf16.gmra.mxu1 %v2328_v2  ;;  %v2348_v60 = vor.u32 %v2989_v51, %v2347_v50  ;;  %v3090_v2 = vld [vmem:[%s3450_s7 + $0x308] sm:$0xff]  ;;  %v2299_v48 = vld [vmem:[%s3849_s0 + $0x40] sm:$0xf]  ;;  %v2371_v50 = vld [vmem:[%s3849_s0 + $0xd0] sm:$0xf] }
  0x75   : > { %1849 = vmatpush.bf16.msra.mxu1 %v3068_v62  ;;  %1801 = vmatmul.bf16.gmra.mxu2 %v2332_v3  ;;  %v3091_v62 = vld [vmem:[%s3450_s7 + $0x310] sm:$0xff]  ;;  %v3114_v3 = vld [vmem:[%s3450_s7 + $0x3c8] sm:$0xff]  ;;  %v2992_v51 = vld [vmem:[%s3849_s0 + $0x114] sm:$0xf0] }
  0x76   : > { %1868 = vmatpush.bf16.msra.mxu2 %v3076_v54  ;;  %1820 = vmatmul.bf16.gmra.mxu3 %v2336_v4  ;;  %v2349_v54 = vld [vmem:[%s3849_s0 + $0x100] sm:$0xf0]  ;;  %v2974_v49 = vld [vmem:[%s3849_s0 + $0x84] sm:$0xf0] }
  0x77   : > { %1887 = vmatpush.bf16.msra.mxu3 %v3084_v63  ;;  %v2352_v61 = vor.u32 %v2980_v52, %v2349_v54  ;;  %v3115_v63 = vld [vmem:[%s3450_s7 + $0x3d0] sm:$0xff]  ;;  %v3105_v4 = vld [vmem:[%s3450_s7 + $0x380] sm:$0xff] }
  0x78   : > { %1831 = vmatpush.bf16.msra.mxu0 %v3059_v5  ;;  %v3097_v5 = vld [vmem:[%s3450_s7 + $0x340] sm:$0xff]  ;;  %v2983_v54 = vld [vmem:[%s3849_s0 + $0xd4] sm:$0xf] }
  0x79   : > { %1850 = vmatpush.bf16.msra.mxu1 %v3067_v6  ;;  %v3128_v6 = vld [vmem:[%s3450_s7 + $0x438] sm:$0xff]  ;;  %v2965_v52 = vld [vmem:[%s3849_s0 + $0x44] sm:$0xf] }
  0x7a   : > { %1869 = vmatpush.bf16.msra.mxu2 %v3075_v1  ;;  %v3098_v1 = vld [vmem:[%s3450_s7 + $0x348] sm:$0xff] }
  0x7b   : > { %1888 = vmatpush.bf16.msra.mxu3 %v3083_v7  ;;  %v3136_v7 = vld [vmem:[%s3450_s7 + $0x478] sm:$0xff] }
  0x7c   : > { %1832 = vmatpush.bf16.msra.mxu0 %v3058_v9  ;;  %v3113_v9 = vld [vmem:[%s3450_s7 + $0x3c0] sm:$0xff] }
  0x7d   : > { %1851 = vmatpush.bf16.msra.mxu1 %v3066_v10  ;;  %v2283_v10 = vld [vmem:[%s3849_s0 + $0x30] sm:$0xf] }
  0x7e   : > { %1870 = vmatpush.bf16.msra.mxu2 %v3074_v8  ;;  %v3089_v8 = vld [vmem:[%s3450_s7 + $0x300] sm:$0xff] }
  0x7f   : > { %1889 = vmatpush.bf16.msra.mxu3 %v3082_v11  ;;  %v3127_v11 = vld [vmem:[%s3450_s7 + $0x430] sm:$0xff] }
  0x80   : > { %1833 = vmatpush.bf16.msra.mxu0 %v3057_v14  ;;  %v3135_v14 = vld [vmem:[%s3450_s7 + $0x470] sm:$0xff] }
  0x81   : > { %1852 = vmatpush.bf16.msra.mxu1 %v3065_v15  ;;  %v2285_v15 = vld [vmem:[%s3849_s0 + $0x78] sm:$0xf0] }
  0x82   : > { %1871 = vmatpush.bf16.msra.mxu2 %v3073_v12  ;;  %v2972_v12 = vld [vmem:[%s3849_s0 + $0x74] sm:$0xf0] }
  0x83   : > { %1890 = vmatpush.bf16.msra.mxu3 %v3081_v16  ;;  %1834 = vmatmul.bf16.vlgmr.msra.gmra.mxu0 %v2268_v29  ;;  %v2291_v16 = vld [vmem:[%s3849_s0 + $0x38] sm:$0xf] }
  0x84   : > { %1902 = vmatpush.bf16.msrb.mxu0 %v3096_v19  ;;  %1853 = vmatmul.bf16.vlgmr.msra.gmra.mxu1 %v2272_v31  ;;  %v2293_v19 = vld [vmem:[%s3849_s0 + $0x80] sm:$0xf0]  ;;  %v3132_v29 = vld [vmem:[%s3450_s7 + $0x458] sm:$0xff]  ;;  %v2990_v31 = vld [vmem:[%s3849_s0 + $0x104] sm:$0xf0] }
  0x85   : > { %1921 = vmatpush.bf16.msrb.mxu1 %v3104_v20  ;;  %1872 = vmatmul.bf16.vlgmr.msra.gmra.mxu2 %v2276_v32  ;;  %v2284_v20 = vor.u32 %v2972_v12, %v2283_v10  ;;  %v2981_v32 = vld [vmem:[%s3849_s0 + $0xc4] sm:$0xf] }
  0x86   : > { %1940 = vmatpush.bf16.msrb.mxu2 %v3112_v13  ;;  %1891 = vmatmul.bf16.vlgmr.msra.gmra.mxu3 %v2280_v33  ;;  %v2963_v13 = vld [vmem:[%s3849_s0 + $0x34] sm:$0xf]  ;;  %v2357_v33 = vld [vmem:[%s3849_s0 + $0x108] sm:$0xf0] }
  0x87   : > { %1959 = vmatpush.bf16.msrb.mxu3 %v3120_v22  ;;  %v2288_v21 = vor.u32 %v2963_v13, %v2285_v15  ;;  %v2292_v22 = vor.u32 %v2973_v17, %v2291_v16 }
  0x88   : > { %1903 = vmatpush.bf16.msrb.mxu0 %v3095_v34  ;;  %v2363_v34 = vld [vmem:[%s3849_s0 + $0xc8] sm:$0xf] }
  0x89   : > { %1922 = vmatpush.bf16.msrb.mxu1 %v3103_v30  ;;  %v2355_v30 = vld [vmem:[%s3849_s0 + $0xc0] sm:$0xf] }
  0x8a   : > { %1941 = vmatpush.bf16.msrb.mxu2 %v3111_v23  ;;  %v2296_v23 = vor.u32 %v2964_v18, %v2293_v19 }
  0x8b   : > { %1960 = vmatpush.bf16.msrb.mxu3 %v3119_v35  ;;  %v2991_v35 = vld [vmem:[%s3849_s0 + $0x10c] sm:$0xf0] }
  0x8c   : > { %1904 = vmatpush.bf16.msrb.mxu0 %v3094_v38  ;;  %v2365_v38 = vld [vmem:[%s3849_s0 + $0x110] sm:$0xf0] }
  0x8d   : > { %1923 = vmatpush.bf16.msrb.mxu1 %v3102_v37  ;;  %v2982_v37 = vld [vmem:[%s3849_s0 + $0xcc] sm:$0xf] }
  0x8e   : > { %1942 = vmatpush.bf16.msrb.mxu2 %v3110_v36  ;;  %v3123_v36 = vld [vmem:[%s3450_s7 + $0x410] sm:$0xff] }
  0x8f   : > { %1961 = vmatpush.bf16.msrb.mxu3 %v3118_v39  ;;  %v3131_v39 = vld [vmem:[%s3450_s7 + $0x450] sm:$0xff] }
  0x90   : > { %1905 = vmatpush.bf16.msrb.mxu0 %v3093_v42  ;;  %v2364_v42 = vor.u32 %v2991_v35, %v2363_v34 }
  0x91   : > { %1924 = vmatpush.bf16.msrb.mxu1 %v3101_v41  ;;  %v2360_v41 = vor.u32 %v2981_v32, %v2357_v33 }
  0x92   : > { %1943 = vmatpush.bf16.msrb.mxu2 %v3109_v40  ;;  %v2356_v40 = vor.u32 %v2990_v31, %v2355_v30 }
  0x93   : > { %1962 = vmatpush.bf16.msrb.mxu3 %v3117_v43  ;;  %1839 = vmatmul.bf16.gmra.mxu0 %v2340_v57  ;;  %v2368_v43 = vor.u32 %v2982_v37, %v2365_v38 }
  0x94   : > { %1906 = vmatpush.bf16.msrb.mxu0 %v3092_v53  ;;  %1858 = vmatmul.bf16.gmra.mxu1 %v2344_v59  ;;  %v2301_v53 = vld [vmem:[%s3849_s0 + $0x88] sm:$0xf0]  ;;  %v2372_v59 = vor.u32 %v2992_v51, %v2371_v50 }
  0x95   : > { %1925 = vmatpush.bf16.msrb.mxu1 %v3100_v47  ;;  %1877 = vmatmul.bf16.gmra.mxu2 %v2348_v60  ;;  %v3129_v47 = vld [vmem:[%s3450_s7 + $0x440] sm:$0xff]  ;;  %v2304_v60 = vor.u32 %v2965_v52, %v2301_v53 }
  0x96   : > { %1944 = vmatpush.bf16.msrb.mxu2 %v3108_v44  ;;  %1896 = vmatmul.bf16.gmra.mxu3 %v2352_v61  ;;  %v3122_v44 = vld [vmem:[%s3450_s7 + $0x408] sm:$0xff] }
  0x97   : > { %1963 = vmatpush.bf16.msrb.mxu3 %v3116_v55  ;;  %v2373_v55 = vld [vmem:[%s3849_s0 + $0x118] sm:$0xf0] }
  0x98   : > { %1907 = vmatpush.bf16.msrb.mxu0 %v3091_v62  ;;  %v2376_v62 = vor.u32 %v2983_v54, %v2373_v55 }
  0x99   : > { %1926 = vmatpush.bf16.msrb.mxu1 %v3099_v58 }
  0x9a   : > { %1945 = vmatpush.bf16.msrb.mxu2 %v3107_v56  ;;  %v2300_v56 = vor.u32 %v2974_v49, %v2299_v48 }
  0x9b   : > { %1964 = vmatpush.bf16.msrb.mxu3 %v3115_v63 }
  0x9c   : > { %1908 = vmatpush.bf16.msrb.mxu0 %v3090_v2 }
  0x9d   : > { %1927 = vmatpush.bf16.msrb.mxu1 %v3098_v1 }
  0x9e   : > { %1946 = vmatpush.bf16.msrb.mxu2 %v3106_v0 }
  0x9f   : > { %1965 = vmatpush.bf16.msrb.mxu3 %v3114_v3 }
  0xa0   : > { %1909 = vmatpush.bf16.msrb.mxu0 %v3089_v8 }
  0xa1   : > { %1928 = vmatpush.bf16.msrb.mxu1 %v3097_v5 }
  0xa2   : > { %1947 = vmatpush.bf16.msrb.mxu2 %v3105_v4 }
  0xa3   : > { %1966 = vmatpush.bf16.msrb.mxu3 %v3113_v9  ;;  %1910 = vmatmul.bf16.vlgmr.msrb.gmra.mxu0 %v2284_v20 }
  0xa4   : > { %1978 = vmatpush.bf16.msra.mxu0 %v3128_v6  ;;  %1929 = vmatmul.bf16.vlgmr.msrb.gmra.mxu1 %v2288_v21 }
  0xa5   : > { %1997 = vmatpush.bf16.msra.mxu1 %v3136_v7  ;;  %1948 = vmatmul.bf16.vlgmr.msrb.gmra.mxu2 %v2292_v22 }
  0xa6   : > { %3148 = vmatpush.bf16.msra.mxu2 %v3128_v6  ;;  %1967 = vmatmul.bf16.vlgmr.msrb.gmra.mxu3 %v2296_v23 }
  0xa7   : > { %3156 = vmatpush.bf16.msra.mxu3 %v3136_v7 }
  0xa8   : > { %1979 = vmatpush.bf16.msra.mxu0 %v3127_v11 }
  0xa9   : > { %1998 = vmatpush.bf16.msra.mxu1 %v3135_v14 }
  0xaa   : > { %3149 = vmatpush.bf16.msra.mxu2 %v3127_v11 }
  0xab   : > { %3157 = vmatpush.bf16.msra.mxu3 %v3135_v14 }
  0xac   : > { %1980 = vmatpush.bf16.msra.mxu0 %v3126_v24 }
  0xad   : > { %1999 = vmatpush.bf16.msra.mxu1 %v3134_v25 }
  0xae   : > { %3150 = vmatpush.bf16.msra.mxu2 %v3126_v24 }
  0xaf   : > { %3158 = vmatpush.bf16.msra.mxu3 %v3134_v25 }
  0xb0   : > { %1981 = vmatpush.bf16.msra.mxu0 %v3125_v26 }
  0xb1   : > { %2000 = vmatpush.bf16.msra.mxu1 %v3133_v27 }
  0xb2   : > { %3151 = vmatpush.bf16.msra.mxu2 %v3125_v26 }
  0xb3   : > { %3159 = vmatpush.bf16.msra.mxu3 %v3133_v27  ;;  %1915 = vmatmul.bf16.gmra.mxu0 %v2356_v40 }
  0xb4   : > { %1982 = vmatpush.bf16.msra.mxu0 %v3124_v28  ;;  %1934 = vmatmul.bf16.gmra.mxu1 %v2360_v41 }
  0xb5   : > { %2001 = vmatpush.bf16.msra.mxu1 %v3132_v29  ;;  %1953 = vmatmul.bf16.gmra.mxu2 %v2364_v42 }
  0xb6   : > { %3152 = vmatpush.bf16.msra.mxu2 %v3124_v28  ;;  %1972 = vmatmul.bf16.gmra.mxu3 %v2368_v43 }
  0xb7   : > { %3160 = vmatpush.bf16.msra.mxu3 %v3132_v29 }
  0xb8   : > { %1983 = vmatpush.bf16.msra.mxu0 %v3123_v36 }
  0xb9   : > { %2002 = vmatpush.bf16.msra.mxu1 %v3131_v39 }
  0xba   : > { %3153 = vmatpush.bf16.msra.mxu2 %v3123_v36 }
  0xbb   : > { %3161 = vmatpush.bf16.msra.mxu3 %v3131_v39 }
  0xbc   : > { %1984 = vmatpush.bf16.msra.mxu0 %v3122_v44 }
  0xbd   : > { %2003 = vmatpush.bf16.msra.mxu1 %v3130_v45 }
  0xbe   : > { %3154 = vmatpush.bf16.msra.mxu2 %v3122_v44 }
  0xbf   : > { %3162 = vmatpush.bf16.msra.mxu3 %v3130_v45 }
  0xc0   : > { %1985 = vmatpush.bf16.msra.mxu0 %v3121_v46  ;;  %v1683_v57 = vpop.f32.mrf.mxu0 }
  0xc1   : > { %2004 = vmatpush.bf16.msra.mxu1 %v3129_v47  ;;  %v1702_v58 = vpop.f32.mrf.mxu1 }
  0xc2   : > { %3155 = vmatpush.bf16.msra.mxu2 %v3121_v46  ;;  %v1703_v61 = vadd.f32 %v1702_v58, %v1683_v57 }
  0xc3   : > { %3163 = vmatpush.bf16.msra.mxu3 %v3129_v47  ;;  %1986 = vmatmul.bf16.vlgmr.msra.gmra.mxu0 %v2300_v56 }
  0xc4   : > { %2005 = vmatmul.bf16.vlgmr.msra.gmra.mxu1 %v2304_v60 }
  0xc5   : > { %1991 = vmatmul.bf16.vlgmr.msra.gmra.mxu2 %v2372_v59 }
  0xc6   : > { %2010 = vmatmul.bf16.vlgmr.msra.gmra.mxu3 %v2376_v62 }
  0xc8   : > { %v1721_v63 = vpop.f32.mrf.mxu2  ;;  %v1685_v2 = vpop.f32.mrf.mxu0 }
  0xc9   : > { %v1740_v0 = vpop.f32.mrf.mxu3  ;;  %v1722_v1 = vadd.f32 %v1721_v63, %v1703_v61  ;;  %v1704_v3 = vpop.f32.mrf.mxu1 }
  0xca   : > { %v1705_v4 = vadd.f32 %v1704_v3, %v1685_v2 }
  0xcb   : > { %v1741_v5 = vadd.f32 %v1740_v0, %v1722_v1 }
  0xd0   : > { %v1723_v6 = vpop.f32.mrf.mxu2  ;;  %v1688_v9 = vpop.f32.mrf.mxu0 }
  0xd1   : > { %v1742_v7 = vpop.f32.mrf.mxu3  ;;  %v1724_v8 = vadd.f32 %v1723_v6, %v1705_v4  ;;  %v1707_v10 = vpop.f32.mrf.mxu1 }
  0xd2   : > { %v1708_v11 = vadd.f32 %v1707_v10, %v1688_v9 }
  0xd3   : > { %v1743_v12 = vadd.f32 %v1742_v7, %v1724_v8 }
  0xd8   : > { %v1726_v13 = vpop.f32.mrf.mxu2  ;;  %v1690_v16 = vpop.f32.mrf.mxu0 }
  0xd9   : > { %v1745_v14 = vpop.f32.mrf.mxu3  ;;  %v1727_v15 = vadd.f32 %v1726_v13, %v1708_v11  ;;  %v1709_v17 = vpop.f32.mrf.mxu1 }
  0xda   : > { %v1710_v18 = vadd.f32 %v1709_v17, %v1690_v16 }
  0xdb   : > { %v1746_v19 = vadd.f32 %v1745_v14, %v1727_v15 }
  0xe0   : > { %v1728_v20 = vpop.f32.mrf.mxu2  ;;  %v1759_v23 = vpop.f32.mrf.mxu0 }
  0xe1   : > { %v1747_v21 = vpop.f32.mrf.mxu3  ;;  %v1729_v22 = vadd.f32 %v1728_v20, %v1710_v18  ;;  %v1760_v24 = vadd.f32 %v1759_v23, %v1741_v5  ;;  %v1778_v25 = vpop.f32.mrf.mxu1 }
  0xe3   : > { %v1748_v26 = vadd.f32 %v1747_v21, %v1729_v22  ;;  %v1779_v27 = vadd.f32 %v1778_v25, %v1760_v24 }
  0xe8   : > { %v1797_v28 = vpop.f32.mrf.mxu2  ;;  %v1761_v31 = vpop.f32.mrf.mxu0 }
  0xe9   : > { %v1798_v29 = vadd.f32 %v1797_v28, %v1779_v27  ;;  %v1816_v30 = vpop.f32.mrf.mxu3  ;;  %v1762_v32 = vadd.f32 %v1761_v31, %v1743_v12  ;;  %v1780_v33 = vpop.f32.mrf.mxu1 }
  0xeb   : > { %v1817_v34 = vadd.f32 %v1816_v30, %v1798_v29  ;;  %v1781_v35 = vadd.f32 %v1780_v33, %v1762_v32 }
  0xf0   : > { %v1799_v36 = vpop.f32.mrf.mxu2  ;;  %v1764_v39 = vpop.f32.mrf.mxu0 }
  0xf1   : > { %v1800_v37 = vadd.f32 %v1799_v36, %v1781_v35  ;;  %v1818_v38 = vpop.f32.mrf.mxu3  ;;  %v1765_v40 = vadd.f32 %v1764_v39, %v1746_v19  ;;  %v1783_v41 = vpop.f32.mrf.mxu1 }
  0xf3   : > { %v1819_v42 = vadd.f32 %v1818_v38, %v1800_v37  ;;  %v1784_v43 = vadd.f32 %v1783_v41, %v1765_v40 }
  0xf8   : > { %v1802_v44 = vpop.f32.mrf.mxu2  ;;  %v1766_v47 = vpop.f32.mrf.mxu0 }
  0xf9   : > { %v1803_v45 = vadd.f32 %v1802_v44, %v1784_v43  ;;  %v1821_v46 = vpop.f32.mrf.mxu3  ;;  %v1785_v48 = vpop.f32.mrf.mxu1  ;;  %v1767_v11 = vadd.f32 %v1766_v47, %v1748_v26 }
  0xfb   : > { %v1822_v49 = vadd.f32 %v1821_v46, %v1803_v45  ;;  %v1786_v14 = vadd.f32 %v1785_v48, %v1767_v11 }
 0x100   : > { %v1804_v50 = vpop.f32.mrf.mxu2  ;;  %v1835_v52 = vpop.f32.mrf.mxu0 }
 0x101   : > { %v1823_v51 = vpop.f32.mrf.mxu3  ;;  %v1854_v53 = vpop.f32.mrf.mxu1  ;;  %v1836_v10 = vadd.f32 %v1835_v52, %v1817_v34  ;;  %v1805_v20 = vadd.f32 %v1804_v50, %v1786_v14 }
 0x103   : > { %v1855_v12 = vadd.f32 %v1854_v53, %v1836_v10  ;;  %v1824_v24 = vadd.f32 %v1823_v51, %v1805_v20 }
 0x108   : > { %v1873_v54 = vpop.f32.mrf.mxu2  ;;  %v1837_v56 = vpop.f32.mrf.mxu0 }
 0x109   : > { %v1892_v55 = vpop.f32.mrf.mxu3  ;;  %v1856_v57 = vpop.f32.mrf.mxu1  ;;  %v1874_v17 = vadd.f32 %v1873_v54, %v1855_v12  ;;  %v1838_v18 = vadd.f32 %v1837_v56, %v1819_v42 }
 0x10b   : > { %v1893_v22 = vadd.f32 %v1892_v55, %v1874_v17  ;;  %v1857_v23 = vadd.f32 %v1856_v57, %v1838_v18  ;;  %v3229_v55 = vld [vmem:[%s239_s5] ss:$0 sm:$0xff]  ;;  %s275_s5 = scalar_lea.vmem [#allocation7], %s2232_s26 }
 0x110   : > { %v1875_v58 = vpop.f32.mrf.mxu2  ;;  %v1840_v60 = vpop.f32.mrf.mxu0 }
 0x111   : > { %v1894_v59 = vpop.f32.mrf.mxu3  ;;  %v1859_v61 = vpop.f32.mrf.mxu1  ;;  %v1841_v21 = vadd.f32 %v1840_v60, %v1822_v49  ;;  %v1876_v27 = vadd.f32 %v1875_v58, %v1857_v23 }
 0x113   : > { %v1860_v25 = vadd.f32 %v1859_v61, %v1841_v21  ;;  %v1895_v34 = vadd.f32 %v1894_v59, %v1876_v27 }
 0x118   : > { %v1878_v62 = vpop.f32.mrf.mxu2  ;;  %v1842_v0 = vpop.f32.mrf.mxu0 }
 0x119   : > { %v1897_v63 = vpop.f32.mrf.mxu3  ;;  %v1861_v1 = vpop.f32.mrf.mxu1  ;;  %v1879_v30 = vadd.f32 %v1878_v62, %v1860_v25  ;;  %v1843_v31 = vadd.f32 %v1842_v0, %v1824_v24 }
 0x11b   : > { %v1898_v36 = vadd.f32 %v1897_v63, %v1879_v30  ;;  %v1862_v37 = vadd.f32 %v1861_v1, %v1843_v31 }
 0x120   : > { %v1880_v2 = vpop.f32.mrf.mxu2  ;;  %v1911_v4 = vpop.f32.mrf.mxu0 }
 0x121   : > { %v1899_v3 = vpop.f32.mrf.mxu3  ;;  %v1930_v5 = vpop.f32.mrf.mxu1  ;;  %v1912_v28 = vadd.f32 %v1911_v4, %v1893_v22  ;;  %v1881_v40 = vadd.f32 %v1880_v2, %v1862_v37 }
 0x123   : > { %v1931_v35 = vadd.f32 %v1930_v5, %v1912_v28  ;;  %v1900_v48 = vadd.f32 %v1899_v3, %v1881_v40 }
 0x128   : > { %v1949_v6 = vpop.f32.mrf.mxu2  ;;  %v1913_v8 = vpop.f32.mrf.mxu0 }
 0x129   : > { %v1968_v7 = vpop.f32.mrf.mxu3  ;;  %v1932_v9 = vpop.f32.mrf.mxu1  ;;  %v1950_v38 = vadd.f32 %v1949_v6, %v1931_v35  ;;  %v1914_v39 = vadd.f32 %v1913_v8, %v1895_v34 }
 0x12b   : > { %v1969_v45 = vadd.f32 %v1968_v7, %v1950_v38  ;;  %v1933_v46 = vadd.f32 %v1932_v9, %v1914_v39 }
 0x130   : > { %v1951_v13 = vpop.f32.mrf.mxu2  ;;  %v1916_v16 = vpop.f32.mrf.mxu0 }
 0x131   : > { %v1970_v15 = vpop.f32.mrf.mxu3  ;;  %v1935_v19 = vpop.f32.mrf.mxu1  ;;  %v1917_v41 = vadd.f32 %v1916_v16, %v1898_v36  ;;  %v1952_v50 = vadd.f32 %v1951_v13, %v1933_v46 }
 0x133   : > { %v1936_v49 = vadd.f32 %v1935_v19, %v1917_v41  ;;  %v1971_v54 = vadd.f32 %v1970_v15, %v1952_v50 }
 0x138   : > { %v1954_v29 = vpop.f32.mrf.mxu2  ;;  %v1918_v32 = vpop.f32.mrf.mxu0 }
 0x139   : > { %v1973_v26 = vpop.f32.mrf.mxu3  ;;  %v1937_v33 = vpop.f32.mrf.mxu1  ;;  %v1955_v52 = vadd.f32 %v1954_v29, %v1936_v49  ;;  %v1919_v53 = vadd.f32 %v1918_v32, %v1900_v48 }
 0x13b   : > { %v1974_v58 = vadd.f32 %v1973_v26, %v1955_v52  ;;  %v1938_v59 = vadd.f32 %v1937_v33, %v1919_v53 }
 0x140   : > { %v1956_v42 = vpop.f32.mrf.mxu2  ;;  %v1987_v44 = vpop.f32.mrf.mxu0 }
 0x141   : > { %v1975_v43 = vpop.f32.mrf.mxu3  ;;  %v2006_v47 = vpop.f32.mrf.mxu1  ;;  %v1988_v51 = vadd.f32 %v1987_v44, %v1969_v45  ;;  %v1957_v63 = vadd.f32 %v1956_v42, %v1938_v59 }
 0x143   : > { %v2007_v56 = vadd.f32 %v2006_v47, %v1988_v51  ;;  %v1976_v5 = vadd.f32 %v1975_v43, %v1957_v63 }
 0x145   : > { %v2016_v2 = vadd.f32 %v3229_v55, %v2007_v56 }
 0x147   : > { %v2031_v7 = vmax.f32 %v2016_v2, 0.0 }
 0x148   : > { %v1992_v57 = vpop.f32.mrf.mxu2  ;;  %v1989_v61 = vpop.f32.mrf.mxu0 }
 0x149   : > { %v2011_v60 = vpop.f32.mrf.mxu3  ;;  %v1990_v62 = vadd.f32 %v1989_v61, %v1971_v54  ;;  %v1993_v0 = vadd.f32 %v1992_v57, %v1974_v58  ;;  %v2008_v1 = vpop.f32.mrf.mxu1 }
 0x14b   : > { %v2009_v3 = vadd.f32 %v2008_v1, %v1990_v62  ;;  %v2012_v6 = vadd.f32 %v2011_v60, %v1993_v0 }
 0x14d   : > { %v2017_v4 = vadd.f32 %v3229_v55, %v2009_v3  ;;  %v2018_v13 = vadd.f32 %v3229_v55, %v2012_v6 }
 0x14f   : > { %v2032_v8 = vmax.f32 %v2017_v4, 0.0  ;;  %v2033_v16 = vmax.f32 %v2018_v13, 0.0 }
 0x150   : > { %v1994_v9 = vpop.f32.mrf.mxu2 }
 0x151   : > { %v1995_v10 = vadd.f32 %v1994_v9, %v1976_v5  ;;  %v3140_v11 = vpack.c.bf16 %v2032_v8, %v2031_v7  ;;  %v2013_v12 = vpop.f32.mrf.mxu3 }
 0x153   : > { %v2014_v14 = vadd.f32 %v2013_v12, %v1995_v10  ;;  %3141 = vst [vmem:[%s275_s5] sm:$0xff] %v3140_v11  }
 0x155   : > { %v2019_v15 = vadd.f32 %v3229_v55, %v2014_v14 }
 0x157   : > { %v2034_v17 = vmax.f32 %v2019_v15, 0.0  ;;  %2049 = sbr.rel (!%p3419_p9) target bundleno = 357 (0x165), region = 52 }
 0x159   : > { %v3145_v18 = vpack.c.bf16 %v2034_v17, %v2033_v16 }
 0x15a   : > { %v2071_v19 = vld [vmem:[%s275_s5] sm:$0xf] (%p3419_p9)  ;;  %v2073_v20 = vld [vmem:[%s275_s5 + $0x4] sm:$0xf] (%p3419_p9) }
 0x15b   : > { %3147 = vst [vmem:[%s275_s5 + $0x8] sm:$0xff] %v3145_v18  }
 0x15c   : > { %2072 = vst [vmem:[%s2054_s9] sm:$0xf] %v2071_v19 }
 0x15d   : > { %2074 = vst [vmem:[%s2054_s9 + $0x10] sm:$0xf] %v2073_v20 }
 0x162   : > { %v2075_v21 = vld [vmem:[%s275_s5 + $0x8] sm:$0xf]  ;;  %v2077_v22 = vld [vmem:[%s275_s5 + $0xc] sm:$0xf] }
 0x163   : > { %2076 = vst [vmem:[%s2054_s9 + $0x20] sm:$0xf] %v2075_v21 }
 0x164   : > { %2078 = vst [vmem:[%s2054_s9 + $0x30] sm:$0xf] %v2077_v22 }
 0x165 PF: > { %s19_s17 = sadd.s32 1, %s3344_s17   ;;  %s3857_s12 = smov %s3328_s13 }
 0x166   : > { %p16_p1 = scmp.ge.s32.totalorder %s19_s17, 6   ;;  %s3858_s13 = smov %s3332_s14 }
 0x167   : > { %s3859_s14 = smov %s3417_s24  ;;  %s3860_s15 = smov %s3340_s16 }
 0x168   : > { %s3861_s16 = smov %s3863_s19  ;;  %18 = sbr.rel (!%p16_p1) target bundleno = 6 (0x6), region = 137 }
 0x16d   :  { %2120 = vsyncpa [#allocation4], 1 }
 0x16e   :  { %2122 = vsyncpa [#allocation4 + $0x1], 1 }
 0x16f   :  { %2123 = vsyncpa [#allocation6], 1 }
 0x170   :  { %2125 = vsyncpa [#allocation6 + $0x1], 1 }

// kernel: nnet_forward.10
= control target key start
LH: loop header
LB: loop body
LE: loop exit
PB: predicated region body
PF: predicated region fallthrough
CT: control target
= control target key end

     0   :  { %8 = vsyncpa [#allocation4], 0  ;;  %s8954_s0 = inlined_call_operand.vmem [shape: bf16[2,8192], index: 0, kind: input, shape index: {}]   ;;  %s8955_s1 = inlined_call_operand.hbm [shape: bf16[8192,512], index: 1, kind: input, shape index: {}]   ;;  %s8956_s2 = inlined_call_operand.hbm [shape: f32[1,512], index: 2, kind: input, shape index: {}]   ;;  %s8957_s3 = inlined_call_operand.vmem [shape: bf16[2,512], index: 3, kind: output, shape index: {}]  }
   0x1   :  { %10 = vsyncpa [#allocation4 + $0x1], 0 }
   0x2   :  { %11 = vsyncpa [#allocation6], 0 }
   0x3   :  { %13 = vsyncpa [#allocation6 + $0x1], 0  ;;  %s8289_s12 = smov 0   ;;  %s8291_s13 = smov 0  }
   0x4   :  { %s8293_s14 = smov 0   ;;  %s8295_s15 = smov 0  }
   0x5   :  { %s8297_s16 = smov 0   ;;  %s8299_s17 = smov 0  }
   0x6 LB: > { %s5515_s18 = sadd.s32 4294967295, %s8264_s17   ;;  %s34_s19 = sadd.s32 1, %s8260_s16  ;;  %s8264_s17 = sphi %s8299_s17, %s19_s17   ;;  %s8260_s16 = sphi %s8297_s16, %s8965_s16   ;;  %s8256_s15 = sphi %s8295_s15, %s8964_s15   ;;  %s8252_s14 = sphi %s8293_s14, %s8963_s14   ;;  %s8248_s13 = sphi %s8291_s13, %s8962_s13   ;;  %s8244_s12 = sphi %s8289_s12, %s8961_s12  }
   0x7   : > { %p36_p0 = scmp.ge.s32.totalorder %s34_s19, 4  ;;  %s75_s20 = sadd.s32 1, %s8252_s14 }
   0x8   : > { %p82_p1 = scmp.ne.s32.totalorder %s8252_s14, %s8248_s13  ;;  %p83_p2 = scmp.eq.s32.totalorder %s8264_s17, 0 }
   0x9   : > { %s8967_s19 = smov (%p36_p0, %s34_s19), 0  ;;  %p88_p4 = scmp.ne.s32.totalorder %s8248_s13, %s8244_s12 }
   0xa   : > { %p8325_p3 = por %p83_p2, %p82_p1  ;;  %s71_s22 = ssub.s32 %s8260_s16, %s8967_s19 }
   0xb   : > { %p89_p5 = scmp.eq.s32.totalorder %s5515_s18, 0  ;;  %p73_p6 = scmp.eq.s32.totalorder %s71_s22, 0 }
   0xc   : > { %p8097_p8 = scmp.lt.s32.totalorder %s8264_s17, 4  ;;  %s178_s25 = sand.u32 1, %s8252_s14  }
   0xd   : > { %p8332_p7 = por %p89_p5, %p88_p4  ;;  %s5521_s26 = sshll.u32 %s8260_s16, 2 }
   0xe   : > { %s8338_s24 = scalar_select %p73_p6, %s8252_s14, %s75_s20  }
   0xf   : > { %s5520_s27 = sshll.u32 %s178_s25, 12  ;;  %s189_s30 = scalar_lea.hbm %s8955_s1, %s5521_s26 }
  0x10   : > { %s190_s4 = sshll.u32 %s189_s30, 4  ;;  %s182_s5 = scalar_lea.vmem [#allocation3], %s5520_s27  ;;  %s191_s4 = int_to_ptr.hbm [resolvable:$true] %s190_s4 }
  0x11   : > { %s192_s6 = sshll.u32 %s182_s5, 4  ;;  %p8347_p9 = pnand %p8097_p8, %p8325_p3  ;;  %s193_s6 = int_to_ptr.vmem [resolvable:$true] %s192_s6 }
  0x12   : > { %p5522_p10 = scmp.ge.s32.totalorder %s8264_s17, 1  ;;  %s179_s8 = scalar_lea.sflag [#allocation4], %s178_s25 }
  0x13   : > { %s8266_s9 = smov 256   ;;  %s8267_s10 = smov 64  }
  0x14   : > { %s8268_s11 = smov 4   ;;  %p217_p11 = scmp.lt.s32.totalorder %s8264_s17, 5 }
  0x15   : > { %8093 = dma.hbm_to_vmem [thread:$0]  (!%p8347_p9), %s191_s4, 65536, %s193_s6, %s179_s8, %s8266_s9, %s8267_s10, %s8268_s11  }
  0x16   : > { %s208_s20 = scalar_lea.hbm %s8956_s2, %s8260_s16  ;;  %p218_p12 = pnand %p5522_p10, %p217_p11 }
  0x17   : > { %s210_s21 = sshll.u32 %s208_s20, 4  ;;  %s205_s22 = scalar_lea.vmem [#allocation5], %s178_s25  ;;  %s211_s21 = int_to_ptr.hbm [resolvable:$true] %s210_s21 }
  0x18   : > { %s212_s26 = sshll.u32 %s205_s22, 4  ;;  %s203_s27 = scalar_lea.sflag [#allocation6], %s178_s25  ;;  %s213_s26 = int_to_ptr.vmem [resolvable:$true] %s212_s26 }
  0x19   : > { %8096 = dma.hbm_to_vmem [thread:$0]  (!%p8347_p9), %s211_s21, 16, %s213_s26, %s203_s27  }
  0x1a   : > { %221 = sbr.rel (%p218_p12) target bundleno = 699 (0x2bb), region = 32  ;;  %s8362_s28 = sand.u32 (!%p218_p12), 1, %s8248_s13  }
  0x1b   : > { %s5523_s29 = sshll.u32 (!%p218_p12), %s8362_s28, 12  ;;  %s224_s30 = scalar_lea.sflag (!%p218_p12), [#allocation4], %s8362_s28 }
  0x1c   : > { %s8366_s4 = scalar_lea.vmem (!%p218_p12), [#allocation3], %s5523_s29 }
  0x1f   : > { %8235 = dma.done.wait (%p8332_p7), %s224_s30, 65536  }
  0x20   : > { %8237 = vsyncadd (%p8332_p7), %s224_s30, 4294901760  ;;  %s234_s25 = scalar_lea.sflag [#allocation6], %s8362_s28  ;;  %s236_s5 = scalar_lea.vmem [#allocation5], %s8362_s28 }
  0x21   : > { %8239 = dma.done.wait (%p8332_p7), %s234_s25, 16  }
  0x22   : > { %8241 = vsyncadd (%p8332_p7), %s234_s25, 4294967280  ;;  %v7581_v0 = vld [vmem:[%s8366_s4 + $0x38] sm:$0xff]  ;;  %v7580_v4 = vld [vmem:[%s8366_s4 + $0x30] sm:$0xff]  ;;  %p286_p13 = scmp.lt.s32.totalorder %s8256_s15, 3 }
  0x23   : > { %v7589_v1 = vld [vmem:[%s8366_s4 + $0x78] sm:$0xff]  ;;  %4549 = vmatpush.bf16.msra.mxu0 %v7581_v0  ;;  %v7588_v5 = vld [vmem:[%s8366_s4 + $0x70] sm:$0xff]  ;;  %v7579_v8 = vld [vmem:[%s8366_s4 + $0x28] sm:$0xff] }
  0x24   : > { %v7597_v2 = vld [vmem:[%s8366_s4 + $0xb8] sm:$0xff]  ;;  %4562 = vmatpush.bf16.msra.mxu1 %v7589_v1  ;;  %v7596_v6 = vld [vmem:[%s8366_s4 + $0xb0] sm:$0xff]  ;;  %v7587_v9 = vld [vmem:[%s8366_s4 + $0x68] sm:$0xff]  ;;  %s8969_s15 = smov (!%p286_p13, %s8256_s15), 3 }
  0x25   : > { %v7605_v3 = vld [vmem:[%s8366_s4 + $0xf8] sm:$0xff]  ;;  %4575 = vmatpush.bf16.msra.mxu2 %v7597_v2  ;;  %v7604_v7 = vld [vmem:[%s8366_s4 + $0xf0] sm:$0xff]  ;;  %v7595_v10 = vld [vmem:[%s8366_s4 + $0xa8] sm:$0xff]  ;;  %s290_s25 = scalar_lea.vmem %s8957_s3, %s8969_s15 }
  0x26   : > { %4588 = vmatpush.bf16.msra.mxu3 %v7605_v3  ;;  %v7603_v11 = vld [vmem:[%s8366_s4 + $0xe8] sm:$0xff]  ;;  %v7578_v12 = vld [vmem:[%s8366_s4 + $0x20] sm:$0xff]  ;;  %v7577_v16 = vld [vmem:[%s8366_s4 + $0x18] sm:$0xff] }
  0x27   : > { %4550 = vmatpush.bf16.msra.mxu0 %v7580_v4  ;;  %v7586_v13 = vld [vmem:[%s8366_s4 + $0x60] sm:$0xff]  ;;  %v7585_v17 = vld [vmem:[%s8366_s4 + $0x58] sm:$0xff]  ;;  %v7576_v21 = vld [vmem:[%s8366_s4 + $0x10] sm:$0xff] }
  0x28   : > { %4563 = vmatpush.bf16.msra.mxu1 %v7588_v5  ;;  %v7594_v14 = vld [vmem:[%s8366_s4 + $0xa0] sm:$0xff]  ;;  %v7593_v18 = vld [vmem:[%s8366_s4 + $0x98] sm:$0xff]  ;;  %v7584_v22 = vld [vmem:[%s8366_s4 + $0x50] sm:$0xff] }
  0x29   : > { %4576 = vmatpush.bf16.msra.mxu2 %v7596_v6  ;;  %v7602_v15 = vld [vmem:[%s8366_s4 + $0xe0] sm:$0xff]  ;;  %v7601_v19 = vld [vmem:[%s8366_s4 + $0xd8] sm:$0xff]  ;;  %v7592_v23 = vld [vmem:[%s8366_s4 + $0x90] sm:$0xff] }
  0x2a   : > { %4589 = vmatpush.bf16.msra.mxu3 %v7604_v7  ;;  %v301_v20 = vld [vmem:[%s8954_s0] sm:$0xff]  ;;  %v7575_v25 = vld [vmem:[%s8366_s4 + $0x8] sm:$0xff]  ;;  %v7574_v29 = vld [vmem:[%s8366_s4] sm:$0xff] }
  0x2b   : > { %4551 = vmatpush.bf16.msra.mxu0 %v7579_v8  ;;  %1334 = vst [vmem:[#allocation1] ss:$9 sm:$0xff] %v301_v20  ;;  %v7600_v24 = vld [vmem:[%s8366_s4 + $0xd0] sm:$0xff]  ;;  %v7583_v26 = vld [vmem:[%s8366_s4 + $0x48] sm:$0xff]  ;;  %v7582_v30 = vld [vmem:[%s8366_s4 + $0x40] sm:$0xff] }
  0x2c   : > { %4564 = vmatpush.bf16.msra.mxu1 %v7587_v9  ;;  %v7591_v27 = vld [vmem:[%s8366_s4 + $0x88] sm:$0xff]  ;;  %v7590_v31 = vld [vmem:[%s8366_s4 + $0x80] sm:$0xff]  ;;  %v7613_v33 = vld [vmem:[%s8366_s4 + $0x138] sm:$0xff] }
  0x2d   : > { %4577 = vmatpush.bf16.msra.mxu2 %v7595_v10  ;;  %v7599_v28 = vld [vmem:[%s8366_s4 + $0xc8] sm:$0xff]  ;;  %v7598_v32 = vld [vmem:[%s8366_s4 + $0xc0] sm:$0xff]  ;;  %v7621_v34 = vld [vmem:[%s8366_s4 + $0x178] sm:$0xff] }
  0x2e   : > { %4590 = vmatpush.bf16.msra.mxu3 %v7603_v11  ;;  %v7629_v35 = vld [vmem:[%s8366_s4 + $0x1b8] sm:$0xff]  ;;  %v7612_v37 = vld [vmem:[%s8366_s4 + $0x130] sm:$0xff]  ;;  %v7611_v45 = vld [vmem:[%s8366_s4 + $0x128] sm:$0xff] }
  0x2f   : > { %4552 = vmatpush.bf16.msra.mxu0 %v7578_v12  ;;  %v7637_v36 = vld [vmem:[%s8366_s4 + $0x1f8] sm:$0xff]  ;;  %v7620_v40 = vld [vmem:[%s8366_s4 + $0x170] sm:$0xff]  ;;  %v7619_v46 = vld [vmem:[%s8366_s4 + $0x168] sm:$0xff] }
  0x30   : > { %4565 = vmatpush.bf16.msra.mxu1 %v7586_v13  ;;  %v7628_v43 = vld [vmem:[%s8366_s4 + $0x1b0] sm:$0xff]  ;;  %v7627_v47 = vld [vmem:[%s8366_s4 + $0x1a8] sm:$0xff]  ;;  %v7610_v49 = vld [vmem:[%s8366_s4 + $0x120] sm:$0xff] }
  0x31   : > { %4578 = vmatpush.bf16.msra.mxu2 %v7594_v14  ;;  %v7636_v44 = vld [vmem:[%s8366_s4 + $0x1f0] sm:$0xff]  ;;  %v7635_v48 = vld [vmem:[%s8366_s4 + $0x1e8] sm:$0xff]  ;;  %v7618_v50 = vld [vmem:[%s8366_s4 + $0x160] sm:$0xff] }
  0x32   : > { %4591 = vmatpush.bf16.msra.mxu3 %v7602_v15  ;;  %v1337_v38 = vld [vmem:[#allocation1 + $0x12] sm:$0xff]  ;;  %v1335_v39 = vld [vmem:[#allocation1] sm:$0xff]  ;;  %v1336_v42 = vld [vmem:[#allocation1 + $0x9] sm:$0xff] }
  0x33   : > { %4553 = vmatpush.bf16.msra.mxu0 %v7577_v16  ;;  %v1338_v41 = vld [vmem:[#allocation1 + $0x1b] sm:$0xff]  ;;  %v7626_v51 = vld [vmem:[%s8366_s4 + $0x1a0] sm:$0xff]  ;;  %v7607_v61 = vld [vmem:[%s8366_s4 + $0x108] sm:$0xff] }
  0x34   : > { %4566 = vmatpush.bf16.msra.mxu1 %v7585_v17  ;;  %v7634_v52 = vld [vmem:[%s8366_s4 + $0x1e0] sm:$0xff]  ;;  %v7609_v53 = vld [vmem:[%s8366_s4 + $0x118] sm:$0xff]  ;;  %v7608_v57 = vld [vmem:[%s8366_s4 + $0x110] sm:$0xff] }
  0x35   : > { %4579 = vmatpush.bf16.msra.mxu2 %v7593_v18  ;;  %v7617_v54 = vld [vmem:[%s8366_s4 + $0x158] sm:$0xff]  ;;  %v7616_v58 = vld [vmem:[%s8366_s4 + $0x150] sm:$0xff]  ;;  %v7615_v62 = vld [vmem:[%s8366_s4 + $0x148] sm:$0xff] }
  0x36   : > { %4592 = vmatpush.bf16.msra.mxu3 %v7601_v19  ;;  %v7625_v55 = vld [vmem:[%s8366_s4 + $0x198] sm:$0xff]  ;;  %v7624_v59 = vld [vmem:[%s8366_s4 + $0x190] sm:$0xff]  ;;  %v7623_v63 = vld [vmem:[%s8366_s4 + $0x188] sm:$0xff] }
  0x37   : > { %4554 = vmatpush.bf16.msra.mxu0 %v7576_v21  ;;  %v7633_v56 = vld [vmem:[%s8366_s4 + $0x1d8] sm:$0xff]  ;;  %v7632_v60 = vld [vmem:[%s8366_s4 + $0x1d0] sm:$0xff]  ;;  %v7631_v0 = vld [vmem:[%s8366_s4 + $0x1c8] sm:$0xff] }
  0x38   : > { %4567 = vmatpush.bf16.msra.mxu1 %v7584_v22  ;;  %v1341_v1 = vld [vmem:[#allocation1 + $0x36] sm:$0xff]  ;;  %v1339_v2 = vld [vmem:[#allocation1 + $0x24] sm:$0xff]  ;;  %v1340_v4 = vld [vmem:[#allocation1 + $0x2d] sm:$0xff] }
  0x39   : > { %4580 = vmatpush.bf16.msra.mxu2 %v7592_v23  ;;  %v1342_v3 = vld [vmem:[#allocation1 + $0x3f] sm:$0xff]  ;;  %v302_v5 = vld [vmem:[%s8954_s0 + $0x8] sm:$0xff]  ;;  %v7643_v18 = vld [vmem:[%s8366_s4 + $0x228] sm:$0xff] }
  0x3a   : > { %4593 = vmatpush.bf16.msra.mxu3 %v7600_v24  ;;  %1344 = vst [vmem:[#allocation1] ss:$9 sm:$0xff] %v302_v5  ;;  %v7606_v6 = vld [vmem:[%s8366_s4 + $0x100] sm:$0xff]  ;;  %v7645_v10 = vld [vmem:[%s8366_s4 + $0x238] sm:$0xff]  ;;  %v7644_v14 = vld [vmem:[%s8366_s4 + $0x230] sm:$0xff] }
  0x3b   : > { %4555 = vmatpush.bf16.msra.mxu0 %v7575_v25  ;;  %v7614_v7 = vld [vmem:[%s8366_s4 + $0x140] sm:$0xff]  ;;  %v7653_v11 = vld [vmem:[%s8366_s4 + $0x278] sm:$0xff]  ;;  %v7652_v15 = vld [vmem:[%s8366_s4 + $0x270] sm:$0xff] }
  0x3c   : > { %4568 = vmatpush.bf16.msra.mxu1 %v7583_v26  ;;  %v7622_v8 = vld [vmem:[%s8366_s4 + $0x180] sm:$0xff]  ;;  %v7661_v12 = vld [vmem:[%s8366_s4 + $0x2b8] sm:$0xff]  ;;  %v7660_v16 = vld [vmem:[%s8366_s4 + $0x2b0] sm:$0xff] }
  0x3d   : > { %4581 = vmatpush.bf16.msra.mxu2 %v7591_v27  ;;  %v7630_v9 = vld [vmem:[%s8366_s4 + $0x1c0] sm:$0xff]  ;;  %v7669_v13 = vld [vmem:[%s8366_s4 + $0x2f8] sm:$0xff]  ;;  %v7668_v17 = vld [vmem:[%s8366_s4 + $0x2f0] sm:$0xff] }
  0x3e   : > { %4594 = vmatpush.bf16.msra.mxu3 %v7599_v28  ;;  %v7651_v19 = vld [vmem:[%s8366_s4 + $0x268] sm:$0xff]  ;;  %v7642_v22 = vld [vmem:[%s8366_s4 + $0x220] sm:$0xff]  ;;  %v7641_v26 = vld [vmem:[%s8366_s4 + $0x218] sm:$0xff] }
  0x3f   : > { %4556 = vmatpush.bf16.msra.mxu0 %v7574_v29  ;;  %v7659_v20 = vld [vmem:[%s8366_s4 + $0x2a8] sm:$0xff]  ;;  %v7650_v23 = vld [vmem:[%s8366_s4 + $0x260] sm:$0xff]  ;;  %v7649_v27 = vld [vmem:[%s8366_s4 + $0x258] sm:$0xff] }
  0x40   : > { %4569 = vmatpush.bf16.msra.mxu1 %v7582_v30  ;;  %v7667_v21 = vld [vmem:[%s8366_s4 + $0x2e8] sm:$0xff]  ;;  %v7658_v24 = vld [vmem:[%s8366_s4 + $0x2a0] sm:$0xff]  ;;  %v7657_v28 = vld [vmem:[%s8366_s4 + $0x298] sm:$0xff] }
  0x41   : > { %4582 = vmatpush.bf16.msra.mxu2 %v7590_v31  ;;  %v7666_v25 = vld [vmem:[%s8366_s4 + $0x2e0] sm:$0xff]  ;;  %v7665_v29 = vld [vmem:[%s8366_s4 + $0x2d8] sm:$0xff]  ;;  %v7640_v30 = vld [vmem:[%s8366_s4 + $0x210] sm:$0xff] }
  0x42   : > { %4595 = vmatpush.bf16.msra.mxu3 %v7598_v32  ;;  %4557 = vmatmul.bf16.vlgmr.msra.gmra.mxu0 %v1335_v39  ;;  %v7648_v31 = vld [vmem:[%s8366_s4 + $0x250] sm:$0xff]  ;;  %v7646_v39 = vld [vmem:[%s8366_s4 + $0x240] sm:$0xff] }
  0x43   : > { %4601 = vmatpush.bf16.msrb.mxu0 %v7613_v33  ;;  %4570 = vmatmul.bf16.vlgmr.msra.gmra.mxu1 %v1336_v42  ;;  %v7656_v32 = vld [vmem:[%s8366_s4 + $0x290] sm:$0xff]  ;;  %v7677_v42 = vld [vmem:[%s8366_s4 + $0x338] sm:$0xff] }
  0x44   : > { %4614 = vmatpush.bf16.msrb.mxu1 %v7621_v34  ;;  %4583 = vmatmul.bf16.vlgmr.msra.gmra.mxu2 %v1337_v38  ;;  %v7664_v33 = vld [vmem:[%s8366_s4 + $0x2d0] sm:$0xff]  ;;  %v7639_v34 = vld [vmem:[%s8366_s4 + $0x208] sm:$0xff]  ;;  %v7638_v38 = vld [vmem:[%s8366_s4 + $0x200] sm:$0xff] }
  0x45   : > { %4627 = vmatpush.bf16.msrb.mxu2 %v7629_v35  ;;  %4596 = vmatmul.bf16.vlgmr.msra.gmra.mxu3 %v1338_v41  ;;  %v7647_v35 = vld [vmem:[%s8366_s4 + $0x248] sm:$0xff]  ;;  %v7662_v41 = vld [vmem:[%s8366_s4 + $0x2c0] sm:$0xff]  ;;  %v7696_v5 = vld [vmem:[%s8366_s4 + $0x3d0] sm:$0xff] }
  0x46   : > { %4640 = vmatpush.bf16.msrb.mxu3 %v7637_v36  ;;  %v7655_v36 = vld [vmem:[%s8366_s4 + $0x288] sm:$0xff] }
  0x47   : > { %4602 = vmatpush.bf16.msrb.mxu0 %v7612_v37  ;;  %v7663_v37 = vld [vmem:[%s8366_s4 + $0x2c8] sm:$0xff] }
  0x48   : > { %4615 = vmatpush.bf16.msrb.mxu1 %v7620_v40  ;;  %v7654_v40 = vld [vmem:[%s8366_s4 + $0x280] sm:$0xff] }
  0x49   : > { %4628 = vmatpush.bf16.msrb.mxu2 %v7628_v43  ;;  %v7685_v43 = vld [vmem:[%s8366_s4 + $0x378] sm:$0xff] }
  0x4a   : > { %4641 = vmatpush.bf16.msrb.mxu3 %v7636_v44  ;;  %v7693_v44 = vld [vmem:[%s8366_s4 + $0x3b8] sm:$0xff] }
  0x4b   : > { %4603 = vmatpush.bf16.msrb.mxu0 %v7611_v45  ;;  %v7701_v45 = vld [vmem:[%s8366_s4 + $0x3f8] sm:$0xff] }
  0x4c   : > { %4616 = vmatpush.bf16.msrb.mxu1 %v7619_v46  ;;  %v1345_v46 = vld [vmem:[#allocation1] sm:$0xff] }
  0x4d   : > { %4629 = vmatpush.bf16.msrb.mxu2 %v7627_v47  ;;  %v1347_v47 = vld [vmem:[#allocation1 + $0x12] sm:$0xff] }
  0x4e   : > { %4642 = vmatpush.bf16.msrb.mxu3 %v7635_v48  ;;  %v1346_v48 = vld [vmem:[#allocation1 + $0x9] sm:$0xff] }
  0x4f   : > { %4604 = vmatpush.bf16.msrb.mxu0 %v7610_v49  ;;  %v1348_v49 = vld [vmem:[#allocation1 + $0x1b] sm:$0xff] }
  0x50   : > { %4617 = vmatpush.bf16.msrb.mxu1 %v7618_v50  ;;  %v7676_v50 = vld [vmem:[%s8366_s4 + $0x330] sm:$0xff] }
  0x51   : > { %4630 = vmatpush.bf16.msrb.mxu2 %v7626_v51  ;;  %v7684_v51 = vld [vmem:[%s8366_s4 + $0x370] sm:$0xff] }
  0x52   : > { %4643 = vmatpush.bf16.msrb.mxu3 %v7634_v52  ;;  %v7692_v52 = vld [vmem:[%s8366_s4 + $0x3b0] sm:$0xff] }
  0x53   : > { %4605 = vmatpush.bf16.msrb.mxu0 %v7609_v53  ;;  %v7700_v53 = vld [vmem:[%s8366_s4 + $0x3f0] sm:$0xff] }
  0x54   : > { %4618 = vmatpush.bf16.msrb.mxu1 %v7617_v54  ;;  %v7675_v54 = vld [vmem:[%s8366_s4 + $0x328] sm:$0xff] }
  0x55   : > { %4631 = vmatpush.bf16.msrb.mxu2 %v7625_v55  ;;  %v7683_v55 = vld [vmem:[%s8366_s4 + $0x368] sm:$0xff] }
  0x56   : > { %4644 = vmatpush.bf16.msrb.mxu3 %v7633_v56  ;;  %v7691_v56 = vld [vmem:[%s8366_s4 + $0x3a8] sm:$0xff] }
  0x57   : > { %4606 = vmatpush.bf16.msrb.mxu0 %v7608_v57  ;;  %v7699_v57 = vld [vmem:[%s8366_s4 + $0x3e8] sm:$0xff] }
  0x58   : > { %4619 = vmatpush.bf16.msrb.mxu1 %v7616_v58  ;;  %v7674_v58 = vld [vmem:[%s8366_s4 + $0x320] sm:$0xff] }
  0x59   : > { %4632 = vmatpush.bf16.msrb.mxu2 %v7624_v59  ;;  %v7682_v59 = vld [vmem:[%s8366_s4 + $0x360] sm:$0xff] }
  0x5a   : > { %4645 = vmatpush.bf16.msrb.mxu3 %v7632_v60  ;;  %v7690_v60 = vld [vmem:[%s8366_s4 + $0x3a0] sm:$0xff] }
  0x5b   : > { %4607 = vmatpush.bf16.msrb.mxu0 %v7607_v61  ;;  %v7698_v61 = vld [vmem:[%s8366_s4 + $0x3e0] sm:$0xff] }
  0x5c   : > { %4620 = vmatpush.bf16.msrb.mxu1 %v7615_v62  ;;  %v7673_v62 = vld [vmem:[%s8366_s4 + $0x318] sm:$0xff] }
  0x5d   : > { %4633 = vmatpush.bf16.msrb.mxu2 %v7623_v63  ;;  %v7681_v63 = vld [vmem:[%s8366_s4 + $0x358] sm:$0xff] }
  0x5e   : > { %4646 = vmatpush.bf16.msrb.mxu3 %v7631_v0  ;;  %v7689_v0 = vld [vmem:[%s8366_s4 + $0x398] sm:$0xff] }
  0x5f   : > { %4608 = vmatpush.bf16.msrb.mxu0 %v7606_v6  ;;  %v7671_v6 = vld [vmem:[%s8366_s4 + $0x308] sm:$0xff] }
  0x60   : > { %4621 = vmatpush.bf16.msrb.mxu1 %v7614_v7  ;;  %v7679_v7 = vld [vmem:[%s8366_s4 + $0x348] sm:$0xff] }
  0x61   : > { %4634 = vmatpush.bf16.msrb.mxu2 %v7622_v8  ;;  %v7687_v8 = vld [vmem:[%s8366_s4 + $0x388] sm:$0xff] }
  0x62   : > { %4647 = vmatpush.bf16.msrb.mxu3 %v7630_v9  ;;  %4609 = vmatmul.bf16.vlgmr.msrb.gmra.mxu0 %v1339_v2  ;;  %v7672_v2 = vld [vmem:[%s8366_s4 + $0x310] sm:$0xff]  ;;  %v7695_v9 = vld [vmem:[%s8366_s4 + $0x3c8] sm:$0xff] }
  0x63   : > { %4653 = vmatpush.bf16.msra.mxu0 %v7645_v10  ;;  %4622 = vmatmul.bf16.vlgmr.msrb.gmra.mxu1 %v1340_v4  ;;  %v7688_v4 = vld [vmem:[%s8366_s4 + $0x390] sm:$0xff]  ;;  %v1349_v10 = vld [vmem:[#allocation1 + $0x24] sm:$0xff] }
  0x64   : > { %4666 = vmatpush.bf16.msra.mxu1 %v7653_v11  ;;  %4635 = vmatmul.bf16.vlgmr.msrb.gmra.mxu2 %v1341_v1  ;;  %v7697_v1 = vld [vmem:[%s8366_s4 + $0x3d8] sm:$0xff]  ;;  %v1351_v11 = vld [vmem:[#allocation1 + $0x36] sm:$0xff] }
  0x65   : > { %4679 = vmatpush.bf16.msra.mxu2 %v7661_v12  ;;  %4648 = vmatmul.bf16.vlgmr.msrb.gmra.mxu3 %v1342_v3  ;;  %v7680_v3 = vld [vmem:[%s8366_s4 + $0x350] sm:$0xff]  ;;  %v1350_v12 = vld [vmem:[#allocation1 + $0x2d] sm:$0xff] }
  0x66   : > { %4692 = vmatpush.bf16.msra.mxu3 %v7669_v13  ;;  %v1352_v13 = vld [vmem:[#allocation1 + $0x3f] sm:$0xff] }
  0x67   : > { %4654 = vmatpush.bf16.msra.mxu0 %v7644_v14  ;;  %v303_v14 = vld [vmem:[%s8954_s0 + $0x10] sm:$0xff] }
  0x68   : > { %4667 = vmatpush.bf16.msra.mxu1 %v7652_v15  ;;  %1354 = vst [vmem:[#allocation1] ss:$9 sm:$0xff] %v303_v14  ;;  %v7670_v15 = vld [vmem:[%s8366_s4 + $0x300] sm:$0xff] }
  0x69   : > { %4680 = vmatpush.bf16.msra.mxu2 %v7660_v16  ;;  %v7678_v16 = vld [vmem:[%s8366_s4 + $0x340] sm:$0xff] }
  0x6a   : > { %4693 = vmatpush.bf16.msra.mxu3 %v7668_v17  ;;  %v7686_v17 = vld [vmem:[%s8366_s4 + $0x380] sm:$0xff] }
  0x6b   : > { %4655 = vmatpush.bf16.msra.mxu0 %v7643_v18  ;;  %v7694_v18 = vld [vmem:[%s8366_s4 + $0x3c0] sm:$0xff] }
  0x6c   : > { %4668 = vmatpush.bf16.msra.mxu1 %v7651_v19  ;;  %v7709_v19 = vld [vmem:[%s8366_s4 + $0x438] sm:$0xff] }
  0x6d   : > { %4681 = vmatpush.bf16.msra.mxu2 %v7659_v20  ;;  %v7717_v20 = vld [vmem:[%s8366_s4 + $0x478] sm:$0xff] }
  0x6e   : > { %4694 = vmatpush.bf16.msra.mxu3 %v7667_v21  ;;  %v7725_v21 = vld [vmem:[%s8366_s4 + $0x4b8] sm:$0xff] }
  0x6f   : > { %4656 = vmatpush.bf16.msra.mxu0 %v7642_v22  ;;  %v7733_v22 = vld [vmem:[%s8366_s4 + $0x4f8] sm:$0xff] }
  0x70   : > { %4669 = vmatpush.bf16.msra.mxu1 %v7650_v23  ;;  %v7708_v23 = vld [vmem:[%s8366_s4 + $0x430] sm:$0xff] }
  0x71   : > { %4682 = vmatpush.bf16.msra.mxu2 %v7658_v24  ;;  %v7716_v24 = vld [vmem:[%s8366_s4 + $0x470] sm:$0xff] }
  0x72   : > { %4695 = vmatpush.bf16.msra.mxu3 %v7666_v25  ;;  %v7724_v25 = vld [vmem:[%s8366_s4 + $0x4b0] sm:$0xff] }
  0x73   : > { %4657 = vmatpush.bf16.msra.mxu0 %v7641_v26  ;;  %v7732_v26 = vld [vmem:[%s8366_s4 + $0x4f0] sm:$0xff] }
  0x74   : > { %4670 = vmatpush.bf16.msra.mxu1 %v7649_v27  ;;  %v7707_v27 = vld [vmem:[%s8366_s4 + $0x428] sm:$0xff] }
  0x75   : > { %4683 = vmatpush.bf16.msra.mxu2 %v7657_v28  ;;  %v7715_v28 = vld [vmem:[%s8366_s4 + $0x468] sm:$0xff] }
  0x76   : > { %4696 = vmatpush.bf16.msra.mxu3 %v7665_v29  ;;  %v7723_v29 = vld [vmem:[%s8366_s4 + $0x4a8] sm:$0xff] }
  0x77   : > { %4658 = vmatpush.bf16.msra.mxu0 %v7640_v30  ;;  %v7731_v30 = vld [vmem:[%s8366_s4 + $0x4e8] sm:$0xff] }
  0x78   : > { %4671 = vmatpush.bf16.msra.mxu1 %v7648_v31  ;;  %v7706_v31 = vld [vmem:[%s8366_s4 + $0x420] sm:$0xff] }
  0x79   : > { %4684 = vmatpush.bf16.msra.mxu2 %v7656_v32  ;;  %v7714_v32 = vld [vmem:[%s8366_s4 + $0x460] sm:$0xff] }
  0x7a   : > { %4697 = vmatpush.bf16.msra.mxu3 %v7664_v33  ;;  %v7722_v33 = vld [vmem:[%s8366_s4 + $0x4a0] sm:$0xff] }
  0x7b   : > { %4659 = vmatpush.bf16.msra.mxu0 %v7639_v34  ;;  %v7730_v34 = vld [vmem:[%s8366_s4 + $0x4e0] sm:$0xff] }
  0x7c   : > { %4672 = vmatpush.bf16.msra.mxu1 %v7647_v35  ;;  %v7705_v35 = vld [vmem:[%s8366_s4 + $0x418] sm:$0xff] }
  0x7d   : > { %4685 = vmatpush.bf16.msra.mxu2 %v7655_v36  ;;  %v7713_v36 = vld [vmem:[%s8366_s4 + $0x458] sm:$0xff] }
  0x7e   : > { %4698 = vmatpush.bf16.msra.mxu3 %v7663_v37  ;;  %v7721_v37 = vld [vmem:[%s8366_s4 + $0x498] sm:$0xff] }
  0x7f   : > { %4660 = vmatpush.bf16.msra.mxu0 %v7638_v38  ;;  %v7729_v38 = vld [vmem:[%s8366_s4 + $0x4d8] sm:$0xff] }
  0x80   : > { %4673 = vmatpush.bf16.msra.mxu1 %v7646_v39  ;;  %v7704_v39 = vld [vmem:[%s8366_s4 + $0x410] sm:$0xff] }
  0x81   : > { %4686 = vmatpush.bf16.msra.mxu2 %v7654_v40  ;;  %v7712_v40 = vld [vmem:[%s8366_s4 + $0x450] sm:$0xff] }
  0x82   : > { %4699 = vmatpush.bf16.msra.mxu3 %v7662_v41  ;;  %4661 = vmatmul.bf16.vlgmr.msra.gmra.mxu0 %v1345_v46  ;;  %v7720_v41 = vld [vmem:[%s8366_s4 + $0x490] sm:$0xff]  ;;  %v7727_v46 = vld [vmem:[%s8366_s4 + $0x4c8] sm:$0xff] }
  0x83   : > { %4705 = vmatpush.bf16.msrb.mxu0 %v7677_v42  ;;  %4674 = vmatmul.bf16.vlgmr.msra.gmra.mxu1 %v1346_v48  ;;  %v7728_v42 = vld [vmem:[%s8366_s4 + $0x4d0] sm:$0xff]  ;;  %v7710_v48 = vld [vmem:[%s8366_s4 + $0x440] sm:$0xff] }
  0x84   : > { %4718 = vmatpush.bf16.msrb.mxu1 %v7685_v43  ;;  %4687 = vmatmul.bf16.vlgmr.msra.gmra.mxu2 %v1347_v47  ;;  %v7703_v43 = vld [vmem:[%s8366_s4 + $0x408] sm:$0xff]  ;;  %v7702_v47 = vld [vmem:[%s8366_s4 + $0x400] sm:$0xff] }
  0x85   : > { %4731 = vmatpush.bf16.msrb.mxu2 %v7693_v44  ;;  %4700 = vmatmul.bf16.vlgmr.msra.gmra.mxu3 %v1348_v49  ;;  %v7711_v44 = vld [vmem:[%s8366_s4 + $0x448] sm:$0xff]  ;;  %v7718_v49 = vld [vmem:[%s8366_s4 + $0x480] sm:$0xff] }
  0x86   : > { %4744 = vmatpush.bf16.msrb.mxu3 %v7701_v45  ;;  %v7719_v45 = vld [vmem:[%s8366_s4 + $0x488] sm:$0xff] }
  0x87   : > { %4706 = vmatpush.bf16.msrb.mxu0 %v7676_v50  ;;  %v7726_v50 = vld [vmem:[%s8366_s4 + $0x4c0] sm:$0xff] }
  0x88   : > { %4719 = vmatpush.bf16.msrb.mxu1 %v7684_v51  ;;  %v7741_v51 = vld [vmem:[%s8366_s4 + $0x538] sm:$0xff] }
  0x89   : > { %4732 = vmatpush.bf16.msrb.mxu2 %v7692_v52  ;;  %v7749_v52 = vld [vmem:[%s8366_s4 + $0x578] sm:$0xff] }
  0x8a   : > { %4745 = vmatpush.bf16.msrb.mxu3 %v7700_v53  ;;  %v7757_v53 = vld [vmem:[%s8366_s4 + $0x5b8] sm:$0xff] }
  0x8b   : > { %4707 = vmatpush.bf16.msrb.mxu0 %v7675_v54  ;;  %v7765_v54 = vld [vmem:[%s8366_s4 + $0x5f8] sm:$0xff] }
  0x8c   : > { %4720 = vmatpush.bf16.msrb.mxu1 %v7683_v55  ;;  %v1355_v55 = vld [vmem:[#allocation1] sm:$0xff] }
  0x8d   : > { %4733 = vmatpush.bf16.msrb.mxu2 %v7691_v56  ;;  %v1357_v56 = vld [vmem:[#allocation1 + $0x12] sm:$0xff] }
  0x8e   : > { %4746 = vmatpush.bf16.msrb.mxu3 %v7699_v57  ;;  %v1356_v57 = vld [vmem:[#allocation1 + $0x9] sm:$0xff] }
  0x8f   : > { %4708 = vmatpush.bf16.msrb.mxu0 %v7674_v58  ;;  %v1358_v58 = vld [vmem:[#allocation1 + $0x1b] sm:$0xff] }
  0x90   : > { %4721 = vmatpush.bf16.msrb.mxu1 %v7682_v59  ;;  %v7740_v59 = vld [vmem:[%s8366_s4 + $0x530] sm:$0xff] }
  0x91   : > { %4734 = vmatpush.bf16.msrb.mxu2 %v7690_v60  ;;  %v7748_v60 = vld [vmem:[%s8366_s4 + $0x570] sm:$0xff] }
  0x92   : > { %4747 = vmatpush.bf16.msrb.mxu3 %v7698_v61  ;;  %v7756_v61 = vld [vmem:[%s8366_s4 + $0x5b0] sm:$0xff] }
  0x93   : > { %4709 = vmatpush.bf16.msrb.mxu0 %v7673_v62  ;;  %v7764_v62 = vld [vmem:[%s8366_s4 + $0x5f0] sm:$0xff] }
  0x94   : > { %4722 = vmatpush.bf16.msrb.mxu1 %v7681_v63  ;;  %v7739_v63 = vld [vmem:[%s8366_s4 + $0x528] sm:$0xff] }
  0x95   : > { %4735 = vmatpush.bf16.msrb.mxu2 %v7689_v0  ;;  %v7747_v0 = vld [vmem:[%s8366_s4 + $0x568] sm:$0xff] }
  0x96   : > { %4748 = vmatpush.bf16.msrb.mxu3 %v7697_v1  ;;  %v7755_v1 = vld [vmem:[%s8366_s4 + $0x5a8] sm:$0xff] }
  0x97   : > { %4710 = vmatpush.bf16.msrb.mxu0 %v7672_v2  ;;  %v7763_v2 = vld [vmem:[%s8366_s4 + $0x5e8] sm:$0xff] }
  0x98   : > { %4723 = vmatpush.bf16.msrb.mxu1 %v7680_v3 }
  0x99   : > { %4736 = vmatpush.bf16.msrb.mxu2 %v7688_v4  ;;  %v7738_v4 = vld [vmem:[%s8366_s4 + $0x520] sm:$0xff] }
  0x9a   : > { %4749 = vmatpush.bf16.msrb.mxu3 %v7696_v5  ;;  %v7746_v5 = vld [vmem:[%s8366_s4 + $0x560] sm:$0xff] }
  0x9b   : > { %4711 = vmatpush.bf16.msrb.mxu0 %v7671_v6 }
  0x9c   : > { %4724 = vmatpush.bf16.msrb.mxu1 %v7679_v7  ;;  %v7754_v7 = vld [vmem:[%s8366_s4 + $0x5a0] sm:$0xff] }
  0x9d   : > { %4737 = vmatpush.bf16.msrb.mxu2 %v7687_v8  ;;  %v7762_v8 = vld [vmem:[%s8366_s4 + $0x5e0] sm:$0xff] }
  0x9e   : > { %4750 = vmatpush.bf16.msrb.mxu3 %v7695_v9 }
  0x9f   : > { %4712 = vmatpush.bf16.msrb.mxu0 %v7670_v15 }
  0xa0   : > { %4725 = vmatpush.bf16.msrb.mxu1 %v7678_v16 }
  0xa1   : > { %4738 = vmatpush.bf16.msrb.mxu2 %v7686_v17 }
  0xa2   : > { %4751 = vmatpush.bf16.msrb.mxu3 %v7694_v18  ;;  %4713 = vmatmul.bf16.vlgmr.msrb.gmra.mxu0 %v1349_v10  ;;  %v7737_v10 = vld [vmem:[%s8366_s4 + $0x518] sm:$0xff]  ;;  %v7736_v18 = vld [vmem:[%s8366_s4 + $0x510] sm:$0xff] }
  0xa3   : > { %4757 = vmatpush.bf16.msra.mxu0 %v7709_v19  ;;  %4726 = vmatmul.bf16.vlgmr.msrb.gmra.mxu1 %v1350_v12  ;;  %v7753_v12 = vld [vmem:[%s8366_s4 + $0x598] sm:$0xff]  ;;  %v7744_v19 = vld [vmem:[%s8366_s4 + $0x550] sm:$0xff] }
  0xa4   : > { %4770 = vmatpush.bf16.msra.mxu1 %v7717_v20  ;;  %4739 = vmatmul.bf16.vlgmr.msrb.gmra.mxu2 %v1351_v11  ;;  %v7745_v11 = vld [vmem:[%s8366_s4 + $0x558] sm:$0xff] }
  0xa5   : > { %4783 = vmatpush.bf16.msra.mxu2 %v7725_v21  ;;  %4752 = vmatmul.bf16.vlgmr.msrb.gmra.mxu3 %v1352_v13  ;;  %v7761_v13 = vld [vmem:[%s8366_s4 + $0x5d8] sm:$0xff] }
  0xa6   : > { %4796 = vmatpush.bf16.msra.mxu3 %v7733_v22  ;;  %v7752_v22 = vld [vmem:[%s8366_s4 + $0x590] sm:$0xff] }
  0xa7   : > { %4758 = vmatpush.bf16.msra.mxu0 %v7708_v23  ;;  %v7760_v23 = vld [vmem:[%s8366_s4 + $0x5d0] sm:$0xff] }
  0xa8   : > { %4771 = vmatpush.bf16.msra.mxu1 %v7716_v24  ;;  %v7735_v24 = vld [vmem:[%s8366_s4 + $0x508] sm:$0xff] }
  0xa9   : > { %4784 = vmatpush.bf16.msra.mxu2 %v7724_v25  ;;  %v7743_v25 = vld [vmem:[%s8366_s4 + $0x548] sm:$0xff] }
  0xaa   : > { %4797 = vmatpush.bf16.msra.mxu3 %v7732_v26  ;;  %v7751_v26 = vld [vmem:[%s8366_s4 + $0x588] sm:$0xff] }
  0xab   : > { %4759 = vmatpush.bf16.msra.mxu0 %v7707_v27  ;;  %v7759_v27 = vld [vmem:[%s8366_s4 + $0x5c8] sm:$0xff] }
  0xac   : > { %4772 = vmatpush.bf16.msra.mxu1 %v7715_v28  ;;  %v1359_v28 = vld [vmem:[#allocation1 + $0x24] sm:$0xff] }
  0xad   : > { %4785 = vmatpush.bf16.msra.mxu2 %v7723_v29  ;;  %v1361_v29 = vld [vmem:[#allocation1 + $0x36] sm:$0xff] }
  0xae   : > { %4798 = vmatpush.bf16.msra.mxu3 %v7731_v30 }
  0xaf   : > { %4760 = vmatpush.bf16.msra.mxu0 %v7706_v31  ;;  %v1360_v31 = vld [vmem:[#allocation1 + $0x2d] sm:$0xff] }
  0xb0   : > { %4773 = vmatpush.bf16.msra.mxu1 %v7714_v32  ;;  %v1362_v32 = vld [vmem:[#allocation1 + $0x3f] sm:$0xff] }
  0xb1   : > { %4786 = vmatpush.bf16.msra.mxu2 %v7722_v33 }
  0xb2   : > { %4799 = vmatpush.bf16.msra.mxu3 %v7730_v34  ;;  %v304_v34 = vld [vmem:[%s8954_s0 + $0x18] sm:$0xff] }
  0xb3   : > { %4761 = vmatpush.bf16.msra.mxu0 %v7705_v35  ;;  %1364 = vst [vmem:[#allocation1] ss:$9 sm:$0xff] %v304_v34  ;;  %v7734_v35 = vld [vmem:[%s8366_s4 + $0x500] sm:$0xff]  ;;  %v7827_v34 = vld [vmem:[%s8366_s4 + $0x7e8] sm:$0xff] }
  0xb4   : > { %4774 = vmatpush.bf16.msra.mxu1 %v7713_v36  ;;  %v7742_v36 = vld [vmem:[%s8366_s4 + $0x540] sm:$0xff] }
  0xb5   : > { %4787 = vmatpush.bf16.msra.mxu2 %v7721_v37  ;;  %v7750_v37 = vld [vmem:[%s8366_s4 + $0x580] sm:$0xff] }
  0xb6   : > { %4800 = vmatpush.bf16.msra.mxu3 %v7729_v38  ;;  %v7758_v38 = vld [vmem:[%s8366_s4 + $0x5c0] sm:$0xff] }
  0xb7   : > { %4762 = vmatpush.bf16.msra.mxu0 %v7704_v39  ;;  %v7773_v39 = vld [vmem:[%s8366_s4 + $0x638] sm:$0xff] }
  0xb8   : > { %4775 = vmatpush.bf16.msra.mxu1 %v7712_v40  ;;  %v7781_v40 = vld [vmem:[%s8366_s4 + $0x678] sm:$0xff] }
  0xb9   : > { %4788 = vmatpush.bf16.msra.mxu2 %v7720_v41  ;;  %v7789_v41 = vld [vmem:[%s8366_s4 + $0x6b8] sm:$0xff] }
  0xba   : > { %4801 = vmatpush.bf16.msra.mxu3 %v7728_v42  ;;  %v7797_v42 = vld [vmem:[%s8366_s4 + $0x6f8] sm:$0xff] }
  0xbb   : > { %4763 = vmatpush.bf16.msra.mxu0 %v7703_v43  ;;  %v7772_v43 = vld [vmem:[%s8366_s4 + $0x630] sm:$0xff] }
  0xbc   : > { %4776 = vmatpush.bf16.msra.mxu1 %v7711_v44  ;;  %v7780_v44 = vld [vmem:[%s8366_s4 + $0x670] sm:$0xff] }
  0xbd   : > { %4789 = vmatpush.bf16.msra.mxu2 %v7719_v45  ;;  %v7788_v45 = vld [vmem:[%s8366_s4 + $0x6b0] sm:$0xff] }
  0xbe   : > { %4802 = vmatpush.bf16.msra.mxu3 %v7727_v46  ;;  %v7796_v46 = vld [vmem:[%s8366_s4 + $0x6f0] sm:$0xff] }
  0xbf   : > { %4764 = vmatpush.bf16.msra.mxu0 %v7702_v47  ;;  %v4558_v3 = vpop.f32.mrf.mxu0  ;;  %v7771_v47 = vld [vmem:[%s8366_s4 + $0x628] sm:$0xff] }
  0xc0   : > { %4777 = vmatpush.bf16.msra.mxu1 %v7710_v48  ;;  %v4571_v6 = vpop.f32.mrf.mxu1  ;;  %v7779_v48 = vld [vmem:[%s8366_s4 + $0x668] sm:$0xff] }
  0xc1   : > { %4790 = vmatpush.bf16.msra.mxu2 %v7718_v49  ;;  %v4572_v9 = vadd.f32 %v4571_v6, %v4558_v3  ;;  %v7787_v49 = vld [vmem:[%s8366_s4 + $0x6a8] sm:$0xff]  ;;  %v7768_v3 = vld [vmem:[%s8366_s4 + $0x610] sm:$0xff] }
  0xc2   : > { %4803 = vmatpush.bf16.msra.mxu3 %v7726_v50  ;;  %4765 = vmatmul.bf16.vlgmr.msra.gmra.mxu0 %v1355_v55  ;;  %v7795_v50 = vld [vmem:[%s8366_s4 + $0x6e8] sm:$0xff] }
  0xc3   : > { %4809 = vmatpush.bf16.msrb.mxu0 %v7741_v51  ;;  %4778 = vmatmul.bf16.vlgmr.msra.gmra.mxu1 %v1356_v57  ;;  %v7794_v57 = vld [vmem:[%s8366_s4 + $0x6e0] sm:$0xff] }
  0xc4   : > { %4822 = vmatpush.bf16.msrb.mxu1 %v7749_v52  ;;  %4791 = vmatmul.bf16.vlgmr.msra.gmra.mxu2 %v1357_v56  ;;  %v7770_v52 = vld [vmem:[%s8366_s4 + $0x620] sm:$0xff] }
  0xc5   : > { %4835 = vmatpush.bf16.msrb.mxu2 %v7757_v53  ;;  %4804 = vmatmul.bf16.vlgmr.msra.gmra.mxu3 %v1358_v58  ;;  %v7778_v53 = vld [vmem:[%s8366_s4 + $0x660] sm:$0xff] }
  0xc6   : > { %4848 = vmatpush.bf16.msrb.mxu3 %v7765_v54  ;;  %v7786_v56 = vld [vmem:[%s8366_s4 + $0x6a0] sm:$0xff] }
  0xc7   : > { %4810 = vmatpush.bf16.msrb.mxu0 %v7740_v59  ;;  %v4584_v14 = vpop.f32.mrf.mxu2  ;;  %v4560_v17 = vpop.f32.mrf.mxu0  ;;  %v7769_v59 = vld [vmem:[%s8366_s4 + $0x618] sm:$0xff] }
  0xc8   : > { %4823 = vmatpush.bf16.msrb.mxu1 %v7748_v60  ;;  %v4585_v15 = vadd.f32 %v4584_v14, %v4572_v9  ;;  %v4597_v16 = vpop.f32.mrf.mxu3  ;;  %v4573_v21 = vpop.f32.mrf.mxu1  ;;  %v7777_v60 = vld [vmem:[%s8366_s4 + $0x658] sm:$0xff]  ;;  %v7767_v9 = vld [vmem:[%s8366_s4 + $0x608] sm:$0xff]  ;;  %v7782_v17 = vld [vmem:[%s8366_s4 + $0x680] sm:$0xff] }
  0xc9   : > { %4836 = vmatpush.bf16.msrb.mxu2 %v7756_v61  ;;  %v7785_v61 = vld [vmem:[%s8366_s4 + $0x698] sm:$0xff] }
  0xca   : > { %4849 = vmatpush.bf16.msrb.mxu3 %v7764_v62  ;;  %v8569_v20 = vadd.f32 %v4597_v16, %v4585_v15  ;;  %v7793_v62 = vld [vmem:[%s8366_s4 + $0x6d8] sm:$0xff]  ;;  %v7766_v15 = vld [vmem:[%s8366_s4 + $0x600] sm:$0xff] }
  0xcb   : > { %4811 = vmatpush.bf16.msrb.mxu0 %v7739_v63  ;;  %v7774_v16 = vld [vmem:[%s8366_s4 + $0x640] sm:$0xff]  ;;  %v7821_v21 = vld [vmem:[%s8366_s4 + $0x7b8] sm:$0xff] }
  0xcc   : > { %4824 = vmatpush.bf16.msrb.mxu1 %v7747_v0 }
  0xcd   : > { %4837 = vmatpush.bf16.msrb.mxu2 %v7755_v1 }
  0xce   : > { %4850 = vmatpush.bf16.msrb.mxu3 %v7763_v2 }
  0xcf   : > { %4812 = vmatpush.bf16.msrb.mxu0 %v7738_v4  ;;  %v4586_v30 = vpop.f32.mrf.mxu2  ;;  %v7776_v4 = vld [vmem:[%s8366_s4 + $0x650] sm:$0xff] }
  0xd0   : > { %4825 = vmatpush.bf16.msrb.mxu1 %v7746_v5  ;;  %v4599_v33 = vpop.f32.mrf.mxu3  ;;  %v7828_v30 = vld [vmem:[%s8366_s4 + $0x7f0] sm:$0xff] }
  0xd1   : > { %4838 = vmatpush.bf16.msrb.mxu2 %v7754_v7  ;;  %v7784_v7 = vld [vmem:[%s8366_s4 + $0x690] sm:$0xff]  ;;  %v7819_v33 = vld [vmem:[%s8366_s4 + $0x7a8] sm:$0xff] }
  0xd2   : > { %4851 = vmatpush.bf16.msrb.mxu3 %v7762_v8  ;;  %v7792_v8 = vld [vmem:[%s8366_s4 + $0x6d0] sm:$0xff] }
  0xd3   : > { %4813 = vmatpush.bf16.msrb.mxu0 %v7737_v10  ;;  %v7775_v10 = vld [vmem:[%s8366_s4 + $0x648] sm:$0xff] }
  0xd4   : > { %4826 = vmatpush.bf16.msrb.mxu1 %v7745_v11  ;;  %v7783_v11 = vld [vmem:[%s8366_s4 + $0x688] sm:$0xff] }
  0xd5   : > { %4839 = vmatpush.bf16.msrb.mxu2 %v7753_v12  ;;  %v7791_v12 = vld [vmem:[%s8366_s4 + $0x6c8] sm:$0xff] }
  0xd6   : > { %4852 = vmatpush.bf16.msrb.mxu3 %v7761_v13 }
  0xd7   : > { %4814 = vmatpush.bf16.msrb.mxu0 %v7736_v18  ;;  %v7790_v18 = vld [vmem:[%s8366_s4 + $0x6c0] sm:$0xff] }
  0xd8   : > { %4827 = vmatpush.bf16.msrb.mxu1 %v7744_v19  ;;  %v7805_v19 = vld [vmem:[%s8366_s4 + $0x738] sm:$0xff] }
  0xd9   : > { %4840 = vmatpush.bf16.msrb.mxu2 %v7752_v22  ;;  %v7829_v22 = vld [vmem:[%s8366_s4 + $0x7f8] sm:$0xff] }
  0xda   : > { %4853 = vmatpush.bf16.msrb.mxu3 %v7760_v23  ;;  %v1365_v23 = vld [vmem:[#allocation1] sm:$0xff] }
  0xdb   : > { %4815 = vmatpush.bf16.msrb.mxu0 %v7735_v24  ;;  %v1367_v24 = vld [vmem:[#allocation1 + $0x12] sm:$0xff] }
  0xdc   : > { %4828 = vmatpush.bf16.msrb.mxu1 %v7743_v25  ;;  %v1366_v25 = vld [vmem:[#allocation1 + $0x9] sm:$0xff] }
  0xdd   : > { %4841 = vmatpush.bf16.msrb.mxu2 %v7751_v26  ;;  %v1368_v26 = vld [vmem:[#allocation1 + $0x1b] sm:$0xff] }
  0xde   : > { %4854 = vmatpush.bf16.msrb.mxu3 %v7759_v27  ;;  %v7804_v27 = vld [vmem:[%s8366_s4 + $0x730] sm:$0xff] }
  0xdf   : > { %4816 = vmatpush.bf16.msrb.mxu0 %v7734_v35  ;;  %v4610_v51 = vpop.f32.mrf.mxu0 }
  0xe0   : > { %4829 = vmatpush.bf16.msrb.mxu1 %v7742_v36  ;;  %v4611_v54 = vadd.f32 %v4610_v51, %v8569_v20  ;;  %v4623_v55 = vpop.f32.mrf.mxu1  ;;  %v7813_v20 = vld [vmem:[%s8366_s4 + $0x778] sm:$0xff] }
  0xe1   : > { %4842 = vmatpush.bf16.msrb.mxu2 %v7750_v37  ;;  %v7802_v37 = vld [vmem:[%s8366_s4 + $0x720] sm:$0xff] }
  0xe2   : > { %4855 = vmatpush.bf16.msrb.mxu3 %v7758_v38  ;;  %4817 = vmatmul.bf16.vlgmr.msrb.gmra.mxu0 %v1359_v28  ;;  %v4624_v58 = vadd.f32 %v4623_v55, %v4611_v54  ;;  %v7812_v28 = vld [vmem:[%s8366_s4 + $0x770] sm:$0xff]  ;;  %v7810_v38 = vld [vmem:[%s8366_s4 + $0x760] sm:$0xff] }
  0xe3   : > { %4861 = vmatpush.bf16.msra.mxu0 %v7773_v39  ;;  %4830 = vmatmul.bf16.vlgmr.msrb.gmra.mxu1 %v1360_v31  ;;  %v7803_v31 = vld [vmem:[%s8366_s4 + $0x728] sm:$0xff]  ;;  %v7816_v55 = vld [vmem:[%s8366_s4 + $0x790] sm:$0xff] }
  0xe4   : > { %4874 = vmatpush.bf16.msra.mxu1 %v7781_v40  ;;  %4843 = vmatmul.bf16.vlgmr.msrb.gmra.mxu2 %v1361_v29  ;;  %v7820_v29 = vld [vmem:[%s8366_s4 + $0x7b0] sm:$0xff]  ;;  %v7818_v40 = vld [vmem:[%s8366_s4 + $0x7a0] sm:$0xff] }
  0xe5   : > { %4887 = vmatpush.bf16.msra.mxu2 %v7789_v41  ;;  %4856 = vmatmul.bf16.vlgmr.msrb.gmra.mxu3 %v1362_v32  ;;  %v7811_v32 = vld [vmem:[%s8366_s4 + $0x768] sm:$0xff]  ;;  %v7826_v41 = vld [vmem:[%s8366_s4 + $0x7e0] sm:$0xff] }
  0xe6   : > { %4900 = vmatpush.bf16.msra.mxu3 %v7797_v42 }
  0xe7   : > { %4862 = vmatpush.bf16.msra.mxu0 %v7772_v43  ;;  %v4636_v63 = vpop.f32.mrf.mxu2  ;;  %v4612_v2 = vpop.f32.mrf.mxu0  ;;  %v7801_v43 = vld [vmem:[%s8366_s4 + $0x718] sm:$0xff] }
  0xe8   : > { %4875 = vmatpush.bf16.msra.mxu1 %v7780_v44  ;;  %v4637_v0 = vadd.f32 %v4636_v63, %v4624_v58  ;;  %v4649_v1 = vpop.f32.mrf.mxu3  ;;  %v4625_v6 = vpop.f32.mrf.mxu1  ;;  %v7809_v44 = vld [vmem:[%s8366_s4 + $0x758] sm:$0xff]  ;;  %v7807_v58 = vld [vmem:[%s8366_s4 + $0x748] sm:$0xff] }
  0xe9   : > { %4888 = vmatpush.bf16.msra.mxu2 %v7788_v45  ;;  %v7817_v45 = vld [vmem:[%s8366_s4 + $0x798] sm:$0xff]  ;;  %v7814_v6 = vld [vmem:[%s8366_s4 + $0x780] sm:$0xff] }
  0xea   : > { %4901 = vmatpush.bf16.msra.mxu3 %v7796_v46  ;;  %v4650_v5 = vadd.f32 %v4649_v1, %v4637_v0  ;;  %v7825_v46 = vld [vmem:[%s8366_s4 + $0x7d8] sm:$0xff]  ;;  %v1370_v0 = vld [vmem:[#allocation1 + $0x2d] sm:$0xff] }
  0xeb   : > { %4863 = vmatpush.bf16.msra.mxu0 %v7771_v47  ;;  %v1372_v1 = vld [vmem:[#allocation1 + $0x3f] sm:$0xff] }
  0xec   : > { %4876 = vmatpush.bf16.msra.mxu1 %v7779_v48 }
  0xed   : > { %4889 = vmatpush.bf16.msra.mxu2 %v7787_v49 }
  0xee   : > { %4902 = vmatpush.bf16.msra.mxu3 %v7795_v50 }
  0xef   : > { %4864 = vmatpush.bf16.msra.mxu0 %v7770_v52  ;;  %v4638_v13 = vpop.f32.mrf.mxu2  ;;  %v7800_v52 = vld [vmem:[%s8366_s4 + $0x710] sm:$0xff] }
  0xf0   : > { %4877 = vmatpush.bf16.msra.mxu1 %v7778_v53  ;;  %v4651_v14 = vpop.f32.mrf.mxu3  ;;  %v7808_v53 = vld [vmem:[%s8366_s4 + $0x750] sm:$0xff] }
  0xf1   : > { %4890 = vmatpush.bf16.msra.mxu2 %v7786_v56  ;;  %v7824_v56 = vld [vmem:[%s8366_s4 + $0x7d0] sm:$0xff] }
  0xf2   : > { %4903 = vmatpush.bf16.msra.mxu3 %v7794_v57  ;;  %v7799_v57 = vld [vmem:[%s8366_s4 + $0x708] sm:$0xff]  ;;  %v7844_v13 = vld [vmem:[%s8366_s4 + $0x870] sm:$0xff] }
  0xf3   : > { %4865 = vmatpush.bf16.msra.mxu0 %v7769_v59  ;;  %v7815_v59 = vld [vmem:[%s8366_s4 + $0x788] sm:$0xff]  ;;  %v7852_v14 = vld [vmem:[%s8366_s4 + $0x8b0] sm:$0xff] }
  0xf4   : > { %4878 = vmatpush.bf16.msra.mxu1 %v7777_v60  ;;  %v7823_v60 = vld [vmem:[%s8366_s4 + $0x7c8] sm:$0xff] }
  0xf5   : > { %4891 = vmatpush.bf16.msra.mxu2 %v7785_v61  ;;  %v1369_v61 = vld [vmem:[#allocation1 + $0x24] sm:$0xff] }
  0xf6   : > { %4904 = vmatpush.bf16.msra.mxu3 %v7793_v62  ;;  %v1371_v62 = vld [vmem:[#allocation1 + $0x36] sm:$0xff] }
  0xf7   : > { %4866 = vmatpush.bf16.msra.mxu0 %v7768_v3  ;;  %v305_v3 = vld [vmem:[%s8954_s0 + $0x20] sm:$0xff] }
  0xf8   : > { %4879 = vmatpush.bf16.msra.mxu1 %v7776_v4  ;;  %1374 = vst [vmem:[#allocation1] ss:$9 sm:$0xff] %v305_v3  ;;  %v7798_v4 = vld [vmem:[%s8366_s4 + $0x700] sm:$0xff]  ;;  %v7891_v3 = vld [vmem:[%s8366_s4 + $0x9e8] sm:$0xff] }
  0xf9   : > { %4892 = vmatpush.bf16.msra.mxu2 %v7784_v7  ;;  %v7822_v7 = vld [vmem:[%s8366_s4 + $0x7c0] sm:$0xff] }
  0xfa   : > { %4905 = vmatpush.bf16.msra.mxu3 %v7792_v8  ;;  %v7837_v8 = vld [vmem:[%s8366_s4 + $0x838] sm:$0xff] }
  0xfb   : > { %4867 = vmatpush.bf16.msra.mxu0 %v7767_v9  ;;  %v7845_v9 = vld [vmem:[%s8366_s4 + $0x878] sm:$0xff] }
  0xfc   : > { %4880 = vmatpush.bf16.msra.mxu1 %v7775_v10  ;;  %v7853_v10 = vld [vmem:[%s8366_s4 + $0x8b8] sm:$0xff] }
  0xfd   : > { %4893 = vmatpush.bf16.msra.mxu2 %v7783_v11  ;;  %v7861_v11 = vld [vmem:[%s8366_s4 + $0x8f8] sm:$0xff] }
  0xfe   : > { %4906 = vmatpush.bf16.msra.mxu3 %v7791_v12  ;;  %v7836_v12 = vld [vmem:[%s8366_s4 + $0x830] sm:$0xff] }
  0xff   : > { %4868 = vmatpush.bf16.msra.mxu0 %v7766_v15  ;;  %v4662_v35 = vpop.f32.mrf.mxu0  ;;  %v7860_v15 = vld [vmem:[%s8366_s4 + $0x8f0] sm:$0xff] }
 0x100   : > { %4881 = vmatpush.bf16.msra.mxu1 %v7774_v16  ;;  %v4663_v36 = vadd.f32 %v4662_v35, %v4650_v5  ;;  %v4675_v39 = vpop.f32.mrf.mxu1  ;;  %v7806_v5 = vld [vmem:[%s8366_s4 + $0x740] sm:$0xff]  ;;  %v7835_v16 = vld [vmem:[%s8366_s4 + $0x828] sm:$0xff] }
 0x101   : > { %4894 = vmatpush.bf16.msra.mxu2 %v7782_v17  ;;  %v7843_v17 = vld [vmem:[%s8366_s4 + $0x868] sm:$0xff] }
 0x102   : > { %4907 = vmatpush.bf16.msra.mxu3 %v7790_v18  ;;  %4869 = vmatmul.bf16.vlgmr.msra.gmra.mxu0 %v1365_v23  ;;  %v4676_v42 = vadd.f32 %v4675_v39, %v4663_v36  ;;  %v7851_v18 = vld [vmem:[%s8366_s4 + $0x8a8] sm:$0xff]  ;;  %v7842_v23 = vld [vmem:[%s8366_s4 + $0x860] sm:$0xff] }
 0x103   : > { %4913 = vmatpush.bf16.msrb.mxu0 %v7805_v19  ;;  %4882 = vmatmul.bf16.vlgmr.msra.gmra.mxu1 %v1366_v25  ;;  %v7859_v19 = vld [vmem:[%s8366_s4 + $0x8e8] sm:$0xff]  ;;  %v7850_v25 = vld [vmem:[%s8366_s4 + $0x8a0] sm:$0xff] }
 0x104   : > { %4926 = vmatpush.bf16.msrb.mxu1 %v7813_v20  ;;  %4895 = vmatmul.bf16.vlgmr.msra.gmra.mxu2 %v1367_v24 }
 0x105   : > { %4939 = vmatpush.bf16.msrb.mxu2 %v7821_v21  ;;  %4908 = vmatmul.bf16.vlgmr.msra.gmra.mxu3 %v1368_v26  ;;  %v7858_v26 = vld [vmem:[%s8366_s4 + $0x8e0] sm:$0xff] }
 0x106   : > { %4952 = vmatpush.bf16.msrb.mxu3 %v7829_v22  ;;  %v7834_v22 = vld [vmem:[%s8366_s4 + $0x820] sm:$0xff] }
 0x107   : > { %4914 = vmatpush.bf16.msrb.mxu0 %v7804_v27  ;;  %v4688_v47 = vpop.f32.mrf.mxu2  ;;  %v4664_v50 = vpop.f32.mrf.mxu0 }
 0x108   : > { %4927 = vmatpush.bf16.msrb.mxu1 %v7812_v28  ;;  %v4689_v48 = vadd.f32 %v4688_v47, %v4676_v42  ;;  %v4701_v49 = vpop.f32.mrf.mxu3  ;;  %v4677_v54 = vpop.f32.mrf.mxu1  ;;  %v7833_v28 = vld [vmem:[%s8366_s4 + $0x818] sm:$0xff]  ;;  %v7831_v42 = vld [vmem:[%s8366_s4 + $0x808] sm:$0xff]  ;;  %v7846_v50 = vld [vmem:[%s8366_s4 + $0x880] sm:$0xff] }
 0x109   : > { %4940 = vmatpush.bf16.msrb.mxu2 %v7820_v29  ;;  %v7841_v29 = vld [vmem:[%s8366_s4 + $0x858] sm:$0xff] }
 0x10a   : > { %4953 = vmatpush.bf16.msrb.mxu3 %v7828_v30  ;;  %v8637_v51 = vadd.f32 %v4701_v49, %v4689_v48  ;;  %v7849_v30 = vld [vmem:[%s8366_s4 + $0x898] sm:$0xff]  ;;  %v7830_v48 = vld [vmem:[%s8366_s4 + $0x800] sm:$0xff] }
 0x10b   : > { %4915 = vmatpush.bf16.msrb.mxu0 %v7803_v31  ;;  %v7857_v31 = vld [vmem:[%s8366_s4 + $0x8d8] sm:$0xff]  ;;  %v7838_v49 = vld [vmem:[%s8366_s4 + $0x840] sm:$0xff] }
 0x10c   : > { %4928 = vmatpush.bf16.msrb.mxu1 %v7811_v32  ;;  %v7885_v54 = vld [vmem:[%s8366_s4 + $0x9b8] sm:$0xff] }
 0x10d   : > { %4941 = vmatpush.bf16.msrb.mxu2 %v7819_v33 }
 0x10e   : > { %4954 = vmatpush.bf16.msrb.mxu3 %v7827_v34 }
 0x10f   : > { %4916 = vmatpush.bf16.msrb.mxu0 %v7802_v37  ;;  %v4690_v63 = vpop.f32.mrf.mxu2  ;;  %v7832_v37 = vld [vmem:[%s8366_s4 + $0x810] sm:$0xff] }
 0x110   : > { %4929 = vmatpush.bf16.msrb.mxu1 %v7810_v38  ;;  %v4703_v2 = vpop.f32.mrf.mxu3  ;;  %v7840_v38 = vld [vmem:[%s8366_s4 + $0x850] sm:$0xff] }
 0x111   : > { %4942 = vmatpush.bf16.msrb.mxu2 %v7818_v40  ;;  %v7848_v40 = vld [vmem:[%s8366_s4 + $0x890] sm:$0xff]  ;;  %v7883_v2 = vld [vmem:[%s8366_s4 + $0x9a8] sm:$0xff] }
 0x112   : > { %4955 = vmatpush.bf16.msrb.mxu3 %v7826_v41  ;;  %v7856_v41 = vld [vmem:[%s8366_s4 + $0x8d0] sm:$0xff] }
 0x113   : > { %4917 = vmatpush.bf16.msrb.mxu0 %v7801_v43  ;;  %v7839_v43 = vld [vmem:[%s8366_s4 + $0x848] sm:$0xff]  ;;  %v7892_v63 = vld [vmem:[%s8366_s4 + $0x9f0] sm:$0xff] }
 0x114   : > { %4930 = vmatpush.bf16.msrb.mxu1 %v7809_v44  ;;  %v7847_v44 = vld [vmem:[%s8366_s4 + $0x888] sm:$0xff] }
 0x115   : > { %4943 = vmatpush.bf16.msrb.mxu2 %v7817_v45  ;;  %v7855_v45 = vld [vmem:[%s8366_s4 + $0x8c8] sm:$0xff] }
 0x116   : > { %4956 = vmatpush.bf16.msrb.mxu3 %v7825_v46 }
 0x117   : > { %4918 = vmatpush.bf16.msrb.mxu0 %v7800_v52  ;;  %v7869_v52 = vld [vmem:[%s8366_s4 + $0x938] sm:$0xff] }
 0x118   : > { %4931 = vmatpush.bf16.msrb.mxu1 %v7808_v53  ;;  %v7877_v53 = vld [vmem:[%s8366_s4 + $0x978] sm:$0xff] }
 0x119   : > { %4944 = vmatpush.bf16.msrb.mxu2 %v7816_v55  ;;  %v7893_v55 = vld [vmem:[%s8366_s4 + $0x9f8] sm:$0xff] }
 0x11a   : > { %4957 = vmatpush.bf16.msrb.mxu3 %v7824_v56  ;;  %v1375_v56 = vld [vmem:[#allocation1] sm:$0xff] }
 0x11b   : > { %4919 = vmatpush.bf16.msrb.mxu0 %v7799_v57  ;;  %v1377_v57 = vld [vmem:[#allocation1 + $0x12] sm:$0xff] }
 0x11c   : > { %4932 = vmatpush.bf16.msrb.mxu1 %v7807_v58  ;;  %v1376_v58 = vld [vmem:[#allocation1 + $0x9] sm:$0xff] }
 0x11d   : > { %4945 = vmatpush.bf16.msrb.mxu2 %v7815_v59  ;;  %v1378_v59 = vld [vmem:[#allocation1 + $0x1b] sm:$0xff] }
 0x11e   : > { %4958 = vmatpush.bf16.msrb.mxu3 %v7823_v60  ;;  %v7868_v60 = vld [vmem:[%s8366_s4 + $0x930] sm:$0xff] }
 0x11f   : > { %4920 = vmatpush.bf16.msrb.mxu0 %v7798_v4  ;;  %v4714_v20 = vpop.f32.mrf.mxu0 }
 0x120   : > { %4933 = vmatpush.bf16.msrb.mxu1 %v7806_v5  ;;  %v4715_v21 = vadd.f32 %v4714_v20, %v8637_v51  ;;  %v4727_v24 = vpop.f32.mrf.mxu1  ;;  %v7854_v51 = vld [vmem:[%s8366_s4 + $0x8c0] sm:$0xff] }
 0x121   : > { %4946 = vmatpush.bf16.msrb.mxu2 %v7814_v6  ;;  %v7866_v6 = vld [vmem:[%s8366_s4 + $0x920] sm:$0xff] }
 0x122   : > { %4959 = vmatpush.bf16.msrb.mxu3 %v7822_v7  ;;  %4921 = vmatmul.bf16.vlgmr.msrb.gmra.mxu0 %v1369_v61  ;;  %v4728_v27 = vadd.f32 %v4727_v24, %v4715_v21  ;;  %v7876_v61 = vld [vmem:[%s8366_s4 + $0x970] sm:$0xff]  ;;  %v7874_v7 = vld [vmem:[%s8366_s4 + $0x960] sm:$0xff] }
 0x123   : > { %4965 = vmatpush.bf16.msra.mxu0 %v7837_v8  ;;  %4934 = vmatmul.bf16.vlgmr.msrb.gmra.mxu1 %v1370_v0  ;;  %v7867_v0 = vld [vmem:[%s8366_s4 + $0x928] sm:$0xff]  ;;  %v7864_v21 = vld [vmem:[%s8366_s4 + $0x910] sm:$0xff] }
 0x124   : > { %4978 = vmatpush.bf16.msra.mxu1 %v7845_v9  ;;  %4947 = vmatmul.bf16.vlgmr.msrb.gmra.mxu2 %v1371_v62  ;;  %v7884_v62 = vld [vmem:[%s8366_s4 + $0x9b0] sm:$0xff]  ;;  %v7882_v9 = vld [vmem:[%s8366_s4 + $0x9a0] sm:$0xff] }
 0x125   : > { %4991 = vmatpush.bf16.msra.mxu2 %v7853_v10  ;;  %4960 = vmatmul.bf16.vlgmr.msrb.gmra.mxu3 %v1372_v1  ;;  %v7875_v1 = vld [vmem:[%s8366_s4 + $0x968] sm:$0xff]  ;;  %v7890_v10 = vld [vmem:[%s8366_s4 + $0x9e0] sm:$0xff]  ;;  %v7880_v24 = vld [vmem:[%s8366_s4 + $0x990] sm:$0xff] }
 0x126   : > { %5004 = vmatpush.bf16.msra.mxu3 %v7861_v11 }
 0x127   : > { %4966 = vmatpush.bf16.msra.mxu0 %v7836_v12  ;;  %v4740_v32 = vpop.f32.mrf.mxu2  ;;  %v4716_v35 = vpop.f32.mrf.mxu0  ;;  %v7865_v12 = vld [vmem:[%s8366_s4 + $0x918] sm:$0xff] }
 0x128   : > { %4979 = vmatpush.bf16.msra.mxu1 %v7844_v13  ;;  %v4741_v33 = vadd.f32 %v4740_v32, %v4728_v27  ;;  %v4753_v34 = vpop.f32.mrf.mxu3  ;;  %v4729_v39 = vpop.f32.mrf.mxu1  ;;  %v7873_v13 = vld [vmem:[%s8366_s4 + $0x958] sm:$0xff]  ;;  %v7871_v27 = vld [vmem:[%s8366_s4 + $0x948] sm:$0xff] }
 0x129   : > { %4992 = vmatpush.bf16.msra.mxu2 %v7852_v14  ;;  %v7881_v14 = vld [vmem:[%s8366_s4 + $0x998] sm:$0xff]  ;;  %v7878_v39 = vld [vmem:[%s8366_s4 + $0x980] sm:$0xff] }
 0x12a   : > { %5005 = vmatpush.bf16.msra.mxu3 %v7860_v15  ;;  %v4754_v36 = vadd.f32 %v4753_v34, %v4741_v33  ;;  %v7889_v15 = vld [vmem:[%s8366_s4 + $0x9d8] sm:$0xff]  ;;  %v1380_v33 = vld [vmem:[#allocation1 + $0x2d] sm:$0xff] }
 0x12b   : > { %4967 = vmatpush.bf16.msra.mxu0 %v7835_v16  ;;  %v1382_v34 = vld [vmem:[#allocation1 + $0x3f] sm:$0xff] }
 0x12c   : > { %4980 = vmatpush.bf16.msra.mxu1 %v7843_v17 }
 0x12d   : > { %4993 = vmatpush.bf16.msra.mxu2 %v7851_v18 }
 0x12e   : > { %5006 = vmatpush.bf16.msra.mxu3 %v7859_v19 }
 0x12f   : > { %4968 = vmatpush.bf16.msra.mxu0 %v7834_v22  ;;  %v4742_v46 = vpop.f32.mrf.mxu2  ;;  %v7872_v22 = vld [vmem:[%s8366_s4 + $0x950] sm:$0xff] }
 0x130   : > { %4981 = vmatpush.bf16.msra.mxu1 %v7842_v23  ;;  %v4755_v47 = vpop.f32.mrf.mxu3  ;;  %v7908_v46 = vld [vmem:[%s8366_s4 + $0xa70] sm:$0xff] }
 0x131   : > { %4994 = vmatpush.bf16.msra.mxu2 %v7850_v25  ;;  %v7888_v25 = vld [vmem:[%s8366_s4 + $0x9d0] sm:$0xff] }
 0x132   : > { %5007 = vmatpush.bf16.msra.mxu3 %v7858_v26  ;;  %v7863_v26 = vld [vmem:[%s8366_s4 + $0x908] sm:$0xff]  ;;  %v7916_v47 = vld [vmem:[%s8366_s4 + $0xab0] sm:$0xff] }
 0x133   : > { %4969 = vmatpush.bf16.msra.mxu0 %v7833_v28  ;;  %v7879_v28 = vld [vmem:[%s8366_s4 + $0x988] sm:$0xff] }
 0x134   : > { %4982 = vmatpush.bf16.msra.mxu1 %v7841_v29  ;;  %v7887_v29 = vld [vmem:[%s8366_s4 + $0x9c8] sm:$0xff] }
 0x135   : > { %4995 = vmatpush.bf16.msra.mxu2 %v7849_v30  ;;  %v1379_v30 = vld [vmem:[#allocation1 + $0x24] sm:$0xff] }
 0x136   : > { %5008 = vmatpush.bf16.msra.mxu3 %v7857_v31  ;;  %v1381_v31 = vld [vmem:[#allocation1 + $0x36] sm:$0xff] }
 0x137   : > { %4970 = vmatpush.bf16.msra.mxu0 %v7832_v37  ;;  %v7862_v37 = vld [vmem:[%s8366_s4 + $0x900] sm:$0xff] }
 0x138   : > { %4983 = vmatpush.bf16.msra.mxu1 %v7840_v38  ;;  %v7870_v38 = vld [vmem:[%s8366_s4 + $0x940] sm:$0xff] }
 0x139   : > { %4996 = vmatpush.bf16.msra.mxu2 %v7848_v40  ;;  %v7886_v40 = vld [vmem:[%s8366_s4 + $0x9c0] sm:$0xff] }
 0x13a   : > { %5009 = vmatpush.bf16.msra.mxu3 %v7856_v41  ;;  %v7901_v41 = vld [vmem:[%s8366_s4 + $0xa38] sm:$0xff] }
 0x13b   : > { %4971 = vmatpush.bf16.msra.mxu0 %v7831_v42  ;;  %v7909_v42 = vld [vmem:[%s8366_s4 + $0xa78] sm:$0xff] }
 0x13c   : > { %4984 = vmatpush.bf16.msra.mxu1 %v7839_v43  ;;  %v7917_v43 = vld [vmem:[%s8366_s4 + $0xab8] sm:$0xff] }
 0x13d   : > { %4997 = vmatpush.bf16.msra.mxu2 %v7847_v44  ;;  %v7925_v44 = vld [vmem:[%s8366_s4 + $0xaf8] sm:$0xff] }
 0x13e   : > { %5010 = vmatpush.bf16.msra.mxu3 %v7855_v45  ;;  %v7900_v45 = vld [vmem:[%s8366_s4 + $0xa30] sm:$0xff] }
 0x13f   : > { %4972 = vmatpush.bf16.msra.mxu0 %v7830_v48  ;;  %v4766_v4 = vpop.f32.mrf.mxu0  ;;  %v7924_v48 = vld [vmem:[%s8366_s4 + $0xaf0] sm:$0xff] }
 0x140   : > { %4985 = vmatpush.bf16.msra.mxu1 %v7838_v49  ;;  %v4767_v5 = vadd.f32 %v4766_v4, %v4754_v36  ;;  %v4779_v8 = vpop.f32.mrf.mxu1  ;;  %v306_v36 = vld [vmem:[%s8954_s0 + $0x28] sm:$0xff]  ;;  %v7899_v49 = vld [vmem:[%s8366_s4 + $0xa28] sm:$0xff] }
 0x141   : > { %4998 = vmatpush.bf16.msra.mxu2 %v7846_v50  ;;  %1384 = vst [vmem:[#allocation1] ss:$9 sm:$0xff] %v306_v36  ;;  %v7907_v50 = vld [vmem:[%s8366_s4 + $0xa68] sm:$0xff] }
 0x142   : > { %5011 = vmatpush.bf16.msra.mxu3 %v7854_v51  ;;  %4973 = vmatmul.bf16.vlgmr.msra.gmra.mxu0 %v1375_v56  ;;  %v4780_v11 = vadd.f32 %v4779_v8, %v4767_v5  ;;  %v7915_v51 = vld [vmem:[%s8366_s4 + $0xaa8] sm:$0xff]  ;;  %v7906_v56 = vld [vmem:[%s8366_s4 + $0xa60] sm:$0xff] }
 0x143   : > { %5017 = vmatpush.bf16.msrb.mxu0 %v7869_v52  ;;  %4986 = vmatmul.bf16.vlgmr.msra.gmra.mxu1 %v1376_v58  ;;  %v7923_v52 = vld [vmem:[%s8366_s4 + $0xae8] sm:$0xff]  ;;  %v7914_v58 = vld [vmem:[%s8366_s4 + $0xaa0] sm:$0xff] }
 0x144   : > { %5030 = vmatpush.bf16.msrb.mxu1 %v7877_v53  ;;  %4999 = vmatmul.bf16.vlgmr.msra.gmra.mxu2 %v1377_v57  ;;  %v7955_v36 = vld [vmem:[%s8366_s4 + $0xbe8] sm:$0xff] }
 0x145   : > { %5043 = vmatpush.bf16.msrb.mxu2 %v7885_v54  ;;  %5012 = vmatmul.bf16.vlgmr.msra.gmra.mxu3 %v1378_v59  ;;  %v7922_v59 = vld [vmem:[%s8366_s4 + $0xae0] sm:$0xff] }
 0x146   : > { %5056 = vmatpush.bf16.msrb.mxu3 %v7893_v55  ;;  %v7898_v55 = vld [vmem:[%s8366_s4 + $0xa20] sm:$0xff] }
 0x147   : > { %5018 = vmatpush.bf16.msrb.mxu0 %v7868_v60  ;;  %v4792_v16 = vpop.f32.mrf.mxu2  ;;  %v4768_v19 = vpop.f32.mrf.mxu0 }
 0x148   : > { %5031 = vmatpush.bf16.msrb.mxu1 %v7876_v61  ;;  %v4793_v17 = vadd.f32 %v4792_v16, %v4780_v11  ;;  %v4805_v18 = vpop.f32.mrf.mxu3  ;;  %v4781_v23 = vpop.f32.mrf.mxu1  ;;  %v7897_v61 = vld [vmem:[%s8366_s4 + $0xa18] sm:$0xff]  ;;  %v7895_v11 = vld [vmem:[%s8366_s4 + $0xa08] sm:$0xff]  ;;  %v7910_v19 = vld [vmem:[%s8366_s4 + $0xa80] sm:$0xff] }
 0x149   : > { %5044 = vmatpush.bf16.msrb.mxu2 %v7884_v62  ;;  %v7905_v62 = vld [vmem:[%s8366_s4 + $0xa58] sm:$0xff] }
 0x14a   : > { %5057 = vmatpush.bf16.msrb.mxu3 %v7892_v63  ;;  %v8707_v20 = vadd.f32 %v4805_v18, %v4793_v17  ;;  %v7913_v63 = vld [vmem:[%s8366_s4 + $0xa98] sm:$0xff]  ;;  %v7894_v17 = vld [vmem:[%s8366_s4 + $0xa00] sm:$0xff] }
 0x14b   : > { %5019 = vmatpush.bf16.msrb.mxu0 %v7867_v0  ;;  %v7921_v0 = vld [vmem:[%s8366_s4 + $0xad8] sm:$0xff]  ;;  %v7902_v18 = vld [vmem:[%s8366_s4 + $0xa40] sm:$0xff] }
 0x14c   : > { %5032 = vmatpush.bf16.msrb.mxu1 %v7875_v1  ;;  %v7949_v23 = vld [vmem:[%s8366_s4 + $0xbb8] sm:$0xff] }
 0x14d   : > { %5045 = vmatpush.bf16.msrb.mxu2 %v7883_v2 }
 0x14e   : > { %5058 = vmatpush.bf16.msrb.mxu3 %v7891_v3 }
 0x14f   : > { %5020 = vmatpush.bf16.msrb.mxu0 %v7866_v6  ;;  %v4794_v32 = vpop.f32.mrf.mxu2  ;;  %v7896_v6 = vld [vmem:[%s8366_s4 + $0xa10] sm:$0xff] }
 0x150   : > { %5033 = vmatpush.bf16.msrb.mxu1 %v7874_v7  ;;  %v4807_v35 = vpop.f32.mrf.mxu3  ;;  %v7904_v7 = vld [vmem:[%s8366_s4 + $0xa50] sm:$0xff] }
 0x151   : > { %5046 = vmatpush.bf16.msrb.mxu2 %v7882_v9  ;;  %v7912_v9 = vld [vmem:[%s8366_s4 + $0xa90] sm:$0xff]  ;;  %v7947_v35 = vld [vmem:[%s8366_s4 + $0xba8] sm:$0xff] }
 0x152   : > { %5059 = vmatpush.bf16.msrb.mxu3 %v7890_v10  ;;  %v7920_v10 = vld [vmem:[%s8366_s4 + $0xad0] sm:$0xff] }
 0x153   : > { %5021 = vmatpush.bf16.msrb.mxu0 %v7865_v12  ;;  %v7903_v12 = vld [vmem:[%s8366_s4 + $0xa48] sm:$0xff]  ;;  %v7956_v32 = vld [vmem:[%s8366_s4 + $0xbf0] sm:$0xff] }
 0x154   : > { %5034 = vmatpush.bf16.msrb.mxu1 %v7873_v13  ;;  %v7911_v13 = vld [vmem:[%s8366_s4 + $0xa88] sm:$0xff] }
 0x155   : > { %5047 = vmatpush.bf16.msrb.mxu2 %v7881_v14  ;;  %v7919_v14 = vld [vmem:[%s8366_s4 + $0xac8] sm:$0xff] }
 0x156   : > { %5060 = vmatpush.bf16.msrb.mxu3 %v7889_v15 }
 0x157   : > { %5022 = vmatpush.bf16.msrb.mxu0 %v7864_v21  ;;  %v7933_v21 = vld [vmem:[%s8366_s4 + $0xb38] sm:$0xff] }
 0x158   : > { %5035 = vmatpush.bf16.msrb.mxu1 %v7872_v22  ;;  %v7941_v22 = vld [vmem:[%s8366_s4 + $0xb78] sm:$0xff] }
 0x159   : > { %5048 = vmatpush.bf16.msrb.mxu2 %v7880_v24  ;;  %v7957_v24 = vld [vmem:[%s8366_s4 + $0xbf8] sm:$0xff] }
 0x15a   : > { %5061 = vmatpush.bf16.msrb.mxu3 %v7888_v25  ;;  %v1385_v25 = vld [vmem:[#allocation1] sm:$0xff] }
 0x15b   : > { %5023 = vmatpush.bf16.msrb.mxu0 %v7863_v26  ;;  %v1387_v26 = vld [vmem:[#allocation1 + $0x12] sm:$0xff] }
 0x15c   : > { %5036 = vmatpush.bf16.msrb.mxu1 %v7871_v27  ;;  %v1386_v27 = vld [vmem:[#allocation1 + $0x9] sm:$0xff] }
 0x15d   : > { %5049 = vmatpush.bf16.msrb.mxu2 %v7879_v28  ;;  %v1388_v28 = vld [vmem:[#allocation1 + $0x1b] sm:$0xff] }
 0x15e   : > { %5062 = vmatpush.bf16.msrb.mxu3 %v7887_v29  ;;  %v7932_v29 = vld [vmem:[%s8366_s4 + $0xb30] sm:$0xff] }
 0x15f   : > { %5024 = vmatpush.bf16.msrb.mxu0 %v7862_v37  ;;  %v4818_v53 = vpop.f32.mrf.mxu0 }
 0x160   : > { %5037 = vmatpush.bf16.msrb.mxu1 %v7870_v38  ;;  %v4819_v54 = vadd.f32 %v4818_v53, %v8707_v20  ;;  %v4831_v57 = vpop.f32.mrf.mxu1  ;;  %v7918_v20 = vld [vmem:[%s8366_s4 + $0xac0] sm:$0xff] }
 0x161   : > { %5050 = vmatpush.bf16.msrb.mxu2 %v7878_v39  ;;  %v7930_v39 = vld [vmem:[%s8366_s4 + $0xb20] sm:$0xff] }
 0x162   : > { %5063 = vmatpush.bf16.msrb.mxu3 %v7886_v40  ;;  %5025 = vmatmul.bf16.vlgmr.msrb.gmra.mxu0 %v1379_v30  ;;  %v4832_v60 = vadd.f32 %v4831_v57, %v4819_v54  ;;  %v7940_v30 = vld [vmem:[%s8366_s4 + $0xb70] sm:$0xff]  ;;  %v7938_v40 = vld [vmem:[%s8366_s4 + $0xb60] sm:$0xff] }
 0x163   : > { %5069 = vmatpush.bf16.msra.mxu0 %v7901_v41  ;;  %5038 = vmatmul.bf16.vlgmr.msrb.gmra.mxu1 %v1380_v33  ;;  %v7931_v33 = vld [vmem:[%s8366_s4 + $0xb28] sm:$0xff]  ;;  %v7928_v54 = vld [vmem:[%s8366_s4 + $0xb10] sm:$0xff] }
 0x164   : > { %5082 = vmatpush.bf16.msra.mxu1 %v7909_v42  ;;  %5051 = vmatmul.bf16.vlgmr.msrb.gmra.mxu2 %v1381_v31  ;;  %v7948_v31 = vld [vmem:[%s8366_s4 + $0xbb0] sm:$0xff]  ;;  %v7946_v42 = vld [vmem:[%s8366_s4 + $0xba0] sm:$0xff] }
 0x165   : > { %5095 = vmatpush.bf16.msra.mxu2 %v7917_v43  ;;  %5064 = vmatmul.bf16.vlgmr.msrb.gmra.mxu3 %v1382_v34  ;;  %v7939_v34 = vld [vmem:[%s8366_s4 + $0xb68] sm:$0xff]  ;;  %v7954_v43 = vld [vmem:[%s8366_s4 + $0xbe0] sm:$0xff]  ;;  %v7944_v57 = vld [vmem:[%s8366_s4 + $0xb90] sm:$0xff] }
 0x166   : > { %5108 = vmatpush.bf16.msra.mxu3 %v7925_v44 }
 0x167   : > { %5070 = vmatpush.bf16.msra.mxu0 %v7900_v45  ;;  %v4844_v1 = vpop.f32.mrf.mxu2  ;;  %v4820_v4 = vpop.f32.mrf.mxu0  ;;  %v7929_v45 = vld [vmem:[%s8366_s4 + $0xb18] sm:$0xff] }
 0x168   : > { %5083 = vmatpush.bf16.msra.mxu1 %v7908_v46  ;;  %v4845_v2 = vadd.f32 %v4844_v1, %v4832_v60  ;;  %v4857_v3 = vpop.f32.mrf.mxu3  ;;  %v4833_v8 = vpop.f32.mrf.mxu1  ;;  %v7937_v46 = vld [vmem:[%s8366_s4 + $0xb58] sm:$0xff]  ;;  %v7935_v60 = vld [vmem:[%s8366_s4 + $0xb48] sm:$0xff] }
 0x169   : > { %5096 = vmatpush.bf16.msra.mxu2 %v7916_v47  ;;  %v7945_v47 = vld [vmem:[%s8366_s4 + $0xb98] sm:$0xff]  ;;  %v7942_v8 = vld [vmem:[%s8366_s4 + $0xb80] sm:$0xff] }
 0x16a   : > { %5109 = vmatpush.bf16.msra.mxu3 %v7924_v48  ;;  %v4858_v5 = vadd.f32 %v4857_v3, %v4845_v2  ;;  %v7953_v48 = vld [vmem:[%s8366_s4 + $0xbd8] sm:$0xff]  ;;  %v1390_v2 = vld [vmem:[#allocation1 + $0x2d] sm:$0xff] }
 0x16b   : > { %5071 = vmatpush.bf16.msra.mxu0 %v7899_v49  ;;  %v1392_v3 = vld [vmem:[#allocation1 + $0x3f] sm:$0xff] }
 0x16c   : > { %5084 = vmatpush.bf16.msra.mxu1 %v7907_v50 }
 0x16d   : > { %5097 = vmatpush.bf16.msra.mxu2 %v7915_v51 }
 0x16e   : > { %5110 = vmatpush.bf16.msra.mxu3 %v7923_v52 }
 0x16f   : > { %5072 = vmatpush.bf16.msra.mxu0 %v7898_v55  ;;  %v4846_v15 = vpop.f32.mrf.mxu2  ;;  %v7936_v55 = vld [vmem:[%s8366_s4 + $0xb50] sm:$0xff] }
 0x170   : > { %5085 = vmatpush.bf16.msra.mxu1 %v7906_v56  ;;  %v4859_v16 = vpop.f32.mrf.mxu3  ;;  %v7972_v15 = vld [vmem:[%s8366_s4 + $0xc70] sm:$0xff] }
 0x171   : > { %5098 = vmatpush.bf16.msra.mxu2 %v7914_v58  ;;  %v7952_v58 = vld [vmem:[%s8366_s4 + $0xbd0] sm:$0xff] }
 0x172   : > { %5111 = vmatpush.bf16.msra.mxu3 %v7922_v59  ;;  %v7927_v59 = vld [vmem:[%s8366_s4 + $0xb08] sm:$0xff]  ;;  %v7980_v16 = vld [vmem:[%s8366_s4 + $0xcb0] sm:$0xff] }
 0x173   : > { %5073 = vmatpush.bf16.msra.mxu0 %v7897_v61  ;;  %v7943_v61 = vld [vmem:[%s8366_s4 + $0xb88] sm:$0xff] }
 0x174   : > { %5086 = vmatpush.bf16.msra.mxu1 %v7905_v62  ;;  %v7951_v62 = vld [vmem:[%s8366_s4 + $0xbc8] sm:$0xff] }
 0x175   : > { %5099 = vmatpush.bf16.msra.mxu2 %v7913_v63  ;;  %v1389_v63 = vld [vmem:[#allocation1 + $0x24] sm:$0xff] }
 0x176   : > { %5112 = vmatpush.bf16.msra.mxu3 %v7921_v0  ;;  %v1391_v0 = vld [vmem:[#allocation1 + $0x36] sm:$0xff] }
 0x177   : > { %5074 = vmatpush.bf16.msra.mxu0 %v7896_v6  ;;  %v7926_v6 = vld [vmem:[%s8366_s4 + $0xb00] sm:$0xff] }
 0x178   : > { %5087 = vmatpush.bf16.msra.mxu1 %v7904_v7  ;;  %v7934_v7 = vld [vmem:[%s8366_s4 + $0xb40] sm:$0xff] }
 0x179   : > { %5100 = vmatpush.bf16.msra.mxu2 %v7912_v9  ;;  %v7950_v9 = vld [vmem:[%s8366_s4 + $0xbc0] sm:$0xff] }
 0x17a   : > { %5113 = vmatpush.bf16.msra.mxu3 %v7920_v10  ;;  %v7965_v10 = vld [vmem:[%s8366_s4 + $0xc38] sm:$0xff] }
 0x17b   : > { %5075 = vmatpush.bf16.msra.mxu0 %v7895_v11  ;;  %v7973_v11 = vld [vmem:[%s8366_s4 + $0xc78] sm:$0xff] }
 0x17c   : > { %5088 = vmatpush.bf16.msra.mxu1 %v7903_v12  ;;  %v7981_v12 = vld [vmem:[%s8366_s4 + $0xcb8] sm:$0xff] }
 0x17d   : > { %5101 = vmatpush.bf16.msra.mxu2 %v7911_v13  ;;  %v7989_v13 = vld [vmem:[%s8366_s4 + $0xcf8] sm:$0xff] }
 0x17e   : > { %5114 = vmatpush.bf16.msra.mxu3 %v7919_v14  ;;  %v7964_v14 = vld [vmem:[%s8366_s4 + $0xc30] sm:$0xff] }
 0x17f   : > { %5076 = vmatpush.bf16.msra.mxu0 %v7894_v17  ;;  %v4870_v37 = vpop.f32.mrf.mxu0  ;;  %v7988_v17 = vld [vmem:[%s8366_s4 + $0xcf0] sm:$0xff] }
 0x180   : > { %5089 = vmatpush.bf16.msra.mxu1 %v7902_v18  ;;  %v4871_v38 = vadd.f32 %v4870_v37, %v4858_v5  ;;  %v4883_v41 = vpop.f32.mrf.mxu1  ;;  %v307_v5 = vld [vmem:[%s8954_s0 + $0x30] sm:$0xff] }
 0x181   : > { %5102 = vmatpush.bf16.msra.mxu2 %v7910_v19  ;;  %1394 = vst [vmem:[#allocation1] ss:$9 sm:$0xff] %v307_v5  ;;  %v7963_v18 = vld [vmem:[%s8366_s4 + $0xc28] sm:$0xff] }
 0x182   : > { %5115 = vmatpush.bf16.msra.mxu3 %v7918_v20  ;;  %5077 = vmatmul.bf16.vlgmr.msra.gmra.mxu0 %v1385_v25  ;;  %v4884_v44 = vadd.f32 %v4883_v41, %v4871_v38  ;;  %v7971_v19 = vld [vmem:[%s8366_s4 + $0xc68] sm:$0xff]  ;;  %v7970_v25 = vld [vmem:[%s8366_s4 + $0xc60] sm:$0xff] }
 0x183   : > { %5121 = vmatpush.bf16.msrb.mxu0 %v7933_v21  ;;  %5090 = vmatmul.bf16.vlgmr.msra.gmra.mxu1 %v1386_v27  ;;  %v7979_v20 = vld [vmem:[%s8366_s4 + $0xca8] sm:$0xff]  ;;  %v7978_v27 = vld [vmem:[%s8366_s4 + $0xca0] sm:$0xff] }
 0x184   : > { %5134 = vmatpush.bf16.msrb.mxu1 %v7941_v22  ;;  %5103 = vmatmul.bf16.vlgmr.msra.gmra.mxu2 %v1387_v26  ;;  %v7987_v21 = vld [vmem:[%s8366_s4 + $0xce8] sm:$0xff] }
 0x185   : > { %5147 = vmatpush.bf16.msrb.mxu2 %v7949_v23  ;;  %5116 = vmatmul.bf16.vlgmr.msra.gmra.mxu3 %v1388_v28  ;;  %v7986_v28 = vld [vmem:[%s8366_s4 + $0xce0] sm:$0xff]  ;;  %v8019_v5 = vld [vmem:[%s8366_s4 + $0xde8] sm:$0xff] }
 0x186   : > { %5160 = vmatpush.bf16.msrb.mxu3 %v7957_v24  ;;  %v7962_v24 = vld [vmem:[%s8366_s4 + $0xc20] sm:$0xff] }
 0x187   : > { %5122 = vmatpush.bf16.msrb.mxu0 %v7932_v29  ;;  %v4896_v49 = vpop.f32.mrf.mxu2  ;;  %v4872_v52 = vpop.f32.mrf.mxu0 }
 0x188   : > { %5135 = vmatpush.bf16.msrb.mxu1 %v7940_v30  ;;  %v4897_v50 = vadd.f32 %v4896_v49, %v4884_v44  ;;  %v4909_v51 = vpop.f32.mrf.mxu3  ;;  %v4885_v56 = vpop.f32.mrf.mxu1  ;;  %v7961_v30 = vld [vmem:[%s8366_s4 + $0xc18] sm:$0xff]  ;;  %v7959_v44 = vld [vmem:[%s8366_s4 + $0xc08] sm:$0xff]  ;;  %v7974_v52 = vld [vmem:[%s8366_s4 + $0xc80] sm:$0xff] }
 0x189   : > { %5148 = vmatpush.bf16.msrb.mxu2 %v7948_v31  ;;  %v7969_v31 = vld [vmem:[%s8366_s4 + $0xc58] sm:$0xff] }
 0x18a   : > { %5161 = vmatpush.bf16.msrb.mxu3 %v7956_v32  ;;  %v8777_v53 = vadd.f32 %v4909_v51, %v4897_v50  ;;  %v7977_v32 = vld [vmem:[%s8366_s4 + $0xc98] sm:$0xff]  ;;  %v7958_v50 = vld [vmem:[%s8366_s4 + $0xc00] sm:$0xff] }
 0x18b   : > { %5123 = vmatpush.bf16.msrb.mxu0 %v7931_v33  ;;  %v7985_v33 = vld [vmem:[%s8366_s4 + $0xcd8] sm:$0xff]  ;;  %v7966_v51 = vld [vmem:[%s8366_s4 + $0xc40] sm:$0xff] }
 0x18c   : > { %5136 = vmatpush.bf16.msrb.mxu1 %v7939_v34  ;;  %v8013_v56 = vld [vmem:[%s8366_s4 + $0xdb8] sm:$0xff] }
 0x18d   : > { %5149 = vmatpush.bf16.msrb.mxu2 %v7947_v35 }
 0x18e   : > { %5162 = vmatpush.bf16.msrb.mxu3 %v7955_v36 }
 0x18f   : > { %5124 = vmatpush.bf16.msrb.mxu0 %v7930_v39  ;;  %v4898_v1 = vpop.f32.mrf.mxu2  ;;  %v7960_v39 = vld [vmem:[%s8366_s4 + $0xc10] sm:$0xff] }
 0x190   : > { %5137 = vmatpush.bf16.msrb.mxu1 %v7938_v40  ;;  %v4911_v4 = vpop.f32.mrf.mxu3  ;;  %v7968_v40 = vld [vmem:[%s8366_s4 + $0xc50] sm:$0xff] }
 0x191   : > { %5150 = vmatpush.bf16.msrb.mxu2 %v7946_v42  ;;  %v7976_v42 = vld [vmem:[%s8366_s4 + $0xc90] sm:$0xff]  ;;  %v8011_v4 = vld [vmem:[%s8366_s4 + $0xda8] sm:$0xff] }
 0x192   : > { %5163 = vmatpush.bf16.msrb.mxu3 %v7954_v43  ;;  %v7984_v43 = vld [vmem:[%s8366_s4 + $0xcd0] sm:$0xff] }
 0x193   : > { %5125 = vmatpush.bf16.msrb.mxu0 %v7929_v45  ;;  %v7967_v45 = vld [vmem:[%s8366_s4 + $0xc48] sm:$0xff]  ;;  %v8020_v1 = vld [vmem:[%s8366_s4 + $0xdf0] sm:$0xff] }
 0x194   : > { %5138 = vmatpush.bf16.msrb.mxu1 %v7937_v46  ;;  %v7975_v46 = vld [vmem:[%s8366_s4 + $0xc88] sm:$0xff] }
 0x195   : > { %5151 = vmatpush.bf16.msrb.mxu2 %v7945_v47  ;;  %v7983_v47 = vld [vmem:[%s8366_s4 + $0xcc8] sm:$0xff] }
 0x196   : > { %5164 = vmatpush.bf16.msrb.mxu3 %v7953_v48 }
 0x197   : > { %5126 = vmatpush.bf16.msrb.mxu0 %v7928_v54  ;;  %v7997_v54 = vld [vmem:[%s8366_s4 + $0xd38] sm:$0xff] }
 0x198   : > { %5139 = vmatpush.bf16.msrb.mxu1 %v7936_v55  ;;  %v8005_v55 = vld [vmem:[%s8366_s4 + $0xd78] sm:$0xff] }
 0x199   : > { %5152 = vmatpush.bf16.msrb.mxu2 %v7944_v57  ;;  %v8021_v57 = vld [vmem:[%s8366_s4 + $0xdf8] sm:$0xff] }
 0x19a   : > { %5165 = vmatpush.bf16.msrb.mxu3 %v7952_v58  ;;  %v1395_v58 = vld [vmem:[#allocation1] sm:$0xff] }
 0x19b   : > { %5127 = vmatpush.bf16.msrb.mxu0 %v7927_v59  ;;  %v1397_v59 = vld [vmem:[#allocation1 + $0x12] sm:$0xff] }
 0x19c   : > { %5140 = vmatpush.bf16.msrb.mxu1 %v7935_v60  ;;  %v1396_v60 = vld [vmem:[#allocation1 + $0x9] sm:$0xff] }
 0x19d   : > { %5153 = vmatpush.bf16.msrb.mxu2 %v7943_v61  ;;  %v1398_v61 = vld [vmem:[#allocation1 + $0x1b] sm:$0xff] }
 0x19e   : > { %5166 = vmatpush.bf16.msrb.mxu3 %v7951_v62  ;;  %v7996_v62 = vld [vmem:[%s8366_s4 + $0xd30] sm:$0xff] }
 0x19f   : > { %5128 = vmatpush.bf16.msrb.mxu0 %v7926_v6  ;;  %v4922_v22 = vpop.f32.mrf.mxu0 }
 0x1a0   : > { %5141 = vmatpush.bf16.msrb.mxu1 %v7934_v7  ;;  %v4923_v23 = vadd.f32 %v4922_v22, %v8777_v53  ;;  %v4935_v26 = vpop.f32.mrf.mxu1  ;;  %v7982_v53 = vld [vmem:[%s8366_s4 + $0xcc0] sm:$0xff] }
 0x1a1   : > { %5154 = vmatpush.bf16.msrb.mxu2 %v7942_v8  ;;  %v7994_v8 = vld [vmem:[%s8366_s4 + $0xd20] sm:$0xff] }
 0x1a2   : > { %5167 = vmatpush.bf16.msrb.mxu3 %v7950_v9  ;;  %5129 = vmatmul.bf16.vlgmr.msrb.gmra.mxu0 %v1389_v63  ;;  %v4936_v29 = vadd.f32 %v4935_v26, %v4923_v23  ;;  %v8004_v63 = vld [vmem:[%s8366_s4 + $0xd70] sm:$0xff]  ;;  %v8002_v9 = vld [vmem:[%s8366_s4 + $0xd60] sm:$0xff] }
 0x1a3   : > { %5173 = vmatpush.bf16.msra.mxu0 %v7965_v10  ;;  %5142 = vmatmul.bf16.vlgmr.msrb.gmra.mxu1 %v1390_v2  ;;  %v7995_v2 = vld [vmem:[%s8366_s4 + $0xd28] sm:$0xff]  ;;  %v7992_v23 = vld [vmem:[%s8366_s4 + $0xd10] sm:$0xff] }
 0x1a4   : > { %5186 = vmatpush.bf16.msra.mxu1 %v7973_v11  ;;  %5155 = vmatmul.bf16.vlgmr.msrb.gmra.mxu2 %v1391_v0  ;;  %v8012_v0 = vld [vmem:[%s8366_s4 + $0xdb0] sm:$0xff]  ;;  %v8010_v11 = vld [vmem:[%s8366_s4 + $0xda0] sm:$0xff] }
 0x1a5   : > { %5199 = vmatpush.bf16.msra.mxu2 %v7981_v12  ;;  %5168 = vmatmul.bf16.vlgmr.msrb.gmra.mxu3 %v1392_v3  ;;  %v8003_v3 = vld [vmem:[%s8366_s4 + $0xd68] sm:$0xff]  ;;  %v8018_v12 = vld [vmem:[%s8366_s4 + $0xde0] sm:$0xff]  ;;  %v8008_v26 = vld [vmem:[%s8366_s4 + $0xd90] sm:$0xff] }
 0x1a6   : > { %5212 = vmatpush.bf16.msra.mxu3 %v7989_v13 }
 0x1a7   : > { %5174 = vmatpush.bf16.msra.mxu0 %v7964_v14  ;;  %v4948_v34 = vpop.f32.mrf.mxu2  ;;  %v4924_v37 = vpop.f32.mrf.mxu0  ;;  %v7993_v14 = vld [vmem:[%s8366_s4 + $0xd18] sm:$0xff] }
 0x1a8   : > { %5187 = vmatpush.bf16.msra.mxu1 %v7972_v15  ;;  %v4949_v35 = vadd.f32 %v4948_v34, %v4936_v29  ;;  %v4961_v36 = vpop.f32.mrf.mxu3  ;;  %v4937_v41 = vpop.f32.mrf.mxu1  ;;  %v8001_v15 = vld [vmem:[%s8366_s4 + $0xd58] sm:$0xff]  ;;  %v7999_v29 = vld [vmem:[%s8366_s4 + $0xd48] sm:$0xff] }
 0x1a9   : > { %5200 = vmatpush.bf16.msra.mxu2 %v7980_v16  ;;  %v8009_v16 = vld [vmem:[%s8366_s4 + $0xd98] sm:$0xff]  ;;  %v8006_v41 = vld [vmem:[%s8366_s4 + $0xd80] sm:$0xff] }
 0x1aa   : > { %5213 = vmatpush.bf16.msra.mxu3 %v7988_v17  ;;  %v4962_v38 = vadd.f32 %v4961_v36, %v4949_v35  ;;  %v8017_v17 = vld [vmem:[%s8366_s4 + $0xdd8] sm:$0xff]  ;;  %v1400_v35 = vld [vmem:[#allocation1 + $0x2d] sm:$0xff] }
 0x1ab   : > { %5175 = vmatpush.bf16.msra.mxu0 %v7963_v18  ;;  %v1402_v36 = vld [vmem:[#allocation1 + $0x3f] sm:$0xff] }
 0x1ac   : > { %5188 = vmatpush.bf16.msra.mxu1 %v7971_v19 }
 0x1ad   : > { %5201 = vmatpush.bf16.msra.mxu2 %v7979_v20 }
 0x1ae   : > { %5214 = vmatpush.bf16.msra.mxu3 %v7987_v21 }
 0x1af   : > { %5176 = vmatpush.bf16.msra.mxu0 %v7962_v24  ;;  %v4950_v48 = vpop.f32.mrf.mxu2  ;;  %v8000_v24 = vld [vmem:[%s8366_s4 + $0xd50] sm:$0xff] }
 0x1b0   : > { %5189 = vmatpush.bf16.msra.mxu1 %v7970_v25  ;;  %v4963_v49 = vpop.f32.mrf.mxu3  ;;  %v8036_v48 = vld [vmem:[%s8366_s4 + $0xe70] sm:$0xff] }
 0x1b1   : > { %5202 = vmatpush.bf16.msra.mxu2 %v7978_v27  ;;  %v8016_v27 = vld [vmem:[%s8366_s4 + $0xdd0] sm:$0xff] }
 0x1b2   : > { %5215 = vmatpush.bf16.msra.mxu3 %v7986_v28  ;;  %v7991_v28 = vld [vmem:[%s8366_s4 + $0xd08] sm:$0xff]  ;;  %v8044_v49 = vld [vmem:[%s8366_s4 + $0xeb0] sm:$0xff] }
 0x1b3   : > { %5177 = vmatpush.bf16.msra.mxu0 %v7961_v30  ;;  %v8007_v30 = vld [vmem:[%s8366_s4 + $0xd88] sm:$0xff] }
 0x1b4   : > { %5190 = vmatpush.bf16.msra.mxu1 %v7969_v31  ;;  %v8015_v31 = vld [vmem:[%s8366_s4 + $0xdc8] sm:$0xff] }
 0x1b5   : > { %5203 = vmatpush.bf16.msra.mxu2 %v7977_v32  ;;  %v1399_v32 = vld [vmem:[#allocation1 + $0x24] sm:$0xff] }
 0x1b6   : > { %5216 = vmatpush.bf16.msra.mxu3 %v7985_v33  ;;  %v1401_v33 = vld [vmem:[#allocation1 + $0x36] sm:$0xff] }
 0x1b7   : > { %5178 = vmatpush.bf16.msra.mxu0 %v7960_v39  ;;  %v7990_v39 = vld [vmem:[%s8366_s4 + $0xd00] sm:$0xff] }
 0x1b8   : > { %5191 = vmatpush.bf16.msra.mxu1 %v7968_v40  ;;  %v7998_v40 = vld [vmem:[%s8366_s4 + $0xd40] sm:$0xff] }
 0x1b9   : > { %5204 = vmatpush.bf16.msra.mxu2 %v7976_v42  ;;  %v8014_v42 = vld [vmem:[%s8366_s4 + $0xdc0] sm:$0xff] }
 0x1ba   : > { %5217 = vmatpush.bf16.msra.mxu3 %v7984_v43  ;;  %v8029_v43 = vld [vmem:[%s8366_s4 + $0xe38] sm:$0xff] }
 0x1bb   : > { %5179 = vmatpush.bf16.msra.mxu0 %v7959_v44  ;;  %v8037_v44 = vld [vmem:[%s8366_s4 + $0xe78] sm:$0xff] }
 0x1bc   : > { %5192 = vmatpush.bf16.msra.mxu1 %v7967_v45  ;;  %v8045_v45 = vld [vmem:[%s8366_s4 + $0xeb8] sm:$0xff] }
 0x1bd   : > { %5205 = vmatpush.bf16.msra.mxu2 %v7975_v46  ;;  %v8053_v46 = vld [vmem:[%s8366_s4 + $0xef8] sm:$0xff] }
 0x1be   : > { %5218 = vmatpush.bf16.msra.mxu3 %v7983_v47  ;;  %v8028_v47 = vld [vmem:[%s8366_s4 + $0xe30] sm:$0xff] }
 0x1bf   : > { %5180 = vmatpush.bf16.msra.mxu0 %v7958_v50  ;;  %v4974_v6 = vpop.f32.mrf.mxu0  ;;  %v8052_v50 = vld [vmem:[%s8366_s4 + $0xef0] sm:$0xff] }
 0x1c0   : > { %5193 = vmatpush.bf16.msra.mxu1 %v7966_v51  ;;  %v4975_v7 = vadd.f32 %v4974_v6, %v4962_v38  ;;  %v4987_v10 = vpop.f32.mrf.mxu1  ;;  %v308_v38 = vld [vmem:[%s8954_s0 + $0x38] sm:$0xff] }
 0x1c1   : > { %5206 = vmatpush.bf16.msra.mxu2 %v7974_v52  ;;  %1404 = vst [vmem:[#allocation1] ss:$9 sm:$0xff] %v308_v38  ;;  %v8027_v51 = vld [vmem:[%s8366_s4 + $0xe28] sm:$0xff] }
 0x1c2   : > { %5219 = vmatpush.bf16.msra.mxu3 %v7982_v53  ;;  %5181 = vmatmul.bf16.vlgmr.msra.gmra.mxu0 %v1395_v58  ;;  %v4988_v13 = vadd.f32 %v4987_v10, %v4975_v7  ;;  %v8035_v52 = vld [vmem:[%s8366_s4 + $0xe68] sm:$0xff]  ;;  %v8034_v58 = vld [vmem:[%s8366_s4 + $0xe60] sm:$0xff] }
 0x1c3   : > { %5225 = vmatpush.bf16.msrb.mxu0 %v7997_v54  ;;  %5194 = vmatmul.bf16.vlgmr.msra.gmra.mxu1 %v1396_v60  ;;  %v8043_v53 = vld [vmem:[%s8366_s4 + $0xea8] sm:$0xff]  ;;  %v8042_v60 = vld [vmem:[%s8366_s4 + $0xea0] sm:$0xff] }
 0x1c4   : > { %5238 = vmatpush.bf16.msrb.mxu1 %v8005_v55  ;;  %5207 = vmatmul.bf16.vlgmr.msra.gmra.mxu2 %v1397_v59  ;;  %v8051_v54 = vld [vmem:[%s8366_s4 + $0xee8] sm:$0xff] }
 0x1c5   : > { %5251 = vmatpush.bf16.msrb.mxu2 %v8013_v56  ;;  %5220 = vmatmul.bf16.vlgmr.msra.gmra.mxu3 %v1398_v61  ;;  %v8050_v61 = vld [vmem:[%s8366_s4 + $0xee0] sm:$0xff]  ;;  %v8083_v38 = vld [vmem:[%s8366_s4 + $0xfe8] sm:$0xff] }
 0x1c6   : > { %5264 = vmatpush.bf16.msrb.mxu3 %v8021_v57  ;;  %v8026_v57 = vld [vmem:[%s8366_s4 + $0xe20] sm:$0xff] }
 0x1c7   : > { %5226 = vmatpush.bf16.msrb.mxu0 %v7996_v62  ;;  %v5000_v18 = vpop.f32.mrf.mxu2  ;;  %v4976_v21 = vpop.f32.mrf.mxu0 }
 0x1c8   : > { %5239 = vmatpush.bf16.msrb.mxu1 %v8004_v63  ;;  %v5001_v19 = vadd.f32 %v5000_v18, %v4988_v13  ;;  %v5013_v20 = vpop.f32.mrf.mxu3  ;;  %v4989_v25 = vpop.f32.mrf.mxu1  ;;  %v8025_v63 = vld [vmem:[%s8366_s4 + $0xe18] sm:$0xff]  ;;  %v8023_v13 = vld [vmem:[%s8366_s4 + $0xe08] sm:$0xff]  ;;  %v8038_v21 = vld [vmem:[%s8366_s4 + $0xe80] sm:$0xff] }
 0x1c9   : > { %5252 = vmatpush.bf16.msrb.mxu2 %v8012_v0  ;;  %v8033_v0 = vld [vmem:[%s8366_s4 + $0xe58] sm:$0xff] }
 0x1ca   : > { %5265 = vmatpush.bf16.msrb.mxu3 %v8020_v1  ;;  %v8847_v22 = vadd.f32 %v5013_v20, %v5001_v19  ;;  %v8041_v1 = vld [vmem:[%s8366_s4 + $0xe98] sm:$0xff]  ;;  %v8022_v19 = vld [vmem:[%s8366_s4 + $0xe00] sm:$0xff] }
 0x1cb   : > { %5227 = vmatpush.bf16.msrb.mxu0 %v7995_v2  ;;  %v8049_v2 = vld [vmem:[%s8366_s4 + $0xed8] sm:$0xff]  ;;  %v8030_v20 = vld [vmem:[%s8366_s4 + $0xe40] sm:$0xff] }
 0x1cc   : > { %5240 = vmatpush.bf16.msrb.mxu1 %v8003_v3  ;;  %v8077_v25 = vld [vmem:[%s8366_s4 + $0xfb8] sm:$0xff] }
 0x1cd   : > { %5253 = vmatpush.bf16.msrb.mxu2 %v8011_v4 }
 0x1ce   : > { %5266 = vmatpush.bf16.msrb.mxu3 %v8019_v5 }
 0x1cf   : > { %5228 = vmatpush.bf16.msrb.mxu0 %v7994_v8  ;;  %v5002_v34 = vpop.f32.mrf.mxu2  ;;  %v8024_v8 = vld [vmem:[%s8366_s4 + $0xe10] sm:$0xff] }
 0x1d0   : > { %5241 = vmatpush.bf16.msrb.mxu1 %v8002_v9  ;;  %v5015_v37 = vpop.f32.mrf.mxu3  ;;  %v8032_v9 = vld [vmem:[%s8366_s4 + $0xe50] sm:$0xff] }
 0x1d1   : > { %5254 = vmatpush.bf16.msrb.mxu2 %v8010_v11  ;;  %v8040_v11 = vld [vmem:[%s8366_s4 + $0xe90] sm:$0xff]  ;;  %v8075_v37 = vld [vmem:[%s8366_s4 + $0xfa8] sm:$0xff] }
 0x1d2   : > { %5267 = vmatpush.bf16.msrb.mxu3 %v8018_v12  ;;  %v8048_v12 = vld [vmem:[%s8366_s4 + $0xed0] sm:$0xff] }
 0x1d3   : > { %5229 = vmatpush.bf16.msrb.mxu0 %v7993_v14  ;;  %v8031_v14 = vld [vmem:[%s8366_s4 + $0xe48] sm:$0xff]  ;;  %v8084_v34 = vld [vmem:[%s8366_s4 + $0xff0] sm:$0xff] }
 0x1d4   : > { %5242 = vmatpush.bf16.msrb.mxu1 %v8001_v15  ;;  %v8039_v15 = vld [vmem:[%s8366_s4 + $0xe88] sm:$0xff] }
 0x1d5   : > { %5255 = vmatpush.bf16.msrb.mxu2 %v8009_v16  ;;  %v8047_v16 = vld [vmem:[%s8366_s4 + $0xec8] sm:$0xff] }
 0x1d6   : > { %5268 = vmatpush.bf16.msrb.mxu3 %v8017_v17 }
 0x1d7   : > { %5230 = vmatpush.bf16.msrb.mxu0 %v7992_v23  ;;  %v8061_v23 = vld [vmem:[%s8366_s4 + $0xf38] sm:$0xff] }
 0x1d8   : > { %5243 = vmatpush.bf16.msrb.mxu1 %v8000_v24  ;;  %v8069_v24 = vld [vmem:[%s8366_s4 + $0xf78] sm:$0xff] }
 0x1d9   : > { %5256 = vmatpush.bf16.msrb.mxu2 %v8008_v26  ;;  %v8085_v26 = vld [vmem:[%s8366_s4 + $0xff8] sm:$0xff] }
 0x1da   : > { %5269 = vmatpush.bf16.msrb.mxu3 %v8016_v27  ;;  %v1405_v27 = vld [vmem:[#allocation1] sm:$0xff] }
 0x1db   : > { %5231 = vmatpush.bf16.msrb.mxu0 %v7991_v28  ;;  %v1407_v28 = vld [vmem:[#allocation1 + $0x12] sm:$0xff] }
 0x1dc   : > { %5244 = vmatpush.bf16.msrb.mxu1 %v7999_v29  ;;  %v1406_v29 = vld [vmem:[#allocation1 + $0x9] sm:$0xff] }
 0x1dd   : > { %5257 = vmatpush.bf16.msrb.mxu2 %v8007_v30  ;;  %v1408_v30 = vld [vmem:[#allocation1 + $0x1b] sm:$0xff] }
 0x1de   : > { %5270 = vmatpush.bf16.msrb.mxu3 %v8015_v31  ;;  %v8060_v31 = vld [vmem:[%s8366_s4 + $0xf30] sm:$0xff] }
 0x1df   : > { %5232 = vmatpush.bf16.msrb.mxu0 %v7990_v39  ;;  %v5026_v55 = vpop.f32.mrf.mxu0 }
 0x1e0   : > { %5245 = vmatpush.bf16.msrb.mxu1 %v7998_v40  ;;  %v5027_v56 = vadd.f32 %v5026_v55, %v8847_v22  ;;  %v5039_v59 = vpop.f32.mrf.mxu1  ;;  %v8046_v22 = vld [vmem:[%s8366_s4 + $0xec0] sm:$0xff] }
 0x1e1   : > { %5258 = vmatpush.bf16.msrb.mxu2 %v8006_v41  ;;  %v8058_v41 = vld [vmem:[%s8366_s4 + $0xf20] sm:$0xff] }
 0x1e2   : > { %5271 = vmatpush.bf16.msrb.mxu3 %v8014_v42  ;;  %5233 = vmatmul.bf16.vlgmr.msrb.gmra.mxu0 %v1399_v32  ;;  %v5040_v62 = vadd.f32 %v5039_v59, %v5027_v56  ;;  %v8068_v32 = vld [vmem:[%s8366_s4 + $0xf70] sm:$0xff]  ;;  %v8066_v42 = vld [vmem:[%s8366_s4 + $0xf60] sm:$0xff] }
 0x1e3   : > { %5277 = vmatpush.bf16.msra.mxu0 %v8029_v43  ;;  %5246 = vmatmul.bf16.vlgmr.msrb.gmra.mxu1 %v1400_v35  ;;  %v8059_v35 = vld [vmem:[%s8366_s4 + $0xf28] sm:$0xff]  ;;  %v8056_v56 = vld [vmem:[%s8366_s4 + $0xf10] sm:$0xff] }
 0x1e4   : > { %5290 = vmatpush.bf16.msra.mxu1 %v8037_v44  ;;  %5259 = vmatmul.bf16.vlgmr.msrb.gmra.mxu2 %v1401_v33  ;;  %v8076_v33 = vld [vmem:[%s8366_s4 + $0xfb0] sm:$0xff]  ;;  %v8074_v44 = vld [vmem:[%s8366_s4 + $0xfa0] sm:$0xff] }
 0x1e5   : > { %5303 = vmatpush.bf16.msra.mxu2 %v8045_v45  ;;  %5272 = vmatmul.bf16.vlgmr.msrb.gmra.mxu3 %v1402_v36  ;;  %v8067_v36 = vld [vmem:[%s8366_s4 + $0xf68] sm:$0xff]  ;;  %v8082_v45 = vld [vmem:[%s8366_s4 + $0xfe0] sm:$0xff]  ;;  %v8072_v59 = vld [vmem:[%s8366_s4 + $0xf90] sm:$0xff] }
 0x1e6   : > { %5316 = vmatpush.bf16.msra.mxu3 %v8053_v46 }
 0x1e7   : > { %5278 = vmatpush.bf16.msra.mxu0 %v8028_v47  ;;  %v5052_v3 = vpop.f32.mrf.mxu2  ;;  %v5028_v6 = vpop.f32.mrf.mxu0  ;;  %v8057_v47 = vld [vmem:[%s8366_s4 + $0xf18] sm:$0xff] }
 0x1e8   : > { %5291 = vmatpush.bf16.msra.mxu1 %v8036_v48  ;;  %v5053_v4 = vadd.f32 %v5052_v3, %v5040_v62  ;;  %v5065_v5 = vpop.f32.mrf.mxu3  ;;  %v5041_v10 = vpop.f32.mrf.mxu1  ;;  %v8065_v48 = vld [vmem:[%s8366_s4 + $0xf58] sm:$0xff]  ;;  %v8063_v62 = vld [vmem:[%s8366_s4 + $0xf48] sm:$0xff]  ;;  %v8054_v3 = vld [vmem:[%s8366_s4 + $0xf00] sm:$0xff] }
 0x1e9   : > { %5304 = vmatpush.bf16.msra.mxu2 %v8044_v49  ;;  %v8073_v49 = vld [vmem:[%s8366_s4 + $0xf98] sm:$0xff]  ;;  %v8078_v6 = vld [vmem:[%s8366_s4 + $0xfc0] sm:$0xff] }
 0x1ea   : > { %5317 = vmatpush.bf16.msra.mxu3 %v8052_v50  ;;  %v5066_v7 = vadd.f32 %v5065_v5, %v5053_v4  ;;  %v8081_v50 = vld [vmem:[%s8366_s4 + $0xfd8] sm:$0xff]  ;;  %v8062_v4 = vld [vmem:[%s8366_s4 + $0xf40] sm:$0xff] }
 0x1eb   : > { %5279 = vmatpush.bf16.msra.mxu0 %v8027_v51  ;;  %v8070_v5 = vld [vmem:[%s8366_s4 + $0xf80] sm:$0xff]  ;;  %v1412_v10 = vld [vmem:[#allocation1 + $0x3f] sm:$0xff] }
 0x1ec   : > { %5292 = vmatpush.bf16.msra.mxu1 %v8035_v52 }
 0x1ed   : > { %5305 = vmatpush.bf16.msra.mxu2 %v8043_v53 }
 0x1ee   : > { %5318 = vmatpush.bf16.msra.mxu3 %v8051_v54 }
 0x1ef   : > { %5280 = vmatpush.bf16.msra.mxu0 %v8026_v57  ;;  %v5054_v17 = vpop.f32.mrf.mxu2  ;;  %v8064_v57 = vld [vmem:[%s8366_s4 + $0xf50] sm:$0xff] }
 0x1f0   : > { %5293 = vmatpush.bf16.msra.mxu1 %v8034_v58  ;;  %v5067_v18 = vpop.f32.mrf.mxu3 }
 0x1f1   : > { %5306 = vmatpush.bf16.msra.mxu2 %v8042_v60  ;;  %v8080_v60 = vld [vmem:[%s8366_s4 + $0xfd0] sm:$0xff] }
 0x1f2   : > { %5319 = vmatpush.bf16.msra.mxu3 %v8050_v61  ;;  %v8055_v61 = vld [vmem:[%s8366_s4 + $0xf08] sm:$0xff] }
 0x1f3   : > { %5281 = vmatpush.bf16.msra.mxu0 %v8025_v63  ;;  %v8071_v63 = vld [vmem:[%s8366_s4 + $0xf88] sm:$0xff] }
 0x1f4   : > { %5294 = vmatpush.bf16.msra.mxu1 %v8033_v0  ;;  %v8079_v0 = vld [vmem:[%s8366_s4 + $0xfc8] sm:$0xff] }
 0x1f5   : > { %5307 = vmatpush.bf16.msra.mxu2 %v8041_v1 }
 0x1f6   : > { %5320 = vmatpush.bf16.msra.mxu3 %v8049_v2 }
 0x1f7   : > { %5282 = vmatpush.bf16.msra.mxu0 %v8024_v8  ;;  %v1410_v8 = vld [vmem:[#allocation1 + $0x2d] sm:$0xff] }
 0x1f8   : > { %5295 = vmatpush.bf16.msra.mxu1 %v8032_v9  ;;  %v1411_v9 = vld [vmem:[#allocation1 + $0x36] sm:$0xff] }
 0x1f9   : > { %5308 = vmatpush.bf16.msra.mxu2 %v8040_v11 }
 0x1fa   : > { %5321 = vmatpush.bf16.msra.mxu3 %v8048_v12 }
 0x1fb   : > { %5283 = vmatpush.bf16.msra.mxu0 %v8023_v13 }
 0x1fc   : > { %5296 = vmatpush.bf16.msra.mxu1 %v8031_v14 }
 0x1fd   : > { %5309 = vmatpush.bf16.msra.mxu2 %v8039_v15 }
 0x1fe   : > { %5322 = vmatpush.bf16.msra.mxu3 %v8047_v16 }
 0x1ff   : > { %5284 = vmatpush.bf16.msra.mxu0 %v8022_v19  ;;  %v5078_v39 = vpop.f32.mrf.mxu0 }
 0x200   : > { %5297 = vmatpush.bf16.msra.mxu1 %v8030_v20  ;;  %v5079_v40 = vadd.f32 %v5078_v39, %v5066_v7  ;;  %v5091_v43 = vpop.f32.mrf.mxu1  ;;  %v1409_v7 = vld [vmem:[#allocation1 + $0x24] sm:$0xff] }
 0x201   : > { %5310 = vmatpush.bf16.msra.mxu2 %v8038_v21 }
 0x202   : > { %5323 = vmatpush.bf16.msra.mxu3 %v8046_v22  ;;  %5285 = vmatmul.bf16.vlgmr.msra.gmra.mxu0 %v1405_v27  ;;  %v5092_v46 = vadd.f32 %v5091_v43, %v5079_v40  ;;  %v8149_v43 = vld [vmem:[%s236_s5] ss:$0 sm:$0xff] }
 0x203   : > { %5329 = vmatpush.bf16.msrb.mxu0 %v8061_v23  ;;  %5298 = vmatmul.bf16.vlgmr.msra.gmra.mxu1 %v1406_v29  ;;  %299 = vst [vmem:[#allocation2] sm:$0x3] %v8149_v43 }
 0x204   : > { %5342 = vmatpush.bf16.msrb.mxu1 %v8069_v24  ;;  %5311 = vmatmul.bf16.vlgmr.msra.gmra.mxu2 %v1407_v28 }
 0x205   : > { %5355 = vmatpush.bf16.msrb.mxu2 %v8077_v25  ;;  %5324 = vmatmul.bf16.vlgmr.msra.gmra.mxu3 %v1408_v30 }
 0x206   : > { %5368 = vmatpush.bf16.msrb.mxu3 %v8085_v26 }
 0x207   : > { %5330 = vmatpush.bf16.msrb.mxu0 %v8060_v31  ;;  %v5104_v51 = vpop.f32.mrf.mxu2  ;;  %v5080_v54 = vpop.f32.mrf.mxu0 }
 0x208   : > { %5343 = vmatpush.bf16.msrb.mxu1 %v8068_v32  ;;  %v5105_v52 = vadd.f32 %v5104_v51, %v5092_v46  ;;  %v5117_v53 = vpop.f32.mrf.mxu3  ;;  %v5093_v58 = vpop.f32.mrf.mxu1 }
 0x209   : > { %5356 = vmatpush.bf16.msrb.mxu2 %v8076_v33 }
 0x20a   : > { %5369 = vmatpush.bf16.msrb.mxu3 %v8084_v34  ;;  %v5118_v55 = vadd.f32 %v5117_v53, %v5105_v52 }
 0x20b   : > { %5331 = vmatpush.bf16.msrb.mxu0 %v8059_v35 }
 0x20c   : > { %5344 = vmatpush.bf16.msrb.mxu1 %v8067_v36 }
 0x20d   : > { %5357 = vmatpush.bf16.msrb.mxu2 %v8075_v37 }
 0x20e   : > { %5370 = vmatpush.bf16.msrb.mxu3 %v8083_v38 }
 0x20f   : > { %5332 = vmatpush.bf16.msrb.mxu0 %v8058_v41  ;;  %v5106_v1 = vpop.f32.mrf.mxu2 }
 0x210   : > { %5345 = vmatpush.bf16.msrb.mxu1 %v8066_v42  ;;  %v5119_v2 = vpop.f32.mrf.mxu3 }
 0x211   : > { %5358 = vmatpush.bf16.msrb.mxu2 %v8074_v44 }
 0x212   : > { %5371 = vmatpush.bf16.msrb.mxu3 %v8082_v45 }
 0x213   : > { %5333 = vmatpush.bf16.msrb.mxu0 %v8057_v47 }
 0x214   : > { %5346 = vmatpush.bf16.msrb.mxu1 %v8065_v48 }
 0x215   : > { %5359 = vmatpush.bf16.msrb.mxu2 %v8073_v49 }
 0x216   : > { %5372 = vmatpush.bf16.msrb.mxu3 %v8081_v50 }
 0x217   : > { %5334 = vmatpush.bf16.msrb.mxu0 %v8056_v56 }
 0x218   : > { %5347 = vmatpush.bf16.msrb.mxu1 %v8064_v57 }
 0x219   : > { %5360 = vmatpush.bf16.msrb.mxu2 %v8072_v59 }
 0x21a   : > { %5373 = vmatpush.bf16.msrb.mxu3 %v8080_v60 }
 0x21b   : > { %5335 = vmatpush.bf16.msrb.mxu0 %v8055_v61 }
 0x21c   : > { %5348 = vmatpush.bf16.msrb.mxu1 %v8063_v62 }
 0x21d   : > { %5361 = vmatpush.bf16.msrb.mxu2 %v8071_v63 }
 0x21e   : > { %5374 = vmatpush.bf16.msrb.mxu3 %v8079_v0 }
 0x21f   : > { %5336 = vmatpush.bf16.msrb.mxu0 %v8054_v3  ;;  %v5130_v11 = vpop.f32.mrf.mxu0 }
 0x220   : > { %5349 = vmatpush.bf16.msrb.mxu1 %v8062_v4  ;;  %v5131_v12 = vadd.f32 %v5130_v11, %v5118_v55  ;;  %v5143_v13 = vpop.f32.mrf.mxu1 }
 0x221   : > { %5362 = vmatpush.bf16.msrb.mxu2 %v8070_v5  ;;  %v300_v5 = vld [vmem:[#allocation2] sm:$0x3] }
 0x222   : > { %5375 = vmatpush.bf16.msrb.mxu3 %v8078_v6  ;;  %5337 = vmatmul.bf16.vlgmr.msrb.gmra.mxu0 %v1409_v7  ;;  %v5144_v14 = vadd.f32 %v5143_v13, %v5131_v12 }
 0x223   : > { %5350 = vmatmul.bf16.vlgmr.msrb.gmra.mxu1 %v1410_v8 }
 0x224   : > { %5363 = vmatmul.bf16.vlgmr.msrb.gmra.mxu2 %v1411_v9 }
 0x225   : > { %5376 = vmatmul.bf16.vlgmr.msrb.gmra.mxu3 %v1412_v10 }
 0x227   : > { %v5156_v15 = vpop.f32.mrf.mxu2  ;;  %v5132_v18 = vpop.f32.mrf.mxu0 }
 0x228   : > { %v5157_v16 = vadd.f32 %v5156_v15, %v5144_v14  ;;  %v5169_v17 = vpop.f32.mrf.mxu3  ;;  %v5145_v20 = vpop.f32.mrf.mxu1 }
 0x22a   : > { %v5170_v19 = vadd.f32 %v5169_v17, %v5157_v16 }
 0x22f   : > { %v5158_v21 = vpop.f32.mrf.mxu2 }
 0x230   : > { %v5171_v22 = vpop.f32.mrf.mxu3 }
 0x23f   : > { %v5182_v23 = vpop.f32.mrf.mxu0 }
 0x240   : > { %v5183_v24 = vadd.f32 %v5182_v23, %v5170_v19  ;;  %v5195_v25 = vpop.f32.mrf.mxu1 }
 0x242   : > { %v5196_v26 = vadd.f32 %v5195_v25, %v5183_v24 }
 0x247   : > { %v5208_v27 = vpop.f32.mrf.mxu2  ;;  %v5184_v30 = vpop.f32.mrf.mxu0 }
 0x248   : > { %v5209_v28 = vadd.f32 %v5208_v27, %v5196_v26  ;;  %v5221_v29 = vpop.f32.mrf.mxu3  ;;  %v5197_v32 = vpop.f32.mrf.mxu1 }
 0x24a   : > { %v5222_v31 = vadd.f32 %v5221_v29, %v5209_v28 }
 0x24f   : > { %v5210_v33 = vpop.f32.mrf.mxu2 }
 0x250   : > { %v5223_v34 = vpop.f32.mrf.mxu3 }
 0x25f   : > { %v5234_v35 = vpop.f32.mrf.mxu0 }
 0x260   : > { %v5247_v36 = vpop.f32.mrf.mxu1  ;;  %v5235_v47 = vadd.f32 %v5234_v35, %v5222_v31 }
 0x262   : > { %v5248_v51 = vadd.f32 %v5247_v36, %v5235_v47 }
 0x267   : > { %v5260_v37 = vpop.f32.mrf.mxu2  ;;  %v5236_v39 = vpop.f32.mrf.mxu0 }
 0x268   : > { %v5273_v38 = vpop.f32.mrf.mxu3  ;;  %v5249_v40 = vpop.f32.mrf.mxu1  ;;  %v5261_v52 = vadd.f32 %v5260_v37, %v5248_v51 }
 0x26a   : > { %v5274_v55 = vadd.f32 %v5273_v38, %v5261_v52 }
 0x26f   : > { %v5262_v41 = vpop.f32.mrf.mxu2 }
 0x270   : > { %v5275_v42 = vpop.f32.mrf.mxu3 }
 0x27f   : > { %v5286_v44 = vpop.f32.mrf.mxu0 }
 0x280   : > { %v5299_v45 = vpop.f32.mrf.mxu1  ;;  %v5287_v56 = vadd.f32 %v5286_v44, %v5274_v55 }
 0x282   : > { %v5300_v57 = vadd.f32 %v5299_v45, %v5287_v56 }
 0x287   : > { %v5312_v46 = vpop.f32.mrf.mxu2  ;;  %v5288_v49 = vpop.f32.mrf.mxu0 }
 0x288   : > { %v5325_v48 = vpop.f32.mrf.mxu3  ;;  %v5301_v50 = vpop.f32.mrf.mxu1  ;;  %v5313_v58 = vadd.f32 %v5312_v46, %v5300_v57 }
 0x28a   : > { %v5326_v59 = vadd.f32 %v5325_v48, %v5313_v58 }
 0x28f   : > { %v5314_v53 = vpop.f32.mrf.mxu2 }
 0x290   : > { %v5327_v54 = vpop.f32.mrf.mxu3 }
 0x29f   : > { %v5338_v60 = vpop.f32.mrf.mxu0 }
 0x2a0   : > { %v5351_v61 = vpop.f32.mrf.mxu1  ;;  %v5339_v62 = vadd.f32 %v5338_v60, %v5326_v59 }
 0x2a2   : > { %v5352_v63 = vadd.f32 %v5351_v61, %v5339_v62 }
 0x2a7   : > { %v5364_v0 = vpop.f32.mrf.mxu2  ;;  %v5340_v3 = vpop.f32.mrf.mxu0 }
 0x2a8   : > { %v5377_v1 = vpop.f32.mrf.mxu3  ;;  %v5365_v2 = vadd.f32 %v5364_v0, %v5352_v63  ;;  %v5353_v4 = vpop.f32.mrf.mxu1 }
 0x2aa   : > { %v5378_v6 = vadd.f32 %v5377_v1, %v5365_v2 }
 0x2ac   : > { %v5381_v7 = vadd.f32 %v5378_v6, %v300_v5 }
 0x2ae   : > { %5382 = vst [vmem:[#allocation2] sm:$0x3] %v5381_v7 }
 0x2af   : > { %v5366_v8 = vpop.f32.mrf.mxu2 }
 0x2b0   : > { %v5379_v9 = vpop.f32.mrf.mxu3 }
 0x2b5   : > { %v5386_v10 = vld [vmem:[#allocation2] sm:$0x3] }
 0x2b6   : > { %v5387_v11 = vmax.f32 %v5386_v10, 0.0 }
 0x2b8   : > { %v5388_v12 = vpack.c.bf16 %v5387_v11, %v5387_v11 }
 0x2ba   : > { %5389 = vst [vmem:[%s290_s25] sm:$0x1] %v5388_v12 }
 0x2bb PF: > { %s19_s17 = sadd.s32 1, %s8264_s17   ;;  %s8961_s12 = smov %s8248_s13 }
 0x2bc   : > { %p16_p0 = scmp.ge.s32.totalorder %s19_s17, 6   ;;  %s8962_s13 = smov %s8252_s14 }
 0x2bd   : > { %s8963_s14 = smov %s8338_s24  ;;  %s8964_s15 = smov %s8260_s16 }
 0x2be   : > { %s8965_s16 = smov %s8967_s19  ;;  %18 = sbr.rel (!%p16_p0) target bundleno = 6 (0x6), region = 96 }
 0x2c3   :  { %5415 = vsyncpa [#allocation4], 1 }
 0x2c4   :  { %5417 = vsyncpa [#allocation4 + $0x1], 1 }
 0x2c5   :  { %5418 = vsyncpa [#allocation6], 1 }
 0x2c6   :  { %5420 = vsyncpa [#allocation6 + $0x1], 1 }

</bundles_post_ra>
